<compile_context>
chip_gen: v7x
topology: tpu7x:2x2x1
jax: 0.10.0
libtpu: 0.0.40
codegen_flags: <defaults>
</compile_context>

<pallas_src>
import jax
import jax.numpy as jnp
from jax.experimental import pallas as pl
from jax.experimental.pallas import tpu as pltpu


LAYER_DIMS = [(784, 1024), (1024, 1024), (1024, 1024), (1024, 512), (512, 10)]
K_PAD = 896      # 784 padded up to a multiple of 128 (clean MXU cadence)
N_PAD = 128      # final 10 logits padded to a full lane group
NEG_BIG = -1e30  # bias value for padded logit lanes -> exp() underflows to 0


# ---------------------------------------------------------------------------
# Fused kernel: 5x (matmul + bias [+ ReLU]) + softmax.
#   - x / out are batch tiles (grid axis 0).
#   - W0/b0 + all biases are auto-DMA'd, constant block index (VMEM resident).
#   - W1..W4 are HBM refs; manually copied into persistent VMEM scratch on the
#     first grid step, with waits placed just before each layer's matmul so
#     earlier-layer compute overlaps later-layer weight DMA.
# ---------------------------------------------------------------------------
def _mlp_fused_kernel(x_ref,
                      w0_ref, b0_ref,
                      w1_hbm, b1_ref,
                      w2_hbm, b2_ref,
                      w3_hbm, b3_ref,
                      w4_hbm, b4_ref,
                      o_ref,
                      w1_buf, w2_buf, w3_buf, w4_buf, sems):
    first = pl.program_id(0) == 0

    # Kick off all later-layer weight DMAs immediately (first step only; the
    # scratch buffers persist across the remaining batch-tile grid steps).
    @pl.when(first)
    def _():
        pltpu.make_async_copy(w1_hbm, w1_buf, sems.at[0]).start()
        pltpu.make_async_copy(w2_hbm, w2_buf, sems.at[1]).start()
        pltpu.make_async_copy(w3_hbm, w3_buf, sems.at[2]).start()
        pltpu.make_async_copy(w4_hbm, w4_buf, sems.at[3]).start()

    def dense(h, w, b_ref):
        # bf16 x bf16 on the MXU, f32 accumulate; bias add stays f32 (VPU).
        acc = jnp.dot(h, w, preferred_element_type=jnp.float32)
        return acc + b_ref[...]            # (1, N) bias broadcasts over rows

    def relu_bf16(y):
        return jnp.maximum(y, 0.0).astype(jnp.bfloat16)

    h = x_ref[...]                                     # (TB, 896) bf16
    h = relu_bf16(dense(h, w0_ref[...], b0_ref))       # overlaps W1..W4 DMA

    @pl.when(first)
    def _():
        pltpu.make_async_copy(w1_hbm, w1_buf, sems.at[0]).wait()
    h = relu_bf16(dense(h, w1_buf[...], b1_ref))

    @pl.when(first)
    def _():
        pltpu.make_async_copy(w2_hbm, w2_buf, sems.at[1]).wait()
    h = relu_bf16(dense(h, w2_buf[...], b2_ref))

    @pl.when(first)
    def _():
        pltpu.make_async_copy(w3_hbm, w3_buf, sems.at[2]).wait()
    h = relu_bf16(dense(h, w3_buf[...], b3_ref))

    @pl.when(first)
    def _():
        pltpu.make_async_copy(w4_hbm, w4_buf, sems.at[3]).wait()
    logits = dense(h, w4_buf[...], b4_ref)             # (TB, 128); pads ~ -1e30

    # Numerically stable softmax in f32; padded lanes contribute exactly 0.
    m = jnp.max(logits, axis=-1, keepdims=True)
    e = jnp.exp(logits - m)
    inv = pl.reciprocal(jnp.sum(e, axis=-1, keepdims=True), approx=True)
    o_ref[...] = (e * inv).astype(o_ref.dtype)


# ---------------------------------------------------------------------------
# Parameter prep: PyTorch-style init, bf16 cast, K/N padding for the kernel
# ---------------------------------------------------------------------------
def init_mlp_params(key):
    """PyTorch default Linear init: U(-1/sqrt(fan_in), 1/sqrt(fan_in))."""
    params = []
    for fan_in, fan_out in LAYER_DIMS:
        key, kw, kb = jax.random.split(key, 3)
        bound = 1.0 / jnp.sqrt(float(fan_in))
        w = jax.random.uniform(kw, (fan_in, fan_out), jnp.float32, -bound, bound)
        b = jax.random.uniform(kb, (fan_out,), jnp.float32, -bound, bound)
        params.append((w, b))
    return params


def prepare_kernel_params(params):
    """Cast weights to bf16; zero-pad W0 rows to 896; pad last layer to 128
    output lanes (zero weight columns, -1e30 f32 bias so softmax is unaffected)."""
    prepped = []
    last = len(params) - 1
    for idx, (w, b) in enumerate(params):
        w = w.astype(jnp.float32)
        b = b.astype(jnp.float32)
        if idx == 0:
            w = jnp.pad(w, ((0, K_PAD - w.shape[0]), (0, 0)))
        if idx == last:
            w = jnp.pad(w, ((0, 0), (0, N_PAD - w.shape[1])))
            b = jnp.pad(b, (0, N_PAD - b.shape[0]), constant_values=NEG_BIG)
        prepped.append((w.astype(jnp.bfloat16), b.reshape(1, -1)))
    return prepped


# ---------------------------------------------------------------------------
# Forward pass
# ---------------------------------------------------------------------------
@jax.jit
def mlp_forward(x, kernel_params):
    B, F = x.shape
    # Batch tile: weights are streamed once per call and reused across tiles.
    B8 = ((B + 7) // 8) * 8
    TB = min(256, B8)
    B_pad = ((B8 + TB - 1) // TB) * TB

    # Fold the 784 -> 896 pad into the input (matches zero rows added to W0)
    # and cast to bf16 in the wrapper: halves x's DMA, removes in-kernel cast.
    x = jnp.pad(x, ((0, B_pad - B), (0, K_PAD - F))).astype(jnp.bfloat16)

    (w0, b0), (w1, b1), (w2, b2), (w3, b3), (w4, b4) = kernel_params

    def resident(shape):
        # Whole-array block, constant block index -> DMA'd once, VMEM-resident
        # across all batch-tile grid steps.
        return pl.BlockSpec(shape, lambda i: (0, 0))

    hbm = pl.BlockSpec(memory_space=pl.ANY)   # raw HBM ref, manual DMA in kernel

    out_padded = pl.pallas_call(
        _mlp_fused_kernel,
        out_shape=jax.ShapeDtypeStruct((B_pad, N_PAD), jnp.float32),
        grid_spec=pltpu.PrefetchScalarGridSpec(
            num_scalar_prefetch=0,
            grid=(B_pad // TB,),
            in_specs=[
                pl.BlockSpec((TB, K_PAD), lambda i: (i, 0)),   # x batch tile
                resident(w0.shape), resident(b0.shape),        # layer 0 auto-DMA
                hbm, resident(b1.shape),                       # W1 manual DMA
                hbm, resident(b2.shape),                       # W2 manual DMA
                hbm, resident(b3.shape),                       # W3 manual DMA
                hbm, resident(b4.shape),                       # W4 manual DMA
            ],
            out_specs=pl.BlockSpec((TB, N_PAD), lambda i: (i, 0)),
            scratch_shapes=[
                pltpu.VMEM(w1.shape, jnp.bfloat16),
                pltpu.VMEM(w2.shape, jnp.bfloat16),
                pltpu.VMEM(w3.shape, jnp.bfloat16),
                pltpu.VMEM(w4.shape, jnp.bfloat16),
                pltpu.SemaphoreType.DMA((4,)),
            ]),
        compiler_params=pltpu.CompilerParams(
            # "arbitrary": single sequential walker -> first-step manual weight
            # loads + cross-step residency are valid; also avoids duplicating
            # the full weight stream on both v7x TensorCores.
            dimension_semantics=("arbitrary",),
            vmem_limit_bytes=32 << 20,   # ~9 MiB used; safe on v7x's 64 MiB too
        ),
    )(x, w0, b0, w1, b1, w2, b2, w3, b3, w4, b4)
    return out_padded[:B, :LAYER_DIMS[-1][1]]              # (B, 10)


# ---------------------------------------------------------------------------
# References
# ---------------------------------------------------------------------------
def mlp_reference_fp32(x, params):
    h = x
    for w, b in params[:-1]:
        h = jnp.maximum(h @ w + b, 0.0)
    w, b = params[-1]
    return jax.nn.softmax(h @ w + b, axis=-1)


def mlp_reference_bf16(x, params):
    """Mirrors kernel numerics: bf16 matmul operands, f32 accum/epilogue."""
    h = x.astype(jnp.bfloat16)
    last = len(params) - 1
    for i, (w, b) in enumerate(params):
        y = jnp.dot(h, w.astype(jnp.bfloat16),
                    preferred_element_type=jnp.float32) + b
        if i < last:
            h = jnp.maximum(y, 0.0).astype(jnp.bfloat16)
    return jax.nn.softmax(y, axis=-1)


if __name__ == "__main__":
    key = jax.random.PRNGKey(0)
    kx, kp = jax.random.split(key)

    B = 8
    x = jax.random.normal(kx, (B, 784), dtype=jnp.float32)

    params = init_mlp_params(kp)          # fp32, PyTorch-equivalent layout
    kparams = prepare_kernel_params(params)

    out = jax.block_until_ready(mlp_forward(x, kparams))

    ref_bf16 = mlp_reference_bf16(x, params)   # same numerics as the kernel
    ref_fp32 = mlp_reference_fp32(x, params)   # original module semantics

    assert out.shape == (B, 10)
    # approx-reciprocal softmax: rows sum to 1 within EUP approximation error.
    assert jnp.allclose(jnp.sum(out, axis=-1), 1.0, atol=1e-2)
    assert jnp.allclose(out, ref_bf16, atol=5e-3), \
        float(jnp.max(jnp.abs(out - ref_bf16)))
    # bf16 weights vs. fp32 weights: loose check that semantics are preserved.
    assert jnp.allclose(out, ref_fp32, atol=5e-2), \
        float(jnp.max(jnp.abs(out - ref_fp32)))

    print("KERNEL_OK")
</pallas_src>

<mosaic_0001>
module attributes {stable_mosaic.version = 11 : i64} {
  func.func @_mlp_fused_kernel(%arg0: i32, %arg1: memref<8x896xbf16, #tpu.memory_space<vmem>>, %arg2: memref<896x1024xbf16, #tpu.memory_space<vmem>>, %arg3: memref<1x1024xf32, #tpu.memory_space<vmem>>, %arg4: memref<1024x1024xbf16, #tpu.memory_space<any>>, %arg5: memref<1x1024xf32, #tpu.memory_space<vmem>>, %arg6: memref<1024x1024xbf16, #tpu.memory_space<any>>, %arg7: memref<1x1024xf32, #tpu.memory_space<vmem>>, %arg8: memref<1024x512xbf16, #tpu.memory_space<any>>, %arg9: memref<1x512xf32, #tpu.memory_space<vmem>>, %arg10: memref<512x128xbf16, #tpu.memory_space<any>>, %arg11: memref<1x128xf32, #tpu.memory_space<vmem>>, %arg12: memref<8x128xf32, #tpu.memory_space<vmem>>, %arg13: memref<1024x1024xbf16, #tpu.memory_space<vmem>>, %arg14: memref<1024x1024xbf16, #tpu.memory_space<vmem>>, %arg15: memref<1024x512xbf16, #tpu.memory_space<vmem>>, %arg16: memref<512x128xbf16, #tpu.memory_space<vmem>>, %arg17: memref<4x!tpu.dma_semaphore, #tpu.memory_space<semaphore_mem>>) attributes {dimension_semantics = [#tpu.dimension_semantics<arbitrary>], iteration_bounds = array<i64: 1>, scalar_prefetch = 0 : i64, scratch_operands = 5 : i64, tpu.core_type = #tpu.core_type<tc>, window_params = [{transform_indices = @transform_0, window_bounds = array<i64: 8, 896>}, {pipeline_mode = #tpu.pipeline_mode<synchronous>, transform_indices = @transform_1, window_bounds = array<i64: 896, 1024>}, {pipeline_mode = #tpu.pipeline_mode<synchronous>, transform_indices = @transform_2, window_bounds = array<i64: 1, 1024>}, {}, {pipeline_mode = #tpu.pipeline_mode<synchronous>, transform_indices = @transform_4, window_bounds = array<i64: 1, 1024>}, {}, {pipeline_mode = #tpu.pipeline_mode<synchronous>, transform_indices = @transform_6, window_bounds = array<i64: 1, 1024>}, {}, {pipeline_mode = #tpu.pipeline_mode<synchronous>, transform_indices = @transform_8, window_bounds = array<i64: 1, 512>}, {}, {pipeline_mode = #tpu.pipeline_mode<synchronous>, transform_indices = @transform_10, window_bounds = array<i64: 1, 128>}, {transform_indices = @transform_11, window_bounds = array<i64: 8, 128>}]} {
    %c0_i32 = arith.constant 0 : i32
    %0 = arith.cmpi eq, %arg0, %c0_i32 : i32
    %1 = arith.extui %0 : i1 to i32
    %c0_i32_0 = arith.constant 0 : i32
    %2 = arith.cmpi ne, %1, %c0_i32_0 : i32
    scf.if %2 {
      %c0_i32_38 = arith.constant 0 : i32
      %60 = tpu.memref_slice %arg17[%c0_i32_38] : memref<4x!tpu.dma_semaphore, #tpu.memory_space<semaphore_mem>> -> memref<1x!tpu.dma_semaphore, #tpu.memory_space<semaphore_mem>>
      %61 = tpu.memref_squeeze %60 : memref<1x!tpu.dma_semaphore, #tpu.memory_space<semaphore_mem>> -> memref<!tpu.dma_semaphore, #tpu.memory_space<semaphore_mem>>
      tpu.enqueue_dma source(%arg4 : memref<1024x1024xbf16, #tpu.memory_space<any>>) target(%arg13 : memref<1024x1024xbf16, #tpu.memory_space<vmem>>) target_semaphore(%61 : memref<!tpu.dma_semaphore, #tpu.memory_space<semaphore_mem>>)
      %c1_i32 = arith.constant 1 : i32
      %62 = tpu.memref_slice %arg17[%c1_i32] : memref<4x!tpu.dma_semaphore, #tpu.memory_space<semaphore_mem>> -> memref<1x!tpu.dma_semaphore, #tpu.memory_space<semaphore_mem>>
      %63 = tpu.memref_squeeze %62 : memref<1x!tpu.dma_semaphore, #tpu.memory_space<semaphore_mem>> -> memref<!tpu.dma_semaphore, #tpu.memory_space<semaphore_mem>>
      tpu.enqueue_dma source(%arg6 : memref<1024x1024xbf16, #tpu.memory_space<any>>) target(%arg14 : memref<1024x1024xbf16, #tpu.memory_space<vmem>>) target_semaphore(%63 : memref<!tpu.dma_semaphore, #tpu.memory_space<semaphore_mem>>)
      %c2_i32 = arith.constant 2 : i32
      %64 = tpu.memref_slice %arg17[%c2_i32] : memref<4x!tpu.dma_semaphore, #tpu.memory_space<semaphore_mem>> -> memref<1x!tpu.dma_semaphore, #tpu.memory_space<semaphore_mem>>
      %65 = tpu.memref_squeeze %64 : memref<1x!tpu.dma_semaphore, #tpu.memory_space<semaphore_mem>> -> memref<!tpu.dma_semaphore, #tpu.memory_space<semaphore_mem>>
      tpu.enqueue_dma source(%arg8 : memref<1024x512xbf16, #tpu.memory_space<any>>) target(%arg15 : memref<1024x512xbf16, #tpu.memory_space<vmem>>) target_semaphore(%65 : memref<!tpu.dma_semaphore, #tpu.memory_space<semaphore_mem>>)
      %c3_i32 = arith.constant 3 : i32
      %66 = tpu.memref_slice %arg17[%c3_i32] : memref<4x!tpu.dma_semaphore, #tpu.memory_space<semaphore_mem>> -> memref<1x!tpu.dma_semaphore, #tpu.memory_space<semaphore_mem>>
      %67 = tpu.memref_squeeze %66 : memref<1x!tpu.dma_semaphore, #tpu.memory_space<semaphore_mem>> -> memref<!tpu.dma_semaphore, #tpu.memory_space<semaphore_mem>>
      tpu.enqueue_dma source(%arg10 : memref<512x128xbf16, #tpu.memory_space<any>>) target(%arg16 : memref<512x128xbf16, #tpu.memory_space<vmem>>) target_semaphore(%67 : memref<!tpu.dma_semaphore, #tpu.memory_space<semaphore_mem>>)
    } else {
    }
    %c0 = arith.constant 0 : index
    %c0_1 = arith.constant 0 : index
    %3 = vector.load %arg1[%c0, %c0_1] : memref<8x896xbf16, #tpu.memory_space<vmem>>, vector<8x896xbf16>
    %c0_2 = arith.constant 0 : index
    %c0_3 = arith.constant 0 : index
    %4 = vector.load %arg2[%c0_2, %c0_3] : memref<896x1024xbf16, #tpu.memory_space<vmem>>, vector<896x1024xbf16>
    %cst = arith.constant dense<0.000000e+00> : vector<8x1024xf32>
    %5 = tpu.matmul %3, %4, %cst {dimension_numbers = #tpu.dot_dimension_numbers<[1], [0], [0], [1], [0, 0, 1, 1], [], []>} : vector<8x896xbf16>, vector<896x1024xbf16>, vector<8x1024xf32> -> vector<8x1024xf32>
    %c0_4 = arith.constant 0 : index
    %c0_5 = arith.constant 0 : index
    %6 = vector.load %arg3[%c0_4, %c0_5] : memref<1x1024xf32, #tpu.memory_space<vmem>>, vector<1x1024xf32>
    %7 = vector.broadcast %6 : vector<1x1024xf32> to vector<8x1024xf32>
    %8 = arith.addf %5, %7 : vector<8x1024xf32>
    %cst_6 = arith.constant 0.000000e+00 : f32
    %9 = vector.broadcast %cst_6 : f32 to vector<8x1024xf32>
    %10 = arith.maximumf %8, %9 : vector<8x1024xf32>
    %11 = arith.truncf %10 : vector<8x1024xf32> to vector<8x1024xbf16>
    %12 = arith.extui %0 : i1 to i32
    %c0_i32_7 = arith.constant 0 : i32
    %13 = arith.cmpi ne, %12, %c0_i32_7 : i32
    scf.if %13 {
      %c0_i32_38 = arith.constant 0 : i32
      %60 = tpu.memref_slice %arg17[%c0_i32_38] : memref<4x!tpu.dma_semaphore, #tpu.memory_space<semaphore_mem>> -> memref<1x!tpu.dma_semaphore, #tpu.memory_space<semaphore_mem>>
      %61 = tpu.memref_squeeze %60 : memref<1x!tpu.dma_semaphore, #tpu.memory_space<semaphore_mem>> -> memref<!tpu.dma_semaphore, #tpu.memory_space<semaphore_mem>>
      tpu.wait_dma2 semaphore(%61 : memref<!tpu.dma_semaphore, #tpu.memory_space<semaphore_mem>>) src(%arg4 : memref<1024x1024xbf16, #tpu.memory_space<any>>) dst(%arg13 : memref<1024x1024xbf16, #tpu.memory_space<vmem>>)
    } else {
    }
    %c0_8 = arith.constant 0 : index
    %c0_9 = arith.constant 0 : index
    %14 = vector.load %arg13[%c0_8, %c0_9] : memref<1024x1024xbf16, #tpu.memory_space<vmem>>, vector<1024x1024xbf16>
    %cst_10 = arith.constant dense<0.000000e+00> : vector<8x1024xf32>
    %15 = tpu.matmul %11, %14, %cst_10 {dimension_numbers = #tpu.dot_dimension_numbers<[1], [0], [0], [1], [0, 0, 1, 1], [], []>} : vector<8x1024xbf16>, vector<1024x1024xbf16>, vector<8x1024xf32> -> vector<8x1024xf32>
    %c0_11 = arith.constant 0 : index
    %c0_12 = arith.constant 0 : index
    %16 = vector.load %arg5[%c0_11, %c0_12] : memref<1x1024xf32, #tpu.memory_space<vmem>>, vector<1x1024xf32>
    %17 = vector.broadcast %16 : vector<1x1024xf32> to vector<8x1024xf32>
    %18 = arith.addf %15, %17 : vector<8x1024xf32>
    %cst_13 = arith.constant 0.000000e+00 : f32
    %19 = vector.broadcast %cst_13 : f32 to vector<8x1024xf32>
    %20 = arith.maximumf %18, %19 : vector<8x1024xf32>
    %21 = arith.truncf %20 : vector<8x1024xf32> to vector<8x1024xbf16>
    %22 = arith.extui %0 : i1 to i32
    %c0_i32_14 = arith.constant 0 : i32
    %23 = arith.cmpi ne, %22, %c0_i32_14 : i32
    scf.if %23 {
      %c1_i32 = arith.constant 1 : i32
      %60 = tpu.memref_slice %arg17[%c1_i32] : memref<4x!tpu.dma_semaphore, #tpu.memory_space<semaphore_mem>> -> memref<1x!tpu.dma_semaphore, #tpu.memory_space<semaphore_mem>>
      %61 = tpu.memref_squeeze %60 : memref<1x!tpu.dma_semaphore, #tpu.memory_space<semaphore_mem>> -> memref<!tpu.dma_semaphore, #tpu.memory_space<semaphore_mem>>
      tpu.wait_dma2 semaphore(%61 : memref<!tpu.dma_semaphore, #tpu.memory_space<semaphore_mem>>) src(%arg6 : memref<1024x1024xbf16, #tpu.memory_space<any>>) dst(%arg14 : memref<1024x1024xbf16, #tpu.memory_space<vmem>>)
    } else {
    }
    %c0_15 = arith.constant 0 : index
    %c0_16 = arith.constant 0 : index
    %24 = vector.load %arg14[%c0_15, %c0_16] : memref<1024x1024xbf16, #tpu.memory_space<vmem>>, vector<1024x1024xbf16>
    %cst_17 = arith.constant dense<0.000000e+00> : vector<8x1024xf32>
    %25 = tpu.matmul %21, %24, %cst_17 {dimension_numbers = #tpu.dot_dimension_numbers<[1], [0], [0], [1], [0, 0, 1, 1], [], []>} : vector<8x1024xbf16>, vector<1024x1024xbf16>, vector<8x1024xf32> -> vector<8x1024xf32>
    %c0_18 = arith.constant 0 : index
    %c0_19 = arith.constant 0 : index
    %26 = vector.load %arg7[%c0_18, %c0_19] : memref<1x1024xf32, #tpu.memory_space<vmem>>, vector<1x1024xf32>
    %27 = vector.broadcast %26 : vector<1x1024xf32> to vector<8x1024xf32>
    %28 = arith.addf %25, %27 : vector<8x1024xf32>
    %cst_20 = arith.constant 0.000000e+00 : f32
    %29 = vector.broadcast %cst_20 : f32 to vector<8x1024xf32>
    %30 = arith.maximumf %28, %29 : vector<8x1024xf32>
    %31 = arith.truncf %30 : vector<8x1024xf32> to vector<8x1024xbf16>
    %32 = arith.extui %0 : i1 to i32
    %c0_i32_21 = arith.constant 0 : i32
    %33 = arith.cmpi ne, %32, %c0_i32_21 : i32
    scf.if %33 {
      %c2_i32 = arith.constant 2 : i32
      %60 = tpu.memref_slice %arg17[%c2_i32] : memref<4x!tpu.dma_semaphore, #tpu.memory_space<semaphore_mem>> -> memref<1x!tpu.dma_semaphore, #tpu.memory_space<semaphore_mem>>
      %61 = tpu.memref_squeeze %60 : memref<1x!tpu.dma_semaphore, #tpu.memory_space<semaphore_mem>> -> memref<!tpu.dma_semaphore, #tpu.memory_space<semaphore_mem>>
      tpu.wait_dma2 semaphore(%61 : memref<!tpu.dma_semaphore, #tpu.memory_space<semaphore_mem>>) src(%arg8 : memref<1024x512xbf16, #tpu.memory_space<any>>) dst(%arg15 : memref<1024x512xbf16, #tpu.memory_space<vmem>>)
    } else {
    }
    %c0_22 = arith.constant 0 : index
    %c0_23 = arith.constant 0 : index
    %34 = vector.load %arg15[%c0_22, %c0_23] : memref<1024x512xbf16, #tpu.memory_space<vmem>>, vector<1024x512xbf16>
    %cst_24 = arith.constant dense<0.000000e+00> : vector<8x512xf32>
    %35 = tpu.matmul %31, %34, %cst_24 {dimension_numbers = #tpu.dot_dimension_numbers<[1], [0], [0], [1], [0, 0, 1, 1], [], []>} : vector<8x1024xbf16>, vector<1024x512xbf16>, vector<8x512xf32> -> vector<8x512xf32>
    %c0_25 = arith.constant 0 : index
    %c0_26 = arith.constant 0 : index
    %36 = vector.load %arg9[%c0_25, %c0_26] : memref<1x512xf32, #tpu.memory_space<vmem>>, vector<1x512xf32>
    %37 = vector.broadcast %36 : vector<1x512xf32> to vector<8x512xf32>
    %38 = arith.addf %35, %37 : vector<8x512xf32>
    %cst_27 = arith.constant 0.000000e+00 : f32
    %39 = vector.broadcast %cst_27 : f32 to vector<8x512xf32>
    %40 = arith.maximumf %38, %39 : vector<8x512xf32>
    %41 = arith.truncf %40 : vector<8x512xf32> to vector<8x512xbf16>
    %42 = arith.extui %0 : i1 to i32
    %c0_i32_28 = arith.constant 0 : i32
    %43 = arith.cmpi ne, %42, %c0_i32_28 : i32
    scf.if %43 {
      %c3_i32 = arith.constant 3 : i32
      %60 = tpu.memref_slice %arg17[%c3_i32] : memref<4x!tpu.dma_semaphore, #tpu.memory_space<semaphore_mem>> -> memref<1x!tpu.dma_semaphore, #tpu.memory_space<semaphore_mem>>
      %61 = tpu.memref_squeeze %60 : memref<1x!tpu.dma_semaphore, #tpu.memory_space<semaphore_mem>> -> memref<!tpu.dma_semaphore, #tpu.memory_space<semaphore_mem>>
      tpu.wait_dma2 semaphore(%61 : memref<!tpu.dma_semaphore, #tpu.memory_space<semaphore_mem>>) src(%arg10 : memref<512x128xbf16, #tpu.memory_space<any>>) dst(%arg16 : memref<512x128xbf16, #tpu.memory_space<vmem>>)
    } else {
    }
    %c0_29 = arith.constant 0 : index
    %c0_30 = arith.constant 0 : index
    %44 = vector.load %arg16[%c0_29, %c0_30] : memref<512x128xbf16, #tpu.memory_space<vmem>>, vector<512x128xbf16>
    %cst_31 = arith.constant dense<0.000000e+00> : vector<8x128xf32>
    %45 = tpu.matmul %41, %44, %cst_31 {dimension_numbers = #tpu.dot_dimension_numbers<[1], [0], [0], [1], [0, 0, 1, 1], [], []>} : vector<8x512xbf16>, vector<512x128xbf16>, vector<8x128xf32> -> vector<8x128xf32>
    %c0_32 = arith.constant 0 : index
    %c0_33 = arith.constant 0 : index
    %46 = vector.load %arg11[%c0_32, %c0_33] : memref<1x128xf32, #tpu.memory_space<vmem>>, vector<1x128xf32>
    %47 = vector.broadcast %46 : vector<1x128xf32> to vector<8x128xf32>
    %48 = arith.addf %45, %47 : vector<8x128xf32>
    %cst_34 = arith.constant dense<0xFF800000> : vector<8xf32>
    %49 = vector.multi_reduction <maximumf>, %48, %cst_34 [1] : vector<8x128xf32> to vector<8xf32>
    %50 = vector.shape_cast %49 : vector<8xf32> to vector<8x1xf32>
    %51 = vector.broadcast %50 : vector<8x1xf32> to vector<8x128xf32>
    %52 = arith.subf %48, %51 : vector<8x128xf32>
    %53 = math.exp %52 : vector<8x128xf32>
    %cst_35 = arith.constant dense<0.000000e+00> : vector<8xf32>
    %54 = vector.multi_reduction <add>, %53, %cst_35 [1] : vector<8x128xf32> to vector<8xf32>
    %55 = vector.shape_cast %54 : vector<8xf32> to vector<8x1xf32>
    %56 = tpu.reciprocal %55 {approx = true} : vector<8x1xf32> -> vector<8x1xf32>
    %57 = vector.broadcast %56 : vector<8x1xf32> to vector<8x128xf32>
    %58 = arith.mulf %53, %57 : vector<8x128xf32>
    %c0_36 = arith.constant 0 : index
    %c0_37 = arith.constant 0 : index
    %59 = vector.load %arg12[%c0_36, %c0_37] : memref<8x128xf32, #tpu.memory_space<vmem>>, vector<8x128xf32>
    tpu.vector_store %arg12[%c0_36, %c0_37], %58 {strides = array<i32>} : memref<8x128xf32, #tpu.memory_space<vmem>>, vector<8x128xf32>,
    return
  }
  func.func @transform_0(%arg0: i32) -> (i32, i32) {
    %c0_i32 = arith.constant 0 : i32
    %c0_i32_0 = arith.constant 0 : i32
    return %arg0, %c0_i32 : i32, i32
  }
  func.func @transform_1(%arg0: i32) -> (i32, i32) {
    %c0_i32 = arith.constant 0 : i32
    %c0_i32_0 = arith.constant 0 : i32
    %c0_i32_1 = arith.constant 0 : i32
    return %c0_i32, %c0_i32_0 : i32, i32
  }
  func.func @transform_2(%arg0: i32) -> (i32, i32) {
    %c0_i32 = arith.constant 0 : i32
    %c0_i32_0 = arith.constant 0 : i32
    %c0_i32_1 = arith.constant 0 : i32
    return %c0_i32, %c0_i32_0 : i32, i32
  }
  func.func @transform_4(%arg0: i32) -> (i32, i32) {
    %c0_i32 = arith.constant 0 : i32
    %c0_i32_0 = arith.constant 0 : i32
    %c0_i32_1 = arith.constant 0 : i32
    return %c0_i32, %c0_i32_0 : i32, i32
  }
  func.func @transform_6(%arg0: i32) -> (i32, i32) {
    %c0_i32 = arith.constant 0 : i32
    %c0_i32_0 = arith.constant 0 : i32
    %c0_i32_1 = arith.constant 0 : i32
    return %c0_i32, %c0_i32_0 : i32, i32
  }
  func.func @transform_8(%arg0: i32) -> (i32, i32) {
    %c0_i32 = arith.constant 0 : i32
    %c0_i32_0 = arith.constant 0 : i32
    %c0_i32_1 = arith.constant 0 : i32
    return %c0_i32, %c0_i32_0 : i32, i32
  }
  func.func @transform_10(%arg0: i32) -> (i32, i32) {
    %c0_i32 = arith.constant 0 : i32
    %c0_i32_0 = arith.constant 0 : i32
    %c0_i32_1 = arith.constant 0 : i32
    return %c0_i32, %c0_i32_0 : i32, i32
  }
  func.func @transform_11(%arg0: i32) -> (i32, i32) {
    %c0_i32 = arith.constant 0 : i32
    %c0_i32_0 = arith.constant 0 : i32
    return %arg0, %c0_i32 : i32, i32
  }
}

</mosaic_0001>

<bundles_post_ra>
// kernel: mlp_forward.1
= control target key start
LH: loop header
LB: loop body
LE: loop exit
PB: predicated region body
PF: predicated region fallthrough
CT: control target
= control target key end

     0   :  { %16 = vsyncpa [#allocation8], 0  ;;  %s8372_s0 = inlined_call_operand.vmem [shape: bf16[8,896], index: 0, kind: input, shape index: {}]   ;;  %s8373_s1 = inlined_call_operand.hbm [shape: bf16[896,1024], index: 1, kind: input, shape index: {}]   ;;  %s8374_s2 = inlined_call_operand.hbm [shape: f32[1,1024], index: 2, kind: input, shape index: {}]   ;;  %s8375_s3 = inlined_call_operand.hbm [shape: bf16[1024,1024], index: 3, kind: input, shape index: {}]   ;;  %s8376_s4 = inlined_call_operand.hbm [shape: f32[1,1024], index: 4, kind: input, shape index: {}]   ;;  %s8377_s5 = inlined_call_operand.hbm [shape: bf16[1024,1024], index: 5, kind: input, shape index: {}]   ;;  %s8378_s6 = inlined_call_operand.hbm [shape: f32[1,1024], index: 6, kind: input, shape index: {}]   ;;  %s8379_s7 = inlined_call_operand.hbm [shape: bf16[1024,512], index: 7, kind: input, shape index: {}]   ;;  %s8380_s8 = inlined_call_operand.hbm [shape: f32[1,512], index: 8, kind: input, shape index: {}]   ;;  %s8381_s9 = inlined_call_operand.hbm [shape: bf16[512,128], index: 9, kind: input, shape index: {}]   ;;  %s8382_s10 = inlined_call_operand.hbm [shape: f32[1,128], index: 10, kind: input, shape index: {}]   ;;  %s8383_s11 = inlined_call_operand.hbm [shape: f32[8,128], index: 11, kind: output, shape index: {}]  }
   0x1   :  { %17 = vsyncpa [#allocation11], 0 }
   0x2   :  { %18 = vsyncpa [#allocation14], 0 }
   0x3   :  { %19 = vsyncpa [#allocation17], 0 }
   0x4   :  { %20 = vsyncpa [#allocation9], 0  ;;  %s7867_s17 = smov [#allocation10]   ;;  %s7868_s19 = smov [#allocation13]  }
   0x5   :  { %s41_s18 = sshll.u32 %s7867_s17, 4  ;;  %s61_s20 = sshll.u32 %s7868_s19, 4  ;;  %s42_s18 = int_to_ptr.vmem [resolvable:$true] %s41_s18  ;;  %s62_s20 = int_to_ptr.vmem [resolvable:$true] %s61_s20 }
   0x6   :  { %s7673_s23 = scalar_lea.hbm %s8374_s2, 128 }
   0x7   :  { %p7674_p0 = scmp.ne.s32.totalorder %s8374_s2, %s7673_s23  ;;  %p7677_p1 = scmp.lt.u32.totalorder %s7673_s23, %s8374_s2 }
   0x9   :  { %p7679_p2 = pnand %p7677_p1, %p7674_p0 }
   0xb   :  { %7682 = shalt.err (!%p7679_p2)
}
   0xc   :  { %s7683_s28 = scalar_lea.vmem %s42_s18, 128  ;;  %p7688_p4 = scmp.lt.s32.totalorder %s42_s18, %s42_s18 }
   0xd   :  { %p7684_p3 = scmp.ne.s32.totalorder %s42_s18, %s7683_s28  ;;  %p7689_p5 = scmp.lt.s32.totalorder %s7683_s28, %s7683_s28 }
   0xf   :  { %p7690_p6 = por %p7689_p5, %p7688_p4 }
  0x11   :  { %p7691_p7 = pnand %p7690_p6, %p7684_p3 }
  0x13   :  { %7694 = shalt.err (!%p7691_p7)
}
  0x14   :  { %44 = dma.hbm_to_vmem [thread:$0]  %s8374_s2, 128, %s42_s18, [#allocation11]  }
  0x15   :  { %s7695_s14 = scalar_lea.hbm %s8378_s6, 128 }
  0x16   :  { %p7696_p8 = scmp.ne.s32.totalorder %s8378_s6, %s7695_s14  ;;  %p7699_p9 = scmp.lt.u32.totalorder %s7695_s14, %s8378_s6 }
  0x18   :  { %p7701_p10 = pnand %p7699_p9, %p7696_p8 }
  0x1a   :  { %7704 = shalt.err (!%p7701_p10)
}
  0x1b   :  { %s7705_s21 = scalar_lea.vmem %s62_s20, 128  ;;  %p7710_p12 = scmp.lt.s32.totalorder %s62_s20, %s62_s20 }
  0x1c   :  { %p7706_p11 = scmp.ne.s32.totalorder %s62_s20, %s7705_s21  ;;  %p7711_p13 = scmp.lt.s32.totalorder %s7705_s21, %s7705_s21 }
  0x1e   :  { %p7712_p0 = por %p7711_p13, %p7710_p12 }
  0x20   :  { %p7713_p1 = pnand %p7712_p0, %p7706_p11 }
  0x22   :  { %7716 = shalt.err (!%p7713_p1)
}
  0x23   :  { %64 = dma.hbm_to_vmem [thread:$0]  %s8378_s6, 128, %s62_s20, [#allocation14]  }
  0x24   :  { %s7869_s22 = smov [#allocation7]   ;;  %s7717_s26 = scalar_lea.hbm %s8373_s1, 57344 }
  0x25   :  { %s28_s23 = sshll.u32 %s7869_s22, 4  ;;  %p7718_p2 = scmp.ne.s32.totalorder %s8373_s1, %s7717_s26  ;;  %s29_s23 = int_to_ptr.vmem [resolvable:$true] %s28_s23 }
  0x26   :  { %p7721_p3 = scmp.lt.u32.totalorder %s7717_s26, %s8373_s1 }
  0x28   :  { %p7723_p4 = pnand %p7721_p3, %p7718_p2 }
  0x2a   :  { %7726 = shalt.err (!%p7723_p4)
}
  0x2b   :  { %s7727_s12 = scalar_lea.vmem %s29_s23, 57344  ;;  %p7732_p6 = scmp.lt.s32.totalorder %s29_s23, %s29_s23 }
  0x2c   :  { %p7728_p5 = scmp.ne.s32.totalorder %s29_s23, %s7727_s12  ;;  %p7733_p7 = scmp.lt.s32.totalorder %s7727_s12, %s7727_s12 }
  0x2e   :  { %p7734_p8 = por %p7733_p7, %p7732_p6 }
  0x30   :  { %p7735_p9 = pnand %p7734_p8, %p7728_p5 }
  0x32   :  { %7738 = shalt.err (!%p7735_p9)
}
  0x33   :  { %s7870_s6 = smov 512   ;;  %s7871_s20 = smov 32  }
  0x34   :  { %34 = dma.hbm_to_vmem [thread:$0]  %s8373_s1, 57344, %s29_s23, [#allocation8], %s7870_s6, %s7870_s6, %s7871_s20  }
  0x35   :  { %s7872_s15 = smov [#allocation12]   ;;  %s7873_s17 = smov [#allocation15]  }
  0x36   :  { %s51_s16 = sshll.u32 %s7872_s15, 4  ;;  %s71_s19 = sshll.u32 %s7873_s17, 4  ;;  %s52_s16 = int_to_ptr.vmem [resolvable:$true] %s51_s16  ;;  %s72_s19 = int_to_ptr.vmem [resolvable:$true] %s71_s19 }
  0x37   :  { %s7739_s18 = scalar_lea.hbm %s8376_s4, 128 }
  0x38   :  { %p7740_p10 = scmp.ne.s32.totalorder %s8376_s4, %s7739_s18  ;;  %p7743_p11 = scmp.lt.u32.totalorder %s7739_s18, %s8376_s4 }
  0x3a   :  { %p7745_p12 = pnand %p7743_p11, %p7740_p10 }
  0x3c   :  { %7748 = shalt.err (!%p7745_p12)
}
  0x3d   :  { %s7749_s1 = scalar_lea.vmem %s52_s16, 128  ;;  %p7754_p0 = scmp.lt.s32.totalorder %s52_s16, %s52_s16 }
  0x3e   :  { %p7750_p13 = scmp.ne.s32.totalorder %s52_s16, %s7749_s1  ;;  %p7755_p1 = scmp.lt.s32.totalorder %s7749_s1, %s7749_s1 }
  0x40   :  { %p7756_p2 = por %p7755_p1, %p7754_p0 }
  0x42   :  { %p7757_p3 = pnand %p7756_p2, %p7750_p13 }
  0x44   :  { %7760 = shalt.err (!%p7757_p3)
}
  0x45   :  { %54 = dma.hbm_to_vmem [thread:$0]  %s8376_s4, 128, %s52_s16, [#allocation11]  }
  0x46   :  { %s7761_s30 = scalar_lea.hbm %s8380_s8, 64 }
  0x47   :  { %p7762_p4 = scmp.ne.s32.totalorder %s8380_s8, %s7761_s30  ;;  %p7765_p5 = scmp.lt.u32.totalorder %s7761_s30, %s8380_s8 }
  0x49   :  { %p7767_p6 = pnand %p7765_p5, %p7762_p4 }
  0x4b   :  { %7770 = shalt.err (!%p7767_p6)
}
  0x4c   :  { %s7771_s14 = scalar_lea.vmem %s72_s19, 64  ;;  %p7776_p8 = scmp.lt.s32.totalorder %s72_s19, %s72_s19 }
  0x4d   :  { %p7772_p7 = scmp.ne.s32.totalorder %s72_s19, %s7771_s14  ;;  %p7777_p9 = scmp.lt.s32.totalorder %s7771_s14, %s7771_s14 }
  0x4f   :  { %p7778_p10 = por %p7777_p9, %p7776_p8 }
  0x51   :  { %p7779_p11 = pnand %p7778_p10, %p7772_p7 }
  0x53   :  { %7782 = shalt.err (!%p7779_p11)
}
  0x54   :  { %74 = dma.hbm_to_vmem [thread:$0]  %s8380_s8, 64, %s72_s19, [#allocation14]  }
  0x55   :  { %s7874_s16 = smov [#allocation16]   ;;  %s7783_s18 = scalar_lea.hbm %s8382_s10, 16 }
  0x56   :  { %s81_s17 = sshll.u32 %s7874_s16, 4  ;;  %p7784_p12 = scmp.ne.s32.totalorder %s8382_s10, %s7783_s18  ;;  %s82_s17 = int_to_ptr.vmem [resolvable:$true] %s81_s17 }
  0x57   :  { %p7787_p13 = scmp.lt.u32.totalorder %s7783_s18, %s8382_s10 }
  0x59   :  { %p7789_p0 = pnand %p7787_p13, %p7784_p12 }
  0x5b   :  { %7792 = shalt.err (!%p7789_p0)
}
  0x5c   :  { %s7793_s1 = scalar_lea.vmem %s82_s17, 16  ;;  %s7797_s8 = scalar_lea.vmem %s82_s17, 32 }
  0x5d   :  { %p7794_p1 = scmp.ne.s32.totalorder %s82_s17, %s7793_s1  ;;  %p7798_p2 = scmp.lt.s32.totalorder %s82_s17, %s82_s17 }
  0x5e   :  { %p7799_p3 = scmp.lt.s32.totalorder %s7797_s8, %s7793_s1 }
  0x60   :  { %p7800_p4 = por %p7799_p3, %p7798_p2 }
  0x62   :  { %p7801_p5 = pnand %p7800_p4, %p7794_p1 }
  0x64   :  { %7804 = shalt.err (!%p7801_p5)
}
  0x65   :  { %84 = dma.hbm_to_vmem [thread:$0]  %s8382_s10, 16, %s82_s17, [#allocation17]  }
  0x66   :  { %7849 = dma.done.wait [#allocation8], 57344  }
  0x67   :  { %7850 = vsyncadd [#allocation8], 4294909952 }
  0x68   :  { %7851 = dma.done.wait [#allocation11], 256  }
  0x69   :  { %7852 = vsyncadd [#allocation11], 4294967040 }
  0x6a   :  { %7853 = dma.done.wait [#allocation14], 192  }
  0x6b   :  { %7854 = vsyncadd [#allocation14], 4294967104 }
  0x6c   :  { %7855 = dma.done.wait [#allocation17], 16  }
  0x6d   :  { %7856 = vsyncadd [#allocation17], 4294967280 }
  0x6e   :  { %s112_s27 = sld [smem:[#allocation0]]   ;;  %s7875_s28 = smov [#allocation2]  }
  0x6f   :  { %s120_s29 = sshll.u32 %s7875_s28, 4  ;;  %s7876_s30 = smov 1024   ;;  %s121_s29 = int_to_ptr.vmem [resolvable:$true] %s120_s29 }
  0x70   :  { %124 = sst [smem:[#allocation20]] %s7876_s30  ;;  %s7877_s12 = smov 8  }
  0x71   :  { %126 = sst [smem:[#allocation20 + $0x1]] %s7876_s30  ;;  %s7878_s6 = smov 64  }
  0x72   :  { %128 = sst [smem:[#allocation20 + $0x2]] %s7877_s12  ;;  %s7879_s20 = smov 128  }
  0x73   :  { %130 = sst [smem:[#allocation20 + $0x3]] %s7878_s6  ;;  %s7880_s14 = smov 2  }
  0x74   :  { %s6927_s10 = sshll.u32 %s112_s27, 26  ;;  %132 = sst [smem:[#allocation20 + $0x4]] %s7879_s20 }
  0x75   :  { %s8029_s13 = sadd.s32 134217728, %s6927_s10  ;;  %134 = sst [smem:[#allocation20 + $0x5]] %s7880_s14 }
  0x76   :  { %s7881_s4 = smov 512   ;;  %138 = sst [smem:[#allocation20 + $0x7]] %s7878_s6 }
  0x77   :  { %136 = sst [smem:[#allocation20 + $0x6]] %s7881_s4  ;;  %s7882_s15 = smov 4  }
  0x78   :  { %140 = sst [smem:[#allocation20 + $0x8]] %s7882_s15  ;;  %s7883_s16 = smov [#allocation6]  }
  0x79   :  { %s7884_s17 = smov [#allocation19]   ;;  %s7885_s18 = smov [#allocation3]  }
  0x7a   :  { %142 = dma.general %s8375_s3, 65536, %s121_s29, %s7883_s16, %s7884_s17, [#allocation20], %s8029_s13, 0  }
  0x7b   :  { %159 = sst [smem:[#allocation22]] %s7876_s30  ;;  %s155_s22 = sshll.u32 %s7885_s18, 4  ;;  %s156_s22 = int_to_ptr.vmem [resolvable:$true] %s155_s22 }
  0x7c   :  { %161 = sst [smem:[#allocation22 + $0x1]] %s7876_s30  ;;  %s7886_s24 = smov [#allocation6 + $0x1]  }
  0x7d   :  { %163 = sst [smem:[#allocation22 + $0x2]] %s7877_s12  ;;  %s7887_s25 = smov [#allocation21]  }
  0x7e   :  { %165 = sst [smem:[#allocation22 + $0x3]] %s7878_s6  ;;  %s7888_s1 = smov [#allocation4]  }
  0x7f   :  { %167 = sst [smem:[#allocation22 + $0x4]] %s7879_s20  ;;  %s190_s8 = sshll.u32 %s7888_s1, 4  ;;  %s191_s8 = int_to_ptr.vmem [resolvable:$true] %s190_s8 }
  0x80   :  { %169 = sst [smem:[#allocation22 + $0x5]] %s7880_s14  ;;  %s7889_s19 = smov [#allocation5]  }
  0x81   :  { %171 = sst [smem:[#allocation22 + $0x6]] %s7881_s4  ;;  %s221_s23 = sshll.u32 %s7889_s19, 4  ;;  %s222_s23 = int_to_ptr.vmem [resolvable:$true] %s221_s23 }
  0x82   :  { %173 = sst [smem:[#allocation22 + $0x7]] %s7878_s6  ;;  %s7890_s27 = smov 256  }
  0x83   :  { %175 = sst [smem:[#allocation22 + $0x8]] %s7882_s15  ;;  %s7892_s28 = smov [#allocation23]  }
  0x84   :  { %177 = dma.general %s8377_s5, 65536, %s156_s22, %s7886_s24, %s7887_s25, [#allocation22], %s8029_s13, 0  }
  0x85   :  { %194 = sst [smem:[#allocation24]] %s7881_s4  ;;  %s7891_s5 = smov [#allocation6 + $0x2]  }
  0x86   :  { %196 = sst [smem:[#allocation24 + $0x1]] %s7881_s4 }
  0x87   :  { %198 = sst [smem:[#allocation24 + $0x2]] %s7882_s15 }
  0x88   :  { %200 = sst [smem:[#allocation24 + $0x3]] %s7878_s6 }
  0x89   :  { %202 = sst [smem:[#allocation24 + $0x4]] %s7879_s20  ;;  %s7805_s20 = scalar_lea.hbm %s8381_s9, 4096 }
  0x8a   :  { %204 = sst [smem:[#allocation24 + $0x5]] %s7880_s14  ;;  %p7806_p6 = scmp.ne.s32.totalorder %s8381_s9, %s7805_s20 }
  0x8b   :  { %206 = sst [smem:[#allocation24 + $0x6]] %s7890_s27  ;;  %p7809_p7 = scmp.lt.u32.totalorder %s7805_s20, %s8381_s9 }
  0x8c   :  { %208 = sst [smem:[#allocation24 + $0x7]] %s7878_s6 }
  0x8d   :  { %210 = sst [smem:[#allocation24 + $0x8]] %s7882_s15  ;;  %p7811_p8 = pnand %p7809_p7, %p7806_p6 }
  0x8e   :  { %212 = dma.general %s8379_s7, 32768, %s191_s8, %s7891_s5, %s7892_s28, [#allocation24], %s8029_s13, 0  }
  0x8f   :  { %7814 = shalt.err (!%p7811_p8)  }
  0x90   :  { %s7815_s6 = scalar_lea.vmem %s222_s23, 4096  ;;  %p7820_p10 = scmp.lt.s32.totalorder %s222_s23, %s222_s23 }
  0x91   :  { %p7816_p9 = scmp.ne.s32.totalorder %s222_s23, %s7815_s6  ;;  %p7821_p11 = scmp.lt.s32.totalorder %s7815_s6, %s7815_s6 }
  0x93   :  { %p7822_p12 = por %p7821_p11, %p7820_p10 }
  0x95   :  { %p7823_p13 = pnand %p7822_p12, %p7816_p9 }
  0x97   :  { %7826 = shalt.err (!%p7823_p13)  }
  0x98   :  { %224 = dma.hbm_to_vmem [thread:$0]  %s8381_s9, 4096, %s222_s23, [#allocation6 + $0x3]  ;;  %v229_v0 = vld [vmem:[#allocation7] sm:$0xff]  ;;  %v230_v2 = vld [vmem:[#allocation7 + $0x8] sm:$0xff] }
  0x99   :  { %v233_v1 = vld [vmem:[#allocation7 + $0x20] sm:$0xff]  ;;  %v234_v4 = vld [vmem:[#allocation7 + $0x28] sm:$0xff] }
  0x9a   :  { %v6941_v3 = vcombine.high %v229_v0, %v233_v1  ;;  %v6940_v5 = vcombine.low %v229_v0, %v233_v1  ;;  %v237_v6 = vld [vmem:[#allocation7 + $0x40] sm:$0xff]  ;;  %v6943_v8 = vcombine.high %v230_v2, %v234_v4  ;;  %v6942_v9 = vcombine.low %v230_v2, %v234_v4  ;;  %v238_v11 = vld [vmem:[#allocation7 + $0x48] sm:$0xff] }
  0x9b   :  { %v241_v7 = vld [vmem:[#allocation7 + $0x60] sm:$0xff]  ;;  %v242_v12 = vld [vmem:[#allocation7 + $0x68] sm:$0xff] }
  0x9c   :  { %v6949_v10 = vcombine.high %v237_v6, %v241_v7  ;;  %v245_v13 = vld [vmem:[#allocation7 + $0x80] sm:$0xff]  ;;  %2984 = vmatprep.subr.bf16.mxu0 %v6941_v3  ;;  %v6951_v14 = vcombine.high %v238_v11, %v242_v12  ;;  %v246_v16 = vld [vmem:[#allocation7 + $0x88] sm:$0xff]  ;;  %3148 = vmatprep.subr.bf16.mxu1 %v6943_v8  ;;  %v6948_v18 = vcombine.low %v237_v6, %v241_v7 }
  0x9d   :  { %v249_v15 = vld [vmem:[#allocation7 + $0xa0] sm:$0xff]  ;;  %v250_v17 = vld [vmem:[#allocation7 + $0xa8] sm:$0xff]  ;;  %2985 = vmatpush1.bf16.msra.mxu0 %v6940_v5  ;;  %3149 = vmatpush1.bf16.msra.mxu1 %v6942_v9  ;;  %v6950_v19 = vcombine.low %v238_v11, %v242_v12 }
  0x9e   :  { %2986 = vmatprep.subr.bf16.mxu0 %v6949_v10  ;;  %v6957_v20 = vcombine.high %v245_v13, %v249_v15  ;;  %3150 = vmatprep.subr.bf16.mxu1 %v6951_v14  ;;  %v6959_v21 = vcombine.high %v246_v16, %v250_v17  ;;  %v253_v22 = vld [vmem:[#allocation7 + $0xc0] sm:$0xff]  ;;  %v254_v24 = vld [vmem:[#allocation7 + $0xc8] sm:$0xff]  ;;  %v6956_v26 = vcombine.low %v245_v13, %v249_v15 }
  0x9f   :  { %v257_v23 = vld [vmem:[#allocation7 + $0xe0] sm:$0xff]  ;;  %v258_v25 = vld [vmem:[#allocation7 + $0xe8] sm:$0xff]  ;;  %v6958_v27 = vcombine.low %v246_v16, %v250_v17 }
  0xa0   :  { %v6965_v28 = vcombine.high %v253_v22, %v257_v23  ;;  %v6967_v29 = vcombine.high %v254_v24, %v258_v25  ;;  %v261_v30 = vld [vmem:[#allocation7 + $0x100] sm:$0xff]  ;;  %v262_v32 = vld [vmem:[#allocation7 + $0x108] sm:$0xff]  ;;  %v6964_v34 = vcombine.low %v253_v22, %v257_v23  ;;  %v6966_v35 = vcombine.low %v254_v24, %v258_v25 }
  0xa1   :  { %2987 = vmatpush1.bf16.msra.mxu0 %v6948_v18  ;;  %3151 = vmatpush1.bf16.msra.mxu1 %v6950_v19  ;;  %v265_v31 = vld [vmem:[#allocation7 + $0x120] sm:$0xff]  ;;  %v266_v33 = vld [vmem:[#allocation7 + $0x128] sm:$0xff] }
  0xa2   :  { %2988 = vmatprep.subr.bf16.mxu0 %v6957_v20  ;;  %3152 = vmatprep.subr.bf16.mxu1 %v6959_v21  ;;  %v6973_v36 = vcombine.high %v261_v30, %v265_v31  ;;  %v6975_v37 = vcombine.high %v262_v32, %v266_v33  ;;  %v269_v38 = vld [vmem:[#allocation7 + $0x140] sm:$0xff]  ;;  %v270_v40 = vld [vmem:[#allocation7 + $0x148] sm:$0xff]  ;;  %v6972_v42 = vcombine.low %v261_v30, %v265_v31 }
  0xa3   :  { %v273_v39 = vld [vmem:[#allocation7 + $0x160] sm:$0xff]  ;;  %v274_v41 = vld [vmem:[#allocation7 + $0x168] sm:$0xff]  ;;  %v6974_v43 = vcombine.low %v262_v32, %v266_v33 }
  0xa4   :  { %v6981_v44 = vcombine.high %v269_v38, %v273_v39  ;;  %v6983_v45 = vcombine.high %v270_v40, %v274_v41  ;;  %v277_v46 = vld [vmem:[#allocation7 + $0x180] sm:$0xff]  ;;  %v278_v48 = vld [vmem:[#allocation7 + $0x188] sm:$0xff]  ;;  %v6980_v50 = vcombine.low %v269_v38, %v273_v39  ;;  %v6982_v51 = vcombine.low %v270_v40, %v274_v41 }
  0xa5   :  { %2989 = vmatpush1.bf16.msra.mxu0 %v6956_v26  ;;  %3153 = vmatpush1.bf16.msra.mxu1 %v6958_v27  ;;  %v281_v47 = vld [vmem:[#allocation7 + $0x1a0] sm:$0xff]  ;;  %v282_v49 = vld [vmem:[#allocation7 + $0x1a8] sm:$0xff] }
  0xa6   :  { %2990 = vmatprep.subr.bf16.mxu0 %v6965_v28  ;;  %3154 = vmatprep.subr.bf16.mxu1 %v6967_v29  ;;  %v6989_v52 = vcombine.high %v277_v46, %v281_v47  ;;  %v8072_v53 = vld [vmem:[%s8372_s0] sm:$0xff]  ;;  %v6991_v54 = vcombine.high %v278_v48, %v282_v49  ;;  %v286_v58 = vld [vmem:[#allocation7 + $0x1c8] sm:$0xff]  ;;  %v6988_v60 = vcombine.low %v277_v46, %v281_v47 }
  0xa7   :  { %v285_v55 = vld [vmem:[#allocation7 + $0x1c0] sm:$0xff]  ;;  %v8076_v57 = vcombine.high %v8072_v53, %v8072_v53  ;;  %v290_v59 = vld [vmem:[#allocation7 + $0x1e8] sm:$0xff]  ;;  %v6990_v61 = vcombine.low %v278_v48, %v282_v49 }
  0xa8   :  { %v289_v56 = vld [vmem:[#allocation7 + $0x1e0] sm:$0xff]  ;;  %v6999_v63 = vcombine.high %v286_v58, %v290_v59  ;;  %v294_v2 = vld [vmem:[#allocation7 + $0x208] sm:$0xff]  ;;  %v6998_v5 = vcombine.low %v286_v58, %v290_v59 }
  0xa9   :  { %2991 = vmatpush1.bf16.msra.mxu0 %v6964_v34  ;;  %3155 = vmatpush1.bf16.msra.mxu1 %v6966_v35  ;;  %v6997_v62 = vcombine.high %v285_v55, %v289_v56  ;;  %v293_v0 = vld [vmem:[#allocation7 + $0x200] sm:$0xff]  ;;  %v298_v3 = vld [vmem:[#allocation7 + $0x228] sm:$0xff]  ;;  %v6996_v4 = vcombine.low %v285_v55, %v289_v56 }
  0xaa   :  { %2992 = vmatprep.subr.bf16.mxu0 %v6973_v36  ;;  %3156 = vmatprep.subr.bf16.mxu1 %v6975_v37  ;;  %v297_v1 = vld [vmem:[#allocation7 + $0x220] sm:$0xff]  ;;  %v7007_v7 = vcombine.high %v294_v2, %v298_v3  ;;  %v302_v10 = vld [vmem:[#allocation7 + $0x248] sm:$0xff]  ;;  %v7006_v13 = vcombine.low %v294_v2, %v298_v3 }
  0xab   :  { %3016 = vmatprep.mubr.bf16.mxu0 %v8076_v57  ;;  %3180 = vmatprep.mubr.bf16.mxu1 %v8076_v57  ;;  %v7005_v6 = vcombine.high %v293_v0, %v297_v1  ;;  %v301_v8 = vld [vmem:[#allocation7 + $0x240] sm:$0xff]  ;;  %v306_v11 = vld [vmem:[#allocation7 + $0x268] sm:$0xff]  ;;  %v7004_v12 = vcombine.low %v293_v0, %v297_v1 }
  0xac   :  { %v305_v9 = vld [vmem:[#allocation7 + $0x260] sm:$0xff]  ;;  %v7015_v15 = vcombine.high %v302_v10, %v306_v11  ;;  %v310_v18 = vld [vmem:[#allocation7 + $0x288] sm:$0xff]  ;;  %v7014_v21 = vcombine.low %v302_v10, %v306_v11 }
  0xad   :  { %2993 = vmatpush1.bf16.msra.mxu0 %v6972_v42  ;;  %3157 = vmatpush1.bf16.msra.mxu1 %v6974_v43  ;;  %v7013_v14 = vcombine.high %v301_v8, %v305_v9  ;;  %v309_v16 = vld [vmem:[#allocation7 + $0x280] sm:$0xff]  ;;  %v314_v19 = vld [vmem:[#allocation7 + $0x2a8] sm:$0xff]  ;;  %v7012_v20 = vcombine.low %v301_v8, %v305_v9 }
  0xae   :  { %2994 = vmatprep.subr.bf16.mxu0 %v6981_v44  ;;  %3158 = vmatprep.subr.bf16.mxu1 %v6983_v45  ;;  %v313_v17 = vld [vmem:[#allocation7 + $0x2a0] sm:$0xff]  ;;  %v7023_v23 = vcombine.high %v310_v18, %v314_v19  ;;  %v318_v26 = vld [vmem:[#allocation7 + $0x2c8] sm:$0xff]  ;;  %v7022_v29 = vcombine.low %v310_v18, %v314_v19 }
  0xaf   :  { %v7021_v22 = vcombine.high %v309_v16, %v313_v17  ;;  %v317_v24 = vld [vmem:[#allocation7 + $0x2c0] sm:$0xff]  ;;  %v322_v27 = vld [vmem:[#allocation7 + $0x2e8] sm:$0xff]  ;;  %v7020_v28 = vcombine.low %v309_v16, %v313_v17 }
  0xb0   :  { %v321_v25 = vld [vmem:[#allocation7 + $0x2e0] sm:$0xff]  ;;  %v7031_v31 = vcombine.high %v318_v26, %v322_v27  ;;  %v326_v34 = vld [vmem:[#allocation7 + $0x308] sm:$0xff]  ;;  %v7030_v37 = vcombine.low %v318_v26, %v322_v27 }
  0xb1   :  { %2995 = vmatpush1.bf16.msra.mxu0 %v6980_v50  ;;  %3159 = vmatpush1.bf16.msra.mxu1 %v6982_v51  ;;  %v7029_v30 = vcombine.high %v317_v24, %v321_v25  ;;  %v325_v32 = vld [vmem:[#allocation7 + $0x300] sm:$0xff]  ;;  %v330_v35 = vld [vmem:[#allocation7 + $0x328] sm:$0xff]  ;;  %v7028_v36 = vcombine.low %v317_v24, %v321_v25 }
  0xb2   :  { %2996 = vmatprep.subr.bf16.mxu0 %v6989_v52  ;;  %3160 = vmatprep.subr.bf16.mxu1 %v6991_v54  ;;  %v329_v33 = vld [vmem:[#allocation7 + $0x320] sm:$0xff]  ;;  %v7039_v39 = vcombine.high %v326_v34, %v330_v35  ;;  %v334_v42 = vld [vmem:[#allocation7 + $0x348] sm:$0xff]  ;;  %v7038_v45 = vcombine.low %v326_v34, %v330_v35 }
  0xb3   :  { %v7037_v38 = vcombine.high %v325_v32, %v329_v33  ;;  %v333_v40 = vld [vmem:[#allocation7 + $0x340] sm:$0xff]  ;;  %v338_v43 = vld [vmem:[#allocation7 + $0x368] sm:$0xff]  ;;  %v7036_v44 = vcombine.low %v325_v32, %v329_v33 }
  0xb4   :  { %v337_v41 = vld [vmem:[#allocation7 + $0x360] sm:$0xff]  ;;  %v7047_v47 = vcombine.high %v334_v42, %v338_v43  ;;  %v342_v50 = vld [vmem:[#allocation7 + $0x388] sm:$0xff]  ;;  %v7046_v54 = vcombine.low %v334_v42, %v338_v43 }
  0xb5   :  { %2997 = vmatpush1.bf16.msra.mxu0 %v6988_v60  ;;  %3161 = vmatpush1.bf16.msra.mxu1 %v6990_v61  ;;  %v7045_v46 = vcombine.high %v333_v40, %v337_v41  ;;  %v341_v48 = vld [vmem:[#allocation7 + $0x380] sm:$0xff]  ;;  %v346_v51 = vld [vmem:[#allocation7 + $0x3a8] sm:$0xff]  ;;  %v7044_v52 = vcombine.low %v333_v40, %v337_v41 }
  0xb6   :  { %2998 = vmatprep.subr.bf16.mxu0 %v6997_v62  ;;  %3162 = vmatprep.subr.bf16.mxu1 %v6999_v63  ;;  %v345_v49 = vld [vmem:[#allocation7 + $0x3a0] sm:$0xff]  ;;  %v7055_v56 = vcombine.high %v342_v50, %v346_v51  ;;  %v350_v60 = vld [vmem:[#allocation7 + $0x3c8] sm:$0xff]  ;;  %v7054_v63 = vcombine.low %v342_v50, %v346_v51 }
  0xb7   :  { %v7053_v55 = vcombine.high %v341_v48, %v345_v49  ;;  %v349_v58 = vld [vmem:[#allocation7 + $0x3c0] sm:$0xff]  ;;  %v354_v61 = vld [vmem:[#allocation7 + $0x3e8] sm:$0xff]  ;;  %v7052_v62 = vcombine.low %v341_v48, %v345_v49 }
  0xb8   :  { %v353_v59 = vld [vmem:[#allocation7 + $0x3e0] sm:$0xff]  ;;  %v7063_v1 = vcombine.high %v350_v60, %v354_v61 }
  0xb9   :  { %2999 = vmatpush1.bf16.msra.mxu0 %v6996_v4  ;;  %3163 = vmatpush1.bf16.msra.mxu1 %v6998_v5  ;;  %v7061_v0 = vcombine.high %v349_v58, %v353_v59  ;;  %v357_v2 = vld [vmem:[#allocation7 + $0x400] sm:$0xff]  ;;  %v358_v4 = vld [vmem:[#allocation7 + $0x408] sm:$0xff] }
  0xba   :  { %3000 = vmatprep.subr.bf16.mxu0 %v7005_v6  ;;  %3164 = vmatprep.subr.bf16.mxu1 %v7007_v7  ;;  %v361_v3 = vld [vmem:[#allocation7 + $0x420] sm:$0xff]  ;;  %v362_v5 = vld [vmem:[#allocation7 + $0x428] sm:$0xff]  ;;  %v7060_v6 = vcombine.low %v349_v58, %v353_v59  ;;  %v7062_v7 = vcombine.low %v350_v60, %v354_v61 }
  0xbb   :  { %v7069_v8 = vcombine.high %v357_v2, %v361_v3  ;;  %v7071_v9 = vcombine.high %v358_v4, %v362_v5  ;;  %v365_v10 = vld [vmem:[#allocation7 + $0x440] sm:$0xff]  ;;  %v7068_v16 = vcombine.low %v357_v2, %v361_v3  ;;  %v7070_v17 = vcombine.low %v358_v4, %v362_v5 }
  0xbc   :  { %v369_v11 = vld [vmem:[#allocation7 + $0x460] sm:$0xff] }
  0xbd   :  { %3001 = vmatpush1.bf16.msra.mxu0 %v7004_v12  ;;  %3165 = vmatpush1.bf16.msra.mxu1 %v7006_v13  ;;  %v8082_v12 = vcombine.low %v8072_v53, %v8072_v53  ;;  %v366_v13 = vld [vmem:[#allocation7 + $0x448] sm:$0xff]  ;;  %v7077_v18 = vcombine.high %v365_v10, %v369_v11  ;;  %v7076_v24 = vcombine.low %v365_v10, %v369_v11 }
  0xbe   :  { %3002 = vmatprep.subr.bf16.mxu0 %v7013_v14  ;;  %3166 = vmatprep.subr.bf16.mxu1 %v7015_v15  ;;  %v370_v14 = vld [vmem:[#allocation7 + $0x468] sm:$0xff] }
  0xbf   :  { %v8087_v15 = vld [vmem:[%s8372_s0 + $0x8] sm:$0xff]  ;;  %v7079_v19 = vcombine.high %v366_v13, %v370_v14  ;;  %v7078_v25 = vcombine.low %v366_v13, %v370_v14 }
  0xc0   :  { %v8091_v53 = vcombine.high %v8087_v15, %v8087_v15 }
  0xc1   :  { %3003 = vmatpush1.bf16.msra.mxu0 %v7012_v20  ;;  %3167 = vmatpush1.bf16.msra.mxu1 %v7014_v21  ;;  %v373_v20 = vld [vmem:[#allocation7 + $0x480] sm:$0xff] }
  0xc2   :  { %3004 = vmatprep.subr.bf16.mxu0 %v7021_v22  ;;  %3168 = vmatprep.subr.bf16.mxu1 %v7023_v23  ;;  %v377_v21 = vld [vmem:[#allocation7 + $0x4a0] sm:$0xff]  ;;  %v374_v22 = vld [vmem:[#allocation7 + $0x488] sm:$0xff] }
  0xc3   :  { %v378_v23 = vld [vmem:[#allocation7 + $0x4a8] sm:$0xff]  ;;  %v7085_v26 = vcombine.high %v373_v20, %v377_v21  ;;  %v7084_v32 = vcombine.low %v373_v20, %v377_v21 }
  0xc4   :  { %v7087_v27 = vcombine.high %v374_v22, %v378_v23  ;;  %v7086_v33 = vcombine.low %v374_v22, %v378_v23 }
  0xc5   :  { %3005 = vmatpush1.bf16.msra.mxu0 %v7020_v28  ;;  %3169 = vmatpush1.bf16.msra.mxu1 %v7022_v29  ;;  %v381_v28 = vld [vmem:[#allocation7 + $0x4c0] sm:$0xff] }
  0xc6   :  { %3006 = vmatprep.subr.bf16.mxu0 %v7029_v30  ;;  %3170 = vmatprep.subr.bf16.mxu1 %v7031_v31  ;;  %v385_v29 = vld [vmem:[#allocation7 + $0x4e0] sm:$0xff]  ;;  %v382_v30 = vld [vmem:[#allocation7 + $0x4c8] sm:$0xff] }
  0xc7   :  { %v386_v31 = vld [vmem:[#allocation7 + $0x4e8] sm:$0xff]  ;;  %v7093_v34 = vcombine.high %v381_v28, %v385_v29  ;;  %v7092_v40 = vcombine.low %v381_v28, %v385_v29 }
  0xc8   :  { %v7095_v35 = vcombine.high %v382_v30, %v386_v31  ;;  %v7094_v41 = vcombine.low %v382_v30, %v386_v31 }
  0xc9   :  { %3007 = vmatpush1.bf16.msra.mxu0 %v7028_v36  ;;  %3171 = vmatpush1.bf16.msra.mxu1 %v7030_v37  ;;  %v389_v36 = vld [vmem:[#allocation7 + $0x500] sm:$0xff] }
  0xca   :  { %3008 = vmatprep.subr.bf16.mxu0 %v7037_v38  ;;  %3172 = vmatprep.subr.bf16.mxu1 %v7039_v39  ;;  %v393_v37 = vld [vmem:[#allocation7 + $0x520] sm:$0xff]  ;;  %v390_v38 = vld [vmem:[#allocation7 + $0x508] sm:$0xff] }
  0xcb   :  { %v394_v39 = vld [vmem:[#allocation7 + $0x528] sm:$0xff]  ;;  %v7101_v42 = vcombine.high %v389_v36, %v393_v37  ;;  %v7100_v48 = vcombine.low %v389_v36, %v393_v37 }
  0xcc   :  { %v7103_v43 = vcombine.high %v390_v38, %v394_v39  ;;  %v7102_v49 = vcombine.low %v390_v38, %v394_v39 }
  0xcd   :  { %3009 = vmatpush1.bf16.msra.mxu0 %v7036_v44  ;;  %3173 = vmatpush1.bf16.msra.mxu1 %v7038_v45  ;;  %v397_v44 = vld [vmem:[#allocation7 + $0x540] sm:$0xff] }
  0xce   :  { %3010 = vmatprep.subr.bf16.mxu0 %v7045_v46  ;;  %3174 = vmatprep.subr.bf16.mxu1 %v7047_v47  ;;  %v401_v45 = vld [vmem:[#allocation7 + $0x560] sm:$0xff]  ;;  %v398_v46 = vld [vmem:[#allocation7 + $0x548] sm:$0xff] }
  0xcf   :  { %v402_v47 = vld [vmem:[#allocation7 + $0x568] sm:$0xff]  ;;  %v7109_v50 = vcombine.high %v397_v44, %v401_v45  ;;  %v7108_v58 = vcombine.low %v397_v44, %v401_v45 }
  0xd0   :  { %v7111_v51 = vcombine.high %v398_v46, %v402_v47  ;;  %v7110_v59 = vcombine.low %v398_v46, %v402_v47 }
  0xd1   :  { %3011 = vmatpush1.bf16.msra.mxu0 %v7044_v52  ;;  %3175 = vmatpush1.bf16.msra.mxu1 %v7046_v54  ;;  %v405_v52 = vld [vmem:[#allocation7 + $0x580] sm:$0xff] }
  0xd2   :  { %3012 = vmatprep.subr.bf16.mxu0 %v7053_v55  ;;  %3176 = vmatprep.subr.bf16.mxu1 %v7055_v56  ;;  %v409_v54 = vld [vmem:[#allocation7 + $0x5a0] sm:$0xff]  ;;  %v406_v55 = vld [vmem:[#allocation7 + $0x588] sm:$0xff] }
  0xd3   :  { %v410_v56 = vld [vmem:[#allocation7 + $0x5a8] sm:$0xff]  ;;  %v7117_v60 = vcombine.high %v405_v52, %v409_v54  ;;  %v7116_v2 = vcombine.low %v405_v52, %v409_v54 }
  0xd4   :  { %v7119_v61 = vcombine.high %v406_v55, %v410_v56  ;;  %v7118_v3 = vcombine.low %v406_v55, %v410_v56 }
  0xd5   :  { %3013 = vmatpush1.bf16.msra.mxu0 %v7052_v62  ;;  %3177 = vmatpush1.bf16.msra.mxu1 %v7054_v63  ;;  %v413_v62 = vld [vmem:[#allocation7 + $0x5c0] sm:$0xff] }
  0xd6   :  { %3014 = vmatprep.subr.bf16.mxu0 %v7061_v0  ;;  %3178 = vmatprep.subr.bf16.mxu1 %v7063_v1  ;;  %v417_v63 = vld [vmem:[#allocation7 + $0x5e0] sm:$0xff]  ;;  %v414_v0 = vld [vmem:[#allocation7 + $0x5c8] sm:$0xff] }
  0xd7   :  { %v418_v1 = vld [vmem:[#allocation7 + $0x5e8] sm:$0xff]  ;;  %v7125_v4 = vcombine.high %v413_v62, %v417_v63  ;;  %v7124_v10 = vcombine.low %v413_v62, %v417_v63 }
  0xd8   :  { %v7127_v5 = vcombine.high %v414_v0, %v418_v1  ;;  %v7126_v11 = vcombine.low %v414_v0, %v418_v1 }
  0xd9   :  { %3015 = vmatpush1.bf16.msra.mxu0 %v7060_v6  ;;  %3179 = vmatpush1.bf16.msra.mxu1 %v7062_v7  ;;  %v421_v6 = vld [vmem:[#allocation7 + $0x600] sm:$0xff] }
  0xda   :  { %3025 = vmatprep.subr.bf16.mxu0 %v7069_v8  ;;  %3189 = vmatprep.subr.bf16.mxu1 %v7071_v9  ;;  %v425_v7 = vld [vmem:[#allocation7 + $0x620] sm:$0xff]  ;;  %v422_v8 = vld [vmem:[#allocation7 + $0x608] sm:$0xff] }
  0xdb   :  { %v426_v9 = vld [vmem:[#allocation7 + $0x628] sm:$0xff]  ;;  %v7133_v13 = vcombine.high %v421_v6, %v425_v7  ;;  %v7132_v20 = vcombine.low %v421_v6, %v425_v7 }
  0xdc   :  { %3017 = vmatmul.mubr.bf16.vlgmr.msra.gmra.mrb[0].mxu0 %v8082_v12  ;;  %3181 = vmatmul.mubr.bf16.vlgmr.msra.gmra.mrb[0].mxu1 %v8082_v12  ;;  %v7135_v14 = vcombine.high %v422_v8, %v426_v9  ;;  %v7134_v21 = vcombine.low %v422_v8, %v426_v9 }
  0xdd   :  { %3026 = vmatpush1.bf16.msra.mxu0 %v7068_v16  ;;  %3190 = vmatpush1.bf16.msra.mxu1 %v7070_v17  ;;  %v429_v16 = vld [vmem:[#allocation7 + $0x640] sm:$0xff] }
  0xde   :  { %3027 = vmatprep.subr.bf16.mxu0 %v7077_v18  ;;  %3191 = vmatprep.subr.bf16.mxu1 %v7079_v19  ;;  %v433_v17 = vld [vmem:[#allocation7 + $0x660] sm:$0xff]  ;;  %v430_v18 = vld [vmem:[#allocation7 + $0x648] sm:$0xff] }
  0xdf   :  { %3057 = vmatprep.mubr.bf16.mxu0 %v8091_v53  ;;  %3221 = vmatprep.mubr.bf16.mxu1 %v8091_v53  ;;  %v434_v19 = vld [vmem:[#allocation7 + $0x668] sm:$0xff]  ;;  %v7141_v22 = vcombine.high %v429_v16, %v433_v17  ;;  %v7140_v28 = vcombine.low %v429_v16, %v433_v17 }
  0xe0   :  { %v7143_v23 = vcombine.high %v430_v18, %v434_v19  ;;  %v7142_v29 = vcombine.low %v430_v18, %v434_v19 }
  0xe1   :  { %3028 = vmatpush1.bf16.msra.mxu0 %v7076_v24  ;;  %3192 = vmatpush1.bf16.msra.mxu1 %v7078_v25  ;;  %v437_v24 = vld [vmem:[#allocation7 + $0x680] sm:$0xff] }
  0xe2   :  { %3029 = vmatprep.subr.bf16.mxu0 %v7085_v26  ;;  %3193 = vmatprep.subr.bf16.mxu1 %v7087_v27  ;;  %v441_v25 = vld [vmem:[#allocation7 + $0x6a0] sm:$0xff]  ;;  %v438_v26 = vld [vmem:[#allocation7 + $0x688] sm:$0xff] }
  0xe3   :  { %v442_v27 = vld [vmem:[#allocation7 + $0x6a8] sm:$0xff]  ;;  %v7149_v30 = vcombine.high %v437_v24, %v441_v25  ;;  %v7148_v36 = vcombine.low %v437_v24, %v441_v25  ;;  %v8104_v25 = vld [vmem:[%s8372_s0 + $0x10] sm:$0xff] }
  0xe4   :  { %v7151_v31 = vcombine.high %v438_v26, %v442_v27  ;;  %v7150_v37 = vcombine.low %v438_v26, %v442_v27  ;;  %v498_v24 = vld [vmem:[#allocation7 + $0x868] sm:$0xff] }
  0xe5   :  { %3030 = vmatpush1.bf16.msra.mxu0 %v7084_v32  ;;  %3194 = vmatpush1.bf16.msra.mxu1 %v7086_v33  ;;  %v445_v32 = vld [vmem:[#allocation7 + $0x6c0] sm:$0xff] }
  0xe6   :  { %3031 = vmatprep.subr.bf16.mxu0 %v7093_v34  ;;  %3195 = vmatprep.subr.bf16.mxu1 %v7095_v35  ;;  %v449_v33 = vld [vmem:[#allocation7 + $0x6e0] sm:$0xff]  ;;  %v446_v34 = vld [vmem:[#allocation7 + $0x6c8] sm:$0xff] }
  0xe7   :  { %v450_v35 = vld [vmem:[#allocation7 + $0x6e8] sm:$0xff]  ;;  %v7157_v38 = vcombine.high %v445_v32, %v449_v33  ;;  %v7156_v44 = vcombine.low %v445_v32, %v449_v33 }
  0xe8   :  { %v7159_v39 = vcombine.high %v446_v34, %v450_v35  ;;  %v7158_v45 = vcombine.low %v446_v34, %v450_v35  ;;  %v502_v32 = vld [vmem:[#allocation7 + $0x888] sm:$0xff] }
  0xe9   :  { %3032 = vmatpush1.bf16.msra.mxu0 %v7092_v40  ;;  %3196 = vmatpush1.bf16.msra.mxu1 %v7094_v41  ;;  %v453_v40 = vld [vmem:[#allocation7 + $0x700] sm:$0xff]  ;;  %v506_v33 = vld [vmem:[#allocation7 + $0x8a8] sm:$0xff] }
  0xea   :  { %3033 = vmatprep.subr.bf16.mxu0 %v7101_v42  ;;  %3197 = vmatprep.subr.bf16.mxu1 %v7103_v43  ;;  %v457_v41 = vld [vmem:[#allocation7 + $0x720] sm:$0xff]  ;;  %v454_v42 = vld [vmem:[#allocation7 + $0x708] sm:$0xff] }
  0xeb   :  { %v458_v43 = vld [vmem:[#allocation7 + $0x728] sm:$0xff]  ;;  %v7165_v46 = vcombine.high %v453_v40, %v457_v41  ;;  %v7164_v52 = vcombine.low %v453_v40, %v457_v41 }
  0xec   :  { %v7167_v47 = vcombine.high %v454_v42, %v458_v43  ;;  %v7166_v54 = vcombine.low %v454_v42, %v458_v43  ;;  %v510_v40 = vld [vmem:[#allocation7 + $0x8c8] sm:$0xff]  ;;  %v7214_v43 = vcombine.low %v502_v32, %v506_v33 }
  0xed   :  { %3034 = vmatpush1.bf16.msra.mxu0 %v7100_v48  ;;  %3198 = vmatpush1.bf16.msra.mxu1 %v7102_v49  ;;  %v461_v48 = vld [vmem:[#allocation7 + $0x740] sm:$0xff]  ;;  %v514_v41 = vld [vmem:[#allocation7 + $0x8e8] sm:$0xff] }
  0xee   :  { %3035 = vmatprep.subr.bf16.mxu0 %v7109_v50  ;;  %3199 = vmatprep.subr.bf16.mxu1 %v7111_v51  ;;  %v465_v49 = vld [vmem:[#allocation7 + $0x760] sm:$0xff]  ;;  %v462_v50 = vld [vmem:[#allocation7 + $0x748] sm:$0xff] }
  0xef   :  { %v466_v51 = vld [vmem:[#allocation7 + $0x768] sm:$0xff]  ;;  %v7173_v55 = vcombine.high %v461_v48, %v465_v49  ;;  %v7172_v62 = vcombine.low %v461_v48, %v465_v49 }
  0xf0   :  { %v7175_v56 = vcombine.high %v462_v50, %v466_v51  ;;  %v7174_v63 = vcombine.low %v462_v50, %v466_v51  ;;  %v518_v48 = vld [vmem:[#allocation7 + $0x908] sm:$0xff]  ;;  %v7222_v51 = vcombine.low %v510_v40, %v514_v41 }
  0xf1   :  { %3036 = vmatpush1.bf16.msra.mxu0 %v7108_v58  ;;  %3200 = vmatpush1.bf16.msra.mxu1 %v7110_v59  ;;  %v469_v58 = vld [vmem:[#allocation7 + $0x780] sm:$0xff]  ;;  %v522_v49 = vld [vmem:[#allocation7 + $0x928] sm:$0xff] }
  0xf2   :  { %3037 = vmatprep.subr.bf16.mxu0 %v7117_v60  ;;  %3201 = vmatprep.subr.bf16.mxu1 %v7119_v61  ;;  %v473_v59 = vld [vmem:[#allocation7 + $0x7a0] sm:$0xff]  ;;  %v470_v60 = vld [vmem:[#allocation7 + $0x788] sm:$0xff] }
  0xf3   :  { %v474_v61 = vld [vmem:[#allocation7 + $0x7a8] sm:$0xff]  ;;  %v7181_v0 = vcombine.high %v469_v58, %v473_v59  ;;  %v7180_v6 = vcombine.low %v469_v58, %v473_v59 }
  0xf4   :  { %v7183_v1 = vcombine.high %v470_v60, %v474_v61  ;;  %v7182_v7 = vcombine.low %v470_v60, %v474_v61  ;;  %v526_v58 = vld [vmem:[#allocation7 + $0x948] sm:$0xff]  ;;  %v7230_v61 = vcombine.low %v518_v48, %v522_v49 }
  0xf5   :  { %3038 = vmatpush1.bf16.msra.mxu0 %v7116_v2  ;;  %3202 = vmatpush1.bf16.msra.mxu1 %v7118_v3  ;;  %v477_v2 = vld [vmem:[#allocation7 + $0x7c0] sm:$0xff]  ;;  %v530_v59 = vld [vmem:[#allocation7 + $0x968] sm:$0xff] }
  0xf6   :  { %3039 = vmatprep.subr.bf16.mxu0 %v7125_v4  ;;  %3203 = vmatprep.subr.bf16.mxu1 %v7127_v5  ;;  %v481_v3 = vld [vmem:[#allocation7 + $0x7e0] sm:$0xff]  ;;  %v478_v4 = vld [vmem:[#allocation7 + $0x7c8] sm:$0xff] }
  0xf7   :  { %v482_v5 = vld [vmem:[#allocation7 + $0x7e8] sm:$0xff]  ;;  %v7189_v8 = vcombine.high %v477_v2, %v481_v3  ;;  %v7188_v16 = vcombine.low %v477_v2, %v481_v3 }
  0xf8   :  { %v7191_v9 = vcombine.high %v478_v4, %v482_v5  ;;  %v7190_v17 = vcombine.low %v478_v4, %v482_v5  ;;  %v534_v2 = vld [vmem:[#allocation7 + $0x988] sm:$0xff]  ;;  %v7238_v5 = vcombine.low %v526_v58, %v530_v59 }
  0xf9   :  { %3040 = vmatpush1.bf16.msra.mxu0 %v7124_v10  ;;  %3204 = vmatpush1.bf16.msra.mxu1 %v7126_v11  ;;  %v485_v10 = vld [vmem:[#allocation7 + $0x800] sm:$0xff]  ;;  %v538_v3 = vld [vmem:[#allocation7 + $0x9a8] sm:$0xff] }
  0xfa   :  { %3041 = vmatprep.subr.bf16.mxu0 %v7133_v13  ;;  %3205 = vmatprep.subr.bf16.mxu1 %v7135_v14  ;;  %v489_v11 = vld [vmem:[#allocation7 + $0x820] sm:$0xff]  ;;  %v486_v13 = vld [vmem:[#allocation7 + $0x808] sm:$0xff] }
  0xfb   :  { %v490_v14 = vld [vmem:[#allocation7 + $0x828] sm:$0xff]  ;;  %v7197_v18 = vcombine.high %v485_v10, %v489_v11  ;;  %v7196_v26 = vcombine.low %v485_v10, %v489_v11 }
  0xfc   :  { %v7199_v19 = vcombine.high %v486_v13, %v490_v14  ;;  %v7198_v27 = vcombine.low %v486_v13, %v490_v14  ;;  %v542_v10 = vld [vmem:[#allocation7 + $0x9c8] sm:$0xff]  ;;  %v7246_v14 = vcombine.low %v534_v2, %v538_v3 }
  0xfd   :  { %3042 = vmatpush1.bf16.msra.mxu0 %v7132_v20  ;;  %3206 = vmatpush1.bf16.msra.mxu1 %v7134_v21  ;;  %v493_v20 = vld [vmem:[#allocation7 + $0x840] sm:$0xff]  ;;  %v546_v11 = vld [vmem:[#allocation7 + $0x9e8] sm:$0xff] }
  0xfe   :  { %3043 = vmatprep.subr.bf16.mxu0 %v7141_v22  ;;  %3207 = vmatprep.subr.bf16.mxu1 %v7143_v23  ;;  %v497_v21 = vld [vmem:[#allocation7 + $0x860] sm:$0xff]  ;;  %v8099_v22 = vcombine.low %v8087_v15, %v8087_v15  ;;  %v494_v23 = vld [vmem:[#allocation7 + $0x848] sm:$0xff]  ;;  %v8108_v15 = vcombine.high %v8104_v25, %v8104_v25 }
  0xff   :  { %v7204_v34 = vcombine.low %v493_v20, %v497_v21  ;;  %v7206_v35 = vcombine.low %v494_v23, %v498_v24 }
 0x101   :  { %3044 = vmatpush1.bf16.msra.mxu0 %v7140_v28  ;;  %3208 = vmatpush1.bf16.msra.mxu1 %v7142_v29  ;;  %v7205_v28 = vcombine.high %v493_v20, %v497_v21  ;;  %v7207_v29 = vcombine.high %v494_v23, %v498_v24  ;;  %v550_v20 = vld [vmem:[#allocation7 + $0xa08] sm:$0xff]  ;;  %v7254_v24 = vcombine.low %v542_v10, %v546_v11 }
 0x102   :  { %3045 = vmatprep.subr.bf16.mxu0 %v7149_v30  ;;  %3209 = vmatprep.subr.bf16.mxu1 %v7151_v31  ;;  %v501_v30 = vld [vmem:[#allocation7 + $0x880] sm:$0xff]  ;;  %v554_v21 = vld [vmem:[#allocation7 + $0xa28] sm:$0xff] }
 0x103   :  { %v505_v31 = vld [vmem:[#allocation7 + $0x8a0] sm:$0xff] }
 0x104   :  { %v7212_v42 = vcombine.low %v501_v30, %v505_v31 }
 0x105   :  { %3046 = vmatpush1.bf16.msra.mxu0 %v7148_v36  ;;  %3210 = vmatpush1.bf16.msra.mxu1 %v7150_v37  ;;  %v7213_v36 = vcombine.high %v501_v30, %v505_v31  ;;  %v7215_v37 = vcombine.high %v502_v32, %v506_v33  ;;  %v558_v30 = vld [vmem:[#allocation7 + $0xa48] sm:$0xff]  ;;  %v7262_v33 = vcombine.low %v550_v20, %v554_v21 }
 0x106   :  { %3047 = vmatprep.subr.bf16.mxu0 %v7157_v38  ;;  %3211 = vmatprep.subr.bf16.mxu1 %v7159_v39  ;;  %v509_v38 = vld [vmem:[#allocation7 + $0x8c0] sm:$0xff]  ;;  %v562_v31 = vld [vmem:[#allocation7 + $0xa68] sm:$0xff] }
 0x107   :  { %v513_v39 = vld [vmem:[#allocation7 + $0x8e0] sm:$0xff] }
 0x108   :  { %v7220_v50 = vcombine.low %v509_v38, %v513_v39 }
 0x109   :  { %3048 = vmatpush1.bf16.msra.mxu0 %v7156_v44  ;;  %3212 = vmatpush1.bf16.msra.mxu1 %v7158_v45  ;;  %v7221_v44 = vcombine.high %v509_v38, %v513_v39  ;;  %v7223_v45 = vcombine.high %v510_v40, %v514_v41  ;;  %v566_v38 = vld [vmem:[#allocation7 + $0xa88] sm:$0xff]  ;;  %v7270_v41 = vcombine.low %v558_v30, %v562_v31 }
 0x10a   :  { %3049 = vmatprep.subr.bf16.mxu0 %v7165_v46  ;;  %3213 = vmatprep.subr.bf16.mxu1 %v7167_v47  ;;  %v517_v46 = vld [vmem:[#allocation7 + $0x900] sm:$0xff]  ;;  %v570_v39 = vld [vmem:[#allocation7 + $0xaa8] sm:$0xff] }
 0x10b   :  { %v521_v47 = vld [vmem:[#allocation7 + $0x920] sm:$0xff] }
 0x10c   :  { %v7228_v60 = vcombine.low %v517_v46, %v521_v47 }
 0x10d   :  { %3050 = vmatpush1.bf16.msra.mxu0 %v7164_v52  ;;  %3214 = vmatpush1.bf16.msra.mxu1 %v7166_v54  ;;  %v7229_v52 = vcombine.high %v517_v46, %v521_v47  ;;  %v7231_v54 = vcombine.high %v518_v48, %v522_v49  ;;  %v574_v46 = vld [vmem:[#allocation7 + $0xac8] sm:$0xff]  ;;  %v7278_v49 = vcombine.low %v566_v38, %v570_v39 }
 0x10e   :  { %3051 = vmatprep.subr.bf16.mxu0 %v7173_v55  ;;  %3215 = vmatprep.subr.bf16.mxu1 %v7175_v56  ;;  %v525_v55 = vld [vmem:[#allocation7 + $0x940] sm:$0xff]  ;;  %v578_v47 = vld [vmem:[#allocation7 + $0xae8] sm:$0xff] }
 0x10f   :  { %v529_v56 = vld [vmem:[#allocation7 + $0x960] sm:$0xff] }
 0x110   :  { %v7236_v4 = vcombine.low %v525_v55, %v529_v56 }
 0x111   :  { %3052 = vmatpush1.bf16.msra.mxu0 %v7172_v62  ;;  %3216 = vmatpush1.bf16.msra.mxu1 %v7174_v63  ;;  %v7237_v62 = vcombine.high %v525_v55, %v529_v56  ;;  %v7239_v63 = vcombine.high %v526_v58, %v530_v59  ;;  %v582_v55 = vld [vmem:[#allocation7 + $0xb08] sm:$0xff]  ;;  %v7286_v59 = vcombine.low %v574_v46, %v578_v47 }
 0x112   :  { %3053 = vmatprep.subr.bf16.mxu0 %v7181_v0  ;;  %3217 = vmatprep.subr.bf16.mxu1 %v7183_v1  ;;  %v533_v0 = vld [vmem:[#allocation7 + $0x980] sm:$0xff]  ;;  %v586_v56 = vld [vmem:[#allocation7 + $0xb28] sm:$0xff] }
 0x113   :  { %v537_v1 = vld [vmem:[#allocation7 + $0x9a0] sm:$0xff] }
 0x114   :  { %v7244_v13 = vcombine.low %v533_v0, %v537_v1 }
 0x115   :  { %3054 = vmatpush1.bf16.msra.mxu0 %v7180_v6  ;;  %3218 = vmatpush1.bf16.msra.mxu1 %v7182_v7  ;;  %v7245_v6 = vcombine.high %v533_v0, %v537_v1  ;;  %v7247_v7 = vcombine.high %v534_v2, %v538_v3  ;;  %v590_v0 = vld [vmem:[#allocation7 + $0xb48] sm:$0xff]  ;;  %v7294_v3 = vcombine.low %v582_v55, %v586_v56 }
 0x116   :  { %3055 = vmatprep.subr.bf16.mxu0 %v7189_v8  ;;  %3219 = vmatprep.subr.bf16.mxu1 %v7191_v9  ;;  %v541_v8 = vld [vmem:[#allocation7 + $0x9c0] sm:$0xff]  ;;  %v594_v1 = vld [vmem:[#allocation7 + $0xb68] sm:$0xff] }
 0x117   :  { %v545_v9 = vld [vmem:[#allocation7 + $0x9e0] sm:$0xff] }
 0x118   :  { %v7252_v23 = vcombine.low %v541_v8, %v545_v9 }
 0x119   :  { %3056 = vmatpush1.bf16.msra.mxu0 %v7188_v16  ;;  %3220 = vmatpush1.bf16.msra.mxu1 %v7190_v17  ;;  %v7253_v16 = vcombine.high %v541_v8, %v545_v9  ;;  %v7255_v17 = vcombine.high %v542_v10, %v546_v11  ;;  %v598_v8 = vld [vmem:[#allocation7 + $0xb88] sm:$0xff]  ;;  %v7302_v11 = vcombine.low %v590_v0, %v594_v1 }
 0x11a   :  { %3066 = vmatprep.subr.bf16.mxu0 %v7197_v18  ;;  %3230 = vmatprep.subr.bf16.mxu1 %v7199_v19  ;;  %v549_v18 = vld [vmem:[#allocation7 + $0xa00] sm:$0xff]  ;;  %v602_v9 = vld [vmem:[#allocation7 + $0xba8] sm:$0xff] }
 0x11b   :  { %v553_v19 = vld [vmem:[#allocation7 + $0xa20] sm:$0xff] }
 0x11c   :  { %3058 = vmatmul.mubr.bf16.vlgmr.msra.gmra.mrb[0].mxu0 %v8099_v22  ;;  %3222 = vmatmul.mubr.bf16.vlgmr.msra.gmra.mrb[0].mxu1 %v8099_v22  ;;  %v7260_v32 = vcombine.low %v549_v18, %v553_v19 }
 0x11d   :  { %3067 = vmatpush1.bf16.msra.mxu0 %v7196_v26  ;;  %3231 = vmatpush1.bf16.msra.mxu1 %v7198_v27  ;;  %v7261_v26 = vcombine.high %v549_v18, %v553_v19  ;;  %v7263_v27 = vcombine.high %v550_v20, %v554_v21  ;;  %v606_v18 = vld [vmem:[#allocation7 + $0xbc8] sm:$0xff]  ;;  %v7310_v21 = vcombine.low %v598_v8, %v602_v9 }
 0x11e   :  { %3068 = vmatprep.subr.bf16.mxu0 %v7205_v28  ;;  %3232 = vmatprep.subr.bf16.mxu1 %v7207_v29  ;;  %v557_v28 = vld [vmem:[#allocation7 + $0xa40] sm:$0xff]  ;;  %v610_v19 = vld [vmem:[#allocation7 + $0xbe8] sm:$0xff] }
 0x11f   :  { %3098 = vmatprep.mubr.bf16.mxu0 %v8108_v15  ;;  %3262 = vmatprep.mubr.bf16.mxu1 %v8108_v15  ;;  %v561_v29 = vld [vmem:[#allocation7 + $0xa60] sm:$0xff] }
 0x120   :  { %v7268_v40 = vcombine.low %v557_v28, %v561_v29 }
 0x121   :  { %3069 = vmatpush1.bf16.msra.mxu0 %v7204_v34  ;;  %3233 = vmatpush1.bf16.msra.mxu1 %v7206_v35  ;;  %v7269_v34 = vcombine.high %v557_v28, %v561_v29  ;;  %v7271_v35 = vcombine.high %v558_v30, %v562_v31  ;;  %v614_v28 = vld [vmem:[#allocation7 + $0xc08] sm:$0xff]  ;;  %v7318_v31 = vcombine.low %v606_v18, %v610_v19 }
 0x122   :  { %3070 = vmatprep.subr.bf16.mxu0 %v7213_v36  ;;  %3234 = vmatprep.subr.bf16.mxu1 %v7215_v37  ;;  %v565_v36 = vld [vmem:[#allocation7 + $0xa80] sm:$0xff]  ;;  %v618_v29 = vld [vmem:[#allocation7 + $0xc28] sm:$0xff] }
 0x123   :  { %v569_v37 = vld [vmem:[#allocation7 + $0xaa0] sm:$0xff] }
 0x124   :  { %v7276_v48 = vcombine.low %v565_v36, %v569_v37 }
 0x125   :  { %3071 = vmatpush1.bf16.msra.mxu0 %v7212_v42  ;;  %3235 = vmatpush1.bf16.msra.mxu1 %v7214_v43  ;;  %v7277_v42 = vcombine.high %v565_v36, %v569_v37  ;;  %v7279_v43 = vcombine.high %v566_v38, %v570_v39  ;;  %v8116_v36 = vcombine.low %v8104_v25, %v8104_v25  ;;  %v622_v37 = vld [vmem:[#allocation7 + $0xc48] sm:$0xff] }
 0x126   :  { %3072 = vmatprep.subr.bf16.mxu0 %v7221_v44  ;;  %3236 = vmatprep.subr.bf16.mxu1 %v7223_v45  ;;  %v573_v44 = vld [vmem:[#allocation7 + $0xac0] sm:$0xff]  ;;  %v626_v38 = vld [vmem:[#allocation7 + $0xc68] sm:$0xff] }
 0x127   :  { %v577_v45 = vld [vmem:[#allocation7 + $0xae0] sm:$0xff] }
 0x128   :  { %v7284_v58 = vcombine.low %v573_v44, %v577_v45 }
 0x129   :  { %3073 = vmatpush1.bf16.msra.mxu0 %v7220_v50  ;;  %3237 = vmatpush1.bf16.msra.mxu1 %v7222_v51  ;;  %v7285_v50 = vcombine.high %v573_v44, %v577_v45  ;;  %v7287_v51 = vcombine.high %v574_v46, %v578_v47  ;;  %v633_v44 = vld [vmem:[#allocation7 + $0xca0] sm:$0xff]  ;;  %v630_v45 = vld [vmem:[#allocation7 + $0xc88] sm:$0xff]  ;;  %v7334_v47 = vcombine.low %v622_v37, %v626_v38 }
 0x12a   :  { %3074 = vmatprep.subr.bf16.mxu0 %v7229_v52  ;;  %3238 = vmatprep.subr.bf16.mxu1 %v7231_v54  ;;  %v581_v52 = vld [vmem:[#allocation7 + $0xb00] sm:$0xff]  ;;  %v634_v46 = vld [vmem:[#allocation7 + $0xca8] sm:$0xff] }
 0x12b   :  { %v585_v54 = vld [vmem:[#allocation7 + $0xb20] sm:$0xff] }
 0x12c   :  { %v7292_v2 = vcombine.low %v581_v52, %v585_v54 }
 0x12d   :  { %3075 = vmatpush1.bf16.msra.mxu0 %v7228_v60  ;;  %3239 = vmatpush1.bf16.msra.mxu1 %v7230_v61  ;;  %v7293_v60 = vcombine.high %v581_v52, %v585_v54  ;;  %v7295_v61 = vcombine.high %v582_v55, %v586_v56  ;;  %v7893_v52 = vmov 0   ;;  %v638_v54 = vld [vmem:[#allocation7 + $0xcc8] sm:$0xff] }
 0x12e   :  { %3076 = vmatprep.subr.bf16.mxu0 %v7237_v62  ;;  %3240 = vmatprep.subr.bf16.mxu1 %v7239_v63  ;;  %v589_v62 = vld [vmem:[#allocation7 + $0xb40] sm:$0xff]  ;;  %v642_v55 = vld [vmem:[#allocation7 + $0xce8] sm:$0xff] }
 0x12f   :  { %v593_v63 = vld [vmem:[#allocation7 + $0xb60] sm:$0xff] }
 0x130   :  { %v7300_v10 = vcombine.low %v589_v62, %v593_v63 }
 0x131   :  { %3077 = vmatpush1.bf16.msra.mxu0 %v7236_v4  ;;  %3241 = vmatpush1.bf16.msra.mxu1 %v7238_v5  ;;  %v7301_v4 = vcombine.high %v589_v62, %v593_v63  ;;  %v7303_v5 = vcombine.high %v590_v0, %v594_v1  ;;  %v649_v62 = vld [vmem:[#allocation7 + $0xd20] sm:$0xff]  ;;  %v646_v63 = vld [vmem:[#allocation7 + $0xd08] sm:$0xff] }
 0x132   :  { %3078 = vmatprep.subr.bf16.mxu0 %v7245_v6  ;;  %3242 = vmatprep.subr.bf16.mxu1 %v7247_v7  ;;  %v597_v6 = vld [vmem:[#allocation7 + $0xb80] sm:$0xff]  ;;  %v650_v0 = vld [vmem:[#allocation7 + $0xd28] sm:$0xff] }
 0x133   :  { %v601_v7 = vld [vmem:[#allocation7 + $0xba0] sm:$0xff] }
 0x134   :  { %v7308_v20 = vcombine.low %v597_v6, %v601_v7 }
 0x135   :  { %3079 = vmatpush1.bf16.msra.mxu0 %v7244_v13  ;;  %3243 = vmatpush1.bf16.msra.mxu1 %v7246_v14  ;;  %v7309_v13 = vcombine.high %v597_v6, %v601_v7  ;;  %v7311_v14 = vcombine.high %v598_v8, %v602_v9  ;;  %v657_v6 = vld [vmem:[#allocation7 + $0xd60] sm:$0xff]  ;;  %v654_v7 = vld [vmem:[#allocation7 + $0xd48] sm:$0xff] }
 0x136   :  { %3080 = vmatprep.subr.bf16.mxu0 %v7253_v16  ;;  %3244 = vmatprep.subr.bf16.mxu1 %v7255_v17  ;;  %v605_v16 = vld [vmem:[#allocation7 + $0xbc0] sm:$0xff]  ;;  %v658_v8 = vld [vmem:[#allocation7 + $0xd68] sm:$0xff] }
 0x137   :  { %v609_v17 = vld [vmem:[#allocation7 + $0xbe0] sm:$0xff] }
 0x138   :  { %v7316_v30 = vcombine.low %v605_v16, %v609_v17 }
 0x139   :  { %3081 = vmatpush1.bf16.msra.mxu0 %v7252_v23  ;;  %3245 = vmatpush1.bf16.msra.mxu1 %v7254_v24  ;;  %v7317_v23 = vcombine.high %v605_v16, %v609_v17  ;;  %v7319_v24 = vcombine.high %v606_v18, %v610_v19  ;;  %v665_v16 = vld [vmem:[#allocation7 + $0xda0] sm:$0xff]  ;;  %v662_v17 = vld [vmem:[#allocation7 + $0xd88] sm:$0xff] }
 0x13a   :  { %3082 = vmatprep.subr.bf16.mxu0 %v7261_v26  ;;  %3246 = vmatprep.subr.bf16.mxu1 %v7263_v27  ;;  %v613_v26 = vld [vmem:[#allocation7 + $0xc00] sm:$0xff]  ;;  %v666_v18 = vld [vmem:[#allocation7 + $0xda8] sm:$0xff] }
 0x13b   :  { %v617_v27 = vld [vmem:[#allocation7 + $0xc20] sm:$0xff] }
 0x13c   :  { %v7324_v39 = vcombine.low %v613_v26, %v617_v27 }
 0x13d   :  { %3083 = vmatpush1.bf16.msra.mxu0 %v7260_v32  ;;  %3247 = vmatpush1.bf16.msra.mxu1 %v7262_v33  ;;  %v7325_v32 = vcombine.high %v613_v26, %v617_v27  ;;  %v7327_v33 = vcombine.high %v614_v28, %v618_v29  ;;  %v673_v26 = vld [vmem:[#allocation7 + $0xde0] sm:$0xff]  ;;  %v670_v27 = vld [vmem:[#allocation7 + $0xdc8] sm:$0xff] }
 0x13e   :  { %3084 = vmatprep.subr.bf16.mxu0 %v7269_v34  ;;  %3248 = vmatprep.subr.bf16.mxu1 %v7271_v35  ;;  %v621_v34 = vld [vmem:[#allocation7 + $0xc40] sm:$0xff] }
 0x13f   :  { %v625_v35 = vld [vmem:[#allocation7 + $0xc60] sm:$0xff] }
 0x140   :  { %v7332_v25 = vcombine.low %v621_v34, %v625_v35 }
 0x141   :  { %3085 = vmatpush1.bf16.msra.mxu0 %v7268_v40  ;;  %3249 = vmatpush1.bf16.msra.mxu1 %v7270_v41  ;;  %v7326_v40 = vcombine.low %v614_v28, %v618_v29  ;;  %v7333_v41 = vcombine.high %v621_v34, %v625_v35  ;;  %v674_v28 = vld [vmem:[#allocation7 + $0xde8] sm:$0xff]  ;;  %v235_v34 = vld [vmem:[#allocation7 + $0x30] sm:$0xff]  ;;  %v232_v35 = vld [vmem:[#allocation7 + $0x18] sm:$0xff] }
 0x142   :  { %3086 = vmatprep.subr.bf16.mxu0 %v7277_v42  ;;  %3250 = vmatprep.subr.bf16.mxu1 %v7279_v43  ;;  %v7335_v42 = vcombine.high %v622_v37, %v626_v38  ;;  %v629_v43 = vld [vmem:[#allocation7 + $0xc80] sm:$0xff]  ;;  %v236_v37 = vld [vmem:[#allocation7 + $0x38] sm:$0xff] }
 0x143   :  { %v7340_v56 = vcombine.low %v629_v43, %v633_v44 }
 0x145   :  { %3087 = vmatpush1.bf16.msra.mxu0 %v7276_v48  ;;  %3251 = vmatpush1.bf16.msra.mxu1 %v7278_v49  ;;  %v7341_v48 = vcombine.high %v629_v43, %v633_v44  ;;  %v7343_v49 = vcombine.high %v630_v45, %v634_v46  ;;  %v243_v43 = vld [vmem:[#allocation7 + $0x70] sm:$0xff]  ;;  %v7667_v44 = vld [vmem:[%s8372_s0 + $0x18] ss:$0 sps:$4 sm:$0xff]  }
 0x146   :  { %3088 = vmatprep.subr.bf16.mxu0 %v7285_v50  ;;  %3252 = vmatprep.subr.bf16.mxu1 %v7287_v51  ;;  %v637_v50 = vld [vmem:[#allocation7 + $0xcc0] sm:$0xff] }
 0x147   :  { %v641_v51 = vld [vmem:[#allocation7 + $0xce0] sm:$0xff] }
 0x148   :  { %v7348_v1 = vcombine.low %v637_v50, %v641_v51 }
 0x149   :  { %3089 = vmatpush1.bf16.msra.mxu0 %v7284_v58  ;;  %3253 = vmatpush1.bf16.msra.mxu1 %v7286_v59  ;;  %v7342_v58 = vcombine.low %v630_v45, %v634_v46  ;;  %v7349_v59 = vcombine.high %v637_v50, %v641_v51  ;;  %v240_v45 = vld [vmem:[#allocation7 + $0x58] sm:$0xff]  ;;  %v247_v50 = vld [vmem:[#allocation7 + $0x90] sm:$0xff] }
 0x14a   :  { %3090 = vmatprep.subr.bf16.mxu0 %v7293_v60  ;;  %3254 = vmatprep.subr.bf16.mxu1 %v7295_v61  ;;  %v7351_v60 = vcombine.high %v638_v54, %v642_v55  ;;  %v645_v61 = vld [vmem:[#allocation7 + $0xd00] sm:$0xff]  ;;  %v244_v46 = vld [vmem:[#allocation7 + $0x78] sm:$0xff]  ;;  %v251_v51 = vld [vmem:[#allocation7 + $0xb0] sm:$0xff] }
 0x14b   :  { %v7356_v9 = vcombine.low %v645_v61, %v649_v62 }
 0x14d   :  { %3091 = vmatpush1.bf16.msra.mxu0 %v7292_v2  ;;  %3255 = vmatpush1.bf16.msra.mxu1 %v7294_v3  ;;  %v7350_v2 = vcombine.low %v638_v54, %v642_v55  ;;  %v7357_v3 = vcombine.high %v645_v61, %v649_v62  ;;  %v248_v54 = vld [vmem:[#allocation7 + $0x98] sm:$0xff]  ;;  %v255_v61 = vld [vmem:[#allocation7 + $0xd0] sm:$0xff] }
 0x14e   :  { %3092 = vmatprep.subr.bf16.mxu0 %v7301_v4  ;;  %3256 = vmatprep.subr.bf16.mxu1 %v7303_v5  ;;  %v7359_v4 = vcombine.high %v646_v63, %v650_v0  ;;  %v653_v5 = vld [vmem:[#allocation7 + $0xd40] sm:$0xff]  ;;  %v252_v55 = vld [vmem:[#allocation7 + $0xb8] sm:$0xff]  ;;  %v259_v62 = vld [vmem:[#allocation7 + $0xf0] sm:$0xff] }
 0x14f   :  { %v7364_v19 = vcombine.low %v653_v5, %v657_v6 }
 0x151   :  { %3093 = vmatpush1.bf16.msra.mxu0 %v7300_v10  ;;  %3257 = vmatpush1.bf16.msra.mxu1 %v7302_v11  ;;  %v7358_v10 = vcombine.low %v646_v63, %v650_v0  ;;  %v7365_v11 = vcombine.high %v653_v5, %v657_v6  ;;  %v256_v63 = vld [vmem:[#allocation7 + $0xd8] sm:$0xff]  ;;  %v263_v5 = vld [vmem:[#allocation7 + $0x110] sm:$0xff] }
 0x152   :  { %3094 = vmatprep.subr.bf16.mxu0 %v7309_v13  ;;  %3258 = vmatprep.subr.bf16.mxu1 %v7311_v14  ;;  %v7367_v13 = vcombine.high %v654_v7, %v658_v8  ;;  %v661_v14 = vld [vmem:[#allocation7 + $0xd80] sm:$0xff]  ;;  %v260_v0 = vld [vmem:[#allocation7 + $0xf8] sm:$0xff]  ;;  %v267_v6 = vld [vmem:[#allocation7 + $0x130] sm:$0xff] }
 0x153   :  { %v7372_v29 = vcombine.low %v661_v14, %v665_v16 }
 0x155   :  { %3095 = vmatpush1.bf16.msra.mxu0 %v7308_v20  ;;  %3259 = vmatpush1.bf16.msra.mxu1 %v7310_v21  ;;  %v7366_v20 = vcombine.low %v654_v7, %v658_v8  ;;  %v7373_v21 = vcombine.high %v661_v14, %v665_v16  ;;  %v264_v7 = vld [vmem:[#allocation7 + $0x118] sm:$0xff]  ;;  %v275_v14 = vld [vmem:[#allocation7 + $0x170] sm:$0xff] }
 0x156   :  { %3096 = vmatprep.subr.bf16.mxu0 %v7317_v23  ;;  %3260 = vmatprep.subr.bf16.mxu1 %v7319_v24  ;;  %v7375_v23 = vcombine.high %v662_v17, %v666_v18  ;;  %v669_v24 = vld [vmem:[#allocation7 + $0xdc0] sm:$0xff]  ;;  %v268_v8 = vld [vmem:[#allocation7 + $0x138] sm:$0xff] }
 0x157   :  { %v7380_v38 = vcombine.low %v669_v24, %v673_v26  ;;  %v272_v16 = vld [vmem:[#allocation7 + $0x158] sm:$0xff] }
 0x159   :  { %3097 = vmatpush1.bf16.msra.mxu0 %v7316_v30  ;;  %3261 = vmatpush1.bf16.msra.mxu1 %v7318_v31  ;;  %v7374_v30 = vcombine.low %v662_v17, %v666_v18  ;;  %v7381_v31 = vcombine.high %v669_v24, %v673_v26  ;;  %v276_v17 = vld [vmem:[#allocation7 + $0x178] sm:$0xff]  ;;  %v6976_v18 = vcombine.low %v263_v5, %v267_v6  ;;  %v283_v24 = vld [vmem:[#allocation7 + $0x1b0] sm:$0xff] }
 0x15a   :  { %3107 = vmatprep.subr.bf16.mxu0 %v7325_v32  ;;  %3271 = vmatprep.subr.bf16.mxu1 %v7327_v33  ;;  %v7383_v32 = vcombine.high %v670_v27, %v674_v28  ;;  %v231_v33 = vld [vmem:[#allocation7 + $0x10] sm:$0xff]  ;;  %v280_v26 = vld [vmem:[#allocation7 + $0x198] sm:$0xff] }
 0x15c   :  { %3099 = vmatmul.mubr.bf16.vlgmr.msra.gmra.mrb[0].mxu0 %v8116_v36  ;;  %3263 = vmatmul.mubr.bf16.vlgmr.msra.gmra.mrb[0].mxu1 %v8116_v36 }
 0x15d   :  { %3108 = vmatpush1.bf16.msra.mxu0 %v7324_v39  ;;  %3272 = vmatpush1.bf16.msra.mxu1 %v7326_v40  ;;  %v7382_v39 = vcombine.low %v670_v27, %v674_v28  ;;  %v6945_v40 = vcombine.high %v231_v33, %v235_v34  ;;  %v284_v27 = vld [vmem:[#allocation7 + $0x1b8] sm:$0xff] }
 0x15e   :  { %3109 = vmatprep.subr.bf16.mxu0 %v7333_v41  ;;  %3273 = vmatprep.subr.bf16.mxu1 %v7335_v42  ;;  %v6947_v41 = vcombine.high %v232_v35, %v236_v37  ;;  %v239_v42 = vld [vmem:[#allocation7 + $0x50] sm:$0xff] }
 0x15f   :  { %3139 = vmatprep.mubr.bf16.mxu0 %v7893_v52  ;;  %3303 = vmatprep.mubr.bf16.mxu1 %v7893_v52 }
 0x161   :  { %3110 = vmatpush1.bf16.msra.mxu0 %v7332_v25  ;;  %3274 = vmatpush1.bf16.msra.mxu1 %v7334_v47  ;;  %v6944_v25 = vcombine.low %v231_v33, %v235_v34  ;;  %v6946_v47 = vcombine.low %v232_v35, %v236_v37  ;;  %v291_v33 = vld [vmem:[#allocation7 + $0x1f0] sm:$0xff]  ;;  %v288_v34 = vld [vmem:[#allocation7 + $0x1d8] sm:$0xff] }
 0x162   :  { %3111 = vmatprep.subr.bf16.mxu0 %v7341_v48  ;;  %3275 = vmatprep.subr.bf16.mxu1 %v7343_v49  ;;  %v6953_v48 = vcombine.high %v239_v42, %v243_v43  ;;  %v6955_v49 = vcombine.high %v240_v45, %v244_v46  ;;  %v292_v35 = vld [vmem:[#allocation7 + $0x1f8] sm:$0xff] }
 0x165   :  { %3112 = vmatpush1.bf16.msra.mxu0 %v7340_v56  ;;  %3276 = vmatpush1.bf16.msra.mxu1 %v7342_v58  ;;  %v6952_v56 = vcombine.low %v239_v42, %v243_v43  ;;  %v6954_v58 = vcombine.low %v240_v45, %v244_v46  ;;  %v299_v42 = vld [vmem:[#allocation7 + $0x230] sm:$0xff]  ;;  %v296_v43 = vld [vmem:[#allocation7 + $0x218] sm:$0xff]  ;;  %v7002_v46 = vcombine.low %v288_v34, %v292_v35 }
 0x166   :  { %3113 = vmatprep.subr.bf16.mxu0 %v7349_v59  ;;  %3277 = vmatprep.subr.bf16.mxu1 %v7351_v60  ;;  %v6961_v59 = vcombine.high %v247_v50, %v251_v51  ;;  %v6963_v60 = vcombine.high %v248_v54, %v252_v55 }
 0x169   :  { %3114 = vmatpush1.bf16.msra.mxu0 %v7348_v1  ;;  %3278 = vmatpush1.bf16.msra.mxu1 %v7350_v2  ;;  %v6960_v1 = vcombine.low %v247_v50, %v251_v51  ;;  %v6962_v2 = vcombine.low %v248_v54, %v252_v55  ;;  %v304_v50 = vld [vmem:[#allocation7 + $0x258] sm:$0xff] }
 0x16a   :  { %3115 = vmatprep.subr.bf16.mxu0 %v7357_v3  ;;  %3279 = vmatprep.subr.bf16.mxu1 %v7359_v4  ;;  %v6969_v3 = vcombine.high %v255_v61, %v259_v62  ;;  %v6971_v4 = vcombine.high %v256_v63, %v260_v0  ;;  %v308_v51 = vld [vmem:[#allocation7 + $0x278] sm:$0xff] }
 0x16d   :  { %3116 = vmatpush1.bf16.msra.mxu0 %v7356_v9  ;;  %3280 = vmatpush1.bf16.msra.mxu1 %v7358_v10  ;;  %v6968_v9 = vcombine.low %v255_v61, %v259_v62  ;;  %v6970_v10 = vcombine.low %v256_v63, %v260_v0  ;;  %v312_v61 = vld [vmem:[#allocation7 + $0x298] sm:$0xff]  ;;  %v7018_v0 = vcombine.low %v304_v50, %v308_v51 }
 0x16e   :  { %3117 = vmatprep.subr.bf16.mxu0 %v7365_v11  ;;  %3281 = vmatprep.subr.bf16.mxu1 %v7367_v13  ;;  %v6977_v11 = vcombine.high %v263_v5, %v267_v6  ;;  %v271_v13 = vld [vmem:[#allocation7 + $0x150] sm:$0xff]  ;;  %v316_v62 = vld [vmem:[#allocation7 + $0x2b8] sm:$0xff] }
 0x16f   :  { %v6984_v28 = vcombine.low %v271_v13, %v275_v14  ;;  %v320_v5 = vld [vmem:[#allocation7 + $0x2d8] sm:$0xff] }
 0x170   :  { %v324_v6 = vld [vmem:[#allocation7 + $0x2f8] sm:$0xff] }
 0x171   :  { %3118 = vmatpush1.bf16.msra.mxu0 %v7364_v19  ;;  %3282 = vmatpush1.bf16.msra.mxu1 %v7366_v20  ;;  %v6978_v19 = vcombine.low %v264_v7, %v268_v8  ;;  %v6985_v20 = vcombine.high %v271_v13, %v275_v14  ;;  %v328_v13 = vld [vmem:[#allocation7 + $0x318] sm:$0xff] }
 0x172   :  { %3119 = vmatprep.subr.bf16.mxu0 %v7373_v21  ;;  %3283 = vmatprep.subr.bf16.mxu1 %v7375_v23  ;;  %v6987_v21 = vcombine.high %v272_v16, %v276_v17  ;;  %v279_v23 = vld [vmem:[#allocation7 + $0x190] sm:$0xff]  ;;  %v332_v14 = vld [vmem:[#allocation7 + $0x338] sm:$0xff] }
 0x173   :  { %v6992_v37 = vcombine.low %v279_v23, %v283_v24 }
 0x175   :  { %3120 = vmatpush1.bf16.msra.mxu0 %v7372_v29  ;;  %3284 = vmatpush1.bf16.msra.mxu1 %v7374_v30  ;;  %v6986_v29 = vcombine.low %v272_v16, %v276_v17  ;;  %v6993_v30 = vcombine.high %v279_v23, %v283_v24  ;;  %v7034_v17 = vcombine.low %v320_v5, %v324_v6  ;;  %v336_v23 = vld [vmem:[#allocation7 + $0x358] sm:$0xff] }
 0x176   :  { %3121 = vmatprep.subr.bf16.mxu0 %v7381_v31  ;;  %3285 = vmatprep.subr.bf16.mxu1 %v7383_v32  ;;  %v6995_v31 = vcombine.high %v280_v26, %v284_v27  ;;  %v287_v32 = vld [vmem:[#allocation7 + $0x1d0] sm:$0xff]  ;;  %v340_v24 = vld [vmem:[#allocation7 + $0x378] sm:$0xff] }
 0x177   :  { %v7000_v45 = vcombine.low %v287_v32, %v291_v33 }
 0x179   :  { %3122 = vmatpush1.bf16.msra.mxu0 %v7380_v38  ;;  %3286 = vmatpush1.bf16.msra.mxu1 %v7382_v39  ;;  %v6994_v38 = vcombine.low %v280_v26, %v284_v27  ;;  %v7001_v39 = vcombine.high %v287_v32, %v291_v33  ;;  %v7042_v27 = vcombine.low %v328_v13, %v332_v14  ;;  %v344_v32 = vld [vmem:[#allocation7 + $0x398] sm:$0xff] }
 0x17a   :  { %3312 = vmatprep.subr.bf16.mxu0 %v6945_v40  ;;  %3476 = vmatprep.subr.bf16.mxu1 %v6947_v41  ;;  %v7003_v40 = vcombine.high %v288_v34, %v292_v35  ;;  %v295_v41 = vld [vmem:[#allocation7 + $0x210] sm:$0xff]  ;;  %v348_v33 = vld [vmem:[#allocation7 + $0x3b8] sm:$0xff]  ;;  %v7050_v35 = vcombine.low %v336_v23, %v340_v24 }
 0x17b   :  { %v7008_v54 = vcombine.low %v295_v41, %v299_v42 }
 0x17c   :  { %3140 = vmatmul.mubr.bf16.vlgmr.msra.gmra.mrb[0].mxu0 %v7667_v44  ;;  %3304 = vmatmul.mubr.bf16.vlgmr.msra.gmra.mrb[0].mxu1 %v7667_v44  ;;  %v300_v44 = vld [vmem:[#allocation7 + $0x238] sm:$0xff] }
 0x17d   :  { %3313 = vmatpush1.bf16.msra.mxu0 %v6944_v25  ;;  %3477 = vmatpush1.bf16.msra.mxu1 %v6946_v47  ;;  %v7009_v25 = vcombine.high %v295_v41, %v299_v42  ;;  %v7011_v47 = vcombine.high %v296_v43, %v300_v44  ;;  %v7010_v55 = vcombine.low %v296_v43, %v300_v44  ;;  %v352_v41 = vld [vmem:[#allocation7 + $0x3d8] sm:$0xff] }
 0x17e   :  { %3314 = vmatprep.subr.bf16.mxu0 %v6953_v48  ;;  %3478 = vmatprep.subr.bf16.mxu1 %v6955_v49  ;;  %v303_v48 = vld [vmem:[#allocation7 + $0x250] sm:$0xff]  ;;  %v356_v42 = vld [vmem:[#allocation7 + $0x3f8] sm:$0xff]  ;;  %v7058_v44 = vcombine.low %v344_v32, %v348_v33 }
 0x17f   :  { %3344 = vmatprep.mubr.bf16.mxu0 %v8076_v57  ;;  %3508 = vmatprep.mubr.bf16.mxu1 %v8076_v57  ;;  %v6979_v57 = vcombine.high %v264_v7, %v268_v8  ;;  %v307_v49 = vld [vmem:[#allocation7 + $0x270] sm:$0xff]  ;;  %v7026_v8 = vcombine.low %v312_v61, %v316_v62 }
 0x180   :  { %v7016_v63 = vcombine.low %v303_v48, %v307_v49 }
 0x181   :  { %3315 = vmatpush1.bf16.msra.mxu0 %v6952_v56  ;;  %3479 = vmatpush1.bf16.msra.mxu1 %v6954_v58  ;;  %v7017_v56 = vcombine.high %v303_v48, %v307_v49  ;;  %v7019_v58 = vcombine.high %v304_v50, %v308_v51  ;;  %v360_v48 = vld [vmem:[#allocation7 + $0x418] sm:$0xff]  ;;  %v7066_v51 = vcombine.low %v352_v41, %v356_v42 }
 0x182   :  { %3316 = vmatprep.subr.bf16.mxu0 %v6961_v59  ;;  %3480 = vmatprep.subr.bf16.mxu1 %v6963_v60  ;;  %v311_v59 = vld [vmem:[#allocation7 + $0x290] sm:$0xff]  ;;  %v364_v49 = vld [vmem:[#allocation7 + $0x438] sm:$0xff] }
 0x183   :  { %v315_v60 = vld [vmem:[#allocation7 + $0x2b0] sm:$0xff] }
 0x184   :  { %v7024_v7 = vcombine.low %v311_v59, %v315_v60 }
 0x185   :  { %3317 = vmatpush1.bf16.msra.mxu0 %v6960_v1  ;;  %3481 = vmatpush1.bf16.msra.mxu1 %v6962_v2  ;;  %v7025_v1 = vcombine.high %v311_v59, %v315_v60  ;;  %v7027_v2 = vcombine.high %v312_v61, %v316_v62  ;;  %v368_v59 = vld [vmem:[#allocation7 + $0x458] sm:$0xff]  ;;  %v7074_v62 = vcombine.low %v360_v48, %v364_v49 }
 0x186   :  { %3318 = vmatprep.subr.bf16.mxu0 %v6969_v3  ;;  %3482 = vmatprep.subr.bf16.mxu1 %v6971_v4  ;;  %v319_v3 = vld [vmem:[#allocation7 + $0x2d0] sm:$0xff]  ;;  %v372_v60 = vld [vmem:[#allocation7 + $0x478] sm:$0xff] }
 0x187   :  { %v323_v4 = vld [vmem:[#allocation7 + $0x2f0] sm:$0xff] }
 0x188   :  { %v7032_v16 = vcombine.low %v319_v3, %v323_v4 }
 0x189   :  { %3319 = vmatpush1.bf16.msra.mxu0 %v6968_v9  ;;  %3483 = vmatpush1.bf16.msra.mxu1 %v6970_v10  ;;  %v7033_v9 = vcombine.high %v319_v3, %v323_v4  ;;  %v7035_v10 = vcombine.high %v320_v5, %v324_v6  ;;  %v376_v3 = vld [vmem:[#allocation7 + $0x498] sm:$0xff]  ;;  %v7082_v6 = vcombine.low %v368_v59, %v372_v60 }
 0x18a   :  { %3320 = vmatprep.subr.bf16.mxu0 %v6977_v11  ;;  %3484 = vmatprep.subr.bf16.mxu1 %v6979_v57  ;;  %v327_v11 = vld [vmem:[#allocation7 + $0x310] sm:$0xff]  ;;  %v380_v4 = vld [vmem:[#allocation7 + $0x4b8] sm:$0xff] }
 0x18b   :  { %v331_v57 = vld [vmem:[#allocation7 + $0x330] sm:$0xff] }
 0x18c   :  { %v7040_v26 = vcombine.low %v327_v11, %v331_v57 }
 0x18d   :  { %3321 = vmatpush1.bf16.msra.mxu0 %v6976_v18  ;;  %3485 = vmatpush1.bf16.msra.mxu1 %v6978_v19  ;;  %v7041_v18 = vcombine.high %v327_v11, %v331_v57  ;;  %v7043_v19 = vcombine.high %v328_v13, %v332_v14  ;;  %v384_v11 = vld [vmem:[#allocation7 + $0x4d8] sm:$0xff] }
 0x18e   :  { %3322 = vmatprep.subr.bf16.mxu0 %v6985_v20  ;;  %3486 = vmatprep.subr.bf16.mxu1 %v6987_v21  ;;  %v335_v20 = vld [vmem:[#allocation7 + $0x350] sm:$0xff]  ;;  %v388_v57 = vld [vmem:[#allocation7 + $0x4f8] sm:$0xff] }
 0x18f   :  { %v339_v21 = vld [vmem:[#allocation7 + $0x370] sm:$0xff] }
 0x190   :  { %v7048_v34 = vcombine.low %v335_v20, %v339_v21 }
 0x191   :  { %3323 = vmatpush1.bf16.msra.mxu0 %v6984_v28  ;;  %3487 = vmatpush1.bf16.msra.mxu1 %v6986_v29  ;;  %v7049_v28 = vcombine.high %v335_v20, %v339_v21  ;;  %v7051_v29 = vcombine.high %v336_v23, %v340_v24  ;;  %v396_v20 = vld [vmem:[#allocation7 + $0x538] sm:$0xff]  ;;  %v7098_v23 = vcombine.low %v384_v11, %v388_v57 }
 0x192   :  { %3324 = vmatprep.subr.bf16.mxu0 %v6993_v30  ;;  %3488 = vmatprep.subr.bf16.mxu1 %v6995_v31  ;;  %v343_v30 = vld [vmem:[#allocation7 + $0x390] sm:$0xff] }
 0x193   :  { %v347_v31 = vld [vmem:[#allocation7 + $0x3b0] sm:$0xff] }
 0x194   :  { %v7056_v43 = vcombine.low %v343_v30, %v347_v31 }
 0x195   :  { %3325 = vmatpush1.bf16.msra.mxu0 %v6992_v37  ;;  %3489 = vmatpush1.bf16.msra.mxu1 %v6994_v38  ;;  %v7057_v37 = vcombine.high %v343_v30, %v347_v31  ;;  %v7059_v38 = vcombine.high %v344_v32, %v348_v33 }
 0x196   :  { %3326 = vmatprep.subr.bf16.mxu0 %v7001_v39  ;;  %3490 = vmatprep.subr.bf16.mxu1 %v7003_v40  ;;  %v351_v39 = vld [vmem:[#allocation7 + $0x3d0] sm:$0xff] }
 0x197   :  { %v355_v40 = vld [vmem:[#allocation7 + $0x3f0] sm:$0xff] }
 0x198   :  { %v7064_v50 = vcombine.low %v351_v39, %v355_v40 }
 0x199   :  { %3327 = vmatpush1.bf16.msra.mxu0 %v7000_v45  ;;  %3491 = vmatpush1.bf16.msra.mxu1 %v7002_v46  ;;  %v7065_v45 = vcombine.high %v351_v39, %v355_v40  ;;  %v7067_v46 = vcombine.high %v352_v41, %v356_v42 }
 0x19a   :  { %3328 = vmatprep.subr.bf16.mxu0 %v7009_v25  ;;  %3492 = vmatprep.subr.bf16.mxu1 %v7011_v47  ;;  %v359_v25 = vld [vmem:[#allocation7 + $0x410] sm:$0xff] }
 0x19b   :  { %v363_v47 = vld [vmem:[#allocation7 + $0x430] sm:$0xff] }
 0x19c   :  { %v7072_v61 = vcombine.low %v359_v25, %v363_v47 }
 0x19d   :  { %3329 = vmatpush1.bf16.msra.mxu0 %v7008_v54  ;;  %3493 = vmatpush1.bf16.msra.mxu1 %v7010_v55  ;;  %v7073_v54 = vcombine.high %v359_v25, %v363_v47  ;;  %v7075_v55 = vcombine.high %v360_v48, %v364_v49 }
 0x19e   :  { %3330 = vmatprep.subr.bf16.mxu0 %v7017_v56  ;;  %3494 = vmatprep.subr.bf16.mxu1 %v7019_v58  ;;  %v367_v56 = vld [vmem:[#allocation7 + $0x450] sm:$0xff] }
 0x19f   :  { %v371_v58 = vld [vmem:[#allocation7 + $0x470] sm:$0xff] }
 0x1a0   :  { %v7080_v5 = vcombine.low %v367_v56, %v371_v58 }
 0x1a1   :  { %3331 = vmatpush1.bf16.msra.mxu0 %v7016_v63  ;;  %3495 = vmatpush1.bf16.msra.mxu1 %v7018_v0  ;;  %v7081_v63 = vcombine.high %v367_v56, %v371_v58  ;;  %v7083_v0 = vcombine.high %v368_v59, %v372_v60 }
 0x1a2   :  { %3332 = vmatprep.subr.bf16.mxu0 %v7025_v1  ;;  %3496 = vmatprep.subr.bf16.mxu1 %v7027_v2  ;;  %v375_v1 = vld [vmem:[#allocation7 + $0x490] sm:$0xff] }
 0x1a3   :  { %v379_v2 = vld [vmem:[#allocation7 + $0x4b0] sm:$0xff] }
 0x1a4   :  { %v7088_v13 = vcombine.low %v375_v1, %v379_v2 }
 0x1a5   :  { %3333 = vmatpush1.bf16.msra.mxu0 %v7024_v7  ;;  %3497 = vmatpush1.bf16.msra.mxu1 %v7026_v8  ;;  %v7089_v7 = vcombine.high %v375_v1, %v379_v2  ;;  %v7091_v8 = vcombine.high %v376_v3, %v380_v4 }
 0x1a6   :  { %3334 = vmatprep.subr.bf16.mxu0 %v7033_v9  ;;  %3498 = vmatprep.subr.bf16.mxu1 %v7035_v10  ;;  %v383_v9 = vld [vmem:[#allocation7 + $0x4d0] sm:$0xff] }
 0x1a7   :  { %v387_v10 = vld [vmem:[#allocation7 + $0x4f0] sm:$0xff] }
 0x1a8   :  { %v7097_v14 = vcombine.high %v383_v9, %v387_v10  ;;  %v7096_v21 = vcombine.low %v383_v9, %v387_v10 }
 0x1a9   :  { %3335 = vmatpush1.bf16.msra.mxu0 %v7032_v16  ;;  %3499 = vmatpush1.bf16.msra.mxu1 %v7034_v17  ;;  %v7099_v16 = vcombine.high %v384_v11, %v388_v57  ;;  %v391_v17 = vld [vmem:[#allocation7 + $0x510] sm:$0xff] }
 0x1aa   :  { %3336 = vmatprep.subr.bf16.mxu0 %v7041_v18  ;;  %3500 = vmatprep.subr.bf16.mxu1 %v7043_v19  ;;  %v395_v18 = vld [vmem:[#allocation7 + $0x530] sm:$0xff]  ;;  %v392_v19 = vld [vmem:[#allocation7 + $0x518] sm:$0xff] }
 0x1ab   :  { %v7105_v24 = vcombine.high %v391_v17, %v395_v18  ;;  %v7104_v30 = vcombine.low %v391_v17, %v395_v18  ;;  %v7106_v31 = vcombine.low %v392_v19, %v396_v20 }
 0x1ad   :  { %3337 = vmatpush1.bf16.msra.mxu0 %v7040_v26  ;;  %3501 = vmatpush1.bf16.msra.mxu1 %v7042_v27  ;;  %v399_v26 = vld [vmem:[#allocation7 + $0x550] sm:$0xff] }
 0x1ae   :  { %3338 = vmatprep.subr.bf16.mxu0 %v7049_v28  ;;  %3502 = vmatprep.subr.bf16.mxu1 %v7051_v29  ;;  %v403_v27 = vld [vmem:[#allocation7 + $0x570] sm:$0xff]  ;;  %v400_v28 = vld [vmem:[#allocation7 + $0x558] sm:$0xff] }
 0x1af   :  { %v404_v29 = vld [vmem:[#allocation7 + $0x578] sm:$0xff]  ;;  %v7113_v32 = vcombine.high %v399_v26, %v403_v27  ;;  %v7112_v39 = vcombine.low %v399_v26, %v403_v27 }
 0x1b0   :  { %v7115_v33 = vcombine.high %v400_v28, %v404_v29  ;;  %v7114_v40 = vcombine.low %v400_v28, %v404_v29 }
 0x1b1   :  { %3339 = vmatpush1.bf16.msra.mxu0 %v7048_v34  ;;  %3503 = vmatpush1.bf16.msra.mxu1 %v7050_v35  ;;  %v407_v34 = vld [vmem:[#allocation7 + $0x590] sm:$0xff] }
 0x1b2   :  { %3340 = vmatprep.subr.bf16.mxu0 %v7057_v37  ;;  %3504 = vmatprep.subr.bf16.mxu1 %v7059_v38  ;;  %v411_v35 = vld [vmem:[#allocation7 + $0x5b0] sm:$0xff]  ;;  %v408_v37 = vld [vmem:[#allocation7 + $0x598] sm:$0xff] }
 0x1b3   :  { %v412_v38 = vld [vmem:[#allocation7 + $0x5b8] sm:$0xff]  ;;  %v7121_v41 = vcombine.high %v407_v34, %v411_v35  ;;  %v7120_v25 = vcombine.low %v407_v34, %v411_v35 }
 0x1b4   :  { %v7123_v42 = vcombine.high %v408_v37, %v412_v38  ;;  %v7122_v47 = vcombine.low %v408_v37, %v412_v38 }
 0x1b5   :  { %3341 = vmatpush1.bf16.msra.mxu0 %v7056_v43  ;;  %3505 = vmatpush1.bf16.msra.mxu1 %v7058_v44  ;;  %v415_v43 = vld [vmem:[#allocation7 + $0x5d0] sm:$0xff] }
 0x1b6   :  { %3342 = vmatprep.subr.bf16.mxu0 %v7065_v45  ;;  %3506 = vmatprep.subr.bf16.mxu1 %v7067_v46  ;;  %v419_v44 = vld [vmem:[#allocation7 + $0x5f0] sm:$0xff]  ;;  %v416_v45 = vld [vmem:[#allocation7 + $0x5d8] sm:$0xff] }
 0x1b7   :  { %v420_v46 = vld [vmem:[#allocation7 + $0x5f8] sm:$0xff]  ;;  %v7129_v48 = vcombine.high %v415_v43, %v419_v44  ;;  %v7128_v56 = vcombine.low %v415_v43, %v419_v44 }
 0x1b8   :  { %v7131_v49 = vcombine.high %v416_v45, %v420_v46  ;;  %v7130_v58 = vcombine.low %v416_v45, %v420_v46 }
 0x1b9   :  { %3343 = vmatpush1.bf16.msra.mxu0 %v7064_v50  ;;  %3507 = vmatpush1.bf16.msra.mxu1 %v7066_v51  ;;  %v423_v50 = vld [vmem:[#allocation7 + $0x610] sm:$0xff] }
 0x1ba   :  { %3353 = vmatprep.subr.bf16.mxu0 %v7073_v54  ;;  %3517 = vmatprep.subr.bf16.mxu1 %v7075_v55  ;;  %v427_v51 = vld [vmem:[#allocation7 + $0x630] sm:$0xff]  ;;  %v424_v54 = vld [vmem:[#allocation7 + $0x618] sm:$0xff] }
 0x1bb   :  { %v428_v55 = vld [vmem:[#allocation7 + $0x638] sm:$0xff]  ;;  %v7137_v59 = vcombine.high %v423_v50, %v427_v51  ;;  %v7136_v1 = vcombine.low %v423_v50, %v427_v51 }
 0x1bc   :  { %3345 = vmatmul.mubr.bf16.vlgmr.msra.gmra.mrb[4].mxu0 %v8082_v12  ;;  %3509 = vmatmul.mubr.bf16.vlgmr.msra.gmra.mrb[4].mxu1 %v8082_v12  ;;  %v7090_v12 = vcombine.low %v376_v3, %v380_v4  ;;  %v7139_v60 = vcombine.high %v424_v54, %v428_v55  ;;  %v7138_v2 = vcombine.low %v424_v54, %v428_v55 }
 0x1bd   :  { %3354 = vmatpush1.bf16.msra.mxu0 %v7072_v61  ;;  %3518 = vmatpush1.bf16.msra.mxu1 %v7074_v62  ;;  %v431_v61 = vld [vmem:[#allocation7 + $0x650] sm:$0xff] }
 0x1be   :  { %3355 = vmatprep.subr.bf16.mxu0 %v7081_v63  ;;  %3519 = vmatprep.subr.bf16.mxu1 %v7083_v0  ;;  %v435_v62 = vld [vmem:[#allocation7 + $0x670] sm:$0xff]  ;;  %v432_v63 = vld [vmem:[#allocation7 + $0x658] sm:$0xff] }
 0x1bf   :  { %3385 = vmatprep.mubr.bf16.mxu0 %v8091_v53  ;;  %3549 = vmatprep.mubr.bf16.mxu1 %v8091_v53  ;;  %v7107_v53 = vcombine.high %v392_v19, %v396_v20  ;;  %v436_v0 = vld [vmem:[#allocation7 + $0x678] sm:$0xff]  ;;  %v7145_v3 = vcombine.high %v431_v61, %v435_v62  ;;  %v7144_v9 = vcombine.low %v431_v61, %v435_v62 }
 0x1c0   :  { %v7147_v4 = vcombine.high %v432_v63, %v436_v0  ;;  %v7146_v10 = vcombine.low %v432_v63, %v436_v0 }
 0x1c1   :  { %3356 = vmatpush1.bf16.msra.mxu0 %v7080_v5  ;;  %3520 = vmatpush1.bf16.msra.mxu1 %v7082_v6  ;;  %v439_v5 = vld [vmem:[#allocation7 + $0x690] sm:$0xff] }
 0x1c2   :  { %3357 = vmatprep.subr.bf16.mxu0 %v7089_v7  ;;  %3521 = vmatprep.subr.bf16.mxu1 %v7091_v8  ;;  %v443_v6 = vld [vmem:[#allocation7 + $0x6b0] sm:$0xff]  ;;  %v440_v7 = vld [vmem:[#allocation7 + $0x698] sm:$0xff] }
 0x1c3   :  { %v444_v8 = vld [vmem:[#allocation7 + $0x6b8] sm:$0xff]  ;;  %v7153_v11 = vcombine.high %v439_v5, %v443_v6  ;;  %v7152_v17 = vcombine.low %v439_v5, %v443_v6 }
 0x1c4   :  { %v7155_v57 = vcombine.high %v440_v7, %v444_v8  ;;  %v7154_v18 = vcombine.low %v440_v7, %v444_v8 }
 0x1c5   :  { %3358 = vmatpush1.bf16.msra.mxu0 %v7088_v13  ;;  %3522 = vmatpush1.bf16.msra.mxu1 %v7090_v12  ;;  %v447_v13 = vld [vmem:[#allocation7 + $0x6d0] sm:$0xff] }
 0x1c6   :  { %3359 = vmatprep.subr.bf16.mxu0 %v7097_v14  ;;  %3523 = vmatprep.subr.bf16.mxu1 %v7099_v16  ;;  %v451_v12 = vld [vmem:[#allocation7 + $0x6f0] sm:$0xff]  ;;  %v448_v14 = vld [vmem:[#allocation7 + $0x6d8] sm:$0xff] }
 0x1c7   :  { %v452_v16 = vld [vmem:[#allocation7 + $0x6f8] sm:$0xff]  ;;  %v7161_v19 = vcombine.high %v447_v13, %v451_v12  ;;  %v7160_v26 = vcombine.low %v447_v13, %v451_v12 }
 0x1c8   :  { %v7163_v20 = vcombine.high %v448_v14, %v452_v16  ;;  %v7162_v27 = vcombine.low %v448_v14, %v452_v16 }
 0x1c9   :  { %3360 = vmatpush1.bf16.msra.mxu0 %v7096_v21  ;;  %3524 = vmatpush1.bf16.msra.mxu1 %v7098_v23  ;;  %v455_v21 = vld [vmem:[#allocation7 + $0x710] sm:$0xff] }
 0x1ca   :  { %3361 = vmatprep.subr.bf16.mxu0 %v7105_v24  ;;  %3525 = vmatprep.subr.bf16.mxu1 %v7107_v53  ;;  %v459_v23 = vld [vmem:[#allocation7 + $0x730] sm:$0xff]  ;;  %v456_v24 = vld [vmem:[#allocation7 + $0x718] sm:$0xff] }
 0x1cb   :  { %v460_v53 = vld [vmem:[#allocation7 + $0x738] sm:$0xff]  ;;  %v7169_v28 = vcombine.high %v455_v21, %v459_v23  ;;  %v7168_v34 = vcombine.low %v455_v21, %v459_v23 }
 0x1cc   :  { %v7171_v29 = vcombine.high %v456_v24, %v460_v53  ;;  %v7170_v35 = vcombine.low %v456_v24, %v460_v53  ;;  %v519_v53 = vld [vmem:[#allocation7 + $0x910] sm:$0xff] }
 0x1cd   :  { %3362 = vmatpush1.bf16.msra.mxu0 %v7104_v30  ;;  %3526 = vmatpush1.bf16.msra.mxu1 %v7106_v31  ;;  %v463_v30 = vld [vmem:[#allocation7 + $0x750] sm:$0xff] }
 0x1ce   :  { %3363 = vmatprep.subr.bf16.mxu0 %v7113_v32  ;;  %3527 = vmatprep.subr.bf16.mxu1 %v7115_v33  ;;  %v467_v31 = vld [vmem:[#allocation7 + $0x770] sm:$0xff]  ;;  %v464_v32 = vld [vmem:[#allocation7 + $0x758] sm:$0xff] }
 0x1cf   :  { %v468_v33 = vld [vmem:[#allocation7 + $0x778] sm:$0xff]  ;;  %v7177_v37 = vcombine.high %v463_v30, %v467_v31  ;;  %v7176_v43 = vcombine.low %v463_v30, %v467_v31 }
 0x1d0   :  { %v7179_v38 = vcombine.high %v464_v32, %v468_v33  ;;  %v7178_v44 = vcombine.low %v464_v32, %v468_v33  ;;  %v527_v32 = vld [vmem:[#allocation7 + $0x950] sm:$0xff] }
 0x1d1   :  { %3364 = vmatpush1.bf16.msra.mxu0 %v7112_v39  ;;  %3528 = vmatpush1.bf16.msra.mxu1 %v7114_v40  ;;  %v471_v39 = vld [vmem:[#allocation7 + $0x790] sm:$0xff] }
 0x1d2   :  { %3365 = vmatprep.subr.bf16.mxu0 %v7121_v41  ;;  %3529 = vmatprep.subr.bf16.mxu1 %v7123_v42  ;;  %v475_v40 = vld [vmem:[#allocation7 + $0x7b0] sm:$0xff]  ;;  %v472_v41 = vld [vmem:[#allocation7 + $0x798] sm:$0xff] }
 0x1d3   :  { %v476_v42 = vld [vmem:[#allocation7 + $0x7b8] sm:$0xff]  ;;  %v7185_v45 = vcombine.high %v471_v39, %v475_v40  ;;  %v7184_v50 = vcombine.low %v471_v39, %v475_v40  ;;  %v531_v33 = vld [vmem:[#allocation7 + $0x970] sm:$0xff] }
 0x1d4   :  { %v7187_v46 = vcombine.high %v472_v41, %v476_v42  ;;  %v7186_v51 = vcombine.low %v472_v41, %v476_v42  ;;  %v7241_v39 = vcombine.high %v527_v32, %v531_v33  ;;  %v535_v41 = vld [vmem:[#allocation7 + $0x990] sm:$0xff] }
 0x1d5   :  { %3366 = vmatpush1.bf16.msra.mxu0 %v7120_v25  ;;  %3530 = vmatpush1.bf16.msra.mxu1 %v7122_v47  ;;  %v479_v25 = vld [vmem:[#allocation7 + $0x7d0] sm:$0xff] }
 0x1d6   :  { %3367 = vmatprep.subr.bf16.mxu0 %v7129_v48  ;;  %3531 = vmatprep.subr.bf16.mxu1 %v7131_v49  ;;  %v483_v47 = vld [vmem:[#allocation7 + $0x7f0] sm:$0xff]  ;;  %v480_v48 = vld [vmem:[#allocation7 + $0x7d8] sm:$0xff] }
 0x1d7   :  { %v484_v49 = vld [vmem:[#allocation7 + $0x7f8] sm:$0xff]  ;;  %v7193_v54 = vcombine.high %v479_v25, %v483_v47  ;;  %v7192_v61 = vcombine.low %v479_v25, %v483_v47  ;;  %v539_v42 = vld [vmem:[#allocation7 + $0x9b0] sm:$0xff] }
 0x1d8   :  { %v7195_v55 = vcombine.high %v480_v48, %v484_v49  ;;  %v7194_v62 = vcombine.low %v480_v48, %v484_v49  ;;  %v7249_v25 = vcombine.high %v535_v41, %v539_v42  ;;  %v543_v48 = vld [vmem:[#allocation7 + $0x9d0] sm:$0xff] }
 0x1d9   :  { %3368 = vmatpush1.bf16.msra.mxu0 %v7128_v56  ;;  %3532 = vmatpush1.bf16.msra.mxu1 %v7130_v58  ;;  %v487_v56 = vld [vmem:[#allocation7 + $0x810] sm:$0xff] }
 0x1da   :  { %3369 = vmatprep.subr.bf16.mxu0 %v7137_v59  ;;  %3533 = vmatprep.subr.bf16.mxu1 %v7139_v60  ;;  %v491_v58 = vld [vmem:[#allocation7 + $0x830] sm:$0xff]  ;;  %v488_v59 = vld [vmem:[#allocation7 + $0x818] sm:$0xff] }
 0x1db   :  { %v492_v60 = vld [vmem:[#allocation7 + $0x838] sm:$0xff]  ;;  %v7201_v63 = vcombine.high %v487_v56, %v491_v58  ;;  %v7200_v5 = vcombine.low %v487_v56, %v491_v58  ;;  %v547_v49 = vld [vmem:[#allocation7 + $0x9f0] sm:$0xff] }
 0x1dc   :  { %v7203_v0 = vcombine.high %v488_v59, %v492_v60  ;;  %v7202_v6 = vcombine.low %v488_v59, %v492_v60  ;;  %v7257_v56 = vcombine.high %v543_v48, %v547_v49  ;;  %v551_v59 = vld [vmem:[#allocation7 + $0xa10] sm:$0xff] }
 0x1dd   :  { %3370 = vmatpush1.bf16.msra.mxu0 %v7136_v1  ;;  %3534 = vmatpush1.bf16.msra.mxu1 %v7138_v2  ;;  %v495_v1 = vld [vmem:[#allocation7 + $0x850] sm:$0xff] }
 0x1de   :  { %3371 = vmatprep.subr.bf16.mxu0 %v7145_v3  ;;  %3535 = vmatprep.subr.bf16.mxu1 %v7147_v4  ;;  %v499_v2 = vld [vmem:[#allocation7 + $0x870] sm:$0xff]  ;;  %v496_v3 = vld [vmem:[#allocation7 + $0x858] sm:$0xff] }
 0x1df   :  { %v500_v4 = vld [vmem:[#allocation7 + $0x878] sm:$0xff]  ;;  %v7209_v7 = vcombine.high %v495_v1, %v499_v2  ;;  %v7208_v13 = vcombine.low %v495_v1, %v499_v2  ;;  %v555_v60 = vld [vmem:[#allocation7 + $0xa30] sm:$0xff] }
 0x1e0   :  { %v7211_v8 = vcombine.high %v496_v3, %v500_v4  ;;  %v7210_v12 = vcombine.low %v496_v3, %v500_v4  ;;  %v7265_v1 = vcombine.high %v551_v59, %v555_v60  ;;  %v559_v3 = vld [vmem:[#allocation7 + $0xa50] sm:$0xff] }
 0x1e1   :  { %3372 = vmatpush1.bf16.msra.mxu0 %v7144_v9  ;;  %3536 = vmatpush1.bf16.msra.mxu1 %v7146_v10  ;;  %v503_v9 = vld [vmem:[#allocation7 + $0x890] sm:$0xff] }
 0x1e2   :  { %3373 = vmatprep.subr.bf16.mxu0 %v7153_v11  ;;  %3537 = vmatprep.subr.bf16.mxu1 %v7155_v57  ;;  %v507_v10 = vld [vmem:[#allocation7 + $0x8b0] sm:$0xff]  ;;  %v504_v11 = vld [vmem:[#allocation7 + $0x898] sm:$0xff] }
 0x1e3   :  { %v508_v57 = vld [vmem:[#allocation7 + $0x8b8] sm:$0xff]  ;;  %v7217_v14 = vcombine.high %v503_v9, %v507_v10  ;;  %v7216_v21 = vcombine.low %v503_v9, %v507_v10  ;;  %v563_v4 = vld [vmem:[#allocation7 + $0xa70] sm:$0xff] }
 0x1e4   :  { %v7219_v16 = vcombine.high %v504_v11, %v508_v57  ;;  %v7273_v9 = vcombine.high %v559_v3, %v563_v4 }
 0x1e5   :  { %3374 = vmatpush1.bf16.msra.mxu0 %v7152_v17  ;;  %3538 = vmatpush1.bf16.msra.mxu1 %v7154_v18  ;;  %v511_v17 = vld [vmem:[#allocation7 + $0x8d0] sm:$0xff] }
 0x1e6   :  { %3375 = vmatprep.subr.bf16.mxu0 %v7161_v19  ;;  %3539 = vmatprep.subr.bf16.mxu1 %v7163_v20  ;;  %v515_v18 = vld [vmem:[#allocation7 + $0x8f0] sm:$0xff]  ;;  %v512_v19 = vld [vmem:[#allocation7 + $0x8d8] sm:$0xff] }
 0x1e7   :  { %v516_v20 = vld [vmem:[#allocation7 + $0x8f8] sm:$0xff]  ;;  %v7225_v23 = vcombine.high %v511_v17, %v515_v18 }
 0x1e8   :  { %v7227_v24 = vcombine.high %v512_v19, %v516_v20  ;;  %v7226_v30 = vcombine.low %v512_v19, %v516_v20  ;;  %v575_v19 = vld [vmem:[#allocation7 + $0xad0] sm:$0xff] }
 0x1e9   :  { %3376 = vmatpush1.bf16.msra.mxu0 %v7160_v26  ;;  %3540 = vmatpush1.bf16.msra.mxu1 %v7162_v27  ;;  %v523_v26 = vld [vmem:[#allocation7 + $0x930] sm:$0xff]  ;;  %v520_v27 = vld [vmem:[#allocation7 + $0x918] sm:$0xff] }
 0x1ea   :  { %3377 = vmatprep.subr.bf16.mxu0 %v7169_v28  ;;  %3541 = vmatprep.subr.bf16.mxu1 %v7171_v29  ;;  %v524_v28 = vld [vmem:[#allocation7 + $0x938] sm:$0xff]  ;;  %v7224_v29 = vcombine.low %v511_v17, %v515_v18  ;;  %v7233_v31 = vcombine.high %v519_v53, %v523_v26  ;;  %v579_v20 = vld [vmem:[#allocation7 + $0xaf0] sm:$0xff] }
 0x1ed   :  { %3378 = vmatpush1.bf16.msra.mxu0 %v7168_v34  ;;  %3542 = vmatpush1.bf16.msra.mxu1 %v7170_v35  ;;  %v528_v34 = vld [vmem:[#allocation7 + $0x958] sm:$0xff] }
 0x1ee   :  { %3379 = vmatprep.subr.bf16.mxu0 %v7177_v37  ;;  %3543 = vmatprep.subr.bf16.mxu1 %v7179_v38  ;;  %v532_v35 = vld [vmem:[#allocation7 + $0x978] sm:$0xff]  ;;  %v7232_v37 = vcombine.low %v519_v53, %v523_v26  ;;  %v7234_v38 = vcombine.low %v520_v27, %v524_v28  ;;  %v7289_v53 = vcombine.high %v575_v19, %v579_v20 }
 0x1ef   :  { %v7243_v40 = vcombine.high %v528_v34, %v532_v35 }
 0x1f1   :  { %3380 = vmatpush1.bf16.msra.mxu0 %v7176_v43  ;;  %3544 = vmatpush1.bf16.msra.mxu1 %v7178_v44  ;;  %v536_v43 = vld [vmem:[#allocation7 + $0x998] sm:$0xff] }
 0x1f2   :  { %3381 = vmatprep.subr.bf16.mxu0 %v7185_v45  ;;  %3545 = vmatprep.subr.bf16.mxu1 %v7187_v46  ;;  %v540_v44 = vld [vmem:[#allocation7 + $0x9b8] sm:$0xff]  ;;  %v7240_v45 = vcombine.low %v527_v32, %v531_v33  ;;  %v7242_v46 = vcombine.low %v528_v34, %v532_v35  ;;  %v591_v34 = vld [vmem:[#allocation7 + $0xb50] sm:$0xff] }
 0x1f3   :  { %v7251_v47 = vcombine.high %v536_v43, %v540_v44  ;;  %v595_v35 = vld [vmem:[#allocation7 + $0xb70] sm:$0xff] }
 0x1f5   :  { %3382 = vmatpush1.bf16.msra.mxu0 %v7184_v50  ;;  %3546 = vmatpush1.bf16.msra.mxu1 %v7186_v51  ;;  %v544_v50 = vld [vmem:[#allocation7 + $0x9d8] sm:$0xff] }
 0x1f6   :  { %3383 = vmatprep.subr.bf16.mxu0 %v7193_v54  ;;  %3547 = vmatprep.subr.bf16.mxu1 %v7195_v55  ;;  %v548_v51 = vld [vmem:[#allocation7 + $0x9f8] sm:$0xff]  ;;  %v7248_v54 = vcombine.low %v535_v41, %v539_v42  ;;  %v7250_v55 = vcombine.low %v536_v43, %v540_v44  ;;  %v7305_v41 = vcombine.high %v591_v34, %v595_v35  ;;  %v599_v43 = vld [vmem:[#allocation7 + $0xb90] sm:$0xff] }
 0x1f7   :  { %v7259_v58 = vcombine.high %v544_v50, %v548_v51  ;;  %v603_v44 = vld [vmem:[#allocation7 + $0xbb0] sm:$0xff] }
 0x1f9   :  { %3384 = vmatpush1.bf16.msra.mxu0 %v7192_v61  ;;  %3548 = vmatpush1.bf16.msra.mxu1 %v7194_v62  ;;  %v552_v61 = vld [vmem:[#allocation7 + $0xa18] sm:$0xff] }
 0x1fa   :  { %3394 = vmatprep.subr.bf16.mxu0 %v7201_v63  ;;  %3558 = vmatprep.subr.bf16.mxu1 %v7203_v0  ;;  %v556_v62 = vld [vmem:[#allocation7 + $0xa38] sm:$0xff]  ;;  %v7256_v63 = vcombine.low %v543_v48, %v547_v49  ;;  %v7258_v0 = vcombine.low %v544_v50, %v548_v51  ;;  %v7313_v48 = vcombine.high %v599_v43, %v603_v44  ;;  %v607_v50 = vld [vmem:[#allocation7 + $0xbd0] sm:$0xff] }
 0x1fb   :  { %v7267_v2 = vcombine.high %v552_v61, %v556_v62  ;;  %v611_v51 = vld [vmem:[#allocation7 + $0xbf0] sm:$0xff] }
 0x1fc   :  { %3386 = vmatmul.mubr.bf16.vlgmr.msra.gmra.mrb[4].mxu0 %v8099_v22  ;;  %3550 = vmatmul.mubr.bf16.vlgmr.msra.gmra.mrb[4].mxu1 %v8099_v22  ;;  %v7218_v22 = vcombine.low %v504_v11, %v508_v57  ;;  %v567_v11 = vld [vmem:[#allocation7 + $0xa90] sm:$0xff] }
 0x1fd   :  { %3395 = vmatpush1.bf16.msra.mxu0 %v7200_v5  ;;  %3559 = vmatpush1.bf16.msra.mxu1 %v7202_v6  ;;  %v560_v5 = vld [vmem:[#allocation7 + $0xa58] sm:$0xff]  ;;  %v571_v57 = vld [vmem:[#allocation7 + $0xab0] sm:$0xff] }
 0x1fe   :  { %3396 = vmatprep.subr.bf16.mxu0 %v7209_v7  ;;  %3560 = vmatprep.subr.bf16.mxu1 %v7211_v8  ;;  %v564_v6 = vld [vmem:[#allocation7 + $0xa78] sm:$0xff]  ;;  %v7264_v7 = vcombine.low %v551_v59, %v555_v60  ;;  %v7266_v8 = vcombine.low %v552_v61, %v556_v62  ;;  %v7281_v17 = vcombine.high %v567_v11, %v571_v57  ;;  %v615_v61 = vld [vmem:[#allocation7 + $0xc10] sm:$0xff] }
 0x1ff   :  { %3426 = vmatprep.mubr.bf16.mxu0 %v8108_v15  ;;  %3590 = vmatprep.mubr.bf16.mxu1 %v8108_v15  ;;  %v7235_v15 = vcombine.high %v520_v27, %v524_v28  ;;  %v7275_v10 = vcombine.high %v560_v5, %v564_v6  ;;  %v583_v27 = vld [vmem:[#allocation7 + $0xb10] sm:$0xff]  ;;  %v7321_v59 = vcombine.high %v607_v50, %v611_v51 }
 0x200   :  { %v587_v28 = vld [vmem:[#allocation7 + $0xb30] sm:$0xff] }
 0x201   :  { %3397 = vmatpush1.bf16.msra.mxu0 %v7208_v13  ;;  %3561 = vmatpush1.bf16.msra.mxu1 %v7210_v12  ;;  %v568_v13 = vld [vmem:[#allocation7 + $0xa98] sm:$0xff]  ;;  %v7297_v32 = vcombine.high %v583_v27, %v587_v28  ;;  %v619_v62 = vld [vmem:[#allocation7 + $0xc30] sm:$0xff] }
 0x202   :  { %3398 = vmatprep.subr.bf16.mxu0 %v7217_v14  ;;  %3562 = vmatprep.subr.bf16.mxu1 %v7219_v16  ;;  %v572_v12 = vld [vmem:[#allocation7 + $0xab8] sm:$0xff]  ;;  %v7272_v14 = vcombine.low %v559_v3, %v563_v4  ;;  %v7274_v16 = vcombine.low %v560_v5, %v564_v6  ;;  %v7329_v3 = vcombine.high %v615_v61, %v619_v62  ;;  %v623_v5 = vld [vmem:[#allocation7 + $0xc50] sm:$0xff] }
 0x203   :  { %v7283_v18 = vcombine.high %v568_v13, %v572_v12  ;;  %v627_v6 = vld [vmem:[#allocation7 + $0xc70] sm:$0xff] }
 0x205   :  { %3399 = vmatpush1.bf16.msra.mxu0 %v7216_v21  ;;  %3563 = vmatpush1.bf16.msra.mxu1 %v7218_v22  ;;  %v576_v21 = vld [vmem:[#allocation7 + $0xad8] sm:$0xff] }
 0x206   :  { %3400 = vmatprep.subr.bf16.mxu0 %v7225_v23  ;;  %3564 = vmatprep.subr.bf16.mxu1 %v7227_v24  ;;  %v580_v22 = vld [vmem:[#allocation7 + $0xaf8] sm:$0xff]  ;;  %v7280_v23 = vcombine.low %v567_v11, %v571_v57  ;;  %v7282_v24 = vcombine.low %v568_v13, %v572_v12  ;;  %v7337_v11 = vcombine.high %v623_v5, %v627_v6  ;;  %v631_v13 = vld [vmem:[#allocation7 + $0xc90] sm:$0xff] }
 0x207   :  { %v7291_v26 = vcombine.high %v576_v21, %v580_v22  ;;  %v635_v12 = vld [vmem:[#allocation7 + $0xcb0] sm:$0xff] }
 0x209   :  { %3401 = vmatpush1.bf16.msra.mxu0 %v7224_v29  ;;  %3565 = vmatpush1.bf16.msra.mxu1 %v7226_v30  ;;  %v584_v29 = vld [vmem:[#allocation7 + $0xb18] sm:$0xff] }
 0x20a   :  { %3402 = vmatprep.subr.bf16.mxu0 %v7233_v31  ;;  %3566 = vmatprep.subr.bf16.mxu1 %v7235_v15  ;;  %v588_v30 = vld [vmem:[#allocation7 + $0xb38] sm:$0xff]  ;;  %v7288_v31 = vcombine.low %v575_v19, %v579_v20  ;;  %v7290_v15 = vcombine.low %v576_v21, %v580_v22  ;;  %v7345_v19 = vcombine.high %v631_v13, %v635_v12  ;;  %v639_v21 = vld [vmem:[#allocation7 + $0xcd0] sm:$0xff] }
 0x20b   :  { %v7299_v33 = vcombine.high %v584_v29, %v588_v30  ;;  %v643_v22 = vld [vmem:[#allocation7 + $0xcf0] sm:$0xff] }
 0x20d   :  { %3403 = vmatpush1.bf16.msra.mxu0 %v7232_v37  ;;  %3567 = vmatpush1.bf16.msra.mxu1 %v7234_v38  ;;  %v592_v37 = vld [vmem:[#allocation7 + $0xb58] sm:$0xff] }
 0x20e   :  { %3404 = vmatprep.subr.bf16.mxu0 %v7241_v39  ;;  %3568 = vmatprep.subr.bf16.mxu1 %v7243_v40  ;;  %v596_v38 = vld [vmem:[#allocation7 + $0xb78] sm:$0xff]  ;;  %v7296_v39 = vcombine.low %v583_v27, %v587_v28  ;;  %v7298_v40 = vcombine.low %v584_v29, %v588_v30  ;;  %v7353_v27 = vcombine.high %v639_v21, %v643_v22  ;;  %v647_v29 = vld [vmem:[#allocation7 + $0xd10] sm:$0xff] }
 0x20f   :  { %v7307_v42 = vcombine.high %v592_v37, %v596_v38  ;;  %v651_v30 = vld [vmem:[#allocation7 + $0xd30] sm:$0xff] }
 0x211   :  { %3405 = vmatpush1.bf16.msra.mxu0 %v7240_v45  ;;  %3569 = vmatpush1.bf16.msra.mxu1 %v7242_v46  ;;  %v600_v45 = vld [vmem:[#allocation7 + $0xb98] sm:$0xff] }
 0x212   :  { %3406 = vmatprep.subr.bf16.mxu0 %v7249_v25  ;;  %3570 = vmatprep.subr.bf16.mxu1 %v7251_v47  ;;  %v604_v46 = vld [vmem:[#allocation7 + $0xbb8] sm:$0xff]  ;;  %v7304_v25 = vcombine.low %v591_v34, %v595_v35  ;;  %v7306_v47 = vcombine.low %v592_v37, %v596_v38  ;;  %v655_v37 = vld [vmem:[#allocation7 + $0xd50] sm:$0xff] }
 0x213   :  { %v7315_v49 = vcombine.high %v600_v45, %v604_v46  ;;  %v659_v38 = vld [vmem:[#allocation7 + $0xd70] sm:$0xff] }
 0x215   :  { %3407 = vmatpush1.bf16.msra.mxu0 %v7248_v54  ;;  %3571 = vmatpush1.bf16.msra.mxu1 %v7250_v55  ;;  %v608_v54 = vld [vmem:[#allocation7 + $0xbd8] sm:$0xff] }
 0x216   :  { %3408 = vmatprep.subr.bf16.mxu0 %v7257_v56  ;;  %3572 = vmatprep.subr.bf16.mxu1 %v7259_v58  ;;  %v612_v55 = vld [vmem:[#allocation7 + $0xbf8] sm:$0xff]  ;;  %v7312_v56 = vcombine.low %v599_v43, %v603_v44  ;;  %v7314_v58 = vcombine.low %v600_v45, %v604_v46  ;;  %v8144_v43 = vld [vmem:[#allocation10] sm:$0xff] }
 0x217   :  { %v7323_v60 = vcombine.high %v608_v54, %v612_v55 }
 0x219   :  { %3409 = vmatpush1.bf16.msra.mxu0 %v7256_v63  ;;  %3573 = vmatpush1.bf16.msra.mxu1 %v7258_v0  ;;  %v616_v63 = vld [vmem:[#allocation7 + $0xc18] sm:$0xff] }
 0x21a   :  { %3410 = vmatprep.subr.bf16.mxu0 %v7265_v1  ;;  %3574 = vmatprep.subr.bf16.mxu1 %v7267_v2  ;;  %v620_v0 = vld [vmem:[#allocation7 + $0xc38] sm:$0xff]  ;;  %v7320_v1 = vcombine.low %v607_v50, %v611_v51  ;;  %v7322_v2 = vcombine.low %v608_v54, %v612_v55  ;;  %v667_v50 = vld [vmem:[#allocation7 + $0xdb0] sm:$0xff] }
 0x21b   :  { %v7331_v4 = vcombine.high %v616_v63, %v620_v0  ;;  %v664_v54 = vld [vmem:[#allocation7 + $0xd98] sm:$0xff] }
 0x21c   :  { %v668_v55 = vld [vmem:[#allocation7 + $0xdb8] sm:$0xff] }
 0x21d   :  { %3411 = vmatpush1.bf16.msra.mxu0 %v7264_v7  ;;  %3575 = vmatpush1.bf16.msra.mxu1 %v7266_v8  ;;  %v624_v7 = vld [vmem:[#allocation7 + $0xc58] sm:$0xff] }
 0x21e   :  { %3412 = vmatprep.subr.bf16.mxu0 %v7273_v9  ;;  %3576 = vmatprep.subr.bf16.mxu1 %v7275_v10  ;;  %v628_v8 = vld [vmem:[#allocation7 + $0xc78] sm:$0xff]  ;;  %v7328_v9 = vcombine.low %v615_v61, %v619_v62  ;;  %v7330_v10 = vcombine.low %v616_v63, %v620_v0  ;;  %v7379_v0 = vcombine.high %v664_v54, %v668_v55 }
 0x21f   :  { %v7339_v57 = vcombine.high %v624_v7, %v628_v8 }
 0x221   :  { %3413 = vmatpush1.bf16.msra.mxu0 %v7272_v14  ;;  %3577 = vmatpush1.bf16.msra.mxu1 %v7274_v16  ;;  %v632_v14 = vld [vmem:[#allocation7 + $0xc98] sm:$0xff] }
 0x222   :  { %3414 = vmatprep.subr.bf16.mxu0 %v7281_v17  ;;  %3578 = vmatprep.subr.bf16.mxu1 %v7283_v18  ;;  %v636_v16 = vld [vmem:[#allocation7 + $0xcb8] sm:$0xff]  ;;  %v7336_v17 = vcombine.low %v623_v5, %v627_v6  ;;  %v7338_v18 = vcombine.low %v624_v7, %v628_v8 }
 0x223   :  { %v7347_v20 = vcombine.high %v632_v14, %v636_v16  ;;  %v672_v6 = vld [vmem:[#allocation7 + $0xdd8] sm:$0xff] }
 0x224   :  { %v676_v7 = vld [vmem:[#allocation7 + $0xdf8] sm:$0xff] }
 0x225   :  { %3415 = vmatpush1.bf16.msra.mxu0 %v7280_v23  ;;  %3579 = vmatpush1.bf16.msra.mxu1 %v7282_v24  ;;  %v640_v23 = vld [vmem:[#allocation7 + $0xcd8] sm:$0xff] }
 0x226   :  { %3416 = vmatprep.subr.bf16.mxu0 %v7289_v53  ;;  %3580 = vmatprep.subr.bf16.mxu1 %v7291_v26  ;;  %v644_v24 = vld [vmem:[#allocation7 + $0xcf8] sm:$0xff]  ;;  %v679_v53 = vlaneseq  ;;  %v7344_v26 = vcombine.low %v631_v13, %v635_v12 }
 0x227   :  { %v7355_v28 = vcombine.high %v640_v23, %v644_v24  ;;  %v7354_v34 = vcombine.low %v640_v23, %v644_v24 }
 0x229   :  { %3417 = vmatpush1.bf16.msra.mxu0 %v7288_v31  ;;  %3581 = vmatpush1.bf16.msra.mxu1 %v7290_v15  ;;  %v648_v31 = vld [vmem:[#allocation7 + $0xd18] sm:$0xff] }
 0x22a   :  { %3418 = vmatprep.subr.bf16.mxu0 %v7297_v32  ;;  %3582 = vmatprep.subr.bf16.mxu1 %v7299_v33  ;;  %v652_v15 = vld [vmem:[#allocation7 + $0xd38] sm:$0xff]  ;;  %v8139_v32 = vshrl.u32 %v679_v53, 7  ;;  %v7352_v33 = vcombine.low %v639_v21, %v643_v22  ;;  %v7387_v22 = vcombine.high %v672_v6, %v676_v7 }
 0x22b   :  { %v7363_v35 = vcombine.high %v648_v31, %v652_v15  ;;  %v7362_v46 = vcombine.low %v648_v31, %v652_v15 }
 0x22c   :  { %v8147_v44 = vsub.s32 2, %v8139_v32  ;;  %v8150_v45 = vsub.s32 1, %v8139_v32  ;;  %v8178_v31 = vsub.s32 6, %v8139_v32  ;;  %v8181_v15 = vsub.s32 5, %v8139_v32 }
 0x22d   :  { %3419 = vmatpush1.bf16.msra.mxu0 %v7296_v39  ;;  %3583 = vmatpush1.bf16.msra.mxu1 %v7298_v40  ;;  %v8142_v39 = vsub.s32 0, %v8139_v32  ;;  %v656_v40 = vld [vmem:[#allocation7 + $0xd58] sm:$0xff] }
 0x22e   :  { %3420 = vmatprep.subr.bf16.mxu0 %v7305_v41  ;;  %3584 = vmatprep.subr.bf16.mxu1 %v7307_v42  ;;  %v660_v41 = vld [vmem:[#allocation7 + $0xd78] sm:$0xff]  ;;  %v7360_v42 = vcombine.low %v647_v29, %v651_v30 }
 0x22f   :  { %v682_v51 = vrot.slane %v8144_v43, %v8142_v39  ;;  %v7370_v61 = vcombine.low %v656_v40, %v660_v41 }
 0x231   :  { %3421 = vmatpush1.bf16.msra.mxu0 %v7304_v25  ;;  %3585 = vmatpush1.bf16.msra.mxu1 %v7306_v47  ;;  %v8153_v25 = vsub.s32 3, %v8139_v32  ;;  %v7369_v47 = vcombine.high %v655_v37, %v659_v38 }
 0x232   :  { %3422 = vmatprep.subr.bf16.mxu0 %v7313_v48  ;;  %3586 = vmatprep.subr.bf16.mxu1 %v7315_v49  ;;  %v7371_v48 = vcombine.high %v656_v40, %v660_v41  ;;  %v663_v49 = vld [vmem:[#allocation7 + $0xd90] sm:$0xff] }
 0x233   :  { %v7377_v62 = vcombine.high %v663_v49, %v667_v50 }
 0x235   :  { %3423 = vmatpush1.bf16.msra.mxu0 %v7312_v56  ;;  %3587 = vmatpush1.bf16.msra.mxu1 %v7314_v58  ;;  %v690_v56 = vrot.slane %v8144_v43, %v8147_v44  ;;  %v686_v58 = vrot.slane %v8144_v43, %v8150_v45 }
 0x236   :  { %3424 = vmatprep.subr.bf16.mxu0 %v7321_v59  ;;  %3588 = vmatprep.subr.bf16.mxu1 %v7323_v60  ;;  %v7368_v59 = vcombine.low %v655_v37, %v659_v38  ;;  %v694_v60 = vrot.slane %v8144_v43, %v8153_v25 }
 0x239   :  { %3425 = vmatpush1.bf16.msra.mxu0 %v7320_v1  ;;  %3589 = vmatpush1.bf16.msra.mxu1 %v7322_v2  ;;  %v671_v1 = vld [vmem:[#allocation7 + $0xdd0] sm:$0xff] }
 0x23a   :  { %3435 = vmatprep.subr.bf16.mxu0 %v7329_v3  ;;  %3599 = vmatprep.subr.bf16.mxu1 %v7331_v4  ;;  %v675_v2 = vld [vmem:[#allocation7 + $0xdf0] sm:$0xff] }
 0x23c   :  { %3427 = vmatmul.mubr.bf16.vlgmr.msra.gmra.mrb[4].mxu0 %v8116_v36  ;;  %3591 = vmatmul.mubr.bf16.vlgmr.msra.gmra.mrb[4].mxu1 %v8116_v36  ;;  %v7346_v36 = vcombine.low %v632_v14, %v636_v16 }
 0x23d   :  { %3436 = vmatpush1.bf16.msra.mxu0 %v7328_v9  ;;  %3600 = vmatpush1.bf16.msra.mxu1 %v7330_v10 }
 0x23e   :  { %3437 = vmatprep.subr.bf16.mxu0 %v7337_v11  ;;  %3601 = vmatprep.subr.bf16.mxu1 %v7339_v57  ;;  %v7376_v57 = vcombine.low %v663_v49, %v667_v50 }
 0x23f   :  { %3467 = vmatprep.mubr.bf16.mxu0 %v7893_v52  ;;  %3631 = vmatprep.mubr.bf16.mxu1 %v7893_v52  ;;  %v7361_v52 = vcombine.high %v647_v29, %v651_v30  ;;  %v7668_v29 = vld [vmem:[%s8372_s0 + $0x18] ss:$0 sps:$4 sm:$0xff]   ;;  %v8175_v30 = vsub.s32 4, %v8139_v32 }
 0x241   :  { %3438 = vmatpush1.bf16.msra.mxu0 %v7336_v17  ;;  %3602 = vmatpush1.bf16.msra.mxu1 %v7338_v18  ;;  %v7378_v17 = vcombine.low %v664_v54, %v668_v55  ;;  %v7385_v18 = vcombine.high %v671_v1, %v675_v2 }
 0x242   :  { %3439 = vmatprep.subr.bf16.mxu0 %v7345_v19  ;;  %3603 = vmatprep.subr.bf16.mxu1 %v7347_v20 }
 0x245   :  { %3440 = vmatpush1.bf16.msra.mxu0 %v7344_v26  ;;  %3604 = vmatpush1.bf16.msra.mxu1 %v7346_v36  ;;  %v7384_v36 = vcombine.low %v671_v1, %v675_v2 }
 0x246   :  { %3441 = vmatprep.subr.bf16.mxu0 %v7353_v27  ;;  %3605 = vmatprep.subr.bf16.mxu1 %v7355_v28  ;;  %v7386_v28 = vcombine.low %v672_v6, %v676_v7 }
 0x249   :  { %3442 = vmatpush1.bf16.msra.mxu0 %v7352_v33  ;;  %3606 = vmatpush1.bf16.msra.mxu1 %v7354_v34  ;;  %v8184_v33 = vsub.s32 7, %v8139_v32  ;;  %v698_v34 = vrot.slane %v8144_v43, %v8175_v30 }
 0x24a   :  { %3443 = vmatprep.subr.bf16.mxu0 %v7361_v52  ;;  %3607 = vmatprep.subr.bf16.mxu1 %v7363_v35  ;;  %v706_v52 = vrot.slane %v8144_v43, %v8178_v31  ;;  %v702_v35 = vrot.slane %v8144_v43, %v8181_v15 }
 0x24b   :  { %v710_v37 = vrot.slane %v8144_v43, %v8184_v33 }
 0x24d   :  { %3444 = vmatpush1.bf16.msra.mxu0 %v7360_v42  ;;  %3608 = vmatpush1.bf16.msra.mxu1 %v7362_v46 }
 0x24e   :  { %3445 = vmatprep.subr.bf16.mxu0 %v7369_v47  ;;  %3609 = vmatprep.subr.bf16.mxu1 %v7371_v48 }
 0x24f   :  { %v3141_v63 = vpop.f32.mrb[0].mxu0  ;;  %v3305_v4 = vpop.f32.mrb[0].mxu1 }
 0x250   :  { %v7437_v3 = vadd.f32 %v3141_v63, %v682_v51  ;;  %v3143_v5 = vpop.f32.mrb[1].mxu0  ;;  %v7439_v8 = vadd.f32 %v3305_v4, %v690_v56  ;;  %v3307_v10 = vpop.f32.mrb[1].mxu1 }
 0x251   :  { %v7438_v9 = vadd.f32 %v3143_v5, %v686_v58  ;;  %v3145_v11 = vpop.f32.mrb[2].mxu0  ;;  %3446 = vmatpush1.bf16.msra.mxu0 %v7368_v59  ;;  %v7440_v12 = vadd.f32 %v3307_v10, %v694_v60  ;;  %v3309_v14 = vpop.f32.mrb[2].mxu1  ;;  %3610 = vmatpush1.bf16.msra.mxu1 %v7370_v61 }
 0x252   :  { %v3640_v13 = vmax.f32 %v7437_v3, 0.0  ;;  %v3146_v16 = vpop.f32.mrb[3].mxu0  ;;  %3447 = vmatprep.subr.bf16.mxu0 %v7377_v62  ;;  %v3642_v19 = vmax.f32 %v7439_v8, 0.0  ;;  %v3310_v21 = vpop.f32.mrb[3].mxu1  ;;  %3611 = vmatprep.subr.bf16.mxu1 %v7379_v0 }
 0x253   :  { %v3641_v20 = vmax.f32 %v7438_v9, 0.0  ;;  %v3643_v24 = vmax.f32 %v7440_v12, 0.0 }
 0x254   :  { %v8163_v23 = vpack.c.bf16 %v3640_v13, %v3640_v13  ;;  %v8165_v53 = vpack.c.bf16 %v3642_v19, %v3642_v19 }
 0x255   :  { %v8167_v26 = vpack.c.bf16 %v3641_v20, %v3641_v20  ;;  %3448 = vmatpush1.bf16.msra.mxu0 %v7376_v57  ;;  %v8169_v27 = vpack.c.bf16 %v3643_v24, %v3643_v24  ;;  %3612 = vmatpush1.bf16.msra.mxu1 %v7378_v17 }
 0x256   :  { %3449 = vmatprep.subr.bf16.mxu0 %v7385_v18  ;;  %3613 = vmatprep.subr.bf16.mxu1 %v7387_v22 }
 0x259   :  { %3450 = vmatpush1.bf16.msra.mxu0 %v7384_v36  ;;  %3614 = vmatpush1.bf16.msra.mxu1 %v7386_v28 }
 0x25c   :  { %3468 = vmatmul.mubr.bf16.vlgmr.msra.gmra.mrb[4].mxu0 %v7668_v29  ;;  %3632 = vmatmul.mubr.bf16.vlgmr.msra.gmra.mrb[4].mxu1 %v7668_v29 }
 0x32f   :  { %v3469_v38 = vpop.f32.mrb[4].mxu0  ;;  %v3633_v41 = vpop.f32.mrb[4].mxu1 }
 0x330   :  { %v7441_v40 = vadd.f32 %v3469_v38, %v698_v34  ;;  %v3471_v42 = vpop.f32.mrb[5].mxu0  ;;  %v7443_v46 = vadd.f32 %v3633_v41, %v706_v52  ;;  %v3635_v32 = vpop.f32.mrb[5].mxu1 }
 0x331   :  { %v7442_v47 = vadd.f32 %v3471_v42, %v702_v35  ;;  %v3473_v48 = vpop.f32.mrb[6].mxu0  ;;  %v7444_v50 = vadd.f32 %v3635_v32, %v710_v37  ;;  %v3637_v51 = vpop.f32.mrb[6].mxu1 }
 0x332   :  { %v3644_v49 = vmax.f32 %v7441_v40, 0.0  ;;  %v3474_v54 = vpop.f32.mrb[7].mxu0  ;;  %v3646_v55 = vmax.f32 %v7443_v46, 0.0  ;;  %v3638_v58 = vpop.f32.mrb[7].mxu1 }
 0x333   :  { %v3645_v56 = vmax.f32 %v7442_v47, 0.0  ;;  %v3647_v60 = vmax.f32 %v7444_v50, 0.0 }
 0x334   :  { %v8194_v59 = vpack.c.bf16 %v3644_v49, %v3644_v49  ;;  %v8196_v61 = vpack.c.bf16 %v3646_v55, %v3646_v55 }
 0x335   :  { %v8198_v43 = vpack.c.bf16 %v3645_v56, %v3645_v56  ;;  %v8200_v62 = vpack.c.bf16 %v3647_v60, %v3647_v60 }
 0x336   :  { %7857 = dma.done.wait [#allocation6], 65536 }
 0x337   :  { %7858 = vsyncadd [#allocation6], 4294901760  ;;  %4249 = vmatprep.mubr.bf16.mxu0 %v8167_v26  ;;  %4413 = vmatprep.mubr.bf16.mxu1 %v8167_v26  ;;  %v3664_v63 = vld [vmem:[#allocation2 + $0x8] sm:$0xff]  ;;  %v3666_v0 = vld [vmem:[#allocation2 + $0x18] sm:$0xff] }
 0x338   :  { %v3663_v1 = vld [vmem:[#allocation2] sm:$0xff]  ;;  %4217 = vmatprep.subr.bf16.mxu0 %v3664_v63  ;;  %4381 = vmatprep.subr.bf16.mxu1 %v3666_v0  ;;  %v3665_v2 = vld [vmem:[#allocation2 + $0x10] sm:$0xff]  ;;  %v3672_v3 = vld [vmem:[#allocation2 + $0x48] sm:$0xff] }
 0x339   :  { %v3674_v4 = vld [vmem:[#allocation2 + $0x58] sm:$0xff]  ;;  %4218 = vmatpush1.bf16.msra.mxu0 %v3663_v1  ;;  %4382 = vmatpush1.bf16.msra.mxu1 %v3665_v2  ;;  %v3671_v5 = vld [vmem:[#allocation2 + $0x40] sm:$0xff]  ;;  %v3673_v6 = vld [vmem:[#allocation2 + $0x50] sm:$0xff] }
 0x33a   :  { %4219 = vmatprep.subr.bf16.mxu0 %v3672_v3  ;;  %4383 = vmatprep.subr.bf16.mxu1 %v3674_v4  ;;  %v3680_v7 = vld [vmem:[#allocation2 + $0x88] sm:$0xff]  ;;  %v3682_v8 = vld [vmem:[#allocation2 + $0x98] sm:$0xff]  ;;  %v3679_v9 = vld [vmem:[#allocation2 + $0x80] sm:$0xff] }
 0x33b   :  { %v3681_v10 = vld [vmem:[#allocation2 + $0x90] sm:$0xff]  ;;  %v3688_v11 = vld [vmem:[#allocation2 + $0xc8] sm:$0xff]  ;;  %v3690_v57 = vld [vmem:[#allocation2 + $0xd8] sm:$0xff] }
 0x33c   :  { %v3687_v13 = vld [vmem:[#allocation2 + $0xc0] sm:$0xff]  ;;  %v3689_v12 = vld [vmem:[#allocation2 + $0xd0] sm:$0xff]  ;;  %v3696_v14 = vld [vmem:[#allocation2 + $0x108] sm:$0xff] }
 0x33d   :  { %4220 = vmatpush1.bf16.msra.mxu0 %v3671_v5  ;;  %4384 = vmatpush1.bf16.msra.mxu1 %v3673_v6  ;;  %v3698_v16 = vld [vmem:[#allocation2 + $0x118] sm:$0xff]  ;;  %v3695_v17 = vld [vmem:[#allocation2 + $0x100] sm:$0xff]  ;;  %v3697_v18 = vld [vmem:[#allocation2 + $0x110] sm:$0xff] }
 0x33e   :  { %4221 = vmatprep.subr.bf16.mxu0 %v3680_v7  ;;  %4385 = vmatprep.subr.bf16.mxu1 %v3682_v8  ;;  %v3704_v19 = vld [vmem:[#allocation2 + $0x148] sm:$0xff]  ;;  %v3706_v20 = vld [vmem:[#allocation2 + $0x158] sm:$0xff]  ;;  %v3703_v21 = vld [vmem:[#allocation2 + $0x140] sm:$0xff] }
 0x33f   :  { %v3705_v22 = vld [vmem:[#allocation2 + $0x150] sm:$0xff]  ;;  %v3712_v24 = vld [vmem:[#allocation2 + $0x188] sm:$0xff]  ;;  %v3714_v36 = vld [vmem:[#allocation2 + $0x198] sm:$0xff] }
 0x340   :  { %v3711_v28 = vld [vmem:[#allocation2 + $0x180] sm:$0xff]  ;;  %v3713_v29 = vld [vmem:[#allocation2 + $0x190] sm:$0xff]  ;;  %v3720_v34 = vld [vmem:[#allocation2 + $0x1c8] sm:$0xff] }
 0x341   :  { %4222 = vmatpush1.bf16.msra.mxu0 %v3679_v9  ;;  %4386 = vmatpush1.bf16.msra.mxu1 %v3681_v10  ;;  %v3722_v52 = vld [vmem:[#allocation2 + $0x1d8] sm:$0xff]  ;;  %v3719_v35 = vld [vmem:[#allocation2 + $0x1c0] sm:$0xff]  ;;  %v3721_v37 = vld [vmem:[#allocation2 + $0x1d0] sm:$0xff] }
 0x342   :  { %4223 = vmatprep.subr.bf16.mxu0 %v3688_v11  ;;  %4387 = vmatprep.subr.bf16.mxu1 %v3690_v57  ;;  %v3728_v38 = vld [vmem:[#allocation2 + $0x208] sm:$0xff]  ;;  %v3730_v40 = vld [vmem:[#allocation2 + $0x218] sm:$0xff]  ;;  %v3727_v41 = vld [vmem:[#allocation2 + $0x200] sm:$0xff] }
 0x343   :  { %v3729_v42 = vld [vmem:[#allocation2 + $0x210] sm:$0xff]  ;;  %v3736_v46 = vld [vmem:[#allocation2 + $0x248] sm:$0xff]  ;;  %v3738_v47 = vld [vmem:[#allocation2 + $0x258] sm:$0xff] }
 0x344   :  { %v3735_v32 = vld [vmem:[#allocation2 + $0x240] sm:$0xff]  ;;  %v3737_v48 = vld [vmem:[#allocation2 + $0x250] sm:$0xff]  ;;  %v3744_v49 = vld [vmem:[#allocation2 + $0x288] sm:$0xff] }
 0x345   :  { %4224 = vmatpush1.bf16.msra.mxu0 %v3687_v13  ;;  %4388 = vmatpush1.bf16.msra.mxu1 %v3689_v12  ;;  %v3746_v50 = vld [vmem:[#allocation2 + $0x298] sm:$0xff]  ;;  %v3743_v51 = vld [vmem:[#allocation2 + $0x280] sm:$0xff]  ;;  %v3745_v54 = vld [vmem:[#allocation2 + $0x290] sm:$0xff] }
 0x346   :  { %4225 = vmatprep.subr.bf16.mxu0 %v3696_v14  ;;  %4389 = vmatprep.subr.bf16.mxu1 %v3698_v16  ;;  %v3752_v55 = vld [vmem:[#allocation2 + $0x2c8] sm:$0xff]  ;;  %v3754_v56 = vld [vmem:[#allocation2 + $0x2d8] sm:$0xff]  ;;  %v3751_v58 = vld [vmem:[#allocation2 + $0x2c0] sm:$0xff] }
 0x347   :  { %v3753_v60 = vld [vmem:[#allocation2 + $0x2d0] sm:$0xff]  ;;  %v3760_v63 = vld [vmem:[#allocation2 + $0x308] sm:$0xff]  ;;  %v3762_v0 = vld [vmem:[#allocation2 + $0x318] sm:$0xff] }
 0x348   :  { %v3759_v1 = vld [vmem:[#allocation2 + $0x300] sm:$0xff]  ;;  %v3761_v2 = vld [vmem:[#allocation2 + $0x310] sm:$0xff]  ;;  %v3768_v3 = vld [vmem:[#allocation2 + $0x348] sm:$0xff] }
 0x349   :  { %4226 = vmatpush1.bf16.msra.mxu0 %v3695_v17  ;;  %4390 = vmatpush1.bf16.msra.mxu1 %v3697_v18  ;;  %v3770_v4 = vld [vmem:[#allocation2 + $0x358] sm:$0xff]  ;;  %v3767_v5 = vld [vmem:[#allocation2 + $0x340] sm:$0xff]  ;;  %v3769_v6 = vld [vmem:[#allocation2 + $0x350] sm:$0xff] }
 0x34a   :  { %4227 = vmatprep.subr.bf16.mxu0 %v3704_v19  ;;  %4391 = vmatprep.subr.bf16.mxu1 %v3706_v20  ;;  %v3776_v7 = vld [vmem:[#allocation2 + $0x388] sm:$0xff]  ;;  %v3778_v8 = vld [vmem:[#allocation2 + $0x398] sm:$0xff]  ;;  %v3775_v9 = vld [vmem:[#allocation2 + $0x380] sm:$0xff] }
 0x34b   :  { %v3777_v10 = vld [vmem:[#allocation2 + $0x390] sm:$0xff]  ;;  %v3784_v11 = vld [vmem:[#allocation2 + $0x3c8] sm:$0xff]  ;;  %v3786_v57 = vld [vmem:[#allocation2 + $0x3d8] sm:$0xff] }
 0x34c   :  { %v3783_v13 = vld [vmem:[#allocation2 + $0x3c0] sm:$0xff]  ;;  %v3785_v12 = vld [vmem:[#allocation2 + $0x3d0] sm:$0xff]  ;;  %v3792_v14 = vld [vmem:[#allocation2 + $0x408] sm:$0xff] }
 0x34d   :  { %4228 = vmatpush1.bf16.msra.mxu0 %v3703_v21  ;;  %4392 = vmatpush1.bf16.msra.mxu1 %v3705_v22  ;;  %v3794_v16 = vld [vmem:[#allocation2 + $0x418] sm:$0xff]  ;;  %v3791_v17 = vld [vmem:[#allocation2 + $0x400] sm:$0xff]  ;;  %v3793_v18 = vld [vmem:[#allocation2 + $0x410] sm:$0xff] }
 0x34e   :  { %4229 = vmatprep.subr.bf16.mxu0 %v3712_v24  ;;  %4393 = vmatprep.subr.bf16.mxu1 %v3714_v36  ;;  %v3800_v19 = vld [vmem:[#allocation2 + $0x448] sm:$0xff]  ;;  %v3802_v20 = vld [vmem:[#allocation2 + $0x458] sm:$0xff]  ;;  %v3799_v21 = vld [vmem:[#allocation2 + $0x440] sm:$0xff] }
 0x34f   :  { %v3801_v22 = vld [vmem:[#allocation2 + $0x450] sm:$0xff]  ;;  %v3808_v24 = vld [vmem:[#allocation2 + $0x488] sm:$0xff]  ;;  %v3810_v36 = vld [vmem:[#allocation2 + $0x498] sm:$0xff] }
 0x351   :  { %4230 = vmatpush1.bf16.msra.mxu0 %v3711_v28  ;;  %4394 = vmatpush1.bf16.msra.mxu1 %v3713_v29  ;;  %v3807_v28 = vld [vmem:[#allocation2 + $0x480] sm:$0xff]  ;;  %v3809_v29 = vld [vmem:[#allocation2 + $0x490] sm:$0xff] }
 0x352   :  { %4231 = vmatprep.subr.bf16.mxu0 %v3720_v34  ;;  %4395 = vmatprep.subr.bf16.mxu1 %v3722_v52  ;;  %v3816_v34 = vld [vmem:[#allocation2 + $0x4c8] sm:$0xff]  ;;  %v3818_v52 = vld [vmem:[#allocation2 + $0x4d8] sm:$0xff] }
 0x355   :  { %4232 = vmatpush1.bf16.msra.mxu0 %v3719_v35  ;;  %4396 = vmatpush1.bf16.msra.mxu1 %v3721_v37  ;;  %v3815_v35 = vld [vmem:[#allocation2 + $0x4c0] sm:$0xff]  ;;  %v3817_v37 = vld [vmem:[#allocation2 + $0x4d0] sm:$0xff] }
 0x356   :  { %4233 = vmatprep.subr.bf16.mxu0 %v3728_v38  ;;  %4397 = vmatprep.subr.bf16.mxu1 %v3730_v40  ;;  %v3824_v38 = vld [vmem:[#allocation2 + $0x508] sm:$0xff]  ;;  %v3826_v40 = vld [vmem:[#allocation2 + $0x518] sm:$0xff] }
 0x359   :  { %4234 = vmatpush1.bf16.msra.mxu0 %v3727_v41  ;;  %4398 = vmatpush1.bf16.msra.mxu1 %v3729_v42  ;;  %v3823_v41 = vld [vmem:[#allocation2 + $0x500] sm:$0xff]  ;;  %v3825_v42 = vld [vmem:[#allocation2 + $0x510] sm:$0xff] }
 0x35a   :  { %4235 = vmatprep.subr.bf16.mxu0 %v3736_v46  ;;  %4399 = vmatprep.subr.bf16.mxu1 %v3738_v47  ;;  %v3832_v46 = vld [vmem:[#allocation2 + $0x548] sm:$0xff]  ;;  %v3834_v47 = vld [vmem:[#allocation2 + $0x558] sm:$0xff] }
 0x35d   :  { %4236 = vmatpush1.bf16.msra.mxu0 %v3735_v32  ;;  %4400 = vmatpush1.bf16.msra.mxu1 %v3737_v48  ;;  %v3831_v32 = vld [vmem:[#allocation2 + $0x540] sm:$0xff]  ;;  %v3833_v48 = vld [vmem:[#allocation2 + $0x550] sm:$0xff] }
 0x35e   :  { %4237 = vmatprep.subr.bf16.mxu0 %v3744_v49  ;;  %4401 = vmatprep.subr.bf16.mxu1 %v3746_v50  ;;  %v3840_v49 = vld [vmem:[#allocation2 + $0x588] sm:$0xff]  ;;  %v3842_v50 = vld [vmem:[#allocation2 + $0x598] sm:$0xff] }
 0x361   :  { %4238 = vmatpush1.bf16.msra.mxu0 %v3743_v51  ;;  %4402 = vmatpush1.bf16.msra.mxu1 %v3745_v54  ;;  %v3839_v51 = vld [vmem:[#allocation2 + $0x580] sm:$0xff]  ;;  %v3841_v54 = vld [vmem:[#allocation2 + $0x590] sm:$0xff] }
 0x362   :  { %4239 = vmatprep.subr.bf16.mxu0 %v3752_v55  ;;  %4403 = vmatprep.subr.bf16.mxu1 %v3754_v56  ;;  %v3848_v55 = vld [vmem:[#allocation2 + $0x5c8] sm:$0xff]  ;;  %v3850_v56 = vld [vmem:[#allocation2 + $0x5d8] sm:$0xff] }
 0x365   :  { %4240 = vmatpush1.bf16.msra.mxu0 %v3751_v58  ;;  %4404 = vmatpush1.bf16.msra.mxu1 %v3753_v60  ;;  %v3847_v58 = vld [vmem:[#allocation2 + $0x5c0] sm:$0xff]  ;;  %v3849_v60 = vld [vmem:[#allocation2 + $0x5d0] sm:$0xff] }
 0x366   :  { %4241 = vmatprep.subr.bf16.mxu0 %v3760_v63  ;;  %4405 = vmatprep.subr.bf16.mxu1 %v3762_v0  ;;  %v3856_v63 = vld [vmem:[#allocation2 + $0x608] sm:$0xff]  ;;  %v3858_v0 = vld [vmem:[#allocation2 + $0x618] sm:$0xff] }
 0x369   :  { %4242 = vmatpush1.bf16.msra.mxu0 %v3759_v1  ;;  %4406 = vmatpush1.bf16.msra.mxu1 %v3761_v2  ;;  %v3855_v1 = vld [vmem:[#allocation2 + $0x600] sm:$0xff]  ;;  %v3857_v2 = vld [vmem:[#allocation2 + $0x610] sm:$0xff] }
 0x36a   :  { %4243 = vmatprep.subr.bf16.mxu0 %v3768_v3  ;;  %4407 = vmatprep.subr.bf16.mxu1 %v3770_v4  ;;  %v3864_v3 = vld [vmem:[#allocation2 + $0x648] sm:$0xff]  ;;  %v3866_v4 = vld [vmem:[#allocation2 + $0x658] sm:$0xff] }
 0x36d   :  { %4244 = vmatpush1.bf16.msra.mxu0 %v3767_v5  ;;  %4408 = vmatpush1.bf16.msra.mxu1 %v3769_v6  ;;  %v3863_v5 = vld [vmem:[#allocation2 + $0x640] sm:$0xff]  ;;  %v3865_v6 = vld [vmem:[#allocation2 + $0x650] sm:$0xff] }
 0x36e   :  { %4245 = vmatprep.subr.bf16.mxu0 %v3776_v7  ;;  %4409 = vmatprep.subr.bf16.mxu1 %v3778_v8  ;;  %v3872_v7 = vld [vmem:[#allocation2 + $0x688] sm:$0xff]  ;;  %v3874_v8 = vld [vmem:[#allocation2 + $0x698] sm:$0xff] }
 0x371   :  { %4246 = vmatpush1.bf16.msra.mxu0 %v3775_v9  ;;  %4410 = vmatpush1.bf16.msra.mxu1 %v3777_v10  ;;  %v3871_v9 = vld [vmem:[#allocation2 + $0x680] sm:$0xff]  ;;  %v3873_v10 = vld [vmem:[#allocation2 + $0x690] sm:$0xff] }
 0x372   :  { %4247 = vmatprep.subr.bf16.mxu0 %v3784_v11  ;;  %4411 = vmatprep.subr.bf16.mxu1 %v3786_v57  ;;  %v3880_v11 = vld [vmem:[#allocation2 + $0x6c8] sm:$0xff]  ;;  %v3882_v57 = vld [vmem:[#allocation2 + $0x6d8] sm:$0xff] }
 0x375   :  { %4248 = vmatpush1.bf16.msra.mxu0 %v3783_v13  ;;  %4412 = vmatpush1.bf16.msra.mxu1 %v3785_v12  ;;  %v3879_v13 = vld [vmem:[#allocation2 + $0x6c0] sm:$0xff]  ;;  %v3881_v12 = vld [vmem:[#allocation2 + $0x6d0] sm:$0xff] }
 0x376   :  { %4258 = vmatprep.subr.bf16.mxu0 %v3792_v14  ;;  %4422 = vmatprep.subr.bf16.mxu1 %v3794_v16  ;;  %v3888_v14 = vld [vmem:[#allocation2 + $0x708] sm:$0xff]  ;;  %v3890_v16 = vld [vmem:[#allocation2 + $0x718] sm:$0xff] }
 0x378   :  { %4250 = vmatmul.mubr.bf16.vlgmr.msra.gmra.mrb[8].mxu0 %v8163_v23  ;;  %4414 = vmatmul.mubr.bf16.vlgmr.msra.gmra.mrb[8].mxu1 %v8163_v23 }
 0x379   :  { %4259 = vmatpush1.bf16.msra.mxu0 %v3791_v17  ;;  %4423 = vmatpush1.bf16.msra.mxu1 %v3793_v18  ;;  %v3887_v17 = vld [vmem:[#allocation2 + $0x700] sm:$0xff]  ;;  %v3889_v18 = vld [vmem:[#allocation2 + $0x710] sm:$0xff] }
 0x37a   :  { %4260 = vmatprep.subr.bf16.mxu0 %v3800_v19  ;;  %4424 = vmatprep.subr.bf16.mxu1 %v3802_v20  ;;  %v3896_v19 = vld [vmem:[#allocation2 + $0x748] sm:$0xff]  ;;  %v3898_v20 = vld [vmem:[#allocation2 + $0x758] sm:$0xff] }
 0x37b   :  { %4290 = vmatprep.mubr.bf16.mxu0 %v8169_v27  ;;  %4454 = vmatprep.mubr.bf16.mxu1 %v8169_v27 }
 0x37d   :  { %4261 = vmatpush1.bf16.msra.mxu0 %v3799_v21  ;;  %4425 = vmatpush1.bf16.msra.mxu1 %v3801_v22  ;;  %v3895_v21 = vld [vmem:[#allocation2 + $0x740] sm:$0xff]  ;;  %v3897_v22 = vld [vmem:[#allocation2 + $0x750] sm:$0xff] }
 0x37e   :  { %4262 = vmatprep.subr.bf16.mxu0 %v3808_v24  ;;  %4426 = vmatprep.subr.bf16.mxu1 %v3810_v36  ;;  %v3904_v24 = vld [vmem:[#allocation2 + $0x788] sm:$0xff]  ;;  %v3906_v36 = vld [vmem:[#allocation2 + $0x798] sm:$0xff] }
 0x381   :  { %4263 = vmatpush1.bf16.msra.mxu0 %v3807_v28  ;;  %4427 = vmatpush1.bf16.msra.mxu1 %v3809_v29  ;;  %v3903_v28 = vld [vmem:[#allocation2 + $0x780] sm:$0xff]  ;;  %v3905_v29 = vld [vmem:[#allocation2 + $0x790] sm:$0xff] }
 0x382   :  { %4264 = vmatprep.subr.bf16.mxu0 %v3816_v34  ;;  %4428 = vmatprep.subr.bf16.mxu1 %v3818_v52  ;;  %v3912_v34 = vld [vmem:[#allocation2 + $0x7c8] sm:$0xff]  ;;  %v3914_v52 = vld [vmem:[#allocation2 + $0x7d8] sm:$0xff] }
 0x385   :  { %4265 = vmatpush1.bf16.msra.mxu0 %v3815_v35  ;;  %4429 = vmatpush1.bf16.msra.mxu1 %v3817_v37  ;;  %v3911_v35 = vld [vmem:[#allocation2 + $0x7c0] sm:$0xff]  ;;  %v3913_v37 = vld [vmem:[#allocation2 + $0x7d0] sm:$0xff] }
 0x386   :  { %4266 = vmatprep.subr.bf16.mxu0 %v3824_v38  ;;  %4430 = vmatprep.subr.bf16.mxu1 %v3826_v40  ;;  %v3920_v38 = vld [vmem:[#allocation2 + $0x808] sm:$0xff]  ;;  %v3922_v40 = vld [vmem:[#allocation2 + $0x818] sm:$0xff] }
 0x389   :  { %4267 = vmatpush1.bf16.msra.mxu0 %v3823_v41  ;;  %4431 = vmatpush1.bf16.msra.mxu1 %v3825_v42  ;;  %v3919_v41 = vld [vmem:[#allocation2 + $0x800] sm:$0xff]  ;;  %v3921_v42 = vld [vmem:[#allocation2 + $0x810] sm:$0xff] }
 0x38a   :  { %4268 = vmatprep.subr.bf16.mxu0 %v3832_v46  ;;  %4432 = vmatprep.subr.bf16.mxu1 %v3834_v47  ;;  %v3928_v46 = vld [vmem:[#allocation2 + $0x848] sm:$0xff]  ;;  %v3930_v47 = vld [vmem:[#allocation2 + $0x858] sm:$0xff] }
 0x38d   :  { %4269 = vmatpush1.bf16.msra.mxu0 %v3831_v32  ;;  %4433 = vmatpush1.bf16.msra.mxu1 %v3833_v48  ;;  %v3927_v32 = vld [vmem:[#allocation2 + $0x840] sm:$0xff]  ;;  %v3929_v48 = vld [vmem:[#allocation2 + $0x850] sm:$0xff] }
 0x38e   :  { %4270 = vmatprep.subr.bf16.mxu0 %v3840_v49  ;;  %4434 = vmatprep.subr.bf16.mxu1 %v3842_v50  ;;  %v3936_v49 = vld [vmem:[#allocation2 + $0x888] sm:$0xff]  ;;  %v3938_v50 = vld [vmem:[#allocation2 + $0x898] sm:$0xff] }
 0x391   :  { %4271 = vmatpush1.bf16.msra.mxu0 %v3839_v51  ;;  %4435 = vmatpush1.bf16.msra.mxu1 %v3841_v54  ;;  %v3935_v51 = vld [vmem:[#allocation2 + $0x880] sm:$0xff]  ;;  %v3937_v54 = vld [vmem:[#allocation2 + $0x890] sm:$0xff] }
 0x392   :  { %4272 = vmatprep.subr.bf16.mxu0 %v3848_v55  ;;  %4436 = vmatprep.subr.bf16.mxu1 %v3850_v56  ;;  %v3944_v55 = vld [vmem:[#allocation2 + $0x8c8] sm:$0xff]  ;;  %v3946_v56 = vld [vmem:[#allocation2 + $0x8d8] sm:$0xff] }
 0x395   :  { %4273 = vmatpush1.bf16.msra.mxu0 %v3847_v58  ;;  %4437 = vmatpush1.bf16.msra.mxu1 %v3849_v60  ;;  %v3943_v58 = vld [vmem:[#allocation2 + $0x8c0] sm:$0xff]  ;;  %v3945_v60 = vld [vmem:[#allocation2 + $0x8d0] sm:$0xff] }
 0x396   :  { %4274 = vmatprep.subr.bf16.mxu0 %v3856_v63  ;;  %4438 = vmatprep.subr.bf16.mxu1 %v3858_v0  ;;  %v3952_v63 = vld [vmem:[#allocation2 + $0x908] sm:$0xff]  ;;  %v3954_v0 = vld [vmem:[#allocation2 + $0x918] sm:$0xff] }
 0x399   :  { %4275 = vmatpush1.bf16.msra.mxu0 %v3855_v1  ;;  %4439 = vmatpush1.bf16.msra.mxu1 %v3857_v2  ;;  %v3951_v1 = vld [vmem:[#allocation2 + $0x900] sm:$0xff]  ;;  %v3953_v2 = vld [vmem:[#allocation2 + $0x910] sm:$0xff] }
 0x39a   :  { %4276 = vmatprep.subr.bf16.mxu0 %v3864_v3  ;;  %4440 = vmatprep.subr.bf16.mxu1 %v3866_v4  ;;  %v3960_v3 = vld [vmem:[#allocation2 + $0x948] sm:$0xff]  ;;  %v3962_v4 = vld [vmem:[#allocation2 + $0x958] sm:$0xff] }
 0x39d   :  { %4277 = vmatpush1.bf16.msra.mxu0 %v3863_v5  ;;  %4441 = vmatpush1.bf16.msra.mxu1 %v3865_v6  ;;  %v3959_v5 = vld [vmem:[#allocation2 + $0x940] sm:$0xff]  ;;  %v3961_v6 = vld [vmem:[#allocation2 + $0x950] sm:$0xff] }
 0x39e   :  { %4278 = vmatprep.subr.bf16.mxu0 %v3872_v7  ;;  %4442 = vmatprep.subr.bf16.mxu1 %v3874_v8  ;;  %v3968_v7 = vld [vmem:[#allocation2 + $0x988] sm:$0xff]  ;;  %v3970_v8 = vld [vmem:[#allocation2 + $0x998] sm:$0xff] }
 0x3a1   :  { %4279 = vmatpush1.bf16.msra.mxu0 %v3871_v9  ;;  %4443 = vmatpush1.bf16.msra.mxu1 %v3873_v10  ;;  %v3967_v9 = vld [vmem:[#allocation2 + $0x980] sm:$0xff]  ;;  %v3969_v10 = vld [vmem:[#allocation2 + $0x990] sm:$0xff] }
 0x3a2   :  { %4280 = vmatprep.subr.bf16.mxu0 %v3880_v11  ;;  %4444 = vmatprep.subr.bf16.mxu1 %v3882_v57  ;;  %v3976_v11 = vld [vmem:[#allocation2 + $0x9c8] sm:$0xff]  ;;  %v3978_v57 = vld [vmem:[#allocation2 + $0x9d8] sm:$0xff] }
 0x3a5   :  { %4281 = vmatpush1.bf16.msra.mxu0 %v3879_v13  ;;  %4445 = vmatpush1.bf16.msra.mxu1 %v3881_v12  ;;  %v3975_v13 = vld [vmem:[#allocation2 + $0x9c0] sm:$0xff]  ;;  %v3977_v12 = vld [vmem:[#allocation2 + $0x9d0] sm:$0xff] }
 0x3a6   :  { %4282 = vmatprep.subr.bf16.mxu0 %v3888_v14  ;;  %4446 = vmatprep.subr.bf16.mxu1 %v3890_v16  ;;  %v3984_v14 = vld [vmem:[#allocation2 + $0xa08] sm:$0xff]  ;;  %v3986_v16 = vld [vmem:[#allocation2 + $0xa18] sm:$0xff] }
 0x3a9   :  { %4283 = vmatpush1.bf16.msra.mxu0 %v3887_v17  ;;  %4447 = vmatpush1.bf16.msra.mxu1 %v3889_v18  ;;  %v3983_v17 = vld [vmem:[#allocation2 + $0xa00] sm:$0xff]  ;;  %v3985_v18 = vld [vmem:[#allocation2 + $0xa10] sm:$0xff] }
 0x3aa   :  { %4284 = vmatprep.subr.bf16.mxu0 %v3896_v19  ;;  %4448 = vmatprep.subr.bf16.mxu1 %v3898_v20  ;;  %v3992_v19 = vld [vmem:[#allocation2 + $0xa48] sm:$0xff]  ;;  %v3994_v20 = vld [vmem:[#allocation2 + $0xa58] sm:$0xff] }
 0x3ad   :  { %4285 = vmatpush1.bf16.msra.mxu0 %v3895_v21  ;;  %4449 = vmatpush1.bf16.msra.mxu1 %v3897_v22  ;;  %v3991_v21 = vld [vmem:[#allocation2 + $0xa40] sm:$0xff]  ;;  %v3993_v22 = vld [vmem:[#allocation2 + $0xa50] sm:$0xff] }
 0x3ae   :  { %4286 = vmatprep.subr.bf16.mxu0 %v3904_v24  ;;  %4450 = vmatprep.subr.bf16.mxu1 %v3906_v36  ;;  %v4000_v24 = vld [vmem:[#allocation2 + $0xa88] sm:$0xff]  ;;  %v4002_v36 = vld [vmem:[#allocation2 + $0xa98] sm:$0xff] }
 0x3b1   :  { %4287 = vmatpush1.bf16.msra.mxu0 %v3903_v28  ;;  %4451 = vmatpush1.bf16.msra.mxu1 %v3905_v29  ;;  %v3999_v28 = vld [vmem:[#allocation2 + $0xa80] sm:$0xff]  ;;  %v4001_v29 = vld [vmem:[#allocation2 + $0xa90] sm:$0xff] }
 0x3b2   :  { %4288 = vmatprep.subr.bf16.mxu0 %v3912_v34  ;;  %4452 = vmatprep.subr.bf16.mxu1 %v3914_v52  ;;  %v4008_v34 = vld [vmem:[#allocation2 + $0xac8] sm:$0xff]  ;;  %v4010_v52 = vld [vmem:[#allocation2 + $0xad8] sm:$0xff] }
 0x3b5   :  { %4289 = vmatpush1.bf16.msra.mxu0 %v3911_v35  ;;  %4453 = vmatpush1.bf16.msra.mxu1 %v3913_v37  ;;  %v4007_v35 = vld [vmem:[#allocation2 + $0xac0] sm:$0xff]  ;;  %v4009_v37 = vld [vmem:[#allocation2 + $0xad0] sm:$0xff] }
 0x3b6   :  { %4299 = vmatprep.subr.bf16.mxu0 %v3920_v38  ;;  %4463 = vmatprep.subr.bf16.mxu1 %v3922_v40  ;;  %v4016_v38 = vld [vmem:[#allocation2 + $0xb08] sm:$0xff]  ;;  %v4018_v40 = vld [vmem:[#allocation2 + $0xb18] sm:$0xff] }
 0x3b8   :  { %4291 = vmatmul.mubr.bf16.vlgmr.msra.gmra.mrb[8].mxu0 %v8165_v53  ;;  %4455 = vmatmul.mubr.bf16.vlgmr.msra.gmra.mrb[8].mxu1 %v8165_v53 }
 0x3b9   :  { %4300 = vmatpush1.bf16.msra.mxu0 %v3919_v41  ;;  %4464 = vmatpush1.bf16.msra.mxu1 %v3921_v42  ;;  %v4015_v41 = vld [vmem:[#allocation2 + $0xb00] sm:$0xff]  ;;  %v4017_v42 = vld [vmem:[#allocation2 + $0xb10] sm:$0xff] }
 0x3ba   :  { %4301 = vmatprep.subr.bf16.mxu0 %v3928_v46  ;;  %4465 = vmatprep.subr.bf16.mxu1 %v3930_v47  ;;  %v4024_v46 = vld [vmem:[#allocation2 + $0xb48] sm:$0xff]  ;;  %v4026_v47 = vld [vmem:[#allocation2 + $0xb58] sm:$0xff] }
 0x3bb   :  { %4331 = vmatprep.mubr.bf16.mxu0 %v8198_v43  ;;  %4495 = vmatprep.mubr.bf16.mxu1 %v8198_v43 }
 0x3bd   :  { %4302 = vmatpush1.bf16.msra.mxu0 %v3927_v32  ;;  %4466 = vmatpush1.bf16.msra.mxu1 %v3929_v48  ;;  %v4023_v32 = vld [vmem:[#allocation2 + $0xb40] sm:$0xff]  ;;  %v4025_v48 = vld [vmem:[#allocation2 + $0xb50] sm:$0xff] }
 0x3be   :  { %4303 = vmatprep.subr.bf16.mxu0 %v3936_v49  ;;  %4467 = vmatprep.subr.bf16.mxu1 %v3938_v50  ;;  %v4032_v49 = vld [vmem:[#allocation2 + $0xb88] sm:$0xff]  ;;  %v4034_v50 = vld [vmem:[#allocation2 + $0xb98] sm:$0xff] }
 0x3c1   :  { %4304 = vmatpush1.bf16.msra.mxu0 %v3935_v51  ;;  %4468 = vmatpush1.bf16.msra.mxu1 %v3937_v54  ;;  %v4031_v51 = vld [vmem:[#allocation2 + $0xb80] sm:$0xff]  ;;  %v4033_v54 = vld [vmem:[#allocation2 + $0xb90] sm:$0xff] }
 0x3c2   :  { %4305 = vmatprep.subr.bf16.mxu0 %v3944_v55  ;;  %4469 = vmatprep.subr.bf16.mxu1 %v3946_v56  ;;  %v4040_v55 = vld [vmem:[#allocation2 + $0xbc8] sm:$0xff]  ;;  %v4042_v56 = vld [vmem:[#allocation2 + $0xbd8] sm:$0xff] }
 0x3c5   :  { %4306 = vmatpush1.bf16.msra.mxu0 %v3943_v58  ;;  %4470 = vmatpush1.bf16.msra.mxu1 %v3945_v60  ;;  %v4039_v58 = vld [vmem:[#allocation2 + $0xbc0] sm:$0xff]  ;;  %v4041_v60 = vld [vmem:[#allocation2 + $0xbd0] sm:$0xff] }
 0x3c6   :  { %4307 = vmatprep.subr.bf16.mxu0 %v3952_v63  ;;  %4471 = vmatprep.subr.bf16.mxu1 %v3954_v0  ;;  %v4048_v63 = vld [vmem:[#allocation2 + $0xc08] sm:$0xff]  ;;  %v4050_v0 = vld [vmem:[#allocation2 + $0xc18] sm:$0xff] }
 0x3c9   :  { %4308 = vmatpush1.bf16.msra.mxu0 %v3951_v1  ;;  %4472 = vmatpush1.bf16.msra.mxu1 %v3953_v2  ;;  %v4047_v1 = vld [vmem:[#allocation2 + $0xc00] sm:$0xff]  ;;  %v4049_v2 = vld [vmem:[#allocation2 + $0xc10] sm:$0xff] }
 0x3ca   :  { %4309 = vmatprep.subr.bf16.mxu0 %v3960_v3  ;;  %4473 = vmatprep.subr.bf16.mxu1 %v3962_v4  ;;  %v4056_v3 = vld [vmem:[#allocation2 + $0xc48] sm:$0xff]  ;;  %v4058_v4 = vld [vmem:[#allocation2 + $0xc58] sm:$0xff] }
 0x3cd   :  { %4310 = vmatpush1.bf16.msra.mxu0 %v3959_v5  ;;  %4474 = vmatpush1.bf16.msra.mxu1 %v3961_v6  ;;  %v4055_v5 = vld [vmem:[#allocation2 + $0xc40] sm:$0xff]  ;;  %v4057_v6 = vld [vmem:[#allocation2 + $0xc50] sm:$0xff] }
 0x3ce   :  { %4311 = vmatprep.subr.bf16.mxu0 %v3968_v7  ;;  %4475 = vmatprep.subr.bf16.mxu1 %v3970_v8  ;;  %v4064_v7 = vld [vmem:[#allocation2 + $0xc88] sm:$0xff]  ;;  %v4066_v8 = vld [vmem:[#allocation2 + $0xc98] sm:$0xff] }
 0x3d1   :  { %4312 = vmatpush1.bf16.msra.mxu0 %v3967_v9  ;;  %4476 = vmatpush1.bf16.msra.mxu1 %v3969_v10  ;;  %v4063_v9 = vld [vmem:[#allocation2 + $0xc80] sm:$0xff]  ;;  %v4065_v10 = vld [vmem:[#allocation2 + $0xc90] sm:$0xff] }
 0x3d2   :  { %4313 = vmatprep.subr.bf16.mxu0 %v3976_v11  ;;  %4477 = vmatprep.subr.bf16.mxu1 %v3978_v57  ;;  %v4072_v11 = vld [vmem:[#allocation2 + $0xcc8] sm:$0xff]  ;;  %v4074_v57 = vld [vmem:[#allocation2 + $0xcd8] sm:$0xff] }
 0x3d5   :  { %4314 = vmatpush1.bf16.msra.mxu0 %v3975_v13  ;;  %4478 = vmatpush1.bf16.msra.mxu1 %v3977_v12  ;;  %v4071_v13 = vld [vmem:[#allocation2 + $0xcc0] sm:$0xff]  ;;  %v4073_v12 = vld [vmem:[#allocation2 + $0xcd0] sm:$0xff] }
 0x3d6   :  { %4315 = vmatprep.subr.bf16.mxu0 %v3984_v14  ;;  %4479 = vmatprep.subr.bf16.mxu1 %v3986_v16  ;;  %v4080_v14 = vld [vmem:[#allocation2 + $0xd08] sm:$0xff]  ;;  %v4082_v16 = vld [vmem:[#allocation2 + $0xd18] sm:$0xff] }
 0x3d9   :  { %4316 = vmatpush1.bf16.msra.mxu0 %v3983_v17  ;;  %4480 = vmatpush1.bf16.msra.mxu1 %v3985_v18  ;;  %v4079_v17 = vld [vmem:[#allocation2 + $0xd00] sm:$0xff]  ;;  %v4081_v18 = vld [vmem:[#allocation2 + $0xd10] sm:$0xff] }
 0x3da   :  { %4317 = vmatprep.subr.bf16.mxu0 %v3992_v19  ;;  %4481 = vmatprep.subr.bf16.mxu1 %v3994_v20  ;;  %v4088_v19 = vld [vmem:[#allocation2 + $0xd48] sm:$0xff]  ;;  %v4090_v20 = vld [vmem:[#allocation2 + $0xd58] sm:$0xff] }
 0x3dd   :  { %4318 = vmatpush1.bf16.msra.mxu0 %v3991_v21  ;;  %4482 = vmatpush1.bf16.msra.mxu1 %v3993_v22  ;;  %v4087_v21 = vld [vmem:[#allocation2 + $0xd40] sm:$0xff]  ;;  %v4089_v22 = vld [vmem:[#allocation2 + $0xd50] sm:$0xff] }
 0x3de   :  { %4319 = vmatprep.subr.bf16.mxu0 %v4000_v24  ;;  %4483 = vmatprep.subr.bf16.mxu1 %v4002_v36  ;;  %v4096_v24 = vld [vmem:[#allocation2 + $0xd88] sm:$0xff]  ;;  %v4098_v36 = vld [vmem:[#allocation2 + $0xd98] sm:$0xff] }
 0x3e1   :  { %4320 = vmatpush1.bf16.msra.mxu0 %v3999_v28  ;;  %4484 = vmatpush1.bf16.msra.mxu1 %v4001_v29  ;;  %v4095_v28 = vld [vmem:[#allocation2 + $0xd80] sm:$0xff]  ;;  %v4097_v29 = vld [vmem:[#allocation2 + $0xd90] sm:$0xff] }
 0x3e2   :  { %4321 = vmatprep.subr.bf16.mxu0 %v4008_v34  ;;  %4485 = vmatprep.subr.bf16.mxu1 %v4010_v52  ;;  %v4104_v34 = vld [vmem:[#allocation2 + $0xdc8] sm:$0xff]  ;;  %v4106_v52 = vld [vmem:[#allocation2 + $0xdd8] sm:$0xff] }
 0x3e5   :  { %4322 = vmatpush1.bf16.msra.mxu0 %v4007_v35  ;;  %4486 = vmatpush1.bf16.msra.mxu1 %v4009_v37  ;;  %v4103_v35 = vld [vmem:[#allocation2 + $0xdc0] sm:$0xff]  ;;  %v4105_v37 = vld [vmem:[#allocation2 + $0xdd0] sm:$0xff] }
 0x3e6   :  { %4323 = vmatprep.subr.bf16.mxu0 %v4016_v38  ;;  %4487 = vmatprep.subr.bf16.mxu1 %v4018_v40  ;;  %v4112_v38 = vld [vmem:[#allocation2 + $0xe08] sm:$0xff]  ;;  %v4114_v40 = vld [vmem:[#allocation2 + $0xe18] sm:$0xff] }
 0x3e9   :  { %4324 = vmatpush1.bf16.msra.mxu0 %v4015_v41  ;;  %4488 = vmatpush1.bf16.msra.mxu1 %v4017_v42  ;;  %v4111_v41 = vld [vmem:[#allocation2 + $0xe00] sm:$0xff]  ;;  %v4113_v42 = vld [vmem:[#allocation2 + $0xe10] sm:$0xff] }
 0x3ea   :  { %4325 = vmatprep.subr.bf16.mxu0 %v4024_v46  ;;  %4489 = vmatprep.subr.bf16.mxu1 %v4026_v47  ;;  %v4120_v46 = vld [vmem:[#allocation2 + $0xe48] sm:$0xff]  ;;  %v4122_v47 = vld [vmem:[#allocation2 + $0xe58] sm:$0xff] }
 0x3ed   :  { %4326 = vmatpush1.bf16.msra.mxu0 %v4023_v32  ;;  %4490 = vmatpush1.bf16.msra.mxu1 %v4025_v48  ;;  %v4119_v32 = vld [vmem:[#allocation2 + $0xe40] sm:$0xff]  ;;  %v4121_v48 = vld [vmem:[#allocation2 + $0xe50] sm:$0xff] }
 0x3ee   :  { %4327 = vmatprep.subr.bf16.mxu0 %v4032_v49  ;;  %4491 = vmatprep.subr.bf16.mxu1 %v4034_v50  ;;  %v4128_v49 = vld [vmem:[#allocation2 + $0xe88] sm:$0xff]  ;;  %v4130_v50 = vld [vmem:[#allocation2 + $0xe98] sm:$0xff] }
 0x3f1   :  { %4328 = vmatpush1.bf16.msra.mxu0 %v4031_v51  ;;  %4492 = vmatpush1.bf16.msra.mxu1 %v4033_v54  ;;  %v4127_v51 = vld [vmem:[#allocation2 + $0xe80] sm:$0xff]  ;;  %v4129_v54 = vld [vmem:[#allocation2 + $0xe90] sm:$0xff] }
 0x3f2   :  { %4329 = vmatprep.subr.bf16.mxu0 %v4040_v55  ;;  %4493 = vmatprep.subr.bf16.mxu1 %v4042_v56  ;;  %v4136_v55 = vld [vmem:[#allocation2 + $0xec8] sm:$0xff]  ;;  %v4138_v56 = vld [vmem:[#allocation2 + $0xed8] sm:$0xff] }
 0x3f5   :  { %4330 = vmatpush1.bf16.msra.mxu0 %v4039_v58  ;;  %4494 = vmatpush1.bf16.msra.mxu1 %v4041_v60  ;;  %v4135_v58 = vld [vmem:[#allocation2 + $0xec0] sm:$0xff]  ;;  %v4137_v60 = vld [vmem:[#allocation2 + $0xed0] sm:$0xff] }
 0x3f6   :  { %4340 = vmatprep.subr.bf16.mxu0 %v4048_v63  ;;  %4504 = vmatprep.subr.bf16.mxu1 %v4050_v0  ;;  %v4144_v63 = vld [vmem:[#allocation2 + $0xf08] sm:$0xff]  ;;  %v4146_v0 = vld [vmem:[#allocation2 + $0xf18] sm:$0xff] }
 0x3f8   :  { %4332 = vmatmul.mubr.bf16.vlgmr.msra.gmra.mrb[8].mxu0 %v8194_v59  ;;  %4496 = vmatmul.mubr.bf16.vlgmr.msra.gmra.mrb[8].mxu1 %v8194_v59 }
 0x3f9   :  { %4341 = vmatpush1.bf16.msra.mxu0 %v4047_v1  ;;  %4505 = vmatpush1.bf16.msra.mxu1 %v4049_v2  ;;  %v4143_v1 = vld [vmem:[#allocation2 + $0xf00] sm:$0xff]  ;;  %v4145_v2 = vld [vmem:[#allocation2 + $0xf10] sm:$0xff] }
 0x3fa   :  { %4342 = vmatprep.subr.bf16.mxu0 %v4056_v3  ;;  %4506 = vmatprep.subr.bf16.mxu1 %v4058_v4  ;;  %v4152_v3 = vld [vmem:[#allocation2 + $0xf48] sm:$0xff]  ;;  %v4154_v4 = vld [vmem:[#allocation2 + $0xf58] sm:$0xff] }
 0x3fb   :  { %4372 = vmatprep.mubr.bf16.mxu0 %v8200_v62  ;;  %4536 = vmatprep.mubr.bf16.mxu1 %v8200_v62 }
 0x3fd   :  { %4343 = vmatpush1.bf16.msra.mxu0 %v4055_v5  ;;  %4507 = vmatpush1.bf16.msra.mxu1 %v4057_v6  ;;  %v4151_v5 = vld [vmem:[#allocation2 + $0xf40] sm:$0xff]  ;;  %v4153_v6 = vld [vmem:[#allocation2 + $0xf50] sm:$0xff] }
 0x3fe   :  { %4344 = vmatprep.subr.bf16.mxu0 %v4064_v7  ;;  %4508 = vmatprep.subr.bf16.mxu1 %v4066_v8  ;;  %v4160_v7 = vld [vmem:[#allocation2 + $0xf88] sm:$0xff]  ;;  %v4162_v8 = vld [vmem:[#allocation2 + $0xf98] sm:$0xff] }
 0x401   :  { %4345 = vmatpush1.bf16.msra.mxu0 %v4063_v9  ;;  %4509 = vmatpush1.bf16.msra.mxu1 %v4065_v10  ;;  %v4159_v9 = vld [vmem:[#allocation2 + $0xf80] sm:$0xff]  ;;  %v4161_v10 = vld [vmem:[#allocation2 + $0xf90] sm:$0xff] }
 0x402   :  { %4346 = vmatprep.subr.bf16.mxu0 %v4072_v11  ;;  %4510 = vmatprep.subr.bf16.mxu1 %v4074_v57  ;;  %v4168_v11 = vld [vmem:[#allocation2 + $0xfc8] sm:$0xff]  ;;  %v4170_v57 = vld [vmem:[#allocation2 + $0xfd8] sm:$0xff] }
 0x405   :  { %4347 = vmatpush1.bf16.msra.mxu0 %v4071_v13  ;;  %4511 = vmatpush1.bf16.msra.mxu1 %v4073_v12  ;;  %v4167_v13 = vld [vmem:[#allocation2 + $0xfc0] sm:$0xff]  ;;  %v4169_v12 = vld [vmem:[#allocation2 + $0xfd0] sm:$0xff] }
 0x406   :  { %4348 = vmatprep.subr.bf16.mxu0 %v4080_v14  ;;  %4512 = vmatprep.subr.bf16.mxu1 %v4082_v16  ;;  %v3668_v14 = vld [vmem:[#allocation2 + $0x28] sm:$0xff]  ;;  %v3670_v16 = vld [vmem:[#allocation2 + $0x38] sm:$0xff] }
 0x409   :  { %4349 = vmatpush1.bf16.msra.mxu0 %v4079_v17  ;;  %4513 = vmatpush1.bf16.msra.mxu1 %v4081_v18  ;;  %v3667_v17 = vld [vmem:[#allocation2 + $0x20] sm:$0xff]  ;;  %v3669_v18 = vld [vmem:[#allocation2 + $0x30] sm:$0xff] }
 0x40a   :  { %4350 = vmatprep.subr.bf16.mxu0 %v4088_v19  ;;  %4514 = vmatprep.subr.bf16.mxu1 %v4090_v20  ;;  %v3676_v19 = vld [vmem:[#allocation2 + $0x68] sm:$0xff]  ;;  %v3678_v20 = vld [vmem:[#allocation2 + $0x78] sm:$0xff] }
 0x40d   :  { %4351 = vmatpush1.bf16.msra.mxu0 %v4087_v21  ;;  %4515 = vmatpush1.bf16.msra.mxu1 %v4089_v22  ;;  %v3675_v21 = vld [vmem:[#allocation2 + $0x60] sm:$0xff]  ;;  %v3677_v22 = vld [vmem:[#allocation2 + $0x70] sm:$0xff] }
 0x40e   :  { %4352 = vmatprep.subr.bf16.mxu0 %v4096_v24  ;;  %4516 = vmatprep.subr.bf16.mxu1 %v4098_v36  ;;  %v3684_v24 = vld [vmem:[#allocation2 + $0xa8] sm:$0xff]  ;;  %v3686_v36 = vld [vmem:[#allocation2 + $0xb8] sm:$0xff] }
 0x411   :  { %4353 = vmatpush1.bf16.msra.mxu0 %v4095_v28  ;;  %4517 = vmatpush1.bf16.msra.mxu1 %v4097_v29  ;;  %v3683_v28 = vld [vmem:[#allocation2 + $0xa0] sm:$0xff]  ;;  %v3685_v29 = vld [vmem:[#allocation2 + $0xb0] sm:$0xff] }
 0x412   :  { %4354 = vmatprep.subr.bf16.mxu0 %v4104_v34  ;;  %4518 = vmatprep.subr.bf16.mxu1 %v4106_v52  ;;  %v3692_v34 = vld [vmem:[#allocation2 + $0xe8] sm:$0xff]  ;;  %v3694_v52 = vld [vmem:[#allocation2 + $0xf8] sm:$0xff] }
 0x415   :  { %4355 = vmatpush1.bf16.msra.mxu0 %v4103_v35  ;;  %4519 = vmatpush1.bf16.msra.mxu1 %v4105_v37  ;;  %v3691_v35 = vld [vmem:[#allocation2 + $0xe0] sm:$0xff]  ;;  %v3693_v37 = vld [vmem:[#allocation2 + $0xf0] sm:$0xff] }
 0x416   :  { %4356 = vmatprep.subr.bf16.mxu0 %v4112_v38  ;;  %4520 = vmatprep.subr.bf16.mxu1 %v4114_v40  ;;  %v3700_v38 = vld [vmem:[#allocation2 + $0x128] sm:$0xff]  ;;  %v3702_v40 = vld [vmem:[#allocation2 + $0x138] sm:$0xff] }
 0x419   :  { %4357 = vmatpush1.bf16.msra.mxu0 %v4111_v41  ;;  %4521 = vmatpush1.bf16.msra.mxu1 %v4113_v42  ;;  %v3701_v41 = vld [vmem:[#allocation2 + $0x130] sm:$0xff]  ;;  %v3708_v42 = vld [vmem:[#allocation2 + $0x168] sm:$0xff] }
 0x41a   :  { %4358 = vmatprep.subr.bf16.mxu0 %v4120_v46  ;;  %4522 = vmatprep.subr.bf16.mxu1 %v4122_v47  ;;  %v3710_v46 = vld [vmem:[#allocation2 + $0x178] sm:$0xff]  ;;  %v3707_v47 = vld [vmem:[#allocation2 + $0x160] sm:$0xff] }
 0x41d   :  { %4359 = vmatpush1.bf16.msra.mxu0 %v4119_v32  ;;  %4523 = vmatpush1.bf16.msra.mxu1 %v4121_v48  ;;  %v3709_v32 = vld [vmem:[#allocation2 + $0x170] sm:$0xff]  ;;  %v3716_v48 = vld [vmem:[#allocation2 + $0x1a8] sm:$0xff] }
 0x41e   :  { %4360 = vmatprep.subr.bf16.mxu0 %v4128_v49  ;;  %4524 = vmatprep.subr.bf16.mxu1 %v4130_v50  ;;  %v3718_v49 = vld [vmem:[#allocation2 + $0x1b8] sm:$0xff]  ;;  %v3715_v50 = vld [vmem:[#allocation2 + $0x1a0] sm:$0xff] }
 0x421   :  { %4361 = vmatpush1.bf16.msra.mxu0 %v4127_v51  ;;  %4525 = vmatpush1.bf16.msra.mxu1 %v4129_v54  ;;  %v3717_v51 = vld [vmem:[#allocation2 + $0x1b0] sm:$0xff]  ;;  %v3724_v54 = vld [vmem:[#allocation2 + $0x1e8] sm:$0xff] }
 0x422   :  { %4362 = vmatprep.subr.bf16.mxu0 %v4136_v55  ;;  %4526 = vmatprep.subr.bf16.mxu1 %v4138_v56  ;;  %v3726_v55 = vld [vmem:[#allocation2 + $0x1f8] sm:$0xff]  ;;  %v3723_v56 = vld [vmem:[#allocation2 + $0x1e0] sm:$0xff] }
 0x425   :  { %4363 = vmatpush1.bf16.msra.mxu0 %v4135_v58  ;;  %4527 = vmatpush1.bf16.msra.mxu1 %v4137_v60  ;;  %v3725_v58 = vld [vmem:[#allocation2 + $0x1f0] sm:$0xff]  ;;  %v3732_v60 = vld [vmem:[#allocation2 + $0x228] sm:$0xff] }
 0x426   :  { %4364 = vmatprep.subr.bf16.mxu0 %v4144_v63  ;;  %4528 = vmatprep.subr.bf16.mxu1 %v4146_v0  ;;  %v3734_v63 = vld [vmem:[#allocation2 + $0x238] sm:$0xff]  ;;  %v3731_v0 = vld [vmem:[#allocation2 + $0x220] sm:$0xff] }
 0x429   :  { %4365 = vmatpush1.bf16.msra.mxu0 %v4143_v1  ;;  %4529 = vmatpush1.bf16.msra.mxu1 %v4145_v2  ;;  %v3733_v1 = vld [vmem:[#allocation2 + $0x230] sm:$0xff]  ;;  %v3740_v2 = vld [vmem:[#allocation2 + $0x268] sm:$0xff] }
 0x42a   :  { %4366 = vmatprep.subr.bf16.mxu0 %v4152_v3  ;;  %4530 = vmatprep.subr.bf16.mxu1 %v4154_v4  ;;  %v3742_v3 = vld [vmem:[#allocation2 + $0x278] sm:$0xff]  ;;  %v3739_v4 = vld [vmem:[#allocation2 + $0x260] sm:$0xff] }
 0x42d   :  { %4367 = vmatpush1.bf16.msra.mxu0 %v4151_v5  ;;  %4531 = vmatpush1.bf16.msra.mxu1 %v4153_v6  ;;  %v3741_v5 = vld [vmem:[#allocation2 + $0x270] sm:$0xff]  ;;  %v3748_v6 = vld [vmem:[#allocation2 + $0x2a8] sm:$0xff] }
 0x42e   :  { %4368 = vmatprep.subr.bf16.mxu0 %v4160_v7  ;;  %4532 = vmatprep.subr.bf16.mxu1 %v4162_v8  ;;  %v3750_v7 = vld [vmem:[#allocation2 + $0x2b8] sm:$0xff]  ;;  %v3747_v8 = vld [vmem:[#allocation2 + $0x2a0] sm:$0xff] }
 0x431   :  { %4369 = vmatpush1.bf16.msra.mxu0 %v4159_v9  ;;  %4533 = vmatpush1.bf16.msra.mxu1 %v4161_v10  ;;  %v3749_v9 = vld [vmem:[#allocation2 + $0x2b0] sm:$0xff]  ;;  %v3756_v10 = vld [vmem:[#allocation2 + $0x2e8] sm:$0xff] }
 0x432   :  { %4370 = vmatprep.subr.bf16.mxu0 %v4168_v11  ;;  %4534 = vmatprep.subr.bf16.mxu1 %v4170_v57  ;;  %v3758_v11 = vld [vmem:[#allocation2 + $0x2f8] sm:$0xff]  ;;  %v3755_v57 = vld [vmem:[#allocation2 + $0x2e0] sm:$0xff] }
 0x435   :  { %4371 = vmatpush1.bf16.msra.mxu0 %v4167_v13  ;;  %4535 = vmatpush1.bf16.msra.mxu1 %v4169_v12  ;;  %v3757_v13 = vld [vmem:[#allocation2 + $0x2f0] sm:$0xff]  ;;  %v3764_v12 = vld [vmem:[#allocation2 + $0x328] sm:$0xff] }
 0x436   :  { %4545 = vmatprep.subr.bf16.mxu0 %v3668_v14  ;;  %4709 = vmatprep.subr.bf16.mxu1 %v3670_v16  ;;  %v3766_v14 = vld [vmem:[#allocation2 + $0x338] sm:$0xff]  ;;  %v3763_v16 = vld [vmem:[#allocation2 + $0x320] sm:$0xff] }
 0x438   :  { %4373 = vmatmul.mubr.bf16.vlgmr.msra.gmra.mrb[8].mxu0 %v8196_v61  ;;  %4537 = vmatmul.mubr.bf16.vlgmr.msra.gmra.mrb[8].mxu1 %v8196_v61 }
 0x439   :  { %4546 = vmatpush1.bf16.msra.mxu0 %v3667_v17  ;;  %4710 = vmatpush1.bf16.msra.mxu1 %v3669_v18  ;;  %v3765_v17 = vld [vmem:[#allocation2 + $0x330] sm:$0xff]  ;;  %v3772_v18 = vld [vmem:[#allocation2 + $0x368] sm:$0xff] }
 0x43a   :  { %4547 = vmatprep.subr.bf16.mxu0 %v3676_v19  ;;  %4711 = vmatprep.subr.bf16.mxu1 %v3678_v20  ;;  %v3774_v19 = vld [vmem:[#allocation2 + $0x378] sm:$0xff]  ;;  %v3771_v20 = vld [vmem:[#allocation2 + $0x360] sm:$0xff] }
 0x43b   :  { %4577 = vmatprep.mubr.bf16.mxu0 %v8167_v26  ;;  %4741 = vmatprep.mubr.bf16.mxu1 %v8167_v26  ;;  %v3699_v26 = vld [vmem:[#allocation2 + $0x120] sm:$0xff] }
 0x43d   :  { %4548 = vmatpush1.bf16.msra.mxu0 %v3675_v21  ;;  %4712 = vmatpush1.bf16.msra.mxu1 %v3677_v22  ;;  %v3773_v21 = vld [vmem:[#allocation2 + $0x370] sm:$0xff]  ;;  %v3780_v22 = vld [vmem:[#allocation2 + $0x3a8] sm:$0xff] }
 0x43e   :  { %4549 = vmatprep.subr.bf16.mxu0 %v3684_v24  ;;  %4713 = vmatprep.subr.bf16.mxu1 %v3686_v36  ;;  %v3782_v24 = vld [vmem:[#allocation2 + $0x3b8] sm:$0xff]  ;;  %v3779_v36 = vld [vmem:[#allocation2 + $0x3a0] sm:$0xff] }
 0x441   :  { %4550 = vmatpush1.bf16.msra.mxu0 %v3683_v28  ;;  %4714 = vmatpush1.bf16.msra.mxu1 %v3685_v29  ;;  %v3781_v28 = vld [vmem:[#allocation2 + $0x3b0] sm:$0xff]  ;;  %v3788_v29 = vld [vmem:[#allocation2 + $0x3e8] sm:$0xff] }
 0x442   :  { %4551 = vmatprep.subr.bf16.mxu0 %v3692_v34  ;;  %4715 = vmatprep.subr.bf16.mxu1 %v3694_v52  ;;  %v3790_v34 = vld [vmem:[#allocation2 + $0x3f8] sm:$0xff]  ;;  %v3787_v52 = vld [vmem:[#allocation2 + $0x3e0] sm:$0xff] }
 0x445   :  { %4552 = vmatpush1.bf16.msra.mxu0 %v3691_v35  ;;  %4716 = vmatpush1.bf16.msra.mxu1 %v3693_v37  ;;  %v3789_v35 = vld [vmem:[#allocation2 + $0x3f0] sm:$0xff]  ;;  %v3796_v37 = vld [vmem:[#allocation2 + $0x428] sm:$0xff] }
 0x446   :  { %4553 = vmatprep.subr.bf16.mxu0 %v3700_v38  ;;  %4717 = vmatprep.subr.bf16.mxu1 %v3702_v40  ;;  %v3798_v38 = vld [vmem:[#allocation2 + $0x438] sm:$0xff]  ;;  %v3795_v40 = vld [vmem:[#allocation2 + $0x420] sm:$0xff] }
 0x449   :  { %4554 = vmatpush1.bf16.msra.mxu0 %v3699_v26  ;;  %4718 = vmatpush1.bf16.msra.mxu1 %v3701_v41  ;;  %v3797_v26 = vld [vmem:[#allocation2 + $0x430] sm:$0xff]  ;;  %v3804_v41 = vld [vmem:[#allocation2 + $0x468] sm:$0xff] }
 0x44a   :  { %4555 = vmatprep.subr.bf16.mxu0 %v3708_v42  ;;  %4719 = vmatprep.subr.bf16.mxu1 %v3710_v46  ;;  %v3806_v42 = vld [vmem:[#allocation2 + $0x478] sm:$0xff]  ;;  %v3803_v46 = vld [vmem:[#allocation2 + $0x460] sm:$0xff] }
 0x44d   :  { %4556 = vmatpush1.bf16.msra.mxu0 %v3707_v47  ;;  %4720 = vmatpush1.bf16.msra.mxu1 %v3709_v32  ;;  %v3805_v47 = vld [vmem:[#allocation2 + $0x470] sm:$0xff]  ;;  %v3812_v32 = vld [vmem:[#allocation2 + $0x4a8] sm:$0xff] }
 0x44e   :  { %4557 = vmatprep.subr.bf16.mxu0 %v3716_v48  ;;  %4721 = vmatprep.subr.bf16.mxu1 %v3718_v49  ;;  %v3814_v48 = vld [vmem:[#allocation2 + $0x4b8] sm:$0xff]  ;;  %v3811_v49 = vld [vmem:[#allocation2 + $0x4a0] sm:$0xff] }
 0x451   :  { %4558 = vmatpush1.bf16.msra.mxu0 %v3715_v50  ;;  %4722 = vmatpush1.bf16.msra.mxu1 %v3717_v51  ;;  %v3813_v50 = vld [vmem:[#allocation2 + $0x4b0] sm:$0xff]  ;;  %v3820_v51 = vld [vmem:[#allocation2 + $0x4e8] sm:$0xff] }
 0x452   :  { %4559 = vmatprep.subr.bf16.mxu0 %v3724_v54  ;;  %4723 = vmatprep.subr.bf16.mxu1 %v3726_v55  ;;  %v3819_v54 = vld [vmem:[#allocation2 + $0x4e0] sm:$0xff]  ;;  %v3821_v55 = vld [vmem:[#allocation2 + $0x4f0] sm:$0xff] }
 0x455   :  { %4560 = vmatpush1.bf16.msra.mxu0 %v3723_v56  ;;  %4724 = vmatpush1.bf16.msra.mxu1 %v3725_v58  ;;  %v3828_v56 = vld [vmem:[#allocation2 + $0x528] sm:$0xff]  ;;  %v3830_v58 = vld [vmem:[#allocation2 + $0x538] sm:$0xff] }
 0x456   :  { %4561 = vmatprep.subr.bf16.mxu0 %v3732_v60  ;;  %4725 = vmatprep.subr.bf16.mxu1 %v3734_v63  ;;  %v3829_v60 = vld [vmem:[#allocation2 + $0x530] sm:$0xff]  ;;  %v3836_v63 = vld [vmem:[#allocation2 + $0x568] sm:$0xff] }
 0x459   :  { %4562 = vmatpush1.bf16.msra.mxu0 %v3731_v0  ;;  %4726 = vmatpush1.bf16.msra.mxu1 %v3733_v1  ;;  %v3838_v0 = vld [vmem:[#allocation2 + $0x578] sm:$0xff]  ;;  %v3835_v1 = vld [vmem:[#allocation2 + $0x560] sm:$0xff] }
 0x45a   :  { %4563 = vmatprep.subr.bf16.mxu0 %v3740_v2  ;;  %4727 = vmatprep.subr.bf16.mxu1 %v3742_v3  ;;  %v3837_v2 = vld [vmem:[#allocation2 + $0x570] sm:$0xff]  ;;  %v3844_v3 = vld [vmem:[#allocation2 + $0x5a8] sm:$0xff] }
 0x45d   :  { %4564 = vmatpush1.bf16.msra.mxu0 %v3739_v4  ;;  %4728 = vmatpush1.bf16.msra.mxu1 %v3741_v5  ;;  %v3846_v4 = vld [vmem:[#allocation2 + $0x5b8] sm:$0xff]  ;;  %v3843_v5 = vld [vmem:[#allocation2 + $0x5a0] sm:$0xff] }
 0x45e   :  { %4565 = vmatprep.subr.bf16.mxu0 %v3748_v6  ;;  %4729 = vmatprep.subr.bf16.mxu1 %v3750_v7  ;;  %v3845_v6 = vld [vmem:[#allocation2 + $0x5b0] sm:$0xff]  ;;  %v3852_v7 = vld [vmem:[#allocation2 + $0x5e8] sm:$0xff] }
 0x461   :  { %4566 = vmatpush1.bf16.msra.mxu0 %v3747_v8  ;;  %4730 = vmatpush1.bf16.msra.mxu1 %v3749_v9  ;;  %v3854_v8 = vld [vmem:[#allocation2 + $0x5f8] sm:$0xff]  ;;  %v3851_v9 = vld [vmem:[#allocation2 + $0x5e0] sm:$0xff] }
 0x462   :  { %4567 = vmatprep.subr.bf16.mxu0 %v3756_v10  ;;  %4731 = vmatprep.subr.bf16.mxu1 %v3758_v11  ;;  %v3853_v10 = vld [vmem:[#allocation2 + $0x5f0] sm:$0xff]  ;;  %v3860_v11 = vld [vmem:[#allocation2 + $0x628] sm:$0xff] }
 0x465   :  { %4568 = vmatpush1.bf16.msra.mxu0 %v3755_v57  ;;  %4732 = vmatpush1.bf16.msra.mxu1 %v3757_v13  ;;  %v3862_v57 = vld [vmem:[#allocation2 + $0x638] sm:$0xff]  ;;  %v3859_v13 = vld [vmem:[#allocation2 + $0x620] sm:$0xff] }
 0x466   :  { %4569 = vmatprep.subr.bf16.mxu0 %v3764_v12  ;;  %4733 = vmatprep.subr.bf16.mxu1 %v3766_v14  ;;  %v3861_v12 = vld [vmem:[#allocation2 + $0x630] sm:$0xff]  ;;  %v3868_v14 = vld [vmem:[#allocation2 + $0x668] sm:$0xff] }
 0x469   :  { %4570 = vmatpush1.bf16.msra.mxu0 %v3763_v16  ;;  %4734 = vmatpush1.bf16.msra.mxu1 %v3765_v17  ;;  %v3870_v16 = vld [vmem:[#allocation2 + $0x678] sm:$0xff]  ;;  %v3867_v17 = vld [vmem:[#allocation2 + $0x660] sm:$0xff] }
 0x46a   :  { %4571 = vmatprep.subr.bf16.mxu0 %v3772_v18  ;;  %4735 = vmatprep.subr.bf16.mxu1 %v3774_v19  ;;  %v3869_v18 = vld [vmem:[#allocation2 + $0x670] sm:$0xff]  ;;  %v3876_v19 = vld [vmem:[#allocation2 + $0x6a8] sm:$0xff] }
 0x46d   :  { %4572 = vmatpush1.bf16.msra.mxu0 %v3771_v20  ;;  %4736 = vmatpush1.bf16.msra.mxu1 %v3773_v21  ;;  %v3878_v20 = vld [vmem:[#allocation2 + $0x6b8] sm:$0xff]  ;;  %v3875_v21 = vld [vmem:[#allocation2 + $0x6a0] sm:$0xff] }
 0x46e   :  { %4573 = vmatprep.subr.bf16.mxu0 %v3780_v22  ;;  %4737 = vmatprep.subr.bf16.mxu1 %v3782_v24  ;;  %v3877_v22 = vld [vmem:[#allocation2 + $0x6b0] sm:$0xff]  ;;  %v3884_v24 = vld [vmem:[#allocation2 + $0x6e8] sm:$0xff] }
 0x471   :  { %4574 = vmatpush1.bf16.msra.mxu0 %v3779_v36  ;;  %4738 = vmatpush1.bf16.msra.mxu1 %v3781_v28  ;;  %v3886_v36 = vld [vmem:[#allocation2 + $0x6f8] sm:$0xff]  ;;  %v3883_v28 = vld [vmem:[#allocation2 + $0x6e0] sm:$0xff] }
 0x472   :  { %4575 = vmatprep.subr.bf16.mxu0 %v3788_v29  ;;  %4739 = vmatprep.subr.bf16.mxu1 %v3790_v34  ;;  %v3885_v29 = vld [vmem:[#allocation2 + $0x6f0] sm:$0xff]  ;;  %v3892_v34 = vld [vmem:[#allocation2 + $0x728] sm:$0xff] }
 0x475   :  { %4576 = vmatpush1.bf16.msra.mxu0 %v3787_v52  ;;  %4740 = vmatpush1.bf16.msra.mxu1 %v3789_v35  ;;  %v3894_v52 = vld [vmem:[#allocation2 + $0x738] sm:$0xff]  ;;  %v3891_v35 = vld [vmem:[#allocation2 + $0x720] sm:$0xff] }
 0x476   :  { %4586 = vmatprep.subr.bf16.mxu0 %v3796_v37  ;;  %4750 = vmatprep.subr.bf16.mxu1 %v3798_v38  ;;  %v3893_v37 = vld [vmem:[#allocation2 + $0x730] sm:$0xff]  ;;  %v3900_v38 = vld [vmem:[#allocation2 + $0x768] sm:$0xff] }
 0x478   :  { %4578 = vmatmul.mubr.bf16.vlgmr.msra.gmra.mrb[12].mxu0 %v8163_v23  ;;  %4742 = vmatmul.mubr.bf16.vlgmr.msra.gmra.mrb[12].mxu1 %v8163_v23  ;;  %v3822_v23 = vld [vmem:[#allocation2 + $0x4f8] sm:$0xff] }
 0x479   :  { %4587 = vmatpush1.bf16.msra.mxu0 %v3795_v40  ;;  %4751 = vmatpush1.bf16.msra.mxu1 %v3797_v26  ;;  %v3902_v40 = vld [vmem:[#allocation2 + $0x778] sm:$0xff]  ;;  %v3899_v26 = vld [vmem:[#allocation2 + $0x760] sm:$0xff] }
 0x47a   :  { %4588 = vmatprep.subr.bf16.mxu0 %v3804_v41  ;;  %4752 = vmatprep.subr.bf16.mxu1 %v3806_v42  ;;  %v3901_v41 = vld [vmem:[#allocation2 + $0x770] sm:$0xff]  ;;  %v3908_v42 = vld [vmem:[#allocation2 + $0x7a8] sm:$0xff] }
 0x47b   :  { %4618 = vmatprep.mubr.bf16.mxu0 %v8169_v27  ;;  %4782 = vmatprep.mubr.bf16.mxu1 %v8169_v27  ;;  %v3827_v27 = vld [vmem:[#allocation2 + $0x520] sm:$0xff] }
 0x47d   :  { %4589 = vmatpush1.bf16.msra.mxu0 %v3803_v46  ;;  %4753 = vmatpush1.bf16.msra.mxu1 %v3805_v47  ;;  %v3910_v46 = vld [vmem:[#allocation2 + $0x7b8] sm:$0xff]  ;;  %v3907_v47 = vld [vmem:[#allocation2 + $0x7a0] sm:$0xff] }
 0x47e   :  { %4590 = vmatprep.subr.bf16.mxu0 %v3812_v32  ;;  %4754 = vmatprep.subr.bf16.mxu1 %v3814_v48  ;;  %v3909_v32 = vld [vmem:[#allocation2 + $0x7b0] sm:$0xff]  ;;  %v3916_v48 = vld [vmem:[#allocation2 + $0x7e8] sm:$0xff] }
 0x481   :  { %4591 = vmatpush1.bf16.msra.mxu0 %v3811_v49  ;;  %4755 = vmatpush1.bf16.msra.mxu1 %v3813_v50  ;;  %v3918_v49 = vld [vmem:[#allocation2 + $0x7f8] sm:$0xff]  ;;  %v3915_v50 = vld [vmem:[#allocation2 + $0x7e0] sm:$0xff] }
 0x482   :  { %4592 = vmatprep.subr.bf16.mxu0 %v3820_v51  ;;  %4756 = vmatprep.subr.bf16.mxu1 %v3822_v23  ;;  %v3917_v51 = vld [vmem:[#allocation2 + $0x7f0] sm:$0xff]  ;;  %v3924_v23 = vld [vmem:[#allocation2 + $0x828] sm:$0xff] }
 0x485   :  { %4593 = vmatpush1.bf16.msra.mxu0 %v3819_v54  ;;  %4757 = vmatpush1.bf16.msra.mxu1 %v3821_v55  ;;  %v3926_v54 = vld [vmem:[#allocation2 + $0x838] sm:$0xff]  ;;  %v3923_v55 = vld [vmem:[#allocation2 + $0x820] sm:$0xff] }
 0x486   :  { %4594 = vmatprep.subr.bf16.mxu0 %v3828_v56  ;;  %4758 = vmatprep.subr.bf16.mxu1 %v3830_v58  ;;  %v3925_v56 = vld [vmem:[#allocation2 + $0x830] sm:$0xff]  ;;  %v3932_v58 = vld [vmem:[#allocation2 + $0x868] sm:$0xff] }
 0x489   :  { %4595 = vmatpush1.bf16.msra.mxu0 %v3827_v27  ;;  %4759 = vmatpush1.bf16.msra.mxu1 %v3829_v60  ;;  %v3934_v27 = vld [vmem:[#allocation2 + $0x878] sm:$0xff]  ;;  %v3931_v60 = vld [vmem:[#allocation2 + $0x860] sm:$0xff] }
 0x48a   :  { %4596 = vmatprep.subr.bf16.mxu0 %v3836_v63  ;;  %4760 = vmatprep.subr.bf16.mxu1 %v3838_v0  ;;  %v3933_v63 = vld [vmem:[#allocation2 + $0x870] sm:$0xff]  ;;  %v3940_v0 = vld [vmem:[#allocation2 + $0x8a8] sm:$0xff] }
 0x48d   :  { %4597 = vmatpush1.bf16.msra.mxu0 %v3835_v1  ;;  %4761 = vmatpush1.bf16.msra.mxu1 %v3837_v2  ;;  %v3942_v1 = vld [vmem:[#allocation2 + $0x8b8] sm:$0xff]  ;;  %v3939_v2 = vld [vmem:[#allocation2 + $0x8a0] sm:$0xff] }
 0x48e   :  { %4598 = vmatprep.subr.bf16.mxu0 %v3844_v3  ;;  %4762 = vmatprep.subr.bf16.mxu1 %v3846_v4  ;;  %v3941_v3 = vld [vmem:[#allocation2 + $0x8b0] sm:$0xff]  ;;  %v3948_v4 = vld [vmem:[#allocation2 + $0x8e8] sm:$0xff] }
 0x491   :  { %4599 = vmatpush1.bf16.msra.mxu0 %v3843_v5  ;;  %4763 = vmatpush1.bf16.msra.mxu1 %v3845_v6  ;;  %v3947_v5 = vld [vmem:[#allocation2 + $0x8e0] sm:$0xff]  ;;  %v3949_v6 = vld [vmem:[#allocation2 + $0x8f0] sm:$0xff] }
 0x492   :  { %4600 = vmatprep.subr.bf16.mxu0 %v3852_v7  ;;  %4764 = vmatprep.subr.bf16.mxu1 %v3854_v8  ;;  %v3956_v7 = vld [vmem:[#allocation2 + $0x928] sm:$0xff]  ;;  %v3958_v8 = vld [vmem:[#allocation2 + $0x938] sm:$0xff] }
 0x495   :  { %4601 = vmatpush1.bf16.msra.mxu0 %v3851_v9  ;;  %4765 = vmatpush1.bf16.msra.mxu1 %v3853_v10  ;;  %v3957_v9 = vld [vmem:[#allocation2 + $0x930] sm:$0xff]  ;;  %v3964_v10 = vld [vmem:[#allocation2 + $0x968] sm:$0xff] }
 0x496   :  { %4602 = vmatprep.subr.bf16.mxu0 %v3860_v11  ;;  %4766 = vmatprep.subr.bf16.mxu1 %v3862_v57  ;;  %v3966_v11 = vld [vmem:[#allocation2 + $0x978] sm:$0xff]  ;;  %v3963_v57 = vld [vmem:[#allocation2 + $0x960] sm:$0xff] }
 0x499   :  { %4603 = vmatpush1.bf16.msra.mxu0 %v3859_v13  ;;  %4767 = vmatpush1.bf16.msra.mxu1 %v3861_v12  ;;  %v3965_v13 = vld [vmem:[#allocation2 + $0x970] sm:$0xff]  ;;  %v3972_v12 = vld [vmem:[#allocation2 + $0x9a8] sm:$0xff] }
 0x49a   :  { %4604 = vmatprep.subr.bf16.mxu0 %v3868_v14  ;;  %4768 = vmatprep.subr.bf16.mxu1 %v3870_v16  ;;  %v3974_v14 = vld [vmem:[#allocation2 + $0x9b8] sm:$0xff]  ;;  %v3971_v16 = vld [vmem:[#allocation2 + $0x9a0] sm:$0xff] }
 0x49d   :  { %4605 = vmatpush1.bf16.msra.mxu0 %v3867_v17  ;;  %4769 = vmatpush1.bf16.msra.mxu1 %v3869_v18  ;;  %v3973_v17 = vld [vmem:[#allocation2 + $0x9b0] sm:$0xff]  ;;  %v3980_v18 = vld [vmem:[#allocation2 + $0x9e8] sm:$0xff] }
 0x49e   :  { %4606 = vmatprep.subr.bf16.mxu0 %v3876_v19  ;;  %4770 = vmatprep.subr.bf16.mxu1 %v3878_v20  ;;  %v3982_v19 = vld [vmem:[#allocation2 + $0x9f8] sm:$0xff]  ;;  %v3979_v20 = vld [vmem:[#allocation2 + $0x9e0] sm:$0xff] }
 0x4a1   :  { %4607 = vmatpush1.bf16.msra.mxu0 %v3875_v21  ;;  %4771 = vmatpush1.bf16.msra.mxu1 %v3877_v22  ;;  %v3981_v21 = vld [vmem:[#allocation2 + $0x9f0] sm:$0xff]  ;;  %v3988_v22 = vld [vmem:[#allocation2 + $0xa28] sm:$0xff] }
 0x4a2   :  { %4608 = vmatprep.subr.bf16.mxu0 %v3884_v24  ;;  %4772 = vmatprep.subr.bf16.mxu1 %v3886_v36  ;;  %v3990_v24 = vld [vmem:[#allocation2 + $0xa38] sm:$0xff]  ;;  %v3987_v36 = vld [vmem:[#allocation2 + $0xa20] sm:$0xff] }
 0x4a5   :  { %4609 = vmatpush1.bf16.msra.mxu0 %v3883_v28  ;;  %4773 = vmatpush1.bf16.msra.mxu1 %v3885_v29  ;;  %v3989_v28 = vld [vmem:[#allocation2 + $0xa30] sm:$0xff]  ;;  %v3996_v29 = vld [vmem:[#allocation2 + $0xa68] sm:$0xff] }
 0x4a6   :  { %4610 = vmatprep.subr.bf16.mxu0 %v3892_v34  ;;  %4774 = vmatprep.subr.bf16.mxu1 %v3894_v52  ;;  %v3998_v34 = vld [vmem:[#allocation2 + $0xa78] sm:$0xff]  ;;  %v3995_v52 = vld [vmem:[#allocation2 + $0xa60] sm:$0xff] }
 0x4a9   :  { %4611 = vmatpush1.bf16.msra.mxu0 %v3891_v35  ;;  %4775 = vmatpush1.bf16.msra.mxu1 %v3893_v37  ;;  %v3997_v35 = vld [vmem:[#allocation2 + $0xa70] sm:$0xff]  ;;  %v4004_v37 = vld [vmem:[#allocation2 + $0xaa8] sm:$0xff] }
 0x4aa   :  { %4612 = vmatprep.subr.bf16.mxu0 %v3900_v38  ;;  %4776 = vmatprep.subr.bf16.mxu1 %v3902_v40  ;;  %v4006_v38 = vld [vmem:[#allocation2 + $0xab8] sm:$0xff]  ;;  %v4003_v40 = vld [vmem:[#allocation2 + $0xaa0] sm:$0xff] }
 0x4ad   :  { %4613 = vmatpush1.bf16.msra.mxu0 %v3899_v26  ;;  %4777 = vmatpush1.bf16.msra.mxu1 %v3901_v41  ;;  %v4005_v26 = vld [vmem:[#allocation2 + $0xab0] sm:$0xff]  ;;  %v4012_v41 = vld [vmem:[#allocation2 + $0xae8] sm:$0xff] }
 0x4ae   :  { %4614 = vmatprep.subr.bf16.mxu0 %v3908_v42  ;;  %4778 = vmatprep.subr.bf16.mxu1 %v3910_v46  ;;  %v4014_v42 = vld [vmem:[#allocation2 + $0xaf8] sm:$0xff]  ;;  %v4011_v46 = vld [vmem:[#allocation2 + $0xae0] sm:$0xff] }
 0x4b1   :  { %4615 = vmatpush1.bf16.msra.mxu0 %v3907_v47  ;;  %4779 = vmatpush1.bf16.msra.mxu1 %v3909_v32  ;;  %v4013_v47 = vld [vmem:[#allocation2 + $0xaf0] sm:$0xff]  ;;  %v4020_v32 = vld [vmem:[#allocation2 + $0xb28] sm:$0xff] }
 0x4b2   :  { %4616 = vmatprep.subr.bf16.mxu0 %v3916_v48  ;;  %4780 = vmatprep.subr.bf16.mxu1 %v3918_v49  ;;  %v4022_v48 = vld [vmem:[#allocation2 + $0xb38] sm:$0xff]  ;;  %v4019_v49 = vld [vmem:[#allocation2 + $0xb20] sm:$0xff] }
 0x4b5   :  { %4617 = vmatpush1.bf16.msra.mxu0 %v3915_v50  ;;  %4781 = vmatpush1.bf16.msra.mxu1 %v3917_v51  ;;  %v4021_v50 = vld [vmem:[#allocation2 + $0xb30] sm:$0xff]  ;;  %v4028_v51 = vld [vmem:[#allocation2 + $0xb68] sm:$0xff] }
 0x4b6   :  { %4627 = vmatprep.subr.bf16.mxu0 %v3924_v23  ;;  %4791 = vmatprep.subr.bf16.mxu1 %v3926_v54  ;;  %v4030_v23 = vld [vmem:[#allocation2 + $0xb78] sm:$0xff]  ;;  %v4027_v54 = vld [vmem:[#allocation2 + $0xb60] sm:$0xff] }
 0x4b8   :  { %4619 = vmatmul.mubr.bf16.vlgmr.msra.gmra.mrb[12].mxu0 %v8165_v53  ;;  %4783 = vmatmul.mubr.bf16.vlgmr.msra.gmra.mrb[12].mxu1 %v8165_v53  ;;  %v3950_v53 = vld [vmem:[#allocation2 + $0x8f8] sm:$0xff] }
 0x4b9   :  { %4628 = vmatpush1.bf16.msra.mxu0 %v3923_v55  ;;  %4792 = vmatpush1.bf16.msra.mxu1 %v3925_v56  ;;  %v4029_v55 = vld [vmem:[#allocation2 + $0xb70] sm:$0xff]  ;;  %v4036_v56 = vld [vmem:[#allocation2 + $0xba8] sm:$0xff] }
 0x4ba   :  { %4629 = vmatprep.subr.bf16.mxu0 %v3932_v58  ;;  %4793 = vmatprep.subr.bf16.mxu1 %v3934_v27  ;;  %v4038_v58 = vld [vmem:[#allocation2 + $0xbb8] sm:$0xff]  ;;  %v4035_v27 = vld [vmem:[#allocation2 + $0xba0] sm:$0xff] }
 0x4bb   :  { %4659 = vmatprep.mubr.bf16.mxu0 %v8198_v43  ;;  %4823 = vmatprep.mubr.bf16.mxu1 %v8198_v43  ;;  %v3955_v43 = vld [vmem:[#allocation2 + $0x920] sm:$0xff] }
 0x4bd   :  { %4630 = vmatpush1.bf16.msra.mxu0 %v3931_v60  ;;  %4794 = vmatpush1.bf16.msra.mxu1 %v3933_v63  ;;  %v4037_v60 = vld [vmem:[#allocation2 + $0xbb0] sm:$0xff]  ;;  %v4044_v63 = vld [vmem:[#allocation2 + $0xbe8] sm:$0xff] }
 0x4be   :  { %4631 = vmatprep.subr.bf16.mxu0 %v3940_v0  ;;  %4795 = vmatprep.subr.bf16.mxu1 %v3942_v1  ;;  %v4046_v0 = vld [vmem:[#allocation2 + $0xbf8] sm:$0xff]  ;;  %v4043_v1 = vld [vmem:[#allocation2 + $0xbe0] sm:$0xff] }
 0x4c1   :  { %4632 = vmatpush1.bf16.msra.mxu0 %v3939_v2  ;;  %4796 = vmatpush1.bf16.msra.mxu1 %v3941_v3  ;;  %v4045_v2 = vld [vmem:[#allocation2 + $0xbf0] sm:$0xff]  ;;  %v4052_v3 = vld [vmem:[#allocation2 + $0xc28] sm:$0xff] }
 0x4c2   :  { %4633 = vmatprep.subr.bf16.mxu0 %v3948_v4  ;;  %4797 = vmatprep.subr.bf16.mxu1 %v3950_v53  ;;  %v4054_v4 = vld [vmem:[#allocation2 + $0xc38] sm:$0xff]  ;;  %v4051_v53 = vld [vmem:[#allocation2 + $0xc20] sm:$0xff] }
 0x4c5   :  { %4634 = vmatpush1.bf16.msra.mxu0 %v3947_v5  ;;  %4798 = vmatpush1.bf16.msra.mxu1 %v3949_v6  ;;  %v4053_v5 = vld [vmem:[#allocation2 + $0xc30] sm:$0xff]  ;;  %v4060_v6 = vld [vmem:[#allocation2 + $0xc68] sm:$0xff] }
 0x4c6   :  { %4635 = vmatprep.subr.bf16.mxu0 %v3956_v7  ;;  %4799 = vmatprep.subr.bf16.mxu1 %v3958_v8  ;;  %v4062_v7 = vld [vmem:[#allocation2 + $0xc78] sm:$0xff]  ;;  %v4059_v8 = vld [vmem:[#allocation2 + $0xc60] sm:$0xff] }
 0x4c9   :  { %4636 = vmatpush1.bf16.msra.mxu0 %v3955_v43  ;;  %4800 = vmatpush1.bf16.msra.mxu1 %v3957_v9  ;;  %v4061_v43 = vld [vmem:[#allocation2 + $0xc70] sm:$0xff]  ;;  %v4068_v9 = vld [vmem:[#allocation2 + $0xca8] sm:$0xff] }
 0x4ca   :  { %4637 = vmatprep.subr.bf16.mxu0 %v3964_v10  ;;  %4801 = vmatprep.subr.bf16.mxu1 %v3966_v11  ;;  %v4070_v10 = vld [vmem:[#allocation2 + $0xcb8] sm:$0xff]  ;;  %v4067_v11 = vld [vmem:[#allocation2 + $0xca0] sm:$0xff] }
 0x4cd   :  { %4638 = vmatpush1.bf16.msra.mxu0 %v3963_v57  ;;  %4802 = vmatpush1.bf16.msra.mxu1 %v3965_v13  ;;  %v4069_v57 = vld [vmem:[#allocation2 + $0xcb0] sm:$0xff]  ;;  %v4076_v13 = vld [vmem:[#allocation2 + $0xce8] sm:$0xff] }
 0x4ce   :  { %4639 = vmatprep.subr.bf16.mxu0 %v3972_v12  ;;  %4803 = vmatprep.subr.bf16.mxu1 %v3974_v14  ;;  %v4075_v12 = vld [vmem:[#allocation2 + $0xce0] sm:$0xff]  ;;  %v4077_v14 = vld [vmem:[#allocation2 + $0xcf0] sm:$0xff] }
 0x4d1   :  { %4640 = vmatpush1.bf16.msra.mxu0 %v3971_v16  ;;  %4804 = vmatpush1.bf16.msra.mxu1 %v3973_v17  ;;  %v4084_v16 = vld [vmem:[#allocation2 + $0xd28] sm:$0xff]  ;;  %v4086_v17 = vld [vmem:[#allocation2 + $0xd38] sm:$0xff] }
 0x4d2   :  { %4641 = vmatprep.subr.bf16.mxu0 %v3980_v18  ;;  %4805 = vmatprep.subr.bf16.mxu1 %v3982_v19  ;;  %v8232_v18 = vld [vmem:[#allocation12] sm:$0xff]  ;;  %v4085_v19 = vld [vmem:[#allocation2 + $0xd30] sm:$0xff] }
 0x4d5   :  { %4642 = vmatpush1.bf16.msra.mxu0 %v3979_v20  ;;  %4806 = vmatpush1.bf16.msra.mxu1 %v3981_v21  ;;  %v4092_v20 = vld [vmem:[#allocation2 + $0xd68] sm:$0xff]  ;;  %v4094_v21 = vld [vmem:[#allocation2 + $0xd78] sm:$0xff] }
 0x4d6   :  { %4643 = vmatprep.subr.bf16.mxu0 %v3988_v22  ;;  %4807 = vmatprep.subr.bf16.mxu1 %v3990_v24  ;;  %v4180_v22 = vrot.slane %v8232_v18, %v8142_v39  ;;  %v4188_v24 = vrot.slane %v8232_v18, %v8147_v44 }
 0x4d9   :  { %4644 = vmatpush1.bf16.msra.mxu0 %v3987_v36  ;;  %4808 = vmatpush1.bf16.msra.mxu1 %v3989_v28  ;;  %v4184_v36 = vrot.slane %v8232_v18, %v8150_v45  ;;  %v4192_v28 = vrot.slane %v8232_v18, %v8153_v25 }
 0x4da   :  { %4645 = vmatprep.subr.bf16.mxu0 %v3996_v29  ;;  %4809 = vmatprep.subr.bf16.mxu1 %v3998_v34  ;;  %v4091_v29 = vld [vmem:[#allocation2 + $0xd60] sm:$0xff]  ;;  %v4093_v34 = vld [vmem:[#allocation2 + $0xd70] sm:$0xff] }
 0x4dd   :  { %4646 = vmatpush1.bf16.msra.mxu0 %v3995_v52  ;;  %4810 = vmatpush1.bf16.msra.mxu1 %v3997_v35 }
 0x4de   :  { %4647 = vmatprep.subr.bf16.mxu0 %v4004_v37  ;;  %4811 = vmatprep.subr.bf16.mxu1 %v4006_v38  ;;  %v4100_v37 = vld [vmem:[#allocation2 + $0xda8] sm:$0xff]  ;;  %v4102_v38 = vld [vmem:[#allocation2 + $0xdb8] sm:$0xff] }
 0x4e1   :  { %4648 = vmatpush1.bf16.msra.mxu0 %v4003_v40  ;;  %4812 = vmatpush1.bf16.msra.mxu1 %v4005_v26 }
 0x4e2   :  { %4649 = vmatprep.subr.bf16.mxu0 %v4012_v41  ;;  %4813 = vmatprep.subr.bf16.mxu1 %v4014_v42 }
 0x4e5   :  { %4650 = vmatpush1.bf16.msra.mxu0 %v4011_v46  ;;  %4814 = vmatpush1.bf16.msra.mxu1 %v4013_v47 }
 0x4e6   :  { %4651 = vmatprep.subr.bf16.mxu0 %v4020_v32  ;;  %4815 = vmatprep.subr.bf16.mxu1 %v4022_v48 }
 0x4e9   :  { %4652 = vmatpush1.bf16.msra.mxu0 %v4019_v49  ;;  %4816 = vmatpush1.bf16.msra.mxu1 %v4021_v50 }
 0x4ea   :  { %4653 = vmatprep.subr.bf16.mxu0 %v4028_v51  ;;  %4817 = vmatprep.subr.bf16.mxu1 %v4030_v23 }
 0x4ed   :  { %4654 = vmatpush1.bf16.msra.mxu0 %v4027_v54  ;;  %4818 = vmatpush1.bf16.msra.mxu1 %v4029_v55  ;;  %v4099_v54 = vld [vmem:[#allocation2 + $0xda0] sm:$0xff]  ;;  %v4101_v55 = vld [vmem:[#allocation2 + $0xdb0] sm:$0xff] }
 0x4ee   :  { %4655 = vmatprep.subr.bf16.mxu0 %v4036_v56  ;;  %4819 = vmatprep.subr.bf16.mxu1 %v4038_v58 }
 0x4f1   :  { %4656 = vmatpush1.bf16.msra.mxu0 %v4035_v27  ;;  %4820 = vmatpush1.bf16.msra.mxu1 %v4037_v60  ;;  %v4108_v27 = vld [vmem:[#allocation2 + $0xde8] sm:$0xff]  ;;  %v4110_v60 = vld [vmem:[#allocation2 + $0xdf8] sm:$0xff] }
 0x4f2   :  { %4657 = vmatprep.subr.bf16.mxu0 %v4044_v63  ;;  %4821 = vmatprep.subr.bf16.mxu1 %v4046_v0 }
 0x4f5   :  { %4658 = vmatpush1.bf16.msra.mxu0 %v4043_v1  ;;  %4822 = vmatpush1.bf16.msra.mxu1 %v4045_v2 }
 0x4f6   :  { %4668 = vmatprep.subr.bf16.mxu0 %v4052_v3  ;;  %4832 = vmatprep.subr.bf16.mxu1 %v4054_v4  ;;  %v4107_v3 = vld [vmem:[#allocation2 + $0xde0] sm:$0xff]  ;;  %v4109_v4 = vld [vmem:[#allocation2 + $0xdf0] sm:$0xff] }
 0x4f8   :  { %4660 = vmatmul.mubr.bf16.vlgmr.msra.gmra.mrb[12].mxu0 %v8194_v59  ;;  %4824 = vmatmul.mubr.bf16.vlgmr.msra.gmra.mrb[12].mxu1 %v8194_v59  ;;  %v4078_v59 = vld [vmem:[#allocation2 + $0xcf8] sm:$0xff] }
 0x4f9   :  { %4669 = vmatpush1.bf16.msra.mxu0 %v4051_v53  ;;  %4833 = vmatpush1.bf16.msra.mxu1 %v4053_v5  ;;  %v4116_v53 = vld [vmem:[#allocation2 + $0xe28] sm:$0xff]  ;;  %v4118_v5 = vld [vmem:[#allocation2 + $0xe38] sm:$0xff] }
 0x4fa   :  { %4670 = vmatprep.subr.bf16.mxu0 %v4060_v6  ;;  %4834 = vmatprep.subr.bf16.mxu1 %v4062_v7  ;;  %v4115_v6 = vld [vmem:[#allocation2 + $0xe20] sm:$0xff]  ;;  %v4117_v7 = vld [vmem:[#allocation2 + $0xe30] sm:$0xff] }
 0x4fb   :  { %4700 = vmatprep.mubr.bf16.mxu0 %v8200_v62  ;;  %4864 = vmatprep.mubr.bf16.mxu1 %v8200_v62  ;;  %v4083_v62 = vld [vmem:[#allocation2 + $0xd20] sm:$0xff] }
 0x4fd   :  { %4671 = vmatpush1.bf16.msra.mxu0 %v4059_v8  ;;  %4835 = vmatpush1.bf16.msra.mxu1 %v4061_v43  ;;  %v4124_v8 = vld [vmem:[#allocation2 + $0xe68] sm:$0xff]  ;;  %v4126_v43 = vld [vmem:[#allocation2 + $0xe78] sm:$0xff] }
 0x4fe   :  { %4672 = vmatprep.subr.bf16.mxu0 %v4068_v9  ;;  %4836 = vmatprep.subr.bf16.mxu1 %v4070_v10  ;;  %v4123_v9 = vld [vmem:[#allocation2 + $0xe60] sm:$0xff]  ;;  %v4125_v10 = vld [vmem:[#allocation2 + $0xe70] sm:$0xff] }
 0x501   :  { %4673 = vmatpush1.bf16.msra.mxu0 %v4067_v11  ;;  %4837 = vmatpush1.bf16.msra.mxu1 %v4069_v57  ;;  %v4132_v11 = vld [vmem:[#allocation2 + $0xea8] sm:$0xff]  ;;  %v4134_v57 = vld [vmem:[#allocation2 + $0xeb8] sm:$0xff] }
 0x502   :  { %4674 = vmatprep.subr.bf16.mxu0 %v4076_v13  ;;  %4838 = vmatprep.subr.bf16.mxu1 %v4078_v59  ;;  %v4131_v13 = vld [vmem:[#allocation2 + $0xea0] sm:$0xff]  ;;  %v4133_v59 = vld [vmem:[#allocation2 + $0xeb0] sm:$0xff] }
 0x505   :  { %4675 = vmatpush1.bf16.msra.mxu0 %v4075_v12  ;;  %4839 = vmatpush1.bf16.msra.mxu1 %v4077_v14  ;;  %v4140_v12 = vld [vmem:[#allocation2 + $0xee8] sm:$0xff]  ;;  %v4142_v14 = vld [vmem:[#allocation2 + $0xef8] sm:$0xff] }
 0x506   :  { %4676 = vmatprep.subr.bf16.mxu0 %v4084_v16  ;;  %4840 = vmatprep.subr.bf16.mxu1 %v4086_v17  ;;  %v4139_v16 = vld [vmem:[#allocation2 + $0xee0] sm:$0xff]  ;;  %v4141_v17 = vld [vmem:[#allocation2 + $0xef0] sm:$0xff] }
 0x509   :  { %4677 = vmatpush1.bf16.msra.mxu0 %v4083_v62  ;;  %4841 = vmatpush1.bf16.msra.mxu1 %v4085_v19  ;;  %v4148_v62 = vld [vmem:[#allocation2 + $0xf28] sm:$0xff]  ;;  %v4150_v19 = vld [vmem:[#allocation2 + $0xf38] sm:$0xff] }
 0x50a   :  { %4678 = vmatprep.subr.bf16.mxu0 %v4092_v20  ;;  %4842 = vmatprep.subr.bf16.mxu1 %v4094_v21  ;;  %v4147_v20 = vld [vmem:[#allocation2 + $0xf20] sm:$0xff]  ;;  %v4149_v21 = vld [vmem:[#allocation2 + $0xf30] sm:$0xff] }
 0x50b   :  { %v4374_v52 = vpop.f32.mrb[8].mxu0  ;;  %v4538_v35 = vpop.f32.mrb[8].mxu1 }
 0x50c   :  { %v7445_v40 = vadd.f32 %v4374_v52, %v4180_v22  ;;  %v7447_v26 = vadd.f32 %v4538_v35, %v4188_v24  ;;  %v4376_v41 = vpop.f32.mrb[9].mxu0  ;;  %v4540_v42 = vpop.f32.mrb[9].mxu1  ;;  %v4156_v22 = vld [vmem:[#allocation2 + $0xf68] sm:$0xff]  ;;  %v4158_v24 = vld [vmem:[#allocation2 + $0xf78] sm:$0xff]  ;;  %v4163_v52 = vld [vmem:[#allocation2 + $0xfa0] sm:$0xff] }
 0x50d   :  { %v7446_v46 = vadd.f32 %v4376_v41, %v4184_v36  ;;  %v7448_v47 = vadd.f32 %v4540_v42, %v4192_v28  ;;  %v4378_v32 = vpop.f32.mrb[10].mxu0  ;;  %v4542_v48 = vpop.f32.mrb[10].mxu1  ;;  %4679 = vmatpush1.bf16.msra.mxu0 %v4091_v29  ;;  %4843 = vmatpush1.bf16.msra.mxu1 %v4093_v34  ;;  %v4155_v36 = vld [vmem:[#allocation2 + $0xf60] sm:$0xff]  ;;  %v4157_v28 = vld [vmem:[#allocation2 + $0xf70] sm:$0xff]  ;;  %v4164_v29 = vld [vmem:[#allocation2 + $0xfa8] sm:$0xff]  ;;  %v4196_v41 = vrot.slane %v8232_v18, %v8175_v30 }
 0x50e   :  { %v4873_v49 = vmax.f32 %v7445_v40, 0.0  ;;  %v4875_v50 = vmax.f32 %v7447_v26, 0.0  ;;  %v4379_v51 = vpop.f32.mrb[11].mxu0  ;;  %v4543_v23 = vpop.f32.mrb[11].mxu1  ;;  %4680 = vmatprep.subr.bf16.mxu0 %v4100_v37  ;;  %4844 = vmatprep.subr.bf16.mxu1 %v4102_v38  ;;  %v4166_v34 = vld [vmem:[#allocation2 + $0xfb8] sm:$0xff]  ;;  %v4165_v35 = vld [vmem:[#allocation2 + $0xfb0] sm:$0xff]  ;;  %v4204_v42 = vrot.slane %v8232_v18, %v8178_v31 }
 0x50f   :  { %v4874_v56 = vmax.f32 %v7446_v46, 0.0  ;;  %v4876_v58 = vmax.f32 %v7448_v47, 0.0  ;;  %v4172_v37 = vld [vmem:[#allocation2 + $0xfe8] sm:$0xff]  ;;  %v4174_v38 = vld [vmem:[#allocation2 + $0xff8] sm:$0xff]  ;;  %v4171_v40 = vld [vmem:[#allocation2 + $0xfe0] sm:$0xff]  ;;  %v4200_v46 = vrot.slane %v8232_v18, %v8181_v15  ;;  %v4208_v47 = vrot.slane %v8232_v18, %v8184_v33 }
 0x510   :  { %v8242_v63 = vpack.c.bf16 %v4873_v49, %v4873_v49  ;;  %v8244_v0 = vpack.c.bf16 %v4875_v50, %v4875_v50  ;;  %v4173_v26 = vld [vmem:[#allocation2 + $0xff0] sm:$0xff] }
 0x511   :  { %v8246_v1 = vpack.c.bf16 %v4874_v56, %v4874_v56  ;;  %v8248_v2 = vpack.c.bf16 %v4876_v58, %v4876_v58  ;;  %4681 = vmatpush1.bf16.msra.mxu0 %v4099_v54  ;;  %4845 = vmatpush1.bf16.msra.mxu1 %v4101_v55 }
 0x512   :  { %4682 = vmatprep.subr.bf16.mxu0 %v4108_v27  ;;  %4846 = vmatprep.subr.bf16.mxu1 %v4110_v60 }
 0x515   :  { %4683 = vmatpush1.bf16.msra.mxu0 %v4107_v3  ;;  %4847 = vmatpush1.bf16.msra.mxu1 %v4109_v4 }
 0x516   :  { %4684 = vmatprep.subr.bf16.mxu0 %v4116_v53  ;;  %4848 = vmatprep.subr.bf16.mxu1 %v4118_v5 }
 0x519   :  { %4685 = vmatpush1.bf16.msra.mxu0 %v4115_v6  ;;  %4849 = vmatpush1.bf16.msra.mxu1 %v4117_v7 }
 0x51a   :  { %4686 = vmatprep.subr.bf16.mxu0 %v4124_v8  ;;  %4850 = vmatprep.subr.bf16.mxu1 %v4126_v43 }
 0x51d   :  { %4687 = vmatpush1.bf16.msra.mxu0 %v4123_v9  ;;  %4851 = vmatpush1.bf16.msra.mxu1 %v4125_v10 }
 0x51e   :  { %4688 = vmatprep.subr.bf16.mxu0 %v4132_v11  ;;  %4852 = vmatprep.subr.bf16.mxu1 %v4134_v57 }
 0x521   :  { %4689 = vmatpush1.bf16.msra.mxu0 %v4131_v13  ;;  %4853 = vmatpush1.bf16.msra.mxu1 %v4133_v59 }
 0x522   :  { %4690 = vmatprep.subr.bf16.mxu0 %v4140_v12  ;;  %4854 = vmatprep.subr.bf16.mxu1 %v4142_v14 }
 0x525   :  { %4691 = vmatpush1.bf16.msra.mxu0 %v4139_v16  ;;  %4855 = vmatpush1.bf16.msra.mxu1 %v4141_v17 }
 0x526   :  { %4692 = vmatprep.subr.bf16.mxu0 %v4148_v62  ;;  %4856 = vmatprep.subr.bf16.mxu1 %v4150_v19 }
 0x529   :  { %4693 = vmatpush1.bf16.msra.mxu0 %v4147_v20  ;;  %4857 = vmatpush1.bf16.msra.mxu1 %v4149_v21 }
 0x52a   :  { %4694 = vmatprep.subr.bf16.mxu0 %v4156_v22  ;;  %4858 = vmatprep.subr.bf16.mxu1 %v4158_v24 }
 0x52d   :  { %4695 = vmatpush1.bf16.msra.mxu0 %v4155_v36  ;;  %4859 = vmatpush1.bf16.msra.mxu1 %v4157_v28 }
 0x52e   :  { %4696 = vmatprep.subr.bf16.mxu0 %v4164_v29  ;;  %4860 = vmatprep.subr.bf16.mxu1 %v4166_v34 }
 0x531   :  { %4697 = vmatpush1.bf16.msra.mxu0 %v4163_v52  ;;  %4861 = vmatpush1.bf16.msra.mxu1 %v4165_v35 }
 0x532   :  { %4698 = vmatprep.subr.bf16.mxu0 %v4172_v37  ;;  %4862 = vmatprep.subr.bf16.mxu1 %v4174_v38 }
 0x535   :  { %4699 = vmatpush1.bf16.msra.mxu0 %v4171_v40  ;;  %4863 = vmatpush1.bf16.msra.mxu1 %v4173_v26 }
 0x538   :  { %4701 = vmatmul.mubr.bf16.vlgmr.msra.gmra.mrb[12].mxu0 %v8196_v61  ;;  %4865 = vmatmul.mubr.bf16.vlgmr.msra.gmra.mrb[12].mxu1 %v8196_v61 }
 0x60b   :  { %v4702_v32 = vpop.f32.mrb[12].mxu0  ;;  %v4866_v48 = vpop.f32.mrb[12].mxu1 }
 0x60c   :  { %v7449_v49 = vadd.f32 %v4702_v32, %v4196_v41  ;;  %v7451_v50 = vadd.f32 %v4866_v48, %v4204_v42  ;;  %v4704_v51 = vpop.f32.mrb[13].mxu0  ;;  %v4868_v23 = vpop.f32.mrb[13].mxu1 }
 0x60d   :  { %v7450_v54 = vadd.f32 %v4704_v51, %v4200_v46  ;;  %v7452_v61 = vadd.f32 %v4868_v23, %v4208_v47  ;;  %v4706_v55 = vpop.f32.mrb[14].mxu0  ;;  %v4870_v56 = vpop.f32.mrb[14].mxu1 }
 0x60e   :  { %v4877_v58 = vmax.f32 %v7449_v49, 0.0  ;;  %v4879_v27 = vmax.f32 %v7451_v50, 0.0  ;;  %v4707_v60 = vpop.f32.mrb[15].mxu0  ;;  %v4871_v3 = vpop.f32.mrb[15].mxu1 }
 0x60f   :  { %v4878_v4 = vmax.f32 %v7450_v54, 0.0  ;;  %v4880_v53 = vmax.f32 %v7452_v61, 0.0 }
 0x610   :  { %v8260_v5 = vpack.c.bf16 %v4877_v58, %v4877_v58  ;;  %v8262_v6 = vpack.c.bf16 %v4879_v27, %v4879_v27 }
 0x611   :  { %v8264_v18 = vpack.c.bf16 %v4878_v4, %v4878_v4  ;;  %v8266_v7 = vpack.c.bf16 %v4880_v53, %v4880_v53 }
 0x612   :  { %7859 = dma.done.wait [#allocation6 + $0x1], 65536 }
 0x613   :  { %7860 = vsyncadd [#allocation6 + $0x1], 4294901760  ;;  %5483 = vmatprep.mubr.bf16.mxu0 %v8246_v1  ;;  %5647 = vmatprep.mubr.bf16.mxu1 %v8246_v1  ;;  %v4898_v8 = vld [vmem:[#allocation3 + $0x8] sm:$0xff]  ;;  %v4900_v43 = vld [vmem:[#allocation3 + $0x18] sm:$0xff] }
 0x614   :  { %v4897_v9 = vld [vmem:[#allocation3] sm:$0xff]  ;;  %5451 = vmatprep.subr.bf16.mxu0 %v4898_v8  ;;  %5615 = vmatprep.subr.bf16.mxu1 %v4900_v43  ;;  %v4899_v10 = vld [vmem:[#allocation3 + $0x10] sm:$0xff]  ;;  %v4906_v11 = vld [vmem:[#allocation3 + $0x48] sm:$0xff] }
 0x615   :  { %v4908_v57 = vld [vmem:[#allocation3 + $0x58] sm:$0xff]  ;;  %5452 = vmatpush1.bf16.msra.mxu0 %v4897_v9  ;;  %5616 = vmatpush1.bf16.msra.mxu1 %v4899_v10  ;;  %v4905_v13 = vld [vmem:[#allocation3 + $0x40] sm:$0xff]  ;;  %v4907_v59 = vld [vmem:[#allocation3 + $0x50] sm:$0xff] }
 0x616   :  { %5453 = vmatprep.subr.bf16.mxu0 %v4906_v11  ;;  %5617 = vmatprep.subr.bf16.mxu1 %v4908_v57  ;;  %v4914_v12 = vld [vmem:[#allocation3 + $0x88] sm:$0xff]  ;;  %v4916_v14 = vld [vmem:[#allocation3 + $0x98] sm:$0xff]  ;;  %v4913_v16 = vld [vmem:[#allocation3 + $0x80] sm:$0xff] }
 0x617   :  { %v4915_v17 = vld [vmem:[#allocation3 + $0x90] sm:$0xff]  ;;  %v4922_v62 = vld [vmem:[#allocation3 + $0xc8] sm:$0xff]  ;;  %v4924_v19 = vld [vmem:[#allocation3 + $0xd8] sm:$0xff] }
 0x618   :  { %v4921_v20 = vld [vmem:[#allocation3 + $0xc0] sm:$0xff]  ;;  %v4923_v21 = vld [vmem:[#allocation3 + $0xd0] sm:$0xff]  ;;  %v4930_v22 = vld [vmem:[#allocation3 + $0x108] sm:$0xff] }
 0x619   :  { %5454 = vmatpush1.bf16.msra.mxu0 %v4905_v13  ;;  %5618 = vmatpush1.bf16.msra.mxu1 %v4907_v59  ;;  %v4932_v24 = vld [vmem:[#allocation3 + $0x118] sm:$0xff]  ;;  %v4929_v36 = vld [vmem:[#allocation3 + $0x100] sm:$0xff]  ;;  %v4931_v28 = vld [vmem:[#allocation3 + $0x110] sm:$0xff] }
 0x61a   :  { %5455 = vmatprep.subr.bf16.mxu0 %v4914_v12  ;;  %5619 = vmatprep.subr.bf16.mxu1 %v4916_v14  ;;  %v4938_v29 = vld [vmem:[#allocation3 + $0x148] sm:$0xff]  ;;  %v4940_v34 = vld [vmem:[#allocation3 + $0x158] sm:$0xff]  ;;  %v4937_v52 = vld [vmem:[#allocation3 + $0x140] sm:$0xff] }
 0x61b   :  { %v4939_v35 = vld [vmem:[#allocation3 + $0x150] sm:$0xff]  ;;  %v4946_v37 = vld [vmem:[#allocation3 + $0x188] sm:$0xff]  ;;  %v4948_v38 = vld [vmem:[#allocation3 + $0x198] sm:$0xff] }
 0x61c   :  { %v4945_v40 = vld [vmem:[#allocation3 + $0x180] sm:$0xff]  ;;  %v4947_v26 = vld [vmem:[#allocation3 + $0x190] sm:$0xff]  ;;  %v4954_v41 = vld [vmem:[#allocation3 + $0x1c8] sm:$0xff] }
 0x61d   :  { %5456 = vmatpush1.bf16.msra.mxu0 %v4913_v16  ;;  %5620 = vmatpush1.bf16.msra.mxu1 %v4915_v17  ;;  %v4956_v42 = vld [vmem:[#allocation3 + $0x1d8] sm:$0xff]  ;;  %v4953_v46 = vld [vmem:[#allocation3 + $0x1c0] sm:$0xff]  ;;  %v4955_v47 = vld [vmem:[#allocation3 + $0x1d0] sm:$0xff] }
 0x61e   :  { %5457 = vmatprep.subr.bf16.mxu0 %v4922_v62  ;;  %5621 = vmatprep.subr.bf16.mxu1 %v4924_v19  ;;  %v4962_v32 = vld [vmem:[#allocation3 + $0x208] sm:$0xff]  ;;  %v4964_v48 = vld [vmem:[#allocation3 + $0x218] sm:$0xff]  ;;  %v4961_v49 = vld [vmem:[#allocation3 + $0x200] sm:$0xff] }
 0x61f   :  { %v4963_v50 = vld [vmem:[#allocation3 + $0x210] sm:$0xff]  ;;  %v4970_v51 = vld [vmem:[#allocation3 + $0x248] sm:$0xff]  ;;  %v4972_v23 = vld [vmem:[#allocation3 + $0x258] sm:$0xff] }
 0x620   :  { %v4969_v54 = vld [vmem:[#allocation3 + $0x240] sm:$0xff]  ;;  %v4971_v61 = vld [vmem:[#allocation3 + $0x250] sm:$0xff]  ;;  %v4978_v55 = vld [vmem:[#allocation3 + $0x288] sm:$0xff] }
 0x621   :  { %5458 = vmatpush1.bf16.msra.mxu0 %v4921_v20  ;;  %5622 = vmatpush1.bf16.msra.mxu1 %v4923_v21  ;;  %v4980_v56 = vld [vmem:[#allocation3 + $0x298] sm:$0xff]  ;;  %v4977_v58 = vld [vmem:[#allocation3 + $0x280] sm:$0xff]  ;;  %v4979_v27 = vld [vmem:[#allocation3 + $0x290] sm:$0xff] }
 0x622   :  { %5459 = vmatprep.subr.bf16.mxu0 %v4930_v22  ;;  %5623 = vmatprep.subr.bf16.mxu1 %v4932_v24  ;;  %v4986_v60 = vld [vmem:[#allocation3 + $0x2c8] sm:$0xff]  ;;  %v4988_v3 = vld [vmem:[#allocation3 + $0x2d8] sm:$0xff]  ;;  %v4985_v4 = vld [vmem:[#allocation3 + $0x2c0] sm:$0xff] }
 0x623   :  { %v4987_v53 = vld [vmem:[#allocation3 + $0x2d0] sm:$0xff]  ;;  %v4994_v8 = vld [vmem:[#allocation3 + $0x308] sm:$0xff]  ;;  %v4996_v43 = vld [vmem:[#allocation3 + $0x318] sm:$0xff] }
 0x624   :  { %v4993_v9 = vld [vmem:[#allocation3 + $0x300] sm:$0xff]  ;;  %v4995_v10 = vld [vmem:[#allocation3 + $0x310] sm:$0xff]  ;;  %v5002_v11 = vld [vmem:[#allocation3 + $0x348] sm:$0xff] }
 0x625   :  { %5460 = vmatpush1.bf16.msra.mxu0 %v4929_v36  ;;  %5624 = vmatpush1.bf16.msra.mxu1 %v4931_v28  ;;  %v5004_v57 = vld [vmem:[#allocation3 + $0x358] sm:$0xff]  ;;  %v5001_v13 = vld [vmem:[#allocation3 + $0x340] sm:$0xff]  ;;  %v5003_v59 = vld [vmem:[#allocation3 + $0x350] sm:$0xff] }
 0x626   :  { %5461 = vmatprep.subr.bf16.mxu0 %v4938_v29  ;;  %5625 = vmatprep.subr.bf16.mxu1 %v4940_v34  ;;  %v5010_v12 = vld [vmem:[#allocation3 + $0x388] sm:$0xff]  ;;  %v5012_v14 = vld [vmem:[#allocation3 + $0x398] sm:$0xff]  ;;  %v5009_v16 = vld [vmem:[#allocation3 + $0x380] sm:$0xff] }
 0x627   :  { %v5011_v17 = vld [vmem:[#allocation3 + $0x390] sm:$0xff]  ;;  %v5018_v62 = vld [vmem:[#allocation3 + $0x3c8] sm:$0xff]  ;;  %v5020_v19 = vld [vmem:[#allocation3 + $0x3d8] sm:$0xff] }
 0x628   :  { %v5017_v20 = vld [vmem:[#allocation3 + $0x3c0] sm:$0xff]  ;;  %v5019_v21 = vld [vmem:[#allocation3 + $0x3d0] sm:$0xff]  ;;  %v5026_v22 = vld [vmem:[#allocation3 + $0x408] sm:$0xff] }
 0x629   :  { %5462 = vmatpush1.bf16.msra.mxu0 %v4937_v52  ;;  %5626 = vmatpush1.bf16.msra.mxu1 %v4939_v35  ;;  %v5028_v24 = vld [vmem:[#allocation3 + $0x418] sm:$0xff]  ;;  %v5025_v36 = vld [vmem:[#allocation3 + $0x400] sm:$0xff]  ;;  %v5027_v28 = vld [vmem:[#allocation3 + $0x410] sm:$0xff] }
 0x62a   :  { %5463 = vmatprep.subr.bf16.mxu0 %v4946_v37  ;;  %5627 = vmatprep.subr.bf16.mxu1 %v4948_v38  ;;  %v5034_v29 = vld [vmem:[#allocation3 + $0x448] sm:$0xff]  ;;  %v5036_v34 = vld [vmem:[#allocation3 + $0x458] sm:$0xff]  ;;  %v5033_v52 = vld [vmem:[#allocation3 + $0x440] sm:$0xff] }
 0x62b   :  { %v5035_v35 = vld [vmem:[#allocation3 + $0x450] sm:$0xff]  ;;  %v5042_v37 = vld [vmem:[#allocation3 + $0x488] sm:$0xff]  ;;  %v5044_v38 = vld [vmem:[#allocation3 + $0x498] sm:$0xff] }
 0x62d   :  { %5464 = vmatpush1.bf16.msra.mxu0 %v4945_v40  ;;  %5628 = vmatpush1.bf16.msra.mxu1 %v4947_v26  ;;  %v5041_v40 = vld [vmem:[#allocation3 + $0x480] sm:$0xff]  ;;  %v5043_v26 = vld [vmem:[#allocation3 + $0x490] sm:$0xff] }
 0x62e   :  { %5465 = vmatprep.subr.bf16.mxu0 %v4954_v41  ;;  %5629 = vmatprep.subr.bf16.mxu1 %v4956_v42  ;;  %v5050_v41 = vld [vmem:[#allocation3 + $0x4c8] sm:$0xff]  ;;  %v5052_v42 = vld [vmem:[#allocation3 + $0x4d8] sm:$0xff] }
 0x631   :  { %5466 = vmatpush1.bf16.msra.mxu0 %v4953_v46  ;;  %5630 = vmatpush1.bf16.msra.mxu1 %v4955_v47  ;;  %v5049_v46 = vld [vmem:[#allocation3 + $0x4c0] sm:$0xff]  ;;  %v5051_v47 = vld [vmem:[#allocation3 + $0x4d0] sm:$0xff] }
 0x632   :  { %5467 = vmatprep.subr.bf16.mxu0 %v4962_v32  ;;  %5631 = vmatprep.subr.bf16.mxu1 %v4964_v48  ;;  %v5058_v32 = vld [vmem:[#allocation3 + $0x508] sm:$0xff]  ;;  %v5060_v48 = vld [vmem:[#allocation3 + $0x518] sm:$0xff] }
 0x635   :  { %5468 = vmatpush1.bf16.msra.mxu0 %v4961_v49  ;;  %5632 = vmatpush1.bf16.msra.mxu1 %v4963_v50  ;;  %v5057_v49 = vld [vmem:[#allocation3 + $0x500] sm:$0xff]  ;;  %v5059_v50 = vld [vmem:[#allocation3 + $0x510] sm:$0xff] }
 0x636   :  { %5469 = vmatprep.subr.bf16.mxu0 %v4970_v51  ;;  %5633 = vmatprep.subr.bf16.mxu1 %v4972_v23  ;;  %v5066_v51 = vld [vmem:[#allocation3 + $0x548] sm:$0xff]  ;;  %v5068_v23 = vld [vmem:[#allocation3 + $0x558] sm:$0xff] }
 0x639   :  { %5470 = vmatpush1.bf16.msra.mxu0 %v4969_v54  ;;  %5634 = vmatpush1.bf16.msra.mxu1 %v4971_v61  ;;  %v5065_v54 = vld [vmem:[#allocation3 + $0x540] sm:$0xff]  ;;  %v5067_v61 = vld [vmem:[#allocation3 + $0x550] sm:$0xff] }
 0x63a   :  { %5471 = vmatprep.subr.bf16.mxu0 %v4978_v55  ;;  %5635 = vmatprep.subr.bf16.mxu1 %v4980_v56  ;;  %v5074_v55 = vld [vmem:[#allocation3 + $0x588] sm:$0xff]  ;;  %v5076_v56 = vld [vmem:[#allocation3 + $0x598] sm:$0xff] }
 0x63d   :  { %5472 = vmatpush1.bf16.msra.mxu0 %v4977_v58  ;;  %5636 = vmatpush1.bf16.msra.mxu1 %v4979_v27  ;;  %v5073_v58 = vld [vmem:[#allocation3 + $0x580] sm:$0xff]  ;;  %v5075_v27 = vld [vmem:[#allocation3 + $0x590] sm:$0xff] }
 0x63e   :  { %5473 = vmatprep.subr.bf16.mxu0 %v4986_v60  ;;  %5637 = vmatprep.subr.bf16.mxu1 %v4988_v3  ;;  %v5082_v60 = vld [vmem:[#allocation3 + $0x5c8] sm:$0xff]  ;;  %v5084_v3 = vld [vmem:[#allocation3 + $0x5d8] sm:$0xff] }
 0x641   :  { %5474 = vmatpush1.bf16.msra.mxu0 %v4985_v4  ;;  %5638 = vmatpush1.bf16.msra.mxu1 %v4987_v53  ;;  %v5081_v4 = vld [vmem:[#allocation3 + $0x5c0] sm:$0xff]  ;;  %v5083_v53 = vld [vmem:[#allocation3 + $0x5d0] sm:$0xff] }
 0x642   :  { %5475 = vmatprep.subr.bf16.mxu0 %v4994_v8  ;;  %5639 = vmatprep.subr.bf16.mxu1 %v4996_v43  ;;  %v5090_v8 = vld [vmem:[#allocation3 + $0x608] sm:$0xff]  ;;  %v5092_v43 = vld [vmem:[#allocation3 + $0x618] sm:$0xff] }
 0x645   :  { %5476 = vmatpush1.bf16.msra.mxu0 %v4993_v9  ;;  %5640 = vmatpush1.bf16.msra.mxu1 %v4995_v10  ;;  %v5089_v9 = vld [vmem:[#allocation3 + $0x600] sm:$0xff]  ;;  %v5091_v10 = vld [vmem:[#allocation3 + $0x610] sm:$0xff] }
 0x646   :  { %5477 = vmatprep.subr.bf16.mxu0 %v5002_v11  ;;  %5641 = vmatprep.subr.bf16.mxu1 %v5004_v57  ;;  %v5098_v11 = vld [vmem:[#allocation3 + $0x648] sm:$0xff]  ;;  %v5100_v57 = vld [vmem:[#allocation3 + $0x658] sm:$0xff] }
 0x649   :  { %5478 = vmatpush1.bf16.msra.mxu0 %v5001_v13  ;;  %5642 = vmatpush1.bf16.msra.mxu1 %v5003_v59  ;;  %v5097_v13 = vld [vmem:[#allocation3 + $0x640] sm:$0xff]  ;;  %v5099_v59 = vld [vmem:[#allocation3 + $0x650] sm:$0xff] }
 0x64a   :  { %5479 = vmatprep.subr.bf16.mxu0 %v5010_v12  ;;  %5643 = vmatprep.subr.bf16.mxu1 %v5012_v14  ;;  %v5106_v12 = vld [vmem:[#allocation3 + $0x688] sm:$0xff]  ;;  %v5108_v14 = vld [vmem:[#allocation3 + $0x698] sm:$0xff] }
 0x64d   :  { %5480 = vmatpush1.bf16.msra.mxu0 %v5009_v16  ;;  %5644 = vmatpush1.bf16.msra.mxu1 %v5011_v17  ;;  %v5105_v16 = vld [vmem:[#allocation3 + $0x680] sm:$0xff]  ;;  %v5107_v17 = vld [vmem:[#allocation3 + $0x690] sm:$0xff] }
 0x64e   :  { %5481 = vmatprep.subr.bf16.mxu0 %v5018_v62  ;;  %5645 = vmatprep.subr.bf16.mxu1 %v5020_v19  ;;  %v5114_v62 = vld [vmem:[#allocation3 + $0x6c8] sm:$0xff]  ;;  %v5116_v19 = vld [vmem:[#allocation3 + $0x6d8] sm:$0xff] }
 0x651   :  { %5482 = vmatpush1.bf16.msra.mxu0 %v5017_v20  ;;  %5646 = vmatpush1.bf16.msra.mxu1 %v5019_v21  ;;  %v5113_v20 = vld [vmem:[#allocation3 + $0x6c0] sm:$0xff]  ;;  %v5115_v21 = vld [vmem:[#allocation3 + $0x6d0] sm:$0xff] }
 0x652   :  { %5492 = vmatprep.subr.bf16.mxu0 %v5026_v22  ;;  %5656 = vmatprep.subr.bf16.mxu1 %v5028_v24  ;;  %v5122_v22 = vld [vmem:[#allocation3 + $0x708] sm:$0xff]  ;;  %v5124_v24 = vld [vmem:[#allocation3 + $0x718] sm:$0xff] }
 0x654   :  { %5484 = vmatmul.mubr.bf16.vlgmr.msra.gmra.mrb[16].mxu0 %v8242_v63  ;;  %5648 = vmatmul.mubr.bf16.vlgmr.msra.gmra.mrb[16].mxu1 %v8242_v63 }
 0x655   :  { %5493 = vmatpush1.bf16.msra.mxu0 %v5025_v36  ;;  %5657 = vmatpush1.bf16.msra.mxu1 %v5027_v28  ;;  %v5121_v36 = vld [vmem:[#allocation3 + $0x700] sm:$0xff]  ;;  %v5123_v28 = vld [vmem:[#allocation3 + $0x710] sm:$0xff] }
 0x656   :  { %5494 = vmatprep.subr.bf16.mxu0 %v5034_v29  ;;  %5658 = vmatprep.subr.bf16.mxu1 %v5036_v34  ;;  %v5130_v29 = vld [vmem:[#allocation3 + $0x748] sm:$0xff]  ;;  %v5132_v34 = vld [vmem:[#allocation3 + $0x758] sm:$0xff] }
 0x657   :  { %5524 = vmatprep.mubr.bf16.mxu0 %v8248_v2  ;;  %5688 = vmatprep.mubr.bf16.mxu1 %v8248_v2 }
 0x659   :  { %5495 = vmatpush1.bf16.msra.mxu0 %v5033_v52  ;;  %5659 = vmatpush1.bf16.msra.mxu1 %v5035_v35  ;;  %v5129_v52 = vld [vmem:[#allocation3 + $0x740] sm:$0xff]  ;;  %v5131_v35 = vld [vmem:[#allocation3 + $0x750] sm:$0xff] }
 0x65a   :  { %5496 = vmatprep.subr.bf16.mxu0 %v5042_v37  ;;  %5660 = vmatprep.subr.bf16.mxu1 %v5044_v38  ;;  %v5138_v37 = vld [vmem:[#allocation3 + $0x788] sm:$0xff]  ;;  %v5140_v38 = vld [vmem:[#allocation3 + $0x798] sm:$0xff] }
 0x65d   :  { %5497 = vmatpush1.bf16.msra.mxu0 %v5041_v40  ;;  %5661 = vmatpush1.bf16.msra.mxu1 %v5043_v26  ;;  %v5137_v40 = vld [vmem:[#allocation3 + $0x780] sm:$0xff]  ;;  %v5139_v26 = vld [vmem:[#allocation3 + $0x790] sm:$0xff] }
 0x65e   :  { %5498 = vmatprep.subr.bf16.mxu0 %v5050_v41  ;;  %5662 = vmatprep.subr.bf16.mxu1 %v5052_v42  ;;  %v5146_v41 = vld [vmem:[#allocation3 + $0x7c8] sm:$0xff]  ;;  %v5148_v42 = vld [vmem:[#allocation3 + $0x7d8] sm:$0xff] }
 0x661   :  { %5499 = vmatpush1.bf16.msra.mxu0 %v5049_v46  ;;  %5663 = vmatpush1.bf16.msra.mxu1 %v5051_v47  ;;  %v5145_v46 = vld [vmem:[#allocation3 + $0x7c0] sm:$0xff]  ;;  %v5147_v47 = vld [vmem:[#allocation3 + $0x7d0] sm:$0xff] }
 0x662   :  { %5500 = vmatprep.subr.bf16.mxu0 %v5058_v32  ;;  %5664 = vmatprep.subr.bf16.mxu1 %v5060_v48  ;;  %v5154_v32 = vld [vmem:[#allocation3 + $0x808] sm:$0xff]  ;;  %v5156_v48 = vld [vmem:[#allocation3 + $0x818] sm:$0xff] }
 0x665   :  { %5501 = vmatpush1.bf16.msra.mxu0 %v5057_v49  ;;  %5665 = vmatpush1.bf16.msra.mxu1 %v5059_v50  ;;  %v5153_v49 = vld [vmem:[#allocation3 + $0x800] sm:$0xff]  ;;  %v5155_v50 = vld [vmem:[#allocation3 + $0x810] sm:$0xff] }
 0x666   :  { %5502 = vmatprep.subr.bf16.mxu0 %v5066_v51  ;;  %5666 = vmatprep.subr.bf16.mxu1 %v5068_v23  ;;  %v5162_v51 = vld [vmem:[#allocation3 + $0x848] sm:$0xff]  ;;  %v5164_v23 = vld [vmem:[#allocation3 + $0x858] sm:$0xff] }
 0x669   :  { %5503 = vmatpush1.bf16.msra.mxu0 %v5065_v54  ;;  %5667 = vmatpush1.bf16.msra.mxu1 %v5067_v61  ;;  %v5161_v54 = vld [vmem:[#allocation3 + $0x840] sm:$0xff]  ;;  %v5163_v61 = vld [vmem:[#allocation3 + $0x850] sm:$0xff] }
 0x66a   :  { %5504 = vmatprep.subr.bf16.mxu0 %v5074_v55  ;;  %5668 = vmatprep.subr.bf16.mxu1 %v5076_v56  ;;  %v5170_v55 = vld [vmem:[#allocation3 + $0x888] sm:$0xff]  ;;  %v5172_v56 = vld [vmem:[#allocation3 + $0x898] sm:$0xff] }
 0x66d   :  { %5505 = vmatpush1.bf16.msra.mxu0 %v5073_v58  ;;  %5669 = vmatpush1.bf16.msra.mxu1 %v5075_v27  ;;  %v5169_v58 = vld [vmem:[#allocation3 + $0x880] sm:$0xff]  ;;  %v5171_v27 = vld [vmem:[#allocation3 + $0x890] sm:$0xff] }
 0x66e   :  { %5506 = vmatprep.subr.bf16.mxu0 %v5082_v60  ;;  %5670 = vmatprep.subr.bf16.mxu1 %v5084_v3  ;;  %v5178_v60 = vld [vmem:[#allocation3 + $0x8c8] sm:$0xff]  ;;  %v5180_v3 = vld [vmem:[#allocation3 + $0x8d8] sm:$0xff] }
 0x671   :  { %5507 = vmatpush1.bf16.msra.mxu0 %v5081_v4  ;;  %5671 = vmatpush1.bf16.msra.mxu1 %v5083_v53  ;;  %v5177_v4 = vld [vmem:[#allocation3 + $0x8c0] sm:$0xff]  ;;  %v5179_v53 = vld [vmem:[#allocation3 + $0x8d0] sm:$0xff] }
 0x672   :  { %5508 = vmatprep.subr.bf16.mxu0 %v5090_v8  ;;  %5672 = vmatprep.subr.bf16.mxu1 %v5092_v43  ;;  %v5186_v8 = vld [vmem:[#allocation3 + $0x908] sm:$0xff]  ;;  %v5188_v43 = vld [vmem:[#allocation3 + $0x918] sm:$0xff] }
 0x675   :  { %5509 = vmatpush1.bf16.msra.mxu0 %v5089_v9  ;;  %5673 = vmatpush1.bf16.msra.mxu1 %v5091_v10  ;;  %v5185_v9 = vld [vmem:[#allocation3 + $0x900] sm:$0xff]  ;;  %v5187_v10 = vld [vmem:[#allocation3 + $0x910] sm:$0xff] }
 0x676   :  { %5510 = vmatprep.subr.bf16.mxu0 %v5098_v11  ;;  %5674 = vmatprep.subr.bf16.mxu1 %v5100_v57  ;;  %v5194_v11 = vld [vmem:[#allocation3 + $0x948] sm:$0xff]  ;;  %v5196_v57 = vld [vmem:[#allocation3 + $0x958] sm:$0xff] }
 0x679   :  { %5511 = vmatpush1.bf16.msra.mxu0 %v5097_v13  ;;  %5675 = vmatpush1.bf16.msra.mxu1 %v5099_v59  ;;  %v5193_v13 = vld [vmem:[#allocation3 + $0x940] sm:$0xff]  ;;  %v5195_v59 = vld [vmem:[#allocation3 + $0x950] sm:$0xff] }
 0x67a   :  { %5512 = vmatprep.subr.bf16.mxu0 %v5106_v12  ;;  %5676 = vmatprep.subr.bf16.mxu1 %v5108_v14  ;;  %v5202_v12 = vld [vmem:[#allocation3 + $0x988] sm:$0xff]  ;;  %v5204_v14 = vld [vmem:[#allocation3 + $0x998] sm:$0xff] }
 0x67d   :  { %5513 = vmatpush1.bf16.msra.mxu0 %v5105_v16  ;;  %5677 = vmatpush1.bf16.msra.mxu1 %v5107_v17  ;;  %v5201_v16 = vld [vmem:[#allocation3 + $0x980] sm:$0xff]  ;;  %v5203_v17 = vld [vmem:[#allocation3 + $0x990] sm:$0xff] }
 0x67e   :  { %5514 = vmatprep.subr.bf16.mxu0 %v5114_v62  ;;  %5678 = vmatprep.subr.bf16.mxu1 %v5116_v19  ;;  %v5210_v62 = vld [vmem:[#allocation3 + $0x9c8] sm:$0xff]  ;;  %v5212_v19 = vld [vmem:[#allocation3 + $0x9d8] sm:$0xff] }
 0x681   :  { %5515 = vmatpush1.bf16.msra.mxu0 %v5113_v20  ;;  %5679 = vmatpush1.bf16.msra.mxu1 %v5115_v21  ;;  %v5209_v20 = vld [vmem:[#allocation3 + $0x9c0] sm:$0xff]  ;;  %v5211_v21 = vld [vmem:[#allocation3 + $0x9d0] sm:$0xff] }
 0x682   :  { %5516 = vmatprep.subr.bf16.mxu0 %v5122_v22  ;;  %5680 = vmatprep.subr.bf16.mxu1 %v5124_v24  ;;  %v5218_v22 = vld [vmem:[#allocation3 + $0xa08] sm:$0xff]  ;;  %v5220_v24 = vld [vmem:[#allocation3 + $0xa18] sm:$0xff] }
 0x685   :  { %5517 = vmatpush1.bf16.msra.mxu0 %v5121_v36  ;;  %5681 = vmatpush1.bf16.msra.mxu1 %v5123_v28  ;;  %v5217_v36 = vld [vmem:[#allocation3 + $0xa00] sm:$0xff]  ;;  %v5219_v28 = vld [vmem:[#allocation3 + $0xa10] sm:$0xff] }
 0x686   :  { %5518 = vmatprep.subr.bf16.mxu0 %v5130_v29  ;;  %5682 = vmatprep.subr.bf16.mxu1 %v5132_v34  ;;  %v5226_v29 = vld [vmem:[#allocation3 + $0xa48] sm:$0xff]  ;;  %v5228_v34 = vld [vmem:[#allocation3 + $0xa58] sm:$0xff] }
 0x689   :  { %5519 = vmatpush1.bf16.msra.mxu0 %v5129_v52  ;;  %5683 = vmatpush1.bf16.msra.mxu1 %v5131_v35  ;;  %v5225_v52 = vld [vmem:[#allocation3 + $0xa40] sm:$0xff]  ;;  %v5227_v35 = vld [vmem:[#allocation3 + $0xa50] sm:$0xff] }
 0x68a   :  { %5520 = vmatprep.subr.bf16.mxu0 %v5138_v37  ;;  %5684 = vmatprep.subr.bf16.mxu1 %v5140_v38  ;;  %v5234_v37 = vld [vmem:[#allocation3 + $0xa88] sm:$0xff]  ;;  %v5236_v38 = vld [vmem:[#allocation3 + $0xa98] sm:$0xff] }
 0x68d   :  { %5521 = vmatpush1.bf16.msra.mxu0 %v5137_v40  ;;  %5685 = vmatpush1.bf16.msra.mxu1 %v5139_v26  ;;  %v5233_v40 = vld [vmem:[#allocation3 + $0xa80] sm:$0xff]  ;;  %v5235_v26 = vld [vmem:[#allocation3 + $0xa90] sm:$0xff] }
 0x68e   :  { %5522 = vmatprep.subr.bf16.mxu0 %v5146_v41  ;;  %5686 = vmatprep.subr.bf16.mxu1 %v5148_v42  ;;  %v5242_v41 = vld [vmem:[#allocation3 + $0xac8] sm:$0xff]  ;;  %v5244_v42 = vld [vmem:[#allocation3 + $0xad8] sm:$0xff] }
 0x691   :  { %5523 = vmatpush1.bf16.msra.mxu0 %v5145_v46  ;;  %5687 = vmatpush1.bf16.msra.mxu1 %v5147_v47  ;;  %v5241_v46 = vld [vmem:[#allocation3 + $0xac0] sm:$0xff]  ;;  %v5243_v47 = vld [vmem:[#allocation3 + $0xad0] sm:$0xff] }
 0x692   :  { %5533 = vmatprep.subr.bf16.mxu0 %v5154_v32  ;;  %5697 = vmatprep.subr.bf16.mxu1 %v5156_v48  ;;  %v5250_v32 = vld [vmem:[#allocation3 + $0xb08] sm:$0xff]  ;;  %v5252_v48 = vld [vmem:[#allocation3 + $0xb18] sm:$0xff] }
 0x694   :  { %5525 = vmatmul.mubr.bf16.vlgmr.msra.gmra.mrb[16].mxu0 %v8244_v0  ;;  %5689 = vmatmul.mubr.bf16.vlgmr.msra.gmra.mrb[16].mxu1 %v8244_v0 }
 0x695   :  { %5534 = vmatpush1.bf16.msra.mxu0 %v5153_v49  ;;  %5698 = vmatpush1.bf16.msra.mxu1 %v5155_v50  ;;  %v5249_v49 = vld [vmem:[#allocation3 + $0xb00] sm:$0xff]  ;;  %v5251_v50 = vld [vmem:[#allocation3 + $0xb10] sm:$0xff] }
 0x696   :  { %5535 = vmatprep.subr.bf16.mxu0 %v5162_v51  ;;  %5699 = vmatprep.subr.bf16.mxu1 %v5164_v23  ;;  %v5258_v51 = vld [vmem:[#allocation3 + $0xb48] sm:$0xff]  ;;  %v5260_v23 = vld [vmem:[#allocation3 + $0xb58] sm:$0xff] }
 0x697   :  { %5565 = vmatprep.mubr.bf16.mxu0 %v8264_v18  ;;  %5729 = vmatprep.mubr.bf16.mxu1 %v8264_v18 }
 0x699   :  { %5536 = vmatpush1.bf16.msra.mxu0 %v5161_v54  ;;  %5700 = vmatpush1.bf16.msra.mxu1 %v5163_v61  ;;  %v5257_v54 = vld [vmem:[#allocation3 + $0xb40] sm:$0xff]  ;;  %v5259_v61 = vld [vmem:[#allocation3 + $0xb50] sm:$0xff] }
 0x69a   :  { %5537 = vmatprep.subr.bf16.mxu0 %v5170_v55  ;;  %5701 = vmatprep.subr.bf16.mxu1 %v5172_v56  ;;  %v5266_v55 = vld [vmem:[#allocation3 + $0xb88] sm:$0xff]  ;;  %v5268_v56 = vld [vmem:[#allocation3 + $0xb98] sm:$0xff] }
 0x69d   :  { %5538 = vmatpush1.bf16.msra.mxu0 %v5169_v58  ;;  %5702 = vmatpush1.bf16.msra.mxu1 %v5171_v27  ;;  %v5265_v58 = vld [vmem:[#allocation3 + $0xb80] sm:$0xff]  ;;  %v5267_v27 = vld [vmem:[#allocation3 + $0xb90] sm:$0xff] }
 0x69e   :  { %5539 = vmatprep.subr.bf16.mxu0 %v5178_v60  ;;  %5703 = vmatprep.subr.bf16.mxu1 %v5180_v3  ;;  %v5274_v60 = vld [vmem:[#allocation3 + $0xbc8] sm:$0xff]  ;;  %v5276_v3 = vld [vmem:[#allocation3 + $0xbd8] sm:$0xff] }
 0x6a1   :  { %5540 = vmatpush1.bf16.msra.mxu0 %v5177_v4  ;;  %5704 = vmatpush1.bf16.msra.mxu1 %v5179_v53  ;;  %v5273_v4 = vld [vmem:[#allocation3 + $0xbc0] sm:$0xff]  ;;  %v5275_v53 = vld [vmem:[#allocation3 + $0xbd0] sm:$0xff] }
 0x6a2   :  { %5541 = vmatprep.subr.bf16.mxu0 %v5186_v8  ;;  %5705 = vmatprep.subr.bf16.mxu1 %v5188_v43  ;;  %v5282_v8 = vld [vmem:[#allocation3 + $0xc08] sm:$0xff]  ;;  %v5284_v43 = vld [vmem:[#allocation3 + $0xc18] sm:$0xff] }
 0x6a5   :  { %5542 = vmatpush1.bf16.msra.mxu0 %v5185_v9  ;;  %5706 = vmatpush1.bf16.msra.mxu1 %v5187_v10  ;;  %v5281_v9 = vld [vmem:[#allocation3 + $0xc00] sm:$0xff]  ;;  %v5283_v10 = vld [vmem:[#allocation3 + $0xc10] sm:$0xff] }
 0x6a6   :  { %5543 = vmatprep.subr.bf16.mxu0 %v5194_v11  ;;  %5707 = vmatprep.subr.bf16.mxu1 %v5196_v57  ;;  %v5290_v11 = vld [vmem:[#allocation3 + $0xc48] sm:$0xff]  ;;  %v5292_v57 = vld [vmem:[#allocation3 + $0xc58] sm:$0xff] }
 0x6a9   :  { %5544 = vmatpush1.bf16.msra.mxu0 %v5193_v13  ;;  %5708 = vmatpush1.bf16.msra.mxu1 %v5195_v59  ;;  %v5289_v13 = vld [vmem:[#allocation3 + $0xc40] sm:$0xff]  ;;  %v5291_v59 = vld [vmem:[#allocation3 + $0xc50] sm:$0xff] }
 0x6aa   :  { %5545 = vmatprep.subr.bf16.mxu0 %v5202_v12  ;;  %5709 = vmatprep.subr.bf16.mxu1 %v5204_v14  ;;  %v5298_v12 = vld [vmem:[#allocation3 + $0xc88] sm:$0xff]  ;;  %v5300_v14 = vld [vmem:[#allocation3 + $0xc98] sm:$0xff] }
 0x6ad   :  { %5546 = vmatpush1.bf16.msra.mxu0 %v5201_v16  ;;  %5710 = vmatpush1.bf16.msra.mxu1 %v5203_v17  ;;  %v5297_v16 = vld [vmem:[#allocation3 + $0xc80] sm:$0xff]  ;;  %v5299_v17 = vld [vmem:[#allocation3 + $0xc90] sm:$0xff] }
 0x6ae   :  { %5547 = vmatprep.subr.bf16.mxu0 %v5210_v62  ;;  %5711 = vmatprep.subr.bf16.mxu1 %v5212_v19  ;;  %v5306_v62 = vld [vmem:[#allocation3 + $0xcc8] sm:$0xff]  ;;  %v5308_v19 = vld [vmem:[#allocation3 + $0xcd8] sm:$0xff] }
 0x6b1   :  { %5548 = vmatpush1.bf16.msra.mxu0 %v5209_v20  ;;  %5712 = vmatpush1.bf16.msra.mxu1 %v5211_v21  ;;  %v5305_v20 = vld [vmem:[#allocation3 + $0xcc0] sm:$0xff]  ;;  %v5307_v21 = vld [vmem:[#allocation3 + $0xcd0] sm:$0xff] }
 0x6b2   :  { %5549 = vmatprep.subr.bf16.mxu0 %v5218_v22  ;;  %5713 = vmatprep.subr.bf16.mxu1 %v5220_v24  ;;  %v5314_v22 = vld [vmem:[#allocation3 + $0xd08] sm:$0xff]  ;;  %v5316_v24 = vld [vmem:[#allocation3 + $0xd18] sm:$0xff] }
 0x6b5   :  { %5550 = vmatpush1.bf16.msra.mxu0 %v5217_v36  ;;  %5714 = vmatpush1.bf16.msra.mxu1 %v5219_v28  ;;  %v5313_v36 = vld [vmem:[#allocation3 + $0xd00] sm:$0xff]  ;;  %v5315_v28 = vld [vmem:[#allocation3 + $0xd10] sm:$0xff] }
 0x6b6   :  { %5551 = vmatprep.subr.bf16.mxu0 %v5226_v29  ;;  %5715 = vmatprep.subr.bf16.mxu1 %v5228_v34  ;;  %v5322_v29 = vld [vmem:[#allocation3 + $0xd48] sm:$0xff]  ;;  %v5324_v34 = vld [vmem:[#allocation3 + $0xd58] sm:$0xff] }
 0x6b9   :  { %5552 = vmatpush1.bf16.msra.mxu0 %v5225_v52  ;;  %5716 = vmatpush1.bf16.msra.mxu1 %v5227_v35  ;;  %v5321_v52 = vld [vmem:[#allocation3 + $0xd40] sm:$0xff]  ;;  %v5323_v35 = vld [vmem:[#allocation3 + $0xd50] sm:$0xff] }
 0x6ba   :  { %5553 = vmatprep.subr.bf16.mxu0 %v5234_v37  ;;  %5717 = vmatprep.subr.bf16.mxu1 %v5236_v38  ;;  %v5330_v37 = vld [vmem:[#allocation3 + $0xd88] sm:$0xff]  ;;  %v5332_v38 = vld [vmem:[#allocation3 + $0xd98] sm:$0xff] }
 0x6bd   :  { %5554 = vmatpush1.bf16.msra.mxu0 %v5233_v40  ;;  %5718 = vmatpush1.bf16.msra.mxu1 %v5235_v26  ;;  %v5329_v40 = vld [vmem:[#allocation3 + $0xd80] sm:$0xff]  ;;  %v5331_v26 = vld [vmem:[#allocation3 + $0xd90] sm:$0xff] }
 0x6be   :  { %5555 = vmatprep.subr.bf16.mxu0 %v5242_v41  ;;  %5719 = vmatprep.subr.bf16.mxu1 %v5244_v42  ;;  %v5338_v41 = vld [vmem:[#allocation3 + $0xdc8] sm:$0xff]  ;;  %v5340_v42 = vld [vmem:[#allocation3 + $0xdd8] sm:$0xff] }
 0x6c1   :  { %5556 = vmatpush1.bf16.msra.mxu0 %v5241_v46  ;;  %5720 = vmatpush1.bf16.msra.mxu1 %v5243_v47  ;;  %v5337_v46 = vld [vmem:[#allocation3 + $0xdc0] sm:$0xff]  ;;  %v5339_v47 = vld [vmem:[#allocation3 + $0xdd0] sm:$0xff] }
 0x6c2   :  { %5557 = vmatprep.subr.bf16.mxu0 %v5250_v32  ;;  %5721 = vmatprep.subr.bf16.mxu1 %v5252_v48  ;;  %v5346_v32 = vld [vmem:[#allocation3 + $0xe08] sm:$0xff]  ;;  %v5348_v48 = vld [vmem:[#allocation3 + $0xe18] sm:$0xff] }
 0x6c5   :  { %5558 = vmatpush1.bf16.msra.mxu0 %v5249_v49  ;;  %5722 = vmatpush1.bf16.msra.mxu1 %v5251_v50  ;;  %v5345_v49 = vld [vmem:[#allocation3 + $0xe00] sm:$0xff]  ;;  %v5347_v50 = vld [vmem:[#allocation3 + $0xe10] sm:$0xff] }
 0x6c6   :  { %5559 = vmatprep.subr.bf16.mxu0 %v5258_v51  ;;  %5723 = vmatprep.subr.bf16.mxu1 %v5260_v23  ;;  %v5354_v51 = vld [vmem:[#allocation3 + $0xe48] sm:$0xff]  ;;  %v5356_v23 = vld [vmem:[#allocation3 + $0xe58] sm:$0xff] }
 0x6c9   :  { %5560 = vmatpush1.bf16.msra.mxu0 %v5257_v54  ;;  %5724 = vmatpush1.bf16.msra.mxu1 %v5259_v61  ;;  %v5353_v54 = vld [vmem:[#allocation3 + $0xe40] sm:$0xff]  ;;  %v5355_v61 = vld [vmem:[#allocation3 + $0xe50] sm:$0xff] }
 0x6ca   :  { %5561 = vmatprep.subr.bf16.mxu0 %v5266_v55  ;;  %5725 = vmatprep.subr.bf16.mxu1 %v5268_v56  ;;  %v5362_v55 = vld [vmem:[#allocation3 + $0xe88] sm:$0xff]  ;;  %v5364_v56 = vld [vmem:[#allocation3 + $0xe98] sm:$0xff] }
 0x6cd   :  { %5562 = vmatpush1.bf16.msra.mxu0 %v5265_v58  ;;  %5726 = vmatpush1.bf16.msra.mxu1 %v5267_v27  ;;  %v5361_v58 = vld [vmem:[#allocation3 + $0xe80] sm:$0xff]  ;;  %v5363_v27 = vld [vmem:[#allocation3 + $0xe90] sm:$0xff] }
 0x6ce   :  { %5563 = vmatprep.subr.bf16.mxu0 %v5274_v60  ;;  %5727 = vmatprep.subr.bf16.mxu1 %v5276_v3  ;;  %v5370_v60 = vld [vmem:[#allocation3 + $0xec8] sm:$0xff]  ;;  %v5372_v3 = vld [vmem:[#allocation3 + $0xed8] sm:$0xff] }
 0x6d1   :  { %5564 = vmatpush1.bf16.msra.mxu0 %v5273_v4  ;;  %5728 = vmatpush1.bf16.msra.mxu1 %v5275_v53  ;;  %v5369_v4 = vld [vmem:[#allocation3 + $0xec0] sm:$0xff]  ;;  %v5371_v53 = vld [vmem:[#allocation3 + $0xed0] sm:$0xff] }
 0x6d2   :  { %5574 = vmatprep.subr.bf16.mxu0 %v5282_v8  ;;  %5738 = vmatprep.subr.bf16.mxu1 %v5284_v43  ;;  %v5378_v8 = vld [vmem:[#allocation3 + $0xf08] sm:$0xff]  ;;  %v5380_v43 = vld [vmem:[#allocation3 + $0xf18] sm:$0xff] }
 0x6d4   :  { %5566 = vmatmul.mubr.bf16.vlgmr.msra.gmra.mrb[16].mxu0 %v8260_v5  ;;  %5730 = vmatmul.mubr.bf16.vlgmr.msra.gmra.mrb[16].mxu1 %v8260_v5 }
 0x6d5   :  { %5575 = vmatpush1.bf16.msra.mxu0 %v5281_v9  ;;  %5739 = vmatpush1.bf16.msra.mxu1 %v5283_v10  ;;  %v5377_v9 = vld [vmem:[#allocation3 + $0xf00] sm:$0xff]  ;;  %v5379_v10 = vld [vmem:[#allocation3 + $0xf10] sm:$0xff] }
 0x6d6   :  { %5576 = vmatprep.subr.bf16.mxu0 %v5290_v11  ;;  %5740 = vmatprep.subr.bf16.mxu1 %v5292_v57  ;;  %v5386_v11 = vld [vmem:[#allocation3 + $0xf48] sm:$0xff]  ;;  %v5388_v57 = vld [vmem:[#allocation3 + $0xf58] sm:$0xff] }
 0x6d7   :  { %5606 = vmatprep.mubr.bf16.mxu0 %v8266_v7  ;;  %5770 = vmatprep.mubr.bf16.mxu1 %v8266_v7 }
 0x6d9   :  { %5577 = vmatpush1.bf16.msra.mxu0 %v5289_v13  ;;  %5741 = vmatpush1.bf16.msra.mxu1 %v5291_v59  ;;  %v5385_v13 = vld [vmem:[#allocation3 + $0xf40] sm:$0xff]  ;;  %v5387_v59 = vld [vmem:[#allocation3 + $0xf50] sm:$0xff] }
 0x6da   :  { %5578 = vmatprep.subr.bf16.mxu0 %v5298_v12  ;;  %5742 = vmatprep.subr.bf16.mxu1 %v5300_v14  ;;  %v5394_v12 = vld [vmem:[#allocation3 + $0xf88] sm:$0xff]  ;;  %v5396_v14 = vld [vmem:[#allocation3 + $0xf98] sm:$0xff] }
 0x6dd   :  { %5579 = vmatpush1.bf16.msra.mxu0 %v5297_v16  ;;  %5743 = vmatpush1.bf16.msra.mxu1 %v5299_v17  ;;  %v5393_v16 = vld [vmem:[#allocation3 + $0xf80] sm:$0xff]  ;;  %v5395_v17 = vld [vmem:[#allocation3 + $0xf90] sm:$0xff] }
 0x6de   :  { %5580 = vmatprep.subr.bf16.mxu0 %v5306_v62  ;;  %5744 = vmatprep.subr.bf16.mxu1 %v5308_v19  ;;  %v5402_v62 = vld [vmem:[#allocation3 + $0xfc8] sm:$0xff]  ;;  %v5404_v19 = vld [vmem:[#allocation3 + $0xfd8] sm:$0xff] }
 0x6e1   :  { %5581 = vmatpush1.bf16.msra.mxu0 %v5305_v20  ;;  %5745 = vmatpush1.bf16.msra.mxu1 %v5307_v21  ;;  %v5401_v20 = vld [vmem:[#allocation3 + $0xfc0] sm:$0xff]  ;;  %v5403_v21 = vld [vmem:[#allocation3 + $0xfd0] sm:$0xff] }
 0x6e2   :  { %5582 = vmatprep.subr.bf16.mxu0 %v5314_v22  ;;  %5746 = vmatprep.subr.bf16.mxu1 %v5316_v24  ;;  %v4902_v22 = vld [vmem:[#allocation3 + $0x28] sm:$0xff]  ;;  %v4904_v24 = vld [vmem:[#allocation3 + $0x38] sm:$0xff] }
 0x6e5   :  { %5583 = vmatpush1.bf16.msra.mxu0 %v5313_v36  ;;  %5747 = vmatpush1.bf16.msra.mxu1 %v5315_v28  ;;  %v4901_v36 = vld [vmem:[#allocation3 + $0x20] sm:$0xff]  ;;  %v4903_v28 = vld [vmem:[#allocation3 + $0x30] sm:$0xff] }
 0x6e6   :  { %5584 = vmatprep.subr.bf16.mxu0 %v5322_v29  ;;  %5748 = vmatprep.subr.bf16.mxu1 %v5324_v34  ;;  %v4910_v29 = vld [vmem:[#allocation3 + $0x68] sm:$0xff]  ;;  %v4912_v34 = vld [vmem:[#allocation3 + $0x78] sm:$0xff] }
 0x6e9   :  { %5585 = vmatpush1.bf16.msra.mxu0 %v5321_v52  ;;  %5749 = vmatpush1.bf16.msra.mxu1 %v5323_v35  ;;  %v4909_v52 = vld [vmem:[#allocation3 + $0x60] sm:$0xff]  ;;  %v4911_v35 = vld [vmem:[#allocation3 + $0x70] sm:$0xff] }
 0x6ea   :  { %5586 = vmatprep.subr.bf16.mxu0 %v5330_v37  ;;  %5750 = vmatprep.subr.bf16.mxu1 %v5332_v38  ;;  %v4918_v37 = vld [vmem:[#allocation3 + $0xa8] sm:$0xff]  ;;  %v4920_v38 = vld [vmem:[#allocation3 + $0xb8] sm:$0xff] }
 0x6ed   :  { %5587 = vmatpush1.bf16.msra.mxu0 %v5329_v40  ;;  %5751 = vmatpush1.bf16.msra.mxu1 %v5331_v26  ;;  %v4917_v40 = vld [vmem:[#allocation3 + $0xa0] sm:$0xff]  ;;  %v4919_v26 = vld [vmem:[#allocation3 + $0xb0] sm:$0xff] }
 0x6ee   :  { %5588 = vmatprep.subr.bf16.mxu0 %v5338_v41  ;;  %5752 = vmatprep.subr.bf16.mxu1 %v5340_v42  ;;  %v4926_v41 = vld [vmem:[#allocation3 + $0xe8] sm:$0xff]  ;;  %v4928_v42 = vld [vmem:[#allocation3 + $0xf8] sm:$0xff] }
 0x6f1   :  { %5589 = vmatpush1.bf16.msra.mxu0 %v5337_v46  ;;  %5753 = vmatpush1.bf16.msra.mxu1 %v5339_v47  ;;  %v4925_v46 = vld [vmem:[#allocation3 + $0xe0] sm:$0xff]  ;;  %v4927_v47 = vld [vmem:[#allocation3 + $0xf0] sm:$0xff] }
 0x6f2   :  { %5590 = vmatprep.subr.bf16.mxu0 %v5346_v32  ;;  %5754 = vmatprep.subr.bf16.mxu1 %v5348_v48  ;;  %v4934_v32 = vld [vmem:[#allocation3 + $0x128] sm:$0xff]  ;;  %v4936_v48 = vld [vmem:[#allocation3 + $0x138] sm:$0xff] }
 0x6f5   :  { %5591 = vmatpush1.bf16.msra.mxu0 %v5345_v49  ;;  %5755 = vmatpush1.bf16.msra.mxu1 %v5347_v50  ;;  %v4935_v49 = vld [vmem:[#allocation3 + $0x130] sm:$0xff]  ;;  %v4942_v50 = vld [vmem:[#allocation3 + $0x168] sm:$0xff] }
 0x6f6   :  { %5592 = vmatprep.subr.bf16.mxu0 %v5354_v51  ;;  %5756 = vmatprep.subr.bf16.mxu1 %v5356_v23  ;;  %v4944_v51 = vld [vmem:[#allocation3 + $0x178] sm:$0xff]  ;;  %v4941_v23 = vld [vmem:[#allocation3 + $0x160] sm:$0xff] }
 0x6f9   :  { %5593 = vmatpush1.bf16.msra.mxu0 %v5353_v54  ;;  %5757 = vmatpush1.bf16.msra.mxu1 %v5355_v61  ;;  %v4943_v54 = vld [vmem:[#allocation3 + $0x170] sm:$0xff]  ;;  %v4950_v61 = vld [vmem:[#allocation3 + $0x1a8] sm:$0xff] }
 0x6fa   :  { %5594 = vmatprep.subr.bf16.mxu0 %v5362_v55  ;;  %5758 = vmatprep.subr.bf16.mxu1 %v5364_v56  ;;  %v4952_v55 = vld [vmem:[#allocation3 + $0x1b8] sm:$0xff]  ;;  %v4949_v56 = vld [vmem:[#allocation3 + $0x1a0] sm:$0xff] }
 0x6fd   :  { %5595 = vmatpush1.bf16.msra.mxu0 %v5361_v58  ;;  %5759 = vmatpush1.bf16.msra.mxu1 %v5363_v27  ;;  %v4951_v58 = vld [vmem:[#allocation3 + $0x1b0] sm:$0xff]  ;;  %v4958_v27 = vld [vmem:[#allocation3 + $0x1e8] sm:$0xff] }
 0x6fe   :  { %5596 = vmatprep.subr.bf16.mxu0 %v5370_v60  ;;  %5760 = vmatprep.subr.bf16.mxu1 %v5372_v3  ;;  %v4960_v60 = vld [vmem:[#allocation3 + $0x1f8] sm:$0xff]  ;;  %v4957_v3 = vld [vmem:[#allocation3 + $0x1e0] sm:$0xff] }
 0x701   :  { %5597 = vmatpush1.bf16.msra.mxu0 %v5369_v4  ;;  %5761 = vmatpush1.bf16.msra.mxu1 %v5371_v53  ;;  %v4959_v4 = vld [vmem:[#allocation3 + $0x1f0] sm:$0xff]  ;;  %v4966_v53 = vld [vmem:[#allocation3 + $0x228] sm:$0xff] }
 0x702   :  { %5598 = vmatprep.subr.bf16.mxu0 %v5378_v8  ;;  %5762 = vmatprep.subr.bf16.mxu1 %v5380_v43  ;;  %v4968_v8 = vld [vmem:[#allocation3 + $0x238] sm:$0xff]  ;;  %v4965_v43 = vld [vmem:[#allocation3 + $0x220] sm:$0xff] }
 0x705   :  { %5599 = vmatpush1.bf16.msra.mxu0 %v5377_v9  ;;  %5763 = vmatpush1.bf16.msra.mxu1 %v5379_v10  ;;  %v4967_v9 = vld [vmem:[#allocation3 + $0x230] sm:$0xff]  ;;  %v4974_v10 = vld [vmem:[#allocation3 + $0x268] sm:$0xff] }
 0x706   :  { %5600 = vmatprep.subr.bf16.mxu0 %v5386_v11  ;;  %5764 = vmatprep.subr.bf16.mxu1 %v5388_v57  ;;  %v4976_v11 = vld [vmem:[#allocation3 + $0x278] sm:$0xff]  ;;  %v4973_v57 = vld [vmem:[#allocation3 + $0x260] sm:$0xff] }
 0x709   :  { %5601 = vmatpush1.bf16.msra.mxu0 %v5385_v13  ;;  %5765 = vmatpush1.bf16.msra.mxu1 %v5387_v59  ;;  %v4975_v13 = vld [vmem:[#allocation3 + $0x270] sm:$0xff]  ;;  %v4982_v59 = vld [vmem:[#allocation3 + $0x2a8] sm:$0xff] }
 0x70a   :  { %5602 = vmatprep.subr.bf16.mxu0 %v5394_v12  ;;  %5766 = vmatprep.subr.bf16.mxu1 %v5396_v14  ;;  %v4984_v12 = vld [vmem:[#allocation3 + $0x2b8] sm:$0xff]  ;;  %v4981_v14 = vld [vmem:[#allocation3 + $0x2a0] sm:$0xff] }
 0x70d   :  { %5603 = vmatpush1.bf16.msra.mxu0 %v5393_v16  ;;  %5767 = vmatpush1.bf16.msra.mxu1 %v5395_v17  ;;  %v4983_v16 = vld [vmem:[#allocation3 + $0x2b0] sm:$0xff]  ;;  %v4990_v17 = vld [vmem:[#allocation3 + $0x2e8] sm:$0xff] }
 0x70e   :  { %5604 = vmatprep.subr.bf16.mxu0 %v5402_v62  ;;  %5768 = vmatprep.subr.bf16.mxu1 %v5404_v19  ;;  %v4992_v62 = vld [vmem:[#allocation3 + $0x2f8] sm:$0xff]  ;;  %v4989_v19 = vld [vmem:[#allocation3 + $0x2e0] sm:$0xff] }
 0x711   :  { %5605 = vmatpush1.bf16.msra.mxu0 %v5401_v20  ;;  %5769 = vmatpush1.bf16.msra.mxu1 %v5403_v21  ;;  %v4991_v20 = vld [vmem:[#allocation3 + $0x2f0] sm:$0xff]  ;;  %v4998_v21 = vld [vmem:[#allocation3 + $0x328] sm:$0xff] }
 0x712   :  { %5779 = vmatprep.subr.bf16.mxu0 %v4902_v22  ;;  %5943 = vmatprep.subr.bf16.mxu1 %v4904_v24  ;;  %v5000_v22 = vld [vmem:[#allocation3 + $0x338] sm:$0xff]  ;;  %v4997_v24 = vld [vmem:[#allocation3 + $0x320] sm:$0xff] }
 0x714   :  { %5607 = vmatmul.mubr.bf16.vlgmr.msra.gmra.mrb[16].mxu0 %v8262_v6  ;;  %5771 = vmatmul.mubr.bf16.vlgmr.msra.gmra.mrb[16].mxu1 %v8262_v6 }
 0x715   :  { %5780 = vmatpush1.bf16.msra.mxu0 %v4901_v36  ;;  %5944 = vmatpush1.bf16.msra.mxu1 %v4903_v28  ;;  %v4999_v36 = vld [vmem:[#allocation3 + $0x330] sm:$0xff]  ;;  %v5006_v28 = vld [vmem:[#allocation3 + $0x368] sm:$0xff] }
 0x716   :  { %5781 = vmatprep.subr.bf16.mxu0 %v4910_v29  ;;  %5945 = vmatprep.subr.bf16.mxu1 %v4912_v34  ;;  %v5008_v29 = vld [vmem:[#allocation3 + $0x378] sm:$0xff]  ;;  %v5005_v34 = vld [vmem:[#allocation3 + $0x360] sm:$0xff] }
 0x717   :  { %5811 = vmatprep.mubr.bf16.mxu0 %v8246_v1  ;;  %5975 = vmatprep.mubr.bf16.mxu1 %v8246_v1  ;;  %v4933_v1 = vld [vmem:[#allocation3 + $0x120] sm:$0xff] }
 0x719   :  { %5782 = vmatpush1.bf16.msra.mxu0 %v4909_v52  ;;  %5946 = vmatpush1.bf16.msra.mxu1 %v4911_v35  ;;  %v5007_v52 = vld [vmem:[#allocation3 + $0x370] sm:$0xff]  ;;  %v5014_v35 = vld [vmem:[#allocation3 + $0x3a8] sm:$0xff] }
 0x71a   :  { %5783 = vmatprep.subr.bf16.mxu0 %v4918_v37  ;;  %5947 = vmatprep.subr.bf16.mxu1 %v4920_v38  ;;  %v5016_v37 = vld [vmem:[#allocation3 + $0x3b8] sm:$0xff]  ;;  %v5013_v38 = vld [vmem:[#allocation3 + $0x3a0] sm:$0xff] }
 0x71d   :  { %5784 = vmatpush1.bf16.msra.mxu0 %v4917_v40  ;;  %5948 = vmatpush1.bf16.msra.mxu1 %v4919_v26  ;;  %v5015_v40 = vld [vmem:[#allocation3 + $0x3b0] sm:$0xff]  ;;  %v5022_v26 = vld [vmem:[#allocation3 + $0x3e8] sm:$0xff] }
 0x71e   :  { %5785 = vmatprep.subr.bf16.mxu0 %v4926_v41  ;;  %5949 = vmatprep.subr.bf16.mxu1 %v4928_v42  ;;  %v5024_v41 = vld [vmem:[#allocation3 + $0x3f8] sm:$0xff]  ;;  %v5021_v42 = vld [vmem:[#allocation3 + $0x3e0] sm:$0xff] }
 0x721   :  { %5786 = vmatpush1.bf16.msra.mxu0 %v4925_v46  ;;  %5950 = vmatpush1.bf16.msra.mxu1 %v4927_v47  ;;  %v5023_v46 = vld [vmem:[#allocation3 + $0x3f0] sm:$0xff]  ;;  %v5030_v47 = vld [vmem:[#allocation3 + $0x428] sm:$0xff] }
 0x722   :  { %5787 = vmatprep.subr.bf16.mxu0 %v4934_v32  ;;  %5951 = vmatprep.subr.bf16.mxu1 %v4936_v48  ;;  %v5032_v32 = vld [vmem:[#allocation3 + $0x438] sm:$0xff]  ;;  %v5029_v48 = vld [vmem:[#allocation3 + $0x420] sm:$0xff] }
 0x725   :  { %5788 = vmatpush1.bf16.msra.mxu0 %v4933_v1  ;;  %5952 = vmatpush1.bf16.msra.mxu1 %v4935_v49  ;;  %v5031_v1 = vld [vmem:[#allocation3 + $0x430] sm:$0xff]  ;;  %v5038_v49 = vld [vmem:[#allocation3 + $0x468] sm:$0xff] }
 0x726   :  { %5789 = vmatprep.subr.bf16.mxu0 %v4942_v50  ;;  %5953 = vmatprep.subr.bf16.mxu1 %v4944_v51  ;;  %v5040_v50 = vld [vmem:[#allocation3 + $0x478] sm:$0xff]  ;;  %v5037_v51 = vld [vmem:[#allocation3 + $0x460] sm:$0xff] }
 0x729   :  { %5790 = vmatpush1.bf16.msra.mxu0 %v4941_v23  ;;  %5954 = vmatpush1.bf16.msra.mxu1 %v4943_v54  ;;  %v5039_v23 = vld [vmem:[#allocation3 + $0x470] sm:$0xff]  ;;  %v5046_v54 = vld [vmem:[#allocation3 + $0x4a8] sm:$0xff] }
 0x72a   :  { %5791 = vmatprep.subr.bf16.mxu0 %v4950_v61  ;;  %5955 = vmatprep.subr.bf16.mxu1 %v4952_v55  ;;  %v5048_v61 = vld [vmem:[#allocation3 + $0x4b8] sm:$0xff]  ;;  %v5045_v55 = vld [vmem:[#allocation3 + $0x4a0] sm:$0xff] }
 0x72d   :  { %5792 = vmatpush1.bf16.msra.mxu0 %v4949_v56  ;;  %5956 = vmatpush1.bf16.msra.mxu1 %v4951_v58  ;;  %v5047_v56 = vld [vmem:[#allocation3 + $0x4b0] sm:$0xff]  ;;  %v5054_v58 = vld [vmem:[#allocation3 + $0x4e8] sm:$0xff] }
 0x72e   :  { %5793 = vmatprep.subr.bf16.mxu0 %v4958_v27  ;;  %5957 = vmatprep.subr.bf16.mxu1 %v4960_v60  ;;  %v5053_v27 = vld [vmem:[#allocation3 + $0x4e0] sm:$0xff]  ;;  %v5055_v60 = vld [vmem:[#allocation3 + $0x4f0] sm:$0xff] }
 0x731   :  { %5794 = vmatpush1.bf16.msra.mxu0 %v4957_v3  ;;  %5958 = vmatpush1.bf16.msra.mxu1 %v4959_v4  ;;  %v5062_v3 = vld [vmem:[#allocation3 + $0x528] sm:$0xff]  ;;  %v5064_v4 = vld [vmem:[#allocation3 + $0x538] sm:$0xff] }
 0x732   :  { %5795 = vmatprep.subr.bf16.mxu0 %v4966_v53  ;;  %5959 = vmatprep.subr.bf16.mxu1 %v4968_v8  ;;  %v5063_v53 = vld [vmem:[#allocation3 + $0x530] sm:$0xff]  ;;  %v5070_v8 = vld [vmem:[#allocation3 + $0x568] sm:$0xff] }
 0x735   :  { %5796 = vmatpush1.bf16.msra.mxu0 %v4965_v43  ;;  %5960 = vmatpush1.bf16.msra.mxu1 %v4967_v9  ;;  %v5072_v43 = vld [vmem:[#allocation3 + $0x578] sm:$0xff]  ;;  %v5069_v9 = vld [vmem:[#allocation3 + $0x560] sm:$0xff] }
 0x736   :  { %5797 = vmatprep.subr.bf16.mxu0 %v4974_v10  ;;  %5961 = vmatprep.subr.bf16.mxu1 %v4976_v11  ;;  %v5071_v10 = vld [vmem:[#allocation3 + $0x570] sm:$0xff]  ;;  %v5078_v11 = vld [vmem:[#allocation3 + $0x5a8] sm:$0xff] }
 0x739   :  { %5798 = vmatpush1.bf16.msra.mxu0 %v4973_v57  ;;  %5962 = vmatpush1.bf16.msra.mxu1 %v4975_v13  ;;  %v5080_v57 = vld [vmem:[#allocation3 + $0x5b8] sm:$0xff]  ;;  %v5077_v13 = vld [vmem:[#allocation3 + $0x5a0] sm:$0xff] }
 0x73a   :  { %5799 = vmatprep.subr.bf16.mxu0 %v4982_v59  ;;  %5963 = vmatprep.subr.bf16.mxu1 %v4984_v12  ;;  %v5079_v59 = vld [vmem:[#allocation3 + $0x5b0] sm:$0xff]  ;;  %v5086_v12 = vld [vmem:[#allocation3 + $0x5e8] sm:$0xff] }
 0x73d   :  { %5800 = vmatpush1.bf16.msra.mxu0 %v4981_v14  ;;  %5964 = vmatpush1.bf16.msra.mxu1 %v4983_v16  ;;  %v5088_v14 = vld [vmem:[#allocation3 + $0x5f8] sm:$0xff]  ;;  %v5085_v16 = vld [vmem:[#allocation3 + $0x5e0] sm:$0xff] }
 0x73e   :  { %5801 = vmatprep.subr.bf16.mxu0 %v4990_v17  ;;  %5965 = vmatprep.subr.bf16.mxu1 %v4992_v62  ;;  %v5087_v17 = vld [vmem:[#allocation3 + $0x5f0] sm:$0xff]  ;;  %v5094_v62 = vld [vmem:[#allocation3 + $0x628] sm:$0xff] }
 0x741   :  { %5802 = vmatpush1.bf16.msra.mxu0 %v4989_v19  ;;  %5966 = vmatpush1.bf16.msra.mxu1 %v4991_v20  ;;  %v5096_v19 = vld [vmem:[#allocation3 + $0x638] sm:$0xff]  ;;  %v5093_v20 = vld [vmem:[#allocation3 + $0x620] sm:$0xff] }
 0x742   :  { %5803 = vmatprep.subr.bf16.mxu0 %v4998_v21  ;;  %5967 = vmatprep.subr.bf16.mxu1 %v5000_v22  ;;  %v5095_v21 = vld [vmem:[#allocation3 + $0x630] sm:$0xff]  ;;  %v5102_v22 = vld [vmem:[#allocation3 + $0x668] sm:$0xff] }
 0x745   :  { %5804 = vmatpush1.bf16.msra.mxu0 %v4997_v24  ;;  %5968 = vmatpush1.bf16.msra.mxu1 %v4999_v36  ;;  %v5104_v24 = vld [vmem:[#allocation3 + $0x678] sm:$0xff]  ;;  %v5101_v36 = vld [vmem:[#allocation3 + $0x660] sm:$0xff] }
 0x746   :  { %5805 = vmatprep.subr.bf16.mxu0 %v5006_v28  ;;  %5969 = vmatprep.subr.bf16.mxu1 %v5008_v29  ;;  %v5103_v28 = vld [vmem:[#allocation3 + $0x670] sm:$0xff]  ;;  %v5110_v29 = vld [vmem:[#allocation3 + $0x6a8] sm:$0xff] }
 0x749   :  { %5806 = vmatpush1.bf16.msra.mxu0 %v5005_v34  ;;  %5970 = vmatpush1.bf16.msra.mxu1 %v5007_v52  ;;  %v5112_v34 = vld [vmem:[#allocation3 + $0x6b8] sm:$0xff]  ;;  %v5109_v52 = vld [vmem:[#allocation3 + $0x6a0] sm:$0xff] }
 0x74a   :  { %5807 = vmatprep.subr.bf16.mxu0 %v5014_v35  ;;  %5971 = vmatprep.subr.bf16.mxu1 %v5016_v37  ;;  %v5111_v35 = vld [vmem:[#allocation3 + $0x6b0] sm:$0xff]  ;;  %v5118_v37 = vld [vmem:[#allocation3 + $0x6e8] sm:$0xff] }
 0x74d   :  { %5808 = vmatpush1.bf16.msra.mxu0 %v5013_v38  ;;  %5972 = vmatpush1.bf16.msra.mxu1 %v5015_v40  ;;  %v5120_v38 = vld [vmem:[#allocation3 + $0x6f8] sm:$0xff]  ;;  %v5117_v40 = vld [vmem:[#allocation3 + $0x6e0] sm:$0xff] }
 0x74e   :  { %5809 = vmatprep.subr.bf16.mxu0 %v5022_v26  ;;  %5973 = vmatprep.subr.bf16.mxu1 %v5024_v41  ;;  %v5119_v26 = vld [vmem:[#allocation3 + $0x6f0] sm:$0xff]  ;;  %v5126_v41 = vld [vmem:[#allocation3 + $0x728] sm:$0xff] }
 0x751   :  { %5810 = vmatpush1.bf16.msra.mxu0 %v5021_v42  ;;  %5974 = vmatpush1.bf16.msra.mxu1 %v5023_v46  ;;  %v5128_v42 = vld [vmem:[#allocation3 + $0x738] sm:$0xff]  ;;  %v5125_v46 = vld [vmem:[#allocation3 + $0x720] sm:$0xff] }
 0x752   :  { %5820 = vmatprep.subr.bf16.mxu0 %v5030_v47  ;;  %5984 = vmatprep.subr.bf16.mxu1 %v5032_v32  ;;  %v5127_v47 = vld [vmem:[#allocation3 + $0x730] sm:$0xff]  ;;  %v5134_v32 = vld [vmem:[#allocation3 + $0x768] sm:$0xff] }
 0x754   :  { %5812 = vmatmul.mubr.bf16.vlgmr.msra.gmra.mrb[20].mxu0 %v8242_v63  ;;  %5976 = vmatmul.mubr.bf16.vlgmr.msra.gmra.mrb[20].mxu1 %v8242_v63  ;;  %v5056_v63 = vld [vmem:[#allocation3 + $0x4f8] sm:$0xff] }
 0x755   :  { %5821 = vmatpush1.bf16.msra.mxu0 %v5029_v48  ;;  %5985 = vmatpush1.bf16.msra.mxu1 %v5031_v1  ;;  %v5136_v48 = vld [vmem:[#allocation3 + $0x778] sm:$0xff]  ;;  %v5133_v1 = vld [vmem:[#allocation3 + $0x760] sm:$0xff] }
 0x756   :  { %5822 = vmatprep.subr.bf16.mxu0 %v5038_v49  ;;  %5986 = vmatprep.subr.bf16.mxu1 %v5040_v50  ;;  %v5135_v49 = vld [vmem:[#allocation3 + $0x770] sm:$0xff]  ;;  %v5142_v50 = vld [vmem:[#allocation3 + $0x7a8] sm:$0xff] }
 0x757   :  { %5852 = vmatprep.mubr.bf16.mxu0 %v8248_v2  ;;  %6016 = vmatprep.mubr.bf16.mxu1 %v8248_v2  ;;  %v5061_v2 = vld [vmem:[#allocation3 + $0x520] sm:$0xff] }
 0x759   :  { %5823 = vmatpush1.bf16.msra.mxu0 %v5037_v51  ;;  %5987 = vmatpush1.bf16.msra.mxu1 %v5039_v23  ;;  %v5144_v51 = vld [vmem:[#allocation3 + $0x7b8] sm:$0xff]  ;;  %v5141_v23 = vld [vmem:[#allocation3 + $0x7a0] sm:$0xff] }
 0x75a   :  { %5824 = vmatprep.subr.bf16.mxu0 %v5046_v54  ;;  %5988 = vmatprep.subr.bf16.mxu1 %v5048_v61  ;;  %v5143_v54 = vld [vmem:[#allocation3 + $0x7b0] sm:$0xff]  ;;  %v5150_v61 = vld [vmem:[#allocation3 + $0x7e8] sm:$0xff] }
 0x75d   :  { %5825 = vmatpush1.bf16.msra.mxu0 %v5045_v55  ;;  %5989 = vmatpush1.bf16.msra.mxu1 %v5047_v56  ;;  %v5152_v55 = vld [vmem:[#allocation3 + $0x7f8] sm:$0xff]  ;;  %v5149_v56 = vld [vmem:[#allocation3 + $0x7e0] sm:$0xff] }
 0x75e   :  { %5826 = vmatprep.subr.bf16.mxu0 %v5054_v58  ;;  %5990 = vmatprep.subr.bf16.mxu1 %v5056_v63  ;;  %v5151_v58 = vld [vmem:[#allocation3 + $0x7f0] sm:$0xff]  ;;  %v5158_v63 = vld [vmem:[#allocation3 + $0x828] sm:$0xff] }
 0x761   :  { %5827 = vmatpush1.bf16.msra.mxu0 %v5053_v27  ;;  %5991 = vmatpush1.bf16.msra.mxu1 %v5055_v60  ;;  %v5160_v27 = vld [vmem:[#allocation3 + $0x838] sm:$0xff]  ;;  %v5157_v60 = vld [vmem:[#allocation3 + $0x820] sm:$0xff] }
 0x762   :  { %5828 = vmatprep.subr.bf16.mxu0 %v5062_v3  ;;  %5992 = vmatprep.subr.bf16.mxu1 %v5064_v4  ;;  %v5159_v3 = vld [vmem:[#allocation3 + $0x830] sm:$0xff]  ;;  %v5166_v4 = vld [vmem:[#allocation3 + $0x868] sm:$0xff] }
 0x765   :  { %5829 = vmatpush1.bf16.msra.mxu0 %v5061_v2  ;;  %5993 = vmatpush1.bf16.msra.mxu1 %v5063_v53  ;;  %v5168_v2 = vld [vmem:[#allocation3 + $0x878] sm:$0xff]  ;;  %v5165_v53 = vld [vmem:[#allocation3 + $0x860] sm:$0xff] }
 0x766   :  { %5830 = vmatprep.subr.bf16.mxu0 %v5070_v8  ;;  %5994 = vmatprep.subr.bf16.mxu1 %v5072_v43  ;;  %v5167_v8 = vld [vmem:[#allocation3 + $0x870] sm:$0xff]  ;;  %v5174_v43 = vld [vmem:[#allocation3 + $0x8a8] sm:$0xff] }
 0x769   :  { %5831 = vmatpush1.bf16.msra.mxu0 %v5069_v9  ;;  %5995 = vmatpush1.bf16.msra.mxu1 %v5071_v10  ;;  %v5176_v9 = vld [vmem:[#allocation3 + $0x8b8] sm:$0xff]  ;;  %v5173_v10 = vld [vmem:[#allocation3 + $0x8a0] sm:$0xff] }
 0x76a   :  { %5832 = vmatprep.subr.bf16.mxu0 %v5078_v11  ;;  %5996 = vmatprep.subr.bf16.mxu1 %v5080_v57  ;;  %v5175_v11 = vld [vmem:[#allocation3 + $0x8b0] sm:$0xff]  ;;  %v5182_v57 = vld [vmem:[#allocation3 + $0x8e8] sm:$0xff] }
 0x76d   :  { %5833 = vmatpush1.bf16.msra.mxu0 %v5077_v13  ;;  %5997 = vmatpush1.bf16.msra.mxu1 %v5079_v59  ;;  %v5181_v13 = vld [vmem:[#allocation3 + $0x8e0] sm:$0xff]  ;;  %v5183_v59 = vld [vmem:[#allocation3 + $0x8f0] sm:$0xff] }
 0x76e   :  { %5834 = vmatprep.subr.bf16.mxu0 %v5086_v12  ;;  %5998 = vmatprep.subr.bf16.mxu1 %v5088_v14  ;;  %v5190_v12 = vld [vmem:[#allocation3 + $0x928] sm:$0xff]  ;;  %v5192_v14 = vld [vmem:[#allocation3 + $0x938] sm:$0xff] }
 0x771   :  { %5835 = vmatpush1.bf16.msra.mxu0 %v5085_v16  ;;  %5999 = vmatpush1.bf16.msra.mxu1 %v5087_v17  ;;  %v5191_v16 = vld [vmem:[#allocation3 + $0x930] sm:$0xff]  ;;  %v5198_v17 = vld [vmem:[#allocation3 + $0x968] sm:$0xff] }
 0x772   :  { %5836 = vmatprep.subr.bf16.mxu0 %v5094_v62  ;;  %6000 = vmatprep.subr.bf16.mxu1 %v5096_v19  ;;  %v5200_v62 = vld [vmem:[#allocation3 + $0x978] sm:$0xff]  ;;  %v5197_v19 = vld [vmem:[#allocation3 + $0x960] sm:$0xff] }
 0x775   :  { %5837 = vmatpush1.bf16.msra.mxu0 %v5093_v20  ;;  %6001 = vmatpush1.bf16.msra.mxu1 %v5095_v21  ;;  %v5199_v20 = vld [vmem:[#allocation3 + $0x970] sm:$0xff]  ;;  %v5206_v21 = vld [vmem:[#allocation3 + $0x9a8] sm:$0xff] }
 0x776   :  { %5838 = vmatprep.subr.bf16.mxu0 %v5102_v22  ;;  %6002 = vmatprep.subr.bf16.mxu1 %v5104_v24  ;;  %v5208_v22 = vld [vmem:[#allocation3 + $0x9b8] sm:$0xff]  ;;  %v5205_v24 = vld [vmem:[#allocation3 + $0x9a0] sm:$0xff] }
 0x779   :  { %5839 = vmatpush1.bf16.msra.mxu0 %v5101_v36  ;;  %6003 = vmatpush1.bf16.msra.mxu1 %v5103_v28  ;;  %v5207_v36 = vld [vmem:[#allocation3 + $0x9b0] sm:$0xff]  ;;  %v5214_v28 = vld [vmem:[#allocation3 + $0x9e8] sm:$0xff] }
 0x77a   :  { %5840 = vmatprep.subr.bf16.mxu0 %v5110_v29  ;;  %6004 = vmatprep.subr.bf16.mxu1 %v5112_v34  ;;  %v5216_v29 = vld [vmem:[#allocation3 + $0x9f8] sm:$0xff]  ;;  %v5213_v34 = vld [vmem:[#allocation3 + $0x9e0] sm:$0xff] }
 0x77d   :  { %5841 = vmatpush1.bf16.msra.mxu0 %v5109_v52  ;;  %6005 = vmatpush1.bf16.msra.mxu1 %v5111_v35  ;;  %v5215_v52 = vld [vmem:[#allocation3 + $0x9f0] sm:$0xff]  ;;  %v5222_v35 = vld [vmem:[#allocation3 + $0xa28] sm:$0xff] }
 0x77e   :  { %5842 = vmatprep.subr.bf16.mxu0 %v5118_v37  ;;  %6006 = vmatprep.subr.bf16.mxu1 %v5120_v38  ;;  %v5224_v37 = vld [vmem:[#allocation3 + $0xa38] sm:$0xff]  ;;  %v5221_v38 = vld [vmem:[#allocation3 + $0xa20] sm:$0xff] }
 0x781   :  { %5843 = vmatpush1.bf16.msra.mxu0 %v5117_v40  ;;  %6007 = vmatpush1.bf16.msra.mxu1 %v5119_v26  ;;  %v5223_v40 = vld [vmem:[#allocation3 + $0xa30] sm:$0xff]  ;;  %v5230_v26 = vld [vmem:[#allocation3 + $0xa68] sm:$0xff] }
 0x782   :  { %5844 = vmatprep.subr.bf16.mxu0 %v5126_v41  ;;  %6008 = vmatprep.subr.bf16.mxu1 %v5128_v42  ;;  %v5232_v41 = vld [vmem:[#allocation3 + $0xa78] sm:$0xff]  ;;  %v5229_v42 = vld [vmem:[#allocation3 + $0xa60] sm:$0xff] }
 0x785   :  { %5845 = vmatpush1.bf16.msra.mxu0 %v5125_v46  ;;  %6009 = vmatpush1.bf16.msra.mxu1 %v5127_v47  ;;  %v5231_v46 = vld [vmem:[#allocation3 + $0xa70] sm:$0xff]  ;;  %v5238_v47 = vld [vmem:[#allocation3 + $0xaa8] sm:$0xff] }
 0x786   :  { %5846 = vmatprep.subr.bf16.mxu0 %v5134_v32  ;;  %6010 = vmatprep.subr.bf16.mxu1 %v5136_v48  ;;  %v5240_v32 = vld [vmem:[#allocation3 + $0xab8] sm:$0xff]  ;;  %v5237_v48 = vld [vmem:[#allocation3 + $0xaa0] sm:$0xff] }
 0x789   :  { %5847 = vmatpush1.bf16.msra.mxu0 %v5133_v1  ;;  %6011 = vmatpush1.bf16.msra.mxu1 %v5135_v49  ;;  %v5239_v1 = vld [vmem:[#allocation3 + $0xab0] sm:$0xff]  ;;  %v5246_v49 = vld [vmem:[#allocation3 + $0xae8] sm:$0xff] }
 0x78a   :  { %5848 = vmatprep.subr.bf16.mxu0 %v5142_v50  ;;  %6012 = vmatprep.subr.bf16.mxu1 %v5144_v51  ;;  %v5248_v50 = vld [vmem:[#allocation3 + $0xaf8] sm:$0xff]  ;;  %v5245_v51 = vld [vmem:[#allocation3 + $0xae0] sm:$0xff] }
 0x78d   :  { %5849 = vmatpush1.bf16.msra.mxu0 %v5141_v23  ;;  %6013 = vmatpush1.bf16.msra.mxu1 %v5143_v54  ;;  %v5247_v23 = vld [vmem:[#allocation3 + $0xaf0] sm:$0xff]  ;;  %v5254_v54 = vld [vmem:[#allocation3 + $0xb28] sm:$0xff] }
 0x78e   :  { %5850 = vmatprep.subr.bf16.mxu0 %v5150_v61  ;;  %6014 = vmatprep.subr.bf16.mxu1 %v5152_v55  ;;  %v5256_v61 = vld [vmem:[#allocation3 + $0xb38] sm:$0xff]  ;;  %v5253_v55 = vld [vmem:[#allocation3 + $0xb20] sm:$0xff] }
 0x791   :  { %5851 = vmatpush1.bf16.msra.mxu0 %v5149_v56  ;;  %6015 = vmatpush1.bf16.msra.mxu1 %v5151_v58  ;;  %v5255_v56 = vld [vmem:[#allocation3 + $0xb30] sm:$0xff]  ;;  %v5262_v58 = vld [vmem:[#allocation3 + $0xb68] sm:$0xff] }
 0x792   :  { %5861 = vmatprep.subr.bf16.mxu0 %v5158_v63  ;;  %6025 = vmatprep.subr.bf16.mxu1 %v5160_v27  ;;  %v5264_v63 = vld [vmem:[#allocation3 + $0xb78] sm:$0xff]  ;;  %v5261_v27 = vld [vmem:[#allocation3 + $0xb60] sm:$0xff] }
 0x794   :  { %5853 = vmatmul.mubr.bf16.vlgmr.msra.gmra.mrb[20].mxu0 %v8244_v0  ;;  %6017 = vmatmul.mubr.bf16.vlgmr.msra.gmra.mrb[20].mxu1 %v8244_v0  ;;  %v5184_v0 = vld [vmem:[#allocation3 + $0x8f8] sm:$0xff] }
 0x795   :  { %5862 = vmatpush1.bf16.msra.mxu0 %v5157_v60  ;;  %6026 = vmatpush1.bf16.msra.mxu1 %v5159_v3  ;;  %v5263_v60 = vld [vmem:[#allocation3 + $0xb70] sm:$0xff]  ;;  %v5270_v3 = vld [vmem:[#allocation3 + $0xba8] sm:$0xff] }
 0x796   :  { %5863 = vmatprep.subr.bf16.mxu0 %v5166_v4  ;;  %6027 = vmatprep.subr.bf16.mxu1 %v5168_v2  ;;  %v5272_v4 = vld [vmem:[#allocation3 + $0xbb8] sm:$0xff]  ;;  %v5269_v2 = vld [vmem:[#allocation3 + $0xba0] sm:$0xff] }
 0x797   :  { %5893 = vmatprep.mubr.bf16.mxu0 %v8264_v18  ;;  %6057 = vmatprep.mubr.bf16.mxu1 %v8264_v18  ;;  %v5189_v18 = vld [vmem:[#allocation3 + $0x920] sm:$0xff] }
 0x799   :  { %5864 = vmatpush1.bf16.msra.mxu0 %v5165_v53  ;;  %6028 = vmatpush1.bf16.msra.mxu1 %v5167_v8  ;;  %v5271_v53 = vld [vmem:[#allocation3 + $0xbb0] sm:$0xff]  ;;  %v5278_v8 = vld [vmem:[#allocation3 + $0xbe8] sm:$0xff] }
 0x79a   :  { %5865 = vmatprep.subr.bf16.mxu0 %v5174_v43  ;;  %6029 = vmatprep.subr.bf16.mxu1 %v5176_v9  ;;  %v5280_v43 = vld [vmem:[#allocation3 + $0xbf8] sm:$0xff]  ;;  %v5277_v9 = vld [vmem:[#allocation3 + $0xbe0] sm:$0xff] }
 0x79d   :  { %5866 = vmatpush1.bf16.msra.mxu0 %v5173_v10  ;;  %6030 = vmatpush1.bf16.msra.mxu1 %v5175_v11  ;;  %v5279_v10 = vld [vmem:[#allocation3 + $0xbf0] sm:$0xff]  ;;  %v5286_v11 = vld [vmem:[#allocation3 + $0xc28] sm:$0xff] }
 0x79e   :  { %5867 = vmatprep.subr.bf16.mxu0 %v5182_v57  ;;  %6031 = vmatprep.subr.bf16.mxu1 %v5184_v0  ;;  %v5288_v57 = vld [vmem:[#allocation3 + $0xc38] sm:$0xff]  ;;  %v5285_v0 = vld [vmem:[#allocation3 + $0xc20] sm:$0xff] }
 0x7a1   :  { %5868 = vmatpush1.bf16.msra.mxu0 %v5181_v13  ;;  %6032 = vmatpush1.bf16.msra.mxu1 %v5183_v59  ;;  %v5287_v13 = vld [vmem:[#allocation3 + $0xc30] sm:$0xff]  ;;  %v5294_v59 = vld [vmem:[#allocation3 + $0xc68] sm:$0xff] }
 0x7a2   :  { %5869 = vmatprep.subr.bf16.mxu0 %v5190_v12  ;;  %6033 = vmatprep.subr.bf16.mxu1 %v5192_v14  ;;  %v5296_v12 = vld [vmem:[#allocation3 + $0xc78] sm:$0xff]  ;;  %v5293_v14 = vld [vmem:[#allocation3 + $0xc60] sm:$0xff] }
 0x7a5   :  { %5870 = vmatpush1.bf16.msra.mxu0 %v5189_v18  ;;  %6034 = vmatpush1.bf16.msra.mxu1 %v5191_v16  ;;  %v5295_v18 = vld [vmem:[#allocation3 + $0xc70] sm:$0xff]  ;;  %v5302_v16 = vld [vmem:[#allocation3 + $0xca8] sm:$0xff] }
 0x7a6   :  { %5871 = vmatprep.subr.bf16.mxu0 %v5198_v17  ;;  %6035 = vmatprep.subr.bf16.mxu1 %v5200_v62  ;;  %v5304_v17 = vld [vmem:[#allocation3 + $0xcb8] sm:$0xff]  ;;  %v5301_v62 = vld [vmem:[#allocation3 + $0xca0] sm:$0xff] }
 0x7a9   :  { %5872 = vmatpush1.bf16.msra.mxu0 %v5197_v19  ;;  %6036 = vmatpush1.bf16.msra.mxu1 %v5199_v20  ;;  %v5303_v19 = vld [vmem:[#allocation3 + $0xcb0] sm:$0xff]  ;;  %v5310_v20 = vld [vmem:[#allocation3 + $0xce8] sm:$0xff] }
 0x7aa   :  { %5873 = vmatprep.subr.bf16.mxu0 %v5206_v21  ;;  %6037 = vmatprep.subr.bf16.mxu1 %v5208_v22  ;;  %v5309_v21 = vld [vmem:[#allocation3 + $0xce0] sm:$0xff]  ;;  %v5311_v22 = vld [vmem:[#allocation3 + $0xcf0] sm:$0xff] }
 0x7ad   :  { %5874 = vmatpush1.bf16.msra.mxu0 %v5205_v24  ;;  %6038 = vmatpush1.bf16.msra.mxu1 %v5207_v36  ;;  %v5318_v24 = vld [vmem:[#allocation3 + $0xd28] sm:$0xff]  ;;  %v5320_v36 = vld [vmem:[#allocation3 + $0xd38] sm:$0xff] }
 0x7ae   :  { %5875 = vmatprep.subr.bf16.mxu0 %v5214_v28  ;;  %6039 = vmatprep.subr.bf16.mxu1 %v5216_v29  ;;  %v8298_v28 = vld [vmem:[#allocation13] sm:$0xff] }
 0x7af   :  { %v5319_v29 = vld [vmem:[#allocation3 + $0xd30] sm:$0xff] }
 0x7b1   :  { %5876 = vmatpush1.bf16.msra.mxu0 %v5213_v34  ;;  %6040 = vmatpush1.bf16.msra.mxu1 %v5215_v52  ;;  %v5326_v34 = vld [vmem:[#allocation3 + $0xd68] sm:$0xff]  ;;  %v5328_v52 = vld [vmem:[#allocation3 + $0xd78] sm:$0xff] }
 0x7b2   :  { %5877 = vmatprep.subr.bf16.mxu0 %v5222_v35  ;;  %6041 = vmatprep.subr.bf16.mxu1 %v5224_v37  ;;  %v5414_v35 = vrot.slane %v8298_v28, %v8142_v39  ;;  %v5422_v37 = vrot.slane %v8298_v28, %v8147_v44 }
 0x7b5   :  { %5878 = vmatpush1.bf16.msra.mxu0 %v5221_v38  ;;  %6042 = vmatpush1.bf16.msra.mxu1 %v5223_v40  ;;  %v5418_v38 = vrot.slane %v8298_v28, %v8150_v45  ;;  %v5426_v40 = vrot.slane %v8298_v28, %v8153_v25 }
 0x7b6   :  { %5879 = vmatprep.subr.bf16.mxu0 %v5230_v26  ;;  %6043 = vmatprep.subr.bf16.mxu1 %v5232_v41  ;;  %v5325_v26 = vld [vmem:[#allocation3 + $0xd60] sm:$0xff]  ;;  %v5327_v41 = vld [vmem:[#allocation3 + $0xd70] sm:$0xff] }
 0x7b9   :  { %5880 = vmatpush1.bf16.msra.mxu0 %v5229_v42  ;;  %6044 = vmatpush1.bf16.msra.mxu1 %v5231_v46 }
 0x7ba   :  { %5881 = vmatprep.subr.bf16.mxu0 %v5238_v47  ;;  %6045 = vmatprep.subr.bf16.mxu1 %v5240_v32  ;;  %v5334_v47 = vld [vmem:[#allocation3 + $0xda8] sm:$0xff]  ;;  %v5336_v32 = vld [vmem:[#allocation3 + $0xdb8] sm:$0xff] }
 0x7bd   :  { %5882 = vmatpush1.bf16.msra.mxu0 %v5237_v48  ;;  %6046 = vmatpush1.bf16.msra.mxu1 %v5239_v1 }
 0x7be   :  { %5883 = vmatprep.subr.bf16.mxu0 %v5246_v49  ;;  %6047 = vmatprep.subr.bf16.mxu1 %v5248_v50 }
 0x7c1   :  { %5884 = vmatpush1.bf16.msra.mxu0 %v5245_v51  ;;  %6048 = vmatpush1.bf16.msra.mxu1 %v5247_v23 }
 0x7c2   :  { %5885 = vmatprep.subr.bf16.mxu0 %v5254_v54  ;;  %6049 = vmatprep.subr.bf16.mxu1 %v5256_v61 }
 0x7c5   :  { %5886 = vmatpush1.bf16.msra.mxu0 %v5253_v55  ;;  %6050 = vmatpush1.bf16.msra.mxu1 %v5255_v56 }
 0x7c6   :  { %5887 = vmatprep.subr.bf16.mxu0 %v5262_v58  ;;  %6051 = vmatprep.subr.bf16.mxu1 %v5264_v63 }
 0x7c9   :  { %5888 = vmatpush1.bf16.msra.mxu0 %v5261_v27  ;;  %6052 = vmatpush1.bf16.msra.mxu1 %v5263_v60  ;;  %v5333_v27 = vld [vmem:[#allocation3 + $0xda0] sm:$0xff]  ;;  %v5335_v60 = vld [vmem:[#allocation3 + $0xdb0] sm:$0xff] }
 0x7ca   :  { %5889 = vmatprep.subr.bf16.mxu0 %v5270_v3  ;;  %6053 = vmatprep.subr.bf16.mxu1 %v5272_v4 }
 0x7cd   :  { %5890 = vmatpush1.bf16.msra.mxu0 %v5269_v2  ;;  %6054 = vmatpush1.bf16.msra.mxu1 %v5271_v53  ;;  %v5342_v2 = vld [vmem:[#allocation3 + $0xde8] sm:$0xff]  ;;  %v5344_v53 = vld [vmem:[#allocation3 + $0xdf8] sm:$0xff] }
 0x7ce   :  { %5891 = vmatprep.subr.bf16.mxu0 %v5278_v8  ;;  %6055 = vmatprep.subr.bf16.mxu1 %v5280_v43 }
 0x7d1   :  { %5892 = vmatpush1.bf16.msra.mxu0 %v5277_v9  ;;  %6056 = vmatpush1.bf16.msra.mxu1 %v5279_v10 }
 0x7d2   :  { %5902 = vmatprep.subr.bf16.mxu0 %v5286_v11  ;;  %6066 = vmatprep.subr.bf16.mxu1 %v5288_v57  ;;  %v5341_v11 = vld [vmem:[#allocation3 + $0xde0] sm:$0xff]  ;;  %v5343_v57 = vld [vmem:[#allocation3 + $0xdf0] sm:$0xff] }
 0x7d4   :  { %5894 = vmatmul.mubr.bf16.vlgmr.msra.gmra.mrb[20].mxu0 %v8260_v5  ;;  %6058 = vmatmul.mubr.bf16.vlgmr.msra.gmra.mrb[20].mxu1 %v8260_v5  ;;  %v5312_v5 = vld [vmem:[#allocation3 + $0xcf8] sm:$0xff] }
 0x7d5   :  { %5903 = vmatpush1.bf16.msra.mxu0 %v5285_v0  ;;  %6067 = vmatpush1.bf16.msra.mxu1 %v5287_v13  ;;  %v5350_v0 = vld [vmem:[#allocation3 + $0xe28] sm:$0xff]  ;;  %v5352_v13 = vld [vmem:[#allocation3 + $0xe38] sm:$0xff] }
 0x7d6   :  { %5904 = vmatprep.subr.bf16.mxu0 %v5294_v59  ;;  %6068 = vmatprep.subr.bf16.mxu1 %v5296_v12  ;;  %v5349_v59 = vld [vmem:[#allocation3 + $0xe20] sm:$0xff]  ;;  %v5351_v12 = vld [vmem:[#allocation3 + $0xe30] sm:$0xff] }
 0x7d7   :  { %5934 = vmatprep.mubr.bf16.mxu0 %v8266_v7  ;;  %6098 = vmatprep.mubr.bf16.mxu1 %v8266_v7  ;;  %v5317_v7 = vld [vmem:[#allocation3 + $0xd20] sm:$0xff] }
 0x7d9   :  { %5905 = vmatpush1.bf16.msra.mxu0 %v5293_v14  ;;  %6069 = vmatpush1.bf16.msra.mxu1 %v5295_v18  ;;  %v5358_v14 = vld [vmem:[#allocation3 + $0xe68] sm:$0xff]  ;;  %v5360_v18 = vld [vmem:[#allocation3 + $0xe78] sm:$0xff] }
 0x7da   :  { %5906 = vmatprep.subr.bf16.mxu0 %v5302_v16  ;;  %6070 = vmatprep.subr.bf16.mxu1 %v5304_v17  ;;  %v5357_v16 = vld [vmem:[#allocation3 + $0xe60] sm:$0xff]  ;;  %v5359_v17 = vld [vmem:[#allocation3 + $0xe70] sm:$0xff] }
 0x7dd   :  { %5907 = vmatpush1.bf16.msra.mxu0 %v5301_v62  ;;  %6071 = vmatpush1.bf16.msra.mxu1 %v5303_v19  ;;  %v5366_v62 = vld [vmem:[#allocation3 + $0xea8] sm:$0xff]  ;;  %v5368_v19 = vld [vmem:[#allocation3 + $0xeb8] sm:$0xff] }
 0x7de   :  { %5908 = vmatprep.subr.bf16.mxu0 %v5310_v20  ;;  %6072 = vmatprep.subr.bf16.mxu1 %v5312_v5  ;;  %v5365_v20 = vld [vmem:[#allocation3 + $0xea0] sm:$0xff]  ;;  %v5367_v5 = vld [vmem:[#allocation3 + $0xeb0] sm:$0xff] }
 0x7e1   :  { %5909 = vmatpush1.bf16.msra.mxu0 %v5309_v21  ;;  %6073 = vmatpush1.bf16.msra.mxu1 %v5311_v22  ;;  %v5374_v21 = vld [vmem:[#allocation3 + $0xee8] sm:$0xff]  ;;  %v5376_v22 = vld [vmem:[#allocation3 + $0xef8] sm:$0xff] }
 0x7e2   :  { %5910 = vmatprep.subr.bf16.mxu0 %v5318_v24  ;;  %6074 = vmatprep.subr.bf16.mxu1 %v5320_v36  ;;  %v5373_v24 = vld [vmem:[#allocation3 + $0xee0] sm:$0xff]  ;;  %v5375_v36 = vld [vmem:[#allocation3 + $0xef0] sm:$0xff] }
 0x7e5   :  { %5911 = vmatpush1.bf16.msra.mxu0 %v5317_v7  ;;  %6075 = vmatpush1.bf16.msra.mxu1 %v5319_v29  ;;  %v5382_v7 = vld [vmem:[#allocation3 + $0xf28] sm:$0xff]  ;;  %v5384_v29 = vld [vmem:[#allocation3 + $0xf38] sm:$0xff] }
 0x7e6   :  { %5912 = vmatprep.subr.bf16.mxu0 %v5326_v34  ;;  %6076 = vmatprep.subr.bf16.mxu1 %v5328_v52  ;;  %v5381_v34 = vld [vmem:[#allocation3 + $0xf20] sm:$0xff]  ;;  %v5383_v52 = vld [vmem:[#allocation3 + $0xf30] sm:$0xff] }
 0x7e7   :  { %v5608_v42 = vpop.f32.mrb[16].mxu0  ;;  %v5772_v46 = vpop.f32.mrb[16].mxu1 }
 0x7e8   :  { %v7453_v48 = vadd.f32 %v5608_v42, %v5414_v35  ;;  %v7455_v1 = vadd.f32 %v5772_v46, %v5422_v37  ;;  %v5610_v49 = vpop.f32.mrb[17].mxu0  ;;  %v5774_v50 = vpop.f32.mrb[17].mxu1  ;;  %v5390_v35 = vld [vmem:[#allocation3 + $0xf68] sm:$0xff]  ;;  %v5392_v37 = vld [vmem:[#allocation3 + $0xf78] sm:$0xff]  ;;  %v5397_v42 = vld [vmem:[#allocation3 + $0xfa0] sm:$0xff] }
 0x7e9   :  { %v7454_v51 = vadd.f32 %v5610_v49, %v5418_v38  ;;  %v7456_v23 = vadd.f32 %v5774_v50, %v5426_v40  ;;  %v5612_v54 = vpop.f32.mrb[18].mxu0  ;;  %v5776_v61 = vpop.f32.mrb[18].mxu1  ;;  %5913 = vmatpush1.bf16.msra.mxu0 %v5325_v26  ;;  %6077 = vmatpush1.bf16.msra.mxu1 %v5327_v41  ;;  %v5389_v38 = vld [vmem:[#allocation3 + $0xf60] sm:$0xff]  ;;  %v5391_v40 = vld [vmem:[#allocation3 + $0xf70] sm:$0xff]  ;;  %v5398_v26 = vld [vmem:[#allocation3 + $0xfa8] sm:$0xff]  ;;  %v5430_v49 = vrot.slane %v8298_v28, %v8175_v30 }
 0x7ea   :  { %v6107_v55 = vmax.f32 %v7453_v48, 0.0  ;;  %v6109_v56 = vmax.f32 %v7455_v1, 0.0  ;;  %v5613_v58 = vpop.f32.mrb[19].mxu0  ;;  %v5777_v63 = vpop.f32.mrb[19].mxu1  ;;  %5914 = vmatprep.subr.bf16.mxu0 %v5334_v47  ;;  %6078 = vmatprep.subr.bf16.mxu1 %v5336_v32  ;;  %v5400_v41 = vld [vmem:[#allocation3 + $0xfb8] sm:$0xff]  ;;  %v5399_v46 = vld [vmem:[#allocation3 + $0xfb0] sm:$0xff]  ;;  %v5438_v50 = vrot.slane %v8298_v28, %v8178_v31 }
 0x7eb   :  { %v6108_v3 = vmax.f32 %v7454_v51, 0.0  ;;  %v6110_v4 = vmax.f32 %v7456_v23, 0.0  ;;  %v5406_v47 = vld [vmem:[#allocation3 + $0xfe8] sm:$0xff]  ;;  %v5408_v32 = vld [vmem:[#allocation3 + $0xff8] sm:$0xff]  ;;  %v5405_v48 = vld [vmem:[#allocation3 + $0xfe0] sm:$0xff]  ;;  %v5434_v51 = vrot.slane %v8298_v28, %v8181_v15  ;;  %v5442_v23 = vrot.slane %v8298_v28, %v8184_v33 }
 0x7ec   :  { %v8308_v8 = vpack.c.bf16 %v6107_v55, %v6107_v55  ;;  %v8310_v43 = vpack.c.bf16 %v6109_v56, %v6109_v56  ;;  %v5407_v1 = vld [vmem:[#allocation3 + $0xff0] sm:$0xff] }
 0x7ed   :  { %v8312_v9 = vpack.c.bf16 %v6108_v3, %v6108_v3  ;;  %v8314_v10 = vpack.c.bf16 %v6110_v4, %v6110_v4  ;;  %5915 = vmatpush1.bf16.msra.mxu0 %v5333_v27  ;;  %6079 = vmatpush1.bf16.msra.mxu1 %v5335_v60 }
 0x7ee   :  { %5916 = vmatprep.subr.bf16.mxu0 %v5342_v2  ;;  %6080 = vmatprep.subr.bf16.mxu1 %v5344_v53 }
 0x7f1   :  { %5917 = vmatpush1.bf16.msra.mxu0 %v5341_v11  ;;  %6081 = vmatpush1.bf16.msra.mxu1 %v5343_v57 }
 0x7f2   :  { %5918 = vmatprep.subr.bf16.mxu0 %v5350_v0  ;;  %6082 = vmatprep.subr.bf16.mxu1 %v5352_v13 }
 0x7f5   :  { %5919 = vmatpush1.bf16.msra.mxu0 %v5349_v59  ;;  %6083 = vmatpush1.bf16.msra.mxu1 %v5351_v12 }
 0x7f6   :  { %5920 = vmatprep.subr.bf16.mxu0 %v5358_v14  ;;  %6084 = vmatprep.subr.bf16.mxu1 %v5360_v18 }
 0x7f9   :  { %5921 = vmatpush1.bf16.msra.mxu0 %v5357_v16  ;;  %6085 = vmatpush1.bf16.msra.mxu1 %v5359_v17 }
 0x7fa   :  { %5922 = vmatprep.subr.bf16.mxu0 %v5366_v62  ;;  %6086 = vmatprep.subr.bf16.mxu1 %v5368_v19 }
 0x7fd   :  { %5923 = vmatpush1.bf16.msra.mxu0 %v5365_v20  ;;  %6087 = vmatpush1.bf16.msra.mxu1 %v5367_v5 }
 0x7fe   :  { %5924 = vmatprep.subr.bf16.mxu0 %v5374_v21  ;;  %6088 = vmatprep.subr.bf16.mxu1 %v5376_v22 }
 0x801   :  { %5925 = vmatpush1.bf16.msra.mxu0 %v5373_v24  ;;  %6089 = vmatpush1.bf16.msra.mxu1 %v5375_v36 }
 0x802   :  { %5926 = vmatprep.subr.bf16.mxu0 %v5382_v7  ;;  %6090 = vmatprep.subr.bf16.mxu1 %v5384_v29 }
 0x805   :  { %5927 = vmatpush1.bf16.msra.mxu0 %v5381_v34  ;;  %6091 = vmatpush1.bf16.msra.mxu1 %v5383_v52 }
 0x806   :  { %5928 = vmatprep.subr.bf16.mxu0 %v5390_v35  ;;  %6092 = vmatprep.subr.bf16.mxu1 %v5392_v37 }
 0x809   :  { %5929 = vmatpush1.bf16.msra.mxu0 %v5389_v38  ;;  %6093 = vmatpush1.bf16.msra.mxu1 %v5391_v40 }
 0x80a   :  { %5930 = vmatprep.subr.bf16.mxu0 %v5398_v26  ;;  %6094 = vmatprep.subr.bf16.mxu1 %v5400_v41 }
 0x80d   :  { %5931 = vmatpush1.bf16.msra.mxu0 %v5397_v42  ;;  %6095 = vmatpush1.bf16.msra.mxu1 %v5399_v46 }
 0x80e   :  { %5932 = vmatprep.subr.bf16.mxu0 %v5406_v47  ;;  %6096 = vmatprep.subr.bf16.mxu1 %v5408_v32 }
 0x811   :  { %5933 = vmatpush1.bf16.msra.mxu0 %v5405_v48  ;;  %6097 = vmatpush1.bf16.msra.mxu1 %v5407_v1 }
 0x814   :  { %5935 = vmatmul.mubr.bf16.vlgmr.msra.gmra.mrb[20].mxu0 %v8262_v6  ;;  %6099 = vmatmul.mubr.bf16.vlgmr.msra.gmra.mrb[20].mxu1 %v8262_v6 }
 0x8e7   :  { %v5936_v54 = vpop.f32.mrb[20].mxu0  ;;  %v6100_v61 = vpop.f32.mrb[20].mxu1 }
 0x8e8   :  { %v7457_v55 = vadd.f32 %v5936_v54, %v5430_v49  ;;  %v7459_v56 = vadd.f32 %v6100_v61, %v5438_v50  ;;  %v5938_v58 = vpop.f32.mrb[21].mxu0  ;;  %v6102_v63 = vpop.f32.mrb[21].mxu1 }
 0x8e9   :  { %v7458_v27 = vadd.f32 %v5938_v58, %v5434_v51  ;;  %v7460_v6 = vadd.f32 %v6102_v63, %v5442_v23  ;;  %v5940_v60 = vpop.f32.mrb[22].mxu0  ;;  %v6104_v3 = vpop.f32.mrb[22].mxu1 }
 0x8ea   :  { %v6111_v30 = vmax.f32 %v7457_v55, 0.0  ;;  %v6113_v4 = vmax.f32 %v7459_v56, 0.0  ;;  %v5941_v2 = vpop.f32.mrb[23].mxu0  ;;  %v6105_v31 = vpop.f32.mrb[23].mxu1 }
 0x8eb   :  { %v6112_v53 = vmax.f32 %v7458_v27, 0.0  ;;  %v6114_v11 = vmax.f32 %v7460_v6, 0.0 }
 0x8ec   :  { %v8326_v15 = vpack.c.bf16 %v6111_v30, %v6111_v30  ;;  %v8328_v57 = vpack.c.bf16 %v6113_v4, %v6113_v4 }
 0x8ed   :  { %v8330_v33 = vpack.c.bf16 %v6112_v53, %v6112_v53  ;;  %v8332_v28 = vpack.c.bf16 %v6114_v11, %v6114_v11 }
 0x8ee   :  { %7861 = dma.done.wait [#allocation6 + $0x2], 32768 }
 0x8ef   :  { %7862 = vsyncadd [#allocation6 + $0x2], 4294934528  ;;  %6441 = vmatprep.mubr.bf16.mxu0 %v8312_v9  ;;  %6605 = vmatprep.mubr.bf16.mxu1 %v8312_v9  ;;  %v6132_v0 = vld [vmem:[#allocation4 + $0x8] sm:$0xff]  ;;  %v6134_v13 = vld [vmem:[#allocation4 + $0x18] sm:$0xff] }
 0x8f0   :  { %v6131_v59 = vld [vmem:[#allocation4] sm:$0xff]  ;;  %6409 = vmatprep.subr.bf16.mxu0 %v6132_v0  ;;  %6573 = vmatprep.subr.bf16.mxu1 %v6134_v13  ;;  %v6133_v12 = vld [vmem:[#allocation4 + $0x10] sm:$0xff]  ;;  %v6136_v14 = vld [vmem:[#allocation4 + $0x28] sm:$0xff] }
 0x8f1   :  { %v6138_v18 = vld [vmem:[#allocation4 + $0x38] sm:$0xff]  ;;  %6410 = vmatpush1.bf16.msra.mxu0 %v6131_v59  ;;  %6574 = vmatpush1.bf16.msra.mxu1 %v6133_v12  ;;  %v6135_v16 = vld [vmem:[#allocation4 + $0x20] sm:$0xff]  ;;  %v6137_v17 = vld [vmem:[#allocation4 + $0x30] sm:$0xff] }
 0x8f2   :  { %6411 = vmatprep.subr.bf16.mxu0 %v6136_v14  ;;  %6575 = vmatprep.subr.bf16.mxu1 %v6138_v18  ;;  %v6140_v62 = vld [vmem:[#allocation4 + $0x48] sm:$0xff]  ;;  %v6142_v19 = vld [vmem:[#allocation4 + $0x58] sm:$0xff]  ;;  %v6139_v9 = vld [vmem:[#allocation4 + $0x40] sm:$0xff] }
 0x8f3   :  { %v6141_v20 = vld [vmem:[#allocation4 + $0x50] sm:$0xff]  ;;  %v6144_v5 = vld [vmem:[#allocation4 + $0x68] sm:$0xff]  ;;  %v6146_v21 = vld [vmem:[#allocation4 + $0x78] sm:$0xff] }
 0x8f4   :  { %v6143_v22 = vld [vmem:[#allocation4 + $0x60] sm:$0xff]  ;;  %v6145_v24 = vld [vmem:[#allocation4 + $0x70] sm:$0xff]  ;;  %v6148_v36 = vld [vmem:[#allocation4 + $0x88] sm:$0xff] }
 0x8f5   :  { %6412 = vmatpush1.bf16.msra.mxu0 %v6135_v16  ;;  %6576 = vmatpush1.bf16.msra.mxu1 %v6137_v17  ;;  %v6150_v7 = vld [vmem:[#allocation4 + $0x98] sm:$0xff]  ;;  %v6147_v29 = vld [vmem:[#allocation4 + $0x80] sm:$0xff]  ;;  %v6149_v34 = vld [vmem:[#allocation4 + $0x90] sm:$0xff] }
 0x8f6   :  { %6413 = vmatprep.subr.bf16.mxu0 %v6140_v62  ;;  %6577 = vmatprep.subr.bf16.mxu1 %v6142_v19  ;;  %v6152_v52 = vld [vmem:[#allocation4 + $0xa8] sm:$0xff]  ;;  %v6154_v35 = vld [vmem:[#allocation4 + $0xb8] sm:$0xff]  ;;  %v6151_v37 = vld [vmem:[#allocation4 + $0xa0] sm:$0xff] }
 0x8f7   :  { %v6153_v38 = vld [vmem:[#allocation4 + $0xb0] sm:$0xff]  ;;  %v6156_v40 = vld [vmem:[#allocation4 + $0xc8] sm:$0xff]  ;;  %v6158_v26 = vld [vmem:[#allocation4 + $0xd8] sm:$0xff] }
 0x8f8   :  { %v6155_v41 = vld [vmem:[#allocation4 + $0xc0] sm:$0xff]  ;;  %v6157_v42 = vld [vmem:[#allocation4 + $0xd0] sm:$0xff]  ;;  %v6160_v46 = vld [vmem:[#allocation4 + $0xe8] sm:$0xff] }
 0x8f9   :  { %6414 = vmatpush1.bf16.msra.mxu0 %v6139_v9  ;;  %6578 = vmatpush1.bf16.msra.mxu1 %v6141_v20  ;;  %v6162_v47 = vld [vmem:[#allocation4 + $0xf8] sm:$0xff]  ;;  %v6159_v32 = vld [vmem:[#allocation4 + $0xe0] sm:$0xff]  ;;  %v6161_v48 = vld [vmem:[#allocation4 + $0xf0] sm:$0xff] }
 0x8fa   :  { %6415 = vmatprep.subr.bf16.mxu0 %v6144_v5  ;;  %6579 = vmatprep.subr.bf16.mxu1 %v6146_v21  ;;  %v6164_v1 = vld [vmem:[#allocation4 + $0x108] sm:$0xff]  ;;  %v6166_v49 = vld [vmem:[#allocation4 + $0x118] sm:$0xff]  ;;  %v6163_v50 = vld [vmem:[#allocation4 + $0x100] sm:$0xff] }
 0x8fb   :  { %v6165_v51 = vld [vmem:[#allocation4 + $0x110] sm:$0xff]  ;;  %v6168_v23 = vld [vmem:[#allocation4 + $0x128] sm:$0xff]  ;;  %v6170_v54 = vld [vmem:[#allocation4 + $0x138] sm:$0xff] }
 0x8fc   :  { %v6167_v61 = vld [vmem:[#allocation4 + $0x120] sm:$0xff]  ;;  %v6169_v55 = vld [vmem:[#allocation4 + $0x130] sm:$0xff]  ;;  %v6172_v56 = vld [vmem:[#allocation4 + $0x148] sm:$0xff] }
 0x8fd   :  { %6416 = vmatpush1.bf16.msra.mxu0 %v6143_v22  ;;  %6580 = vmatpush1.bf16.msra.mxu1 %v6145_v24  ;;  %v6174_v58 = vld [vmem:[#allocation4 + $0x158] sm:$0xff]  ;;  %v6171_v63 = vld [vmem:[#allocation4 + $0x140] sm:$0xff]  ;;  %v6173_v27 = vld [vmem:[#allocation4 + $0x150] sm:$0xff] }
 0x8fe   :  { %6417 = vmatprep.subr.bf16.mxu0 %v6148_v36  ;;  %6581 = vmatprep.subr.bf16.mxu1 %v6150_v7  ;;  %v6176_v6 = vld [vmem:[#allocation4 + $0x168] sm:$0xff]  ;;  %v6178_v60 = vld [vmem:[#allocation4 + $0x178] sm:$0xff]  ;;  %v6175_v3 = vld [vmem:[#allocation4 + $0x160] sm:$0xff] }
 0x8ff   :  { %v6177_v30 = vld [vmem:[#allocation4 + $0x170] sm:$0xff]  ;;  %v6180_v4 = vld [vmem:[#allocation4 + $0x188] sm:$0xff]  ;;  %v6182_v2 = vld [vmem:[#allocation4 + $0x198] sm:$0xff] }
 0x900   :  { %v6179_v31 = vld [vmem:[#allocation4 + $0x180] sm:$0xff]  ;;  %v6181_v53 = vld [vmem:[#allocation4 + $0x190] sm:$0xff]  ;;  %v6184_v11 = vld [vmem:[#allocation4 + $0x1a8] sm:$0xff] }
 0x901   :  { %6418 = vmatpush1.bf16.msra.mxu0 %v6147_v29  ;;  %6582 = vmatpush1.bf16.msra.mxu1 %v6149_v34  ;;  %v6186_v0 = vld [vmem:[#allocation4 + $0x1b8] sm:$0xff]  ;;  %v6183_v13 = vld [vmem:[#allocation4 + $0x1a0] sm:$0xff]  ;;  %v6185_v59 = vld [vmem:[#allocation4 + $0x1b0] sm:$0xff] }
 0x902   :  { %6419 = vmatprep.subr.bf16.mxu0 %v6152_v52  ;;  %6583 = vmatprep.subr.bf16.mxu1 %v6154_v35  ;;  %v6188_v12 = vld [vmem:[#allocation4 + $0x1c8] sm:$0xff]  ;;  %v6190_v14 = vld [vmem:[#allocation4 + $0x1d8] sm:$0xff]  ;;  %v6187_v18 = vld [vmem:[#allocation4 + $0x1c0] sm:$0xff] }
 0x903   :  { %v6189_v16 = vld [vmem:[#allocation4 + $0x1d0] sm:$0xff]  ;;  %v6192_v17 = vld [vmem:[#allocation4 + $0x1e8] sm:$0xff]  ;;  %v6194_v62 = vld [vmem:[#allocation4 + $0x1f8] sm:$0xff] }
 0x904   :  { %v6191_v19 = vld [vmem:[#allocation4 + $0x1e0] sm:$0xff]  ;;  %v6193_v9 = vld [vmem:[#allocation4 + $0x1f0] sm:$0xff]  ;;  %v6196_v20 = vld [vmem:[#allocation4 + $0x208] sm:$0xff] }
 0x905   :  { %6420 = vmatpush1.bf16.msra.mxu0 %v6151_v37  ;;  %6584 = vmatpush1.bf16.msra.mxu1 %v6153_v38  ;;  %v6198_v5 = vld [vmem:[#allocation4 + $0x218] sm:$0xff]  ;;  %v6195_v21 = vld [vmem:[#allocation4 + $0x200] sm:$0xff]  ;;  %v6197_v22 = vld [vmem:[#allocation4 + $0x210] sm:$0xff] }
 0x906   :  { %6421 = vmatprep.subr.bf16.mxu0 %v6156_v40  ;;  %6585 = vmatprep.subr.bf16.mxu1 %v6158_v26  ;;  %v6200_v24 = vld [vmem:[#allocation4 + $0x228] sm:$0xff]  ;;  %v6202_v36 = vld [vmem:[#allocation4 + $0x238] sm:$0xff]  ;;  %v6199_v7 = vld [vmem:[#allocation4 + $0x220] sm:$0xff] }
 0x907   :  { %v6201_v29 = vld [vmem:[#allocation4 + $0x230] sm:$0xff]  ;;  %v6204_v34 = vld [vmem:[#allocation4 + $0x248] sm:$0xff]  ;;  %v6206_v52 = vld [vmem:[#allocation4 + $0x258] sm:$0xff] }
 0x908   :  { %v6203_v35 = vld [vmem:[#allocation4 + $0x240] sm:$0xff]  ;;  %v6205_v37 = vld [vmem:[#allocation4 + $0x250] sm:$0xff]  ;;  %v6208_v38 = vld [vmem:[#allocation4 + $0x268] sm:$0xff] }
 0x909   :  { %6422 = vmatpush1.bf16.msra.mxu0 %v6155_v41  ;;  %6586 = vmatpush1.bf16.msra.mxu1 %v6157_v42  ;;  %v6207_v40 = vld [vmem:[#allocation4 + $0x260] sm:$0xff]  ;;  %v6209_v26 = vld [vmem:[#allocation4 + $0x270] sm:$0xff]  ;;  %v6212_v41 = vld [vmem:[#allocation4 + $0x288] sm:$0xff] }
 0x90a   :  { %6423 = vmatprep.subr.bf16.mxu0 %v6160_v46  ;;  %6587 = vmatprep.subr.bf16.mxu1 %v6162_v47  ;;  %v6214_v42 = vld [vmem:[#allocation4 + $0x298] sm:$0xff]  ;;  %v6213_v46 = vld [vmem:[#allocation4 + $0x290] sm:$0xff]  ;;  %v6216_v47 = vld [vmem:[#allocation4 + $0x2a8] sm:$0xff] }
 0x90d   :  { %6424 = vmatpush1.bf16.msra.mxu0 %v6159_v32  ;;  %6588 = vmatpush1.bf16.msra.mxu1 %v6161_v48  ;;  %v6218_v32 = vld [vmem:[#allocation4 + $0x2b8] sm:$0xff]  ;;  %v6215_v48 = vld [vmem:[#allocation4 + $0x2a0] sm:$0xff] }
 0x90e   :  { %6425 = vmatprep.subr.bf16.mxu0 %v6164_v1  ;;  %6589 = vmatprep.subr.bf16.mxu1 %v6166_v49  ;;  %v6217_v1 = vld [vmem:[#allocation4 + $0x2b0] sm:$0xff]  ;;  %v6220_v49 = vld [vmem:[#allocation4 + $0x2c8] sm:$0xff] }
 0x911   :  { %6426 = vmatpush1.bf16.msra.mxu0 %v6163_v50  ;;  %6590 = vmatpush1.bf16.msra.mxu1 %v6165_v51  ;;  %v6222_v50 = vld [vmem:[#allocation4 + $0x2d8] sm:$0xff]  ;;  %v6219_v51 = vld [vmem:[#allocation4 + $0x2c0] sm:$0xff] }
 0x912   :  { %6427 = vmatprep.subr.bf16.mxu0 %v6168_v23  ;;  %6591 = vmatprep.subr.bf16.mxu1 %v6170_v54  ;;  %v6221_v23 = vld [vmem:[#allocation4 + $0x2d0] sm:$0xff]  ;;  %v6224_v54 = vld [vmem:[#allocation4 + $0x2e8] sm:$0xff] }
 0x915   :  { %6428 = vmatpush1.bf16.msra.mxu0 %v6167_v61  ;;  %6592 = vmatpush1.bf16.msra.mxu1 %v6169_v55  ;;  %v6226_v61 = vld [vmem:[#allocation4 + $0x2f8] sm:$0xff]  ;;  %v6223_v55 = vld [vmem:[#allocation4 + $0x2e0] sm:$0xff] }
 0x916   :  { %6429 = vmatprep.subr.bf16.mxu0 %v6172_v56  ;;  %6593 = vmatprep.subr.bf16.mxu1 %v6174_v58  ;;  %v6225_v56 = vld [vmem:[#allocation4 + $0x2f0] sm:$0xff]  ;;  %v6228_v58 = vld [vmem:[#allocation4 + $0x308] sm:$0xff] }
 0x919   :  { %6430 = vmatpush1.bf16.msra.mxu0 %v6171_v63  ;;  %6594 = vmatpush1.bf16.msra.mxu1 %v6173_v27  ;;  %v6230_v63 = vld [vmem:[#allocation4 + $0x318] sm:$0xff]  ;;  %v6227_v27 = vld [vmem:[#allocation4 + $0x300] sm:$0xff] }
 0x91a   :  { %6431 = vmatprep.subr.bf16.mxu0 %v6176_v6  ;;  %6595 = vmatprep.subr.bf16.mxu1 %v6178_v60  ;;  %v6229_v6 = vld [vmem:[#allocation4 + $0x310] sm:$0xff]  ;;  %v6232_v60 = vld [vmem:[#allocation4 + $0x328] sm:$0xff] }
 0x91d   :  { %6432 = vmatpush1.bf16.msra.mxu0 %v6175_v3  ;;  %6596 = vmatpush1.bf16.msra.mxu1 %v6177_v30  ;;  %v6234_v3 = vld [vmem:[#allocation4 + $0x338] sm:$0xff]  ;;  %v6231_v30 = vld [vmem:[#allocation4 + $0x320] sm:$0xff] }
 0x91e   :  { %6433 = vmatprep.subr.bf16.mxu0 %v6180_v4  ;;  %6597 = vmatprep.subr.bf16.mxu1 %v6182_v2  ;;  %v6233_v4 = vld [vmem:[#allocation4 + $0x330] sm:$0xff]  ;;  %v6236_v2 = vld [vmem:[#allocation4 + $0x348] sm:$0xff] }
 0x921   :  { %6434 = vmatpush1.bf16.msra.mxu0 %v6179_v31  ;;  %6598 = vmatpush1.bf16.msra.mxu1 %v6181_v53  ;;  %v6238_v31 = vld [vmem:[#allocation4 + $0x358] sm:$0xff]  ;;  %v6235_v53 = vld [vmem:[#allocation4 + $0x340] sm:$0xff] }
 0x922   :  { %6435 = vmatprep.subr.bf16.mxu0 %v6184_v11  ;;  %6599 = vmatprep.subr.bf16.mxu1 %v6186_v0  ;;  %v6237_v11 = vld [vmem:[#allocation4 + $0x350] sm:$0xff]  ;;  %v6240_v0 = vld [vmem:[#allocation4 + $0x368] sm:$0xff] }
 0x925   :  { %6436 = vmatpush1.bf16.msra.mxu0 %v6183_v13  ;;  %6600 = vmatpush1.bf16.msra.mxu1 %v6185_v59  ;;  %v6242_v13 = vld [vmem:[#allocation4 + $0x378] sm:$0xff]  ;;  %v6239_v59 = vld [vmem:[#allocation4 + $0x360] sm:$0xff] }
 0x926   :  { %6437 = vmatprep.subr.bf16.mxu0 %v6188_v12  ;;  %6601 = vmatprep.subr.bf16.mxu1 %v6190_v14  ;;  %v6241_v12 = vld [vmem:[#allocation4 + $0x370] sm:$0xff]  ;;  %v6244_v14 = vld [vmem:[#allocation4 + $0x388] sm:$0xff] }
 0x929   :  { %6438 = vmatpush1.bf16.msra.mxu0 %v6187_v18  ;;  %6602 = vmatpush1.bf16.msra.mxu1 %v6189_v16  ;;  %v6246_v18 = vld [vmem:[#allocation4 + $0x398] sm:$0xff]  ;;  %v6243_v16 = vld [vmem:[#allocation4 + $0x380] sm:$0xff] }
 0x92a   :  { %6439 = vmatprep.subr.bf16.mxu0 %v6192_v17  ;;  %6603 = vmatprep.subr.bf16.mxu1 %v6194_v62  ;;  %v6245_v17 = vld [vmem:[#allocation4 + $0x390] sm:$0xff]  ;;  %v6248_v62 = vld [vmem:[#allocation4 + $0x3a8] sm:$0xff] }
 0x92d   :  { %6440 = vmatpush1.bf16.msra.mxu0 %v6191_v19  ;;  %6604 = vmatpush1.bf16.msra.mxu1 %v6193_v9  ;;  %v6250_v19 = vld [vmem:[#allocation4 + $0x3b8] sm:$0xff]  ;;  %v6247_v9 = vld [vmem:[#allocation4 + $0x3a0] sm:$0xff] }
 0x92e   :  { %6450 = vmatprep.subr.bf16.mxu0 %v6196_v20  ;;  %6614 = vmatprep.subr.bf16.mxu1 %v6198_v5  ;;  %v6249_v20 = vld [vmem:[#allocation4 + $0x3b0] sm:$0xff]  ;;  %v6252_v5 = vld [vmem:[#allocation4 + $0x3c8] sm:$0xff] }
 0x930   :  { %6442 = vmatmul.mubr.bf16.vlgmr.msra.gmra.mrb[24].mxu0 %v8308_v8  ;;  %6606 = vmatmul.mubr.bf16.vlgmr.msra.gmra.mrb[24].mxu1 %v8308_v8  ;;  %v6210_v8 = vld [vmem:[#allocation4 + $0x278] sm:$0xff] }
 0x931   :  { %6451 = vmatpush1.bf16.msra.mxu0 %v6195_v21  ;;  %6615 = vmatpush1.bf16.msra.mxu1 %v6197_v22  ;;  %v6254_v21 = vld [vmem:[#allocation4 + $0x3d8] sm:$0xff]  ;;  %v6251_v22 = vld [vmem:[#allocation4 + $0x3c0] sm:$0xff] }
 0x932   :  { %6452 = vmatprep.subr.bf16.mxu0 %v6200_v24  ;;  %6616 = vmatprep.subr.bf16.mxu1 %v6202_v36  ;;  %v6253_v24 = vld [vmem:[#allocation4 + $0x3d0] sm:$0xff]  ;;  %v6256_v36 = vld [vmem:[#allocation4 + $0x3e8] sm:$0xff] }
 0x933   :  { %6482 = vmatprep.mubr.bf16.mxu0 %v8314_v10  ;;  %6646 = vmatprep.mubr.bf16.mxu1 %v8314_v10  ;;  %v6211_v10 = vld [vmem:[#allocation4 + $0x280] sm:$0xff] }
 0x935   :  { %6453 = vmatpush1.bf16.msra.mxu0 %v6199_v7  ;;  %6617 = vmatpush1.bf16.msra.mxu1 %v6201_v29  ;;  %v6258_v7 = vld [vmem:[#allocation4 + $0x3f8] sm:$0xff]  ;;  %v6255_v29 = vld [vmem:[#allocation4 + $0x3e0] sm:$0xff] }
 0x936   :  { %6454 = vmatprep.subr.bf16.mxu0 %v6204_v34  ;;  %6618 = vmatprep.subr.bf16.mxu1 %v6206_v52  ;;  %v6257_v34 = vld [vmem:[#allocation4 + $0x3f0] sm:$0xff]  ;;  %v6260_v52 = vld [vmem:[#allocation4 + $0x408] sm:$0xff] }
 0x939   :  { %6455 = vmatpush1.bf16.msra.mxu0 %v6203_v35  ;;  %6619 = vmatpush1.bf16.msra.mxu1 %v6205_v37  ;;  %v6262_v35 = vld [vmem:[#allocation4 + $0x418] sm:$0xff]  ;;  %v6259_v37 = vld [vmem:[#allocation4 + $0x400] sm:$0xff] }
 0x93a   :  { %6456 = vmatprep.subr.bf16.mxu0 %v6208_v38  ;;  %6620 = vmatprep.subr.bf16.mxu1 %v6210_v8  ;;  %v6261_v38 = vld [vmem:[#allocation4 + $0x410] sm:$0xff]  ;;  %v6264_v8 = vld [vmem:[#allocation4 + $0x428] sm:$0xff] }
 0x93d   :  { %6457 = vmatpush1.bf16.msra.mxu0 %v6207_v40  ;;  %6621 = vmatpush1.bf16.msra.mxu1 %v6209_v26  ;;  %v6266_v40 = vld [vmem:[#allocation4 + $0x438] sm:$0xff]  ;;  %v6263_v26 = vld [vmem:[#allocation4 + $0x420] sm:$0xff] }
 0x93e   :  { %6458 = vmatprep.subr.bf16.mxu0 %v6212_v41  ;;  %6622 = vmatprep.subr.bf16.mxu1 %v6214_v42  ;;  %v6265_v41 = vld [vmem:[#allocation4 + $0x430] sm:$0xff]  ;;  %v6268_v42 = vld [vmem:[#allocation4 + $0x448] sm:$0xff] }
 0x941   :  { %6459 = vmatpush1.bf16.msra.mxu0 %v6211_v10  ;;  %6623 = vmatpush1.bf16.msra.mxu1 %v6213_v46  ;;  %v6270_v10 = vld [vmem:[#allocation4 + $0x458] sm:$0xff]  ;;  %v6267_v46 = vld [vmem:[#allocation4 + $0x440] sm:$0xff] }
 0x942   :  { %6460 = vmatprep.subr.bf16.mxu0 %v6216_v47  ;;  %6624 = vmatprep.subr.bf16.mxu1 %v6218_v32  ;;  %v6269_v47 = vld [vmem:[#allocation4 + $0x450] sm:$0xff]  ;;  %v6272_v32 = vld [vmem:[#allocation4 + $0x468] sm:$0xff] }
 0x945   :  { %6461 = vmatpush1.bf16.msra.mxu0 %v6215_v48  ;;  %6625 = vmatpush1.bf16.msra.mxu1 %v6217_v1  ;;  %v6271_v48 = vld [vmem:[#allocation4 + $0x460] sm:$0xff]  ;;  %v6273_v1 = vld [vmem:[#allocation4 + $0x470] sm:$0xff] }
 0x946   :  { %6462 = vmatprep.subr.bf16.mxu0 %v6220_v49  ;;  %6626 = vmatprep.subr.bf16.mxu1 %v6222_v50  ;;  %v6276_v49 = vld [vmem:[#allocation4 + $0x488] sm:$0xff]  ;;  %v6278_v50 = vld [vmem:[#allocation4 + $0x498] sm:$0xff] }
 0x949   :  { %6463 = vmatpush1.bf16.msra.mxu0 %v6219_v51  ;;  %6627 = vmatpush1.bf16.msra.mxu1 %v6221_v23  ;;  %v6277_v51 = vld [vmem:[#allocation4 + $0x490] sm:$0xff]  ;;  %v6280_v23 = vld [vmem:[#allocation4 + $0x4a8] sm:$0xff] }
 0x94a   :  { %6464 = vmatprep.subr.bf16.mxu0 %v6224_v54  ;;  %6628 = vmatprep.subr.bf16.mxu1 %v6226_v61  ;;  %v6282_v54 = vld [vmem:[#allocation4 + $0x4b8] sm:$0xff]  ;;  %v6279_v61 = vld [vmem:[#allocation4 + $0x4a0] sm:$0xff] }
 0x94d   :  { %6465 = vmatpush1.bf16.msra.mxu0 %v6223_v55  ;;  %6629 = vmatpush1.bf16.msra.mxu1 %v6225_v56  ;;  %v6281_v55 = vld [vmem:[#allocation4 + $0x4b0] sm:$0xff]  ;;  %v6284_v56 = vld [vmem:[#allocation4 + $0x4c8] sm:$0xff] }
 0x94e   :  { %6466 = vmatprep.subr.bf16.mxu0 %v6228_v58  ;;  %6630 = vmatprep.subr.bf16.mxu1 %v6230_v63  ;;  %v6286_v58 = vld [vmem:[#allocation4 + $0x4d8] sm:$0xff]  ;;  %v6283_v63 = vld [vmem:[#allocation4 + $0x4c0] sm:$0xff] }
 0x951   :  { %6467 = vmatpush1.bf16.msra.mxu0 %v6227_v27  ;;  %6631 = vmatpush1.bf16.msra.mxu1 %v6229_v6  ;;  %v6285_v27 = vld [vmem:[#allocation4 + $0x4d0] sm:$0xff]  ;;  %v6288_v6 = vld [vmem:[#allocation4 + $0x4e8] sm:$0xff] }
 0x952   :  { %6468 = vmatprep.subr.bf16.mxu0 %v6232_v60  ;;  %6632 = vmatprep.subr.bf16.mxu1 %v6234_v3  ;;  %v6290_v60 = vld [vmem:[#allocation4 + $0x4f8] sm:$0xff]  ;;  %v6287_v3 = vld [vmem:[#allocation4 + $0x4e0] sm:$0xff] }
 0x955   :  { %6469 = vmatpush1.bf16.msra.mxu0 %v6231_v30  ;;  %6633 = vmatpush1.bf16.msra.mxu1 %v6233_v4  ;;  %v6289_v30 = vld [vmem:[#allocation4 + $0x4f0] sm:$0xff]  ;;  %v6292_v4 = vld [vmem:[#allocation4 + $0x508] sm:$0xff] }
 0x956   :  { %6470 = vmatprep.subr.bf16.mxu0 %v6236_v2  ;;  %6634 = vmatprep.subr.bf16.mxu1 %v6238_v31  ;;  %v6294_v2 = vld [vmem:[#allocation4 + $0x518] sm:$0xff]  ;;  %v6291_v31 = vld [vmem:[#allocation4 + $0x500] sm:$0xff] }
 0x959   :  { %6471 = vmatpush1.bf16.msra.mxu0 %v6235_v53  ;;  %6635 = vmatpush1.bf16.msra.mxu1 %v6237_v11  ;;  %v6293_v53 = vld [vmem:[#allocation4 + $0x510] sm:$0xff]  ;;  %v6296_v11 = vld [vmem:[#allocation4 + $0x528] sm:$0xff] }
 0x95a   :  { %6472 = vmatprep.subr.bf16.mxu0 %v6240_v0  ;;  %6636 = vmatprep.subr.bf16.mxu1 %v6242_v13  ;;  %v6298_v0 = vld [vmem:[#allocation4 + $0x538] sm:$0xff]  ;;  %v6295_v13 = vld [vmem:[#allocation4 + $0x520] sm:$0xff] }
 0x95d   :  { %6473 = vmatpush1.bf16.msra.mxu0 %v6239_v59  ;;  %6637 = vmatpush1.bf16.msra.mxu1 %v6241_v12  ;;  %v6297_v59 = vld [vmem:[#allocation4 + $0x530] sm:$0xff]  ;;  %v6300_v12 = vld [vmem:[#allocation4 + $0x548] sm:$0xff] }
 0x95e   :  { %6474 = vmatprep.subr.bf16.mxu0 %v6244_v14  ;;  %6638 = vmatprep.subr.bf16.mxu1 %v6246_v18  ;;  %v6302_v14 = vld [vmem:[#allocation4 + $0x558] sm:$0xff]  ;;  %v6299_v18 = vld [vmem:[#allocation4 + $0x540] sm:$0xff] }
 0x961   :  { %6475 = vmatpush1.bf16.msra.mxu0 %v6243_v16  ;;  %6639 = vmatpush1.bf16.msra.mxu1 %v6245_v17  ;;  %v6301_v16 = vld [vmem:[#allocation4 + $0x550] sm:$0xff]  ;;  %v6304_v17 = vld [vmem:[#allocation4 + $0x568] sm:$0xff] }
 0x962   :  { %6476 = vmatprep.subr.bf16.mxu0 %v6248_v62  ;;  %6640 = vmatprep.subr.bf16.mxu1 %v6250_v19  ;;  %v6306_v62 = vld [vmem:[#allocation4 + $0x578] sm:$0xff]  ;;  %v6303_v19 = vld [vmem:[#allocation4 + $0x560] sm:$0xff] }
 0x965   :  { %6477 = vmatpush1.bf16.msra.mxu0 %v6247_v9  ;;  %6641 = vmatpush1.bf16.msra.mxu1 %v6249_v20  ;;  %v6305_v9 = vld [vmem:[#allocation4 + $0x570] sm:$0xff]  ;;  %v6308_v20 = vld [vmem:[#allocation4 + $0x588] sm:$0xff] }
 0x966   :  { %6478 = vmatprep.subr.bf16.mxu0 %v6252_v5  ;;  %6642 = vmatprep.subr.bf16.mxu1 %v6254_v21  ;;  %v6310_v5 = vld [vmem:[#allocation4 + $0x598] sm:$0xff]  ;;  %v6307_v21 = vld [vmem:[#allocation4 + $0x580] sm:$0xff] }
 0x969   :  { %6479 = vmatpush1.bf16.msra.mxu0 %v6251_v22  ;;  %6643 = vmatpush1.bf16.msra.mxu1 %v6253_v24  ;;  %v6309_v22 = vld [vmem:[#allocation4 + $0x590] sm:$0xff]  ;;  %v6312_v24 = vld [vmem:[#allocation4 + $0x5a8] sm:$0xff] }
 0x96a   :  { %6480 = vmatprep.subr.bf16.mxu0 %v6256_v36  ;;  %6644 = vmatprep.subr.bf16.mxu1 %v6258_v7  ;;  %v6314_v36 = vld [vmem:[#allocation4 + $0x5b8] sm:$0xff]  ;;  %v6311_v7 = vld [vmem:[#allocation4 + $0x5a0] sm:$0xff] }
 0x96d   :  { %6481 = vmatpush1.bf16.msra.mxu0 %v6255_v29  ;;  %6645 = vmatpush1.bf16.msra.mxu1 %v6257_v34  ;;  %v6313_v29 = vld [vmem:[#allocation4 + $0x5b0] sm:$0xff]  ;;  %v6316_v34 = vld [vmem:[#allocation4 + $0x5c8] sm:$0xff] }
 0x96e   :  { %6491 = vmatprep.subr.bf16.mxu0 %v6260_v52  ;;  %6655 = vmatprep.subr.bf16.mxu1 %v6262_v35  ;;  %v6318_v52 = vld [vmem:[#allocation4 + $0x5d8] sm:$0xff]  ;;  %v6315_v35 = vld [vmem:[#allocation4 + $0x5c0] sm:$0xff] }
 0x970   :  { %6483 = vmatmul.mubr.bf16.vlgmr.msra.gmra.mrb[24].mxu0 %v8310_v43  ;;  %6647 = vmatmul.mubr.bf16.vlgmr.msra.gmra.mrb[24].mxu1 %v8310_v43  ;;  %v6274_v43 = vld [vmem:[#allocation4 + $0x478] sm:$0xff] }
 0x971   :  { %6492 = vmatpush1.bf16.msra.mxu0 %v6259_v37  ;;  %6656 = vmatpush1.bf16.msra.mxu1 %v6261_v38  ;;  %v6317_v37 = vld [vmem:[#allocation4 + $0x5d0] sm:$0xff]  ;;  %v6320_v38 = vld [vmem:[#allocation4 + $0x5e8] sm:$0xff] }
 0x972   :  { %6493 = vmatprep.subr.bf16.mxu0 %v6264_v8  ;;  %6657 = vmatprep.subr.bf16.mxu1 %v6266_v40  ;;  %v6322_v8 = vld [vmem:[#allocation4 + $0x5f8] sm:$0xff]  ;;  %v6319_v40 = vld [vmem:[#allocation4 + $0x5e0] sm:$0xff] }
 0x973   :  { %6523 = vmatprep.mubr.bf16.mxu0 %v8330_v33  ;;  %6687 = vmatprep.mubr.bf16.mxu1 %v8330_v33  ;;  %v6275_v33 = vld [vmem:[#allocation4 + $0x480] sm:$0xff] }
 0x975   :  { %6494 = vmatpush1.bf16.msra.mxu0 %v6263_v26  ;;  %6658 = vmatpush1.bf16.msra.mxu1 %v6265_v41  ;;  %v6321_v26 = vld [vmem:[#allocation4 + $0x5f0] sm:$0xff]  ;;  %v6324_v41 = vld [vmem:[#allocation4 + $0x608] sm:$0xff] }
 0x976   :  { %6495 = vmatprep.subr.bf16.mxu0 %v6268_v42  ;;  %6659 = vmatprep.subr.bf16.mxu1 %v6270_v10  ;;  %v6326_v42 = vld [vmem:[#allocation4 + $0x618] sm:$0xff]  ;;  %v6323_v10 = vld [vmem:[#allocation4 + $0x600] sm:$0xff] }
 0x979   :  { %6496 = vmatpush1.bf16.msra.mxu0 %v6267_v46  ;;  %6660 = vmatpush1.bf16.msra.mxu1 %v6269_v47  ;;  %v6325_v46 = vld [vmem:[#allocation4 + $0x610] sm:$0xff]  ;;  %v6328_v47 = vld [vmem:[#allocation4 + $0x628] sm:$0xff] }
 0x97a   :  { %6497 = vmatprep.subr.bf16.mxu0 %v6272_v32  ;;  %6661 = vmatprep.subr.bf16.mxu1 %v6274_v43  ;;  %v6330_v32 = vld [vmem:[#allocation4 + $0x638] sm:$0xff]  ;;  %v6327_v43 = vld [vmem:[#allocation4 + $0x620] sm:$0xff] }
 0x97d   :  { %6498 = vmatpush1.bf16.msra.mxu0 %v6271_v48  ;;  %6662 = vmatpush1.bf16.msra.mxu1 %v6273_v1  ;;  %v6329_v48 = vld [vmem:[#allocation4 + $0x630] sm:$0xff]  ;;  %v6332_v1 = vld [vmem:[#allocation4 + $0x648] sm:$0xff] }
 0x97e   :  { %6499 = vmatprep.subr.bf16.mxu0 %v6276_v49  ;;  %6663 = vmatprep.subr.bf16.mxu1 %v6278_v50  ;;  %v6334_v49 = vld [vmem:[#allocation4 + $0x658] sm:$0xff]  ;;  %v6331_v50 = vld [vmem:[#allocation4 + $0x640] sm:$0xff] }
 0x981   :  { %6500 = vmatpush1.bf16.msra.mxu0 %v6275_v33  ;;  %6664 = vmatpush1.bf16.msra.mxu1 %v6277_v51  ;;  %v6333_v33 = vld [vmem:[#allocation4 + $0x650] sm:$0xff]  ;;  %v6336_v51 = vld [vmem:[#allocation4 + $0x668] sm:$0xff] }
 0x982   :  { %6501 = vmatprep.subr.bf16.mxu0 %v6280_v23  ;;  %6665 = vmatprep.subr.bf16.mxu1 %v6282_v54  ;;  %v6335_v23 = vld [vmem:[#allocation4 + $0x660] sm:$0xff]  ;;  %v6337_v54 = vld [vmem:[#allocation4 + $0x670] sm:$0xff] }
 0x985   :  { %6502 = vmatpush1.bf16.msra.mxu0 %v6279_v61  ;;  %6666 = vmatpush1.bf16.msra.mxu1 %v6281_v55  ;;  %v6340_v61 = vld [vmem:[#allocation4 + $0x688] sm:$0xff]  ;;  %v6342_v55 = vld [vmem:[#allocation4 + $0x698] sm:$0xff] }
 0x986   :  { %6503 = vmatprep.subr.bf16.mxu0 %v6284_v56  ;;  %6667 = vmatprep.subr.bf16.mxu1 %v6286_v58  ;;  %v6341_v56 = vld [vmem:[#allocation4 + $0x690] sm:$0xff]  ;;  %v6344_v58 = vld [vmem:[#allocation4 + $0x6a8] sm:$0xff] }
 0x989   :  { %6504 = vmatpush1.bf16.msra.mxu0 %v6283_v63  ;;  %6668 = vmatpush1.bf16.msra.mxu1 %v6285_v27  ;;  %v6346_v63 = vld [vmem:[#allocation4 + $0x6b8] sm:$0xff]  ;;  %v6343_v27 = vld [vmem:[#allocation4 + $0x6a0] sm:$0xff] }
 0x98a   :  { %6505 = vmatprep.subr.bf16.mxu0 %v6288_v6  ;;  %6669 = vmatprep.subr.bf16.mxu1 %v6290_v60  ;;  %v6345_v6 = vld [vmem:[#allocation4 + $0x6b0] sm:$0xff]  ;;  %v6348_v60 = vld [vmem:[#allocation4 + $0x6c8] sm:$0xff] }
 0x98d   :  { %6506 = vmatpush1.bf16.msra.mxu0 %v6287_v3  ;;  %6670 = vmatpush1.bf16.msra.mxu1 %v6289_v30  ;;  %v6350_v3 = vld [vmem:[#allocation4 + $0x6d8] sm:$0xff]  ;;  %v6347_v30 = vld [vmem:[#allocation4 + $0x6c0] sm:$0xff] }
 0x98e   :  { %6507 = vmatprep.subr.bf16.mxu0 %v6292_v4  ;;  %6671 = vmatprep.subr.bf16.mxu1 %v6294_v2  ;;  %v6349_v4 = vld [vmem:[#allocation4 + $0x6d0] sm:$0xff]  ;;  %v6352_v2 = vld [vmem:[#allocation4 + $0x6e8] sm:$0xff] }
 0x991   :  { %6508 = vmatpush1.bf16.msra.mxu0 %v6291_v31  ;;  %6672 = vmatpush1.bf16.msra.mxu1 %v6293_v53  ;;  %v6354_v31 = vld [vmem:[#allocation4 + $0x6f8] sm:$0xff]  ;;  %v6351_v53 = vld [vmem:[#allocation4 + $0x6e0] sm:$0xff] }
 0x992   :  { %6509 = vmatprep.subr.bf16.mxu0 %v6296_v11  ;;  %6673 = vmatprep.subr.bf16.mxu1 %v6298_v0  ;;  %v6353_v11 = vld [vmem:[#allocation4 + $0x6f0] sm:$0xff]  ;;  %v6356_v0 = vld [vmem:[#allocation4 + $0x708] sm:$0xff] }
 0x995   :  { %6510 = vmatpush1.bf16.msra.mxu0 %v6295_v13  ;;  %6674 = vmatpush1.bf16.msra.mxu1 %v6297_v59  ;;  %v6358_v13 = vld [vmem:[#allocation4 + $0x718] sm:$0xff]  ;;  %v6355_v59 = vld [vmem:[#allocation4 + $0x700] sm:$0xff] }
 0x996   :  { %6511 = vmatprep.subr.bf16.mxu0 %v6300_v12  ;;  %6675 = vmatprep.subr.bf16.mxu1 %v6302_v14  ;;  %v6357_v12 = vld [vmem:[#allocation4 + $0x710] sm:$0xff]  ;;  %v6360_v14 = vld [vmem:[#allocation4 + $0x728] sm:$0xff] }
 0x999   :  { %6512 = vmatpush1.bf16.msra.mxu0 %v6299_v18  ;;  %6676 = vmatpush1.bf16.msra.mxu1 %v6301_v16  ;;  %v6362_v18 = vld [vmem:[#allocation4 + $0x738] sm:$0xff]  ;;  %v6359_v16 = vld [vmem:[#allocation4 + $0x720] sm:$0xff] }
 0x99a   :  { %6513 = vmatprep.subr.bf16.mxu0 %v6304_v17  ;;  %6677 = vmatprep.subr.bf16.mxu1 %v6306_v62  ;;  %v6361_v17 = vld [vmem:[#allocation4 + $0x730] sm:$0xff]  ;;  %v6364_v62 = vld [vmem:[#allocation4 + $0x748] sm:$0xff] }
 0x99d   :  { %6514 = vmatpush1.bf16.msra.mxu0 %v6303_v19  ;;  %6678 = vmatpush1.bf16.msra.mxu1 %v6305_v9  ;;  %v6366_v19 = vld [vmem:[#allocation4 + $0x758] sm:$0xff]  ;;  %v6363_v9 = vld [vmem:[#allocation4 + $0x740] sm:$0xff] }
 0x99e   :  { %6515 = vmatprep.subr.bf16.mxu0 %v6308_v20  ;;  %6679 = vmatprep.subr.bf16.mxu1 %v6310_v5  ;;  %v6365_v20 = vld [vmem:[#allocation4 + $0x750] sm:$0xff]  ;;  %v6368_v5 = vld [vmem:[#allocation4 + $0x768] sm:$0xff] }
 0x9a1   :  { %6516 = vmatpush1.bf16.msra.mxu0 %v6307_v21  ;;  %6680 = vmatpush1.bf16.msra.mxu1 %v6309_v22  ;;  %v6370_v21 = vld [vmem:[#allocation4 + $0x778] sm:$0xff]  ;;  %v6367_v22 = vld [vmem:[#allocation4 + $0x760] sm:$0xff] }
 0x9a2   :  { %6517 = vmatprep.subr.bf16.mxu0 %v6312_v24  ;;  %6681 = vmatprep.subr.bf16.mxu1 %v6314_v36  ;;  %v6369_v24 = vld [vmem:[#allocation4 + $0x770] sm:$0xff]  ;;  %v6372_v36 = vld [vmem:[#allocation4 + $0x788] sm:$0xff] }
 0x9a5   :  { %6518 = vmatpush1.bf16.msra.mxu0 %v6311_v7  ;;  %6682 = vmatpush1.bf16.msra.mxu1 %v6313_v29  ;;  %v6374_v7 = vld [vmem:[#allocation4 + $0x798] sm:$0xff]  ;;  %v6371_v29 = vld [vmem:[#allocation4 + $0x780] sm:$0xff] }
 0x9a6   :  { %6519 = vmatprep.subr.bf16.mxu0 %v6316_v34  ;;  %6683 = vmatprep.subr.bf16.mxu1 %v6318_v52  ;;  %v6373_v34 = vld [vmem:[#allocation4 + $0x790] sm:$0xff]  ;;  %v6376_v52 = vld [vmem:[#allocation4 + $0x7a8] sm:$0xff] }
 0x9a9   :  { %6520 = vmatpush1.bf16.msra.mxu0 %v6315_v35  ;;  %6684 = vmatpush1.bf16.msra.mxu1 %v6317_v37  ;;  %v6378_v35 = vld [vmem:[#allocation4 + $0x7b8] sm:$0xff]  ;;  %v6375_v37 = vld [vmem:[#allocation4 + $0x7a0] sm:$0xff] }
 0x9aa   :  { %6521 = vmatprep.subr.bf16.mxu0 %v6320_v38  ;;  %6685 = vmatprep.subr.bf16.mxu1 %v6322_v8  ;;  %v6377_v38 = vld [vmem:[#allocation4 + $0x7b0] sm:$0xff]  ;;  %v6380_v8 = vld [vmem:[#allocation4 + $0x7c8] sm:$0xff] }
 0x9ad   :  { %6522 = vmatpush1.bf16.msra.mxu0 %v6319_v40  ;;  %6686 = vmatpush1.bf16.msra.mxu1 %v6321_v26  ;;  %v6382_v40 = vld [vmem:[#allocation4 + $0x7d8] sm:$0xff]  ;;  %v6379_v26 = vld [vmem:[#allocation4 + $0x7c0] sm:$0xff] }
 0x9ae   :  { %6532 = vmatprep.subr.bf16.mxu0 %v6324_v41  ;;  %6696 = vmatprep.subr.bf16.mxu1 %v6326_v42  ;;  %v6381_v41 = vld [vmem:[#allocation4 + $0x7d0] sm:$0xff]  ;;  %v6384_v42 = vld [vmem:[#allocation4 + $0x7e8] sm:$0xff] }
 0x9b0   :  { %6524 = vmatmul.mubr.bf16.vlgmr.msra.gmra.mrb[24].mxu0 %v8326_v15  ;;  %6688 = vmatmul.mubr.bf16.vlgmr.msra.gmra.mrb[24].mxu1 %v8326_v15  ;;  %v6338_v15 = vld [vmem:[#allocation4 + $0x678] sm:$0xff] }
 0x9b1   :  { %6533 = vmatpush1.bf16.msra.mxu0 %v6323_v10  ;;  %6697 = vmatpush1.bf16.msra.mxu1 %v6325_v46  ;;  %v6386_v10 = vld [vmem:[#allocation4 + $0x7f8] sm:$0xff]  ;;  %v6383_v46 = vld [vmem:[#allocation4 + $0x7e0] sm:$0xff] }
 0x9b2   :  { %6534 = vmatprep.subr.bf16.mxu0 %v6328_v47  ;;  %6698 = vmatprep.subr.bf16.mxu1 %v6330_v32  ;;  %v6385_v47 = vld [vmem:[#allocation4 + $0x7f0] sm:$0xff]  ;;  %v6387_v32 = vld [vmem:[#allocation15] sm:$0xf] }
 0x9b3   :  { %6564 = vmatprep.mubr.bf16.mxu0 %v8332_v28  ;;  %6728 = vmatprep.mubr.bf16.mxu1 %v8332_v28  ;;  %v6339_v28 = vld [vmem:[#allocation4 + $0x680] sm:$0xff] }
 0x9b5   :  { %6535 = vmatpush1.bf16.msra.mxu0 %v6327_v43  ;;  %6699 = vmatpush1.bf16.msra.mxu1 %v6329_v48  ;;  %v6392_v43 = vrot.slane %v6387_v32, %v8142_v39  ;;  %v6400_v48 = vrot.slane %v6387_v32, %v8147_v44 }
 0x9b6   :  { %6536 = vmatprep.subr.bf16.mxu0 %v6332_v1  ;;  %6700 = vmatprep.subr.bf16.mxu1 %v6334_v49  ;;  %v6396_v1 = vrot.slane %v6387_v32, %v8150_v45  ;;  %v6404_v49 = vrot.slane %v6387_v32, %v8153_v25 }
 0x9b9   :  { %6537 = vmatpush1.bf16.msra.mxu0 %v6331_v50  ;;  %6701 = vmatpush1.bf16.msra.mxu1 %v6333_v33 }
 0x9ba   :  { %6538 = vmatprep.subr.bf16.mxu0 %v6336_v51  ;;  %6702 = vmatprep.subr.bf16.mxu1 %v6338_v15 }
 0x9bd   :  { %6539 = vmatpush1.bf16.msra.mxu0 %v6335_v23  ;;  %6703 = vmatpush1.bf16.msra.mxu1 %v6337_v54 }
 0x9be   :  { %6540 = vmatprep.subr.bf16.mxu0 %v6340_v61  ;;  %6704 = vmatprep.subr.bf16.mxu1 %v6342_v55 }
 0x9c1   :  { %6541 = vmatpush1.bf16.msra.mxu0 %v6339_v28  ;;  %6705 = vmatpush1.bf16.msra.mxu1 %v6341_v56 }
 0x9c2   :  { %6542 = vmatprep.subr.bf16.mxu0 %v6344_v58  ;;  %6706 = vmatprep.subr.bf16.mxu1 %v6346_v63 }
 0x9c5   :  { %6543 = vmatpush1.bf16.msra.mxu0 %v6343_v27  ;;  %6707 = vmatpush1.bf16.msra.mxu1 %v6345_v6 }
 0x9c6   :  { %6544 = vmatprep.subr.bf16.mxu0 %v6348_v60  ;;  %6708 = vmatprep.subr.bf16.mxu1 %v6350_v3 }
 0x9c9   :  { %6545 = vmatpush1.bf16.msra.mxu0 %v6347_v30  ;;  %6709 = vmatpush1.bf16.msra.mxu1 %v6349_v4 }
 0x9ca   :  { %6546 = vmatprep.subr.bf16.mxu0 %v6352_v2  ;;  %6710 = vmatprep.subr.bf16.mxu1 %v6354_v31 }
 0x9cd   :  { %6547 = vmatpush1.bf16.msra.mxu0 %v6351_v53  ;;  %6711 = vmatpush1.bf16.msra.mxu1 %v6353_v11 }
 0x9ce   :  { %6548 = vmatprep.subr.bf16.mxu0 %v6356_v0  ;;  %6712 = vmatprep.subr.bf16.mxu1 %v6358_v13 }
 0x9d1   :  { %6549 = vmatpush1.bf16.msra.mxu0 %v6355_v59  ;;  %6713 = vmatpush1.bf16.msra.mxu1 %v6357_v12 }
 0x9d2   :  { %6550 = vmatprep.subr.bf16.mxu0 %v6360_v14  ;;  %6714 = vmatprep.subr.bf16.mxu1 %v6362_v18 }
 0x9d5   :  { %6551 = vmatpush1.bf16.msra.mxu0 %v6359_v16  ;;  %6715 = vmatpush1.bf16.msra.mxu1 %v6361_v17 }
 0x9d6   :  { %6552 = vmatprep.subr.bf16.mxu0 %v6364_v62  ;;  %6716 = vmatprep.subr.bf16.mxu1 %v6366_v19 }
 0x9d9   :  { %6553 = vmatpush1.bf16.msra.mxu0 %v6363_v9  ;;  %6717 = vmatpush1.bf16.msra.mxu1 %v6365_v20 }
 0x9da   :  { %6554 = vmatprep.subr.bf16.mxu0 %v6368_v5  ;;  %6718 = vmatprep.subr.bf16.mxu1 %v6370_v21 }
 0x9dd   :  { %6555 = vmatpush1.bf16.msra.mxu0 %v6367_v22  ;;  %6719 = vmatpush1.bf16.msra.mxu1 %v6369_v24 }
 0x9de   :  { %6556 = vmatprep.subr.bf16.mxu0 %v6372_v36  ;;  %6720 = vmatprep.subr.bf16.mxu1 %v6374_v7 }
 0x9e1   :  { %6557 = vmatpush1.bf16.msra.mxu0 %v6371_v29  ;;  %6721 = vmatpush1.bf16.msra.mxu1 %v6373_v34 }
 0x9e2   :  { %6558 = vmatprep.subr.bf16.mxu0 %v6376_v52  ;;  %6722 = vmatprep.subr.bf16.mxu1 %v6378_v35 }
 0x9e5   :  { %6559 = vmatpush1.bf16.msra.mxu0 %v6375_v37  ;;  %6723 = vmatpush1.bf16.msra.mxu1 %v6377_v38 }
 0x9e6   :  { %6560 = vmatprep.subr.bf16.mxu0 %v6380_v8  ;;  %6724 = vmatprep.subr.bf16.mxu1 %v6382_v40 }
 0x9e9   :  { %6561 = vmatpush1.bf16.msra.mxu0 %v6379_v26  ;;  %6725 = vmatpush1.bf16.msra.mxu1 %v6381_v41 }
 0x9ea   :  { %6562 = vmatprep.subr.bf16.mxu0 %v6384_v42  ;;  %6726 = vmatprep.subr.bf16.mxu1 %v6386_v10 }
 0x9ed   :  { %6563 = vmatpush1.bf16.msra.mxu0 %v6383_v46  ;;  %6727 = vmatpush1.bf16.msra.mxu1 %v6385_v47 }
 0x9f0   :  { %6565 = vmatmul.mubr.bf16.vlgmr.msra.gmra.mrb[24].mxu0 %v8328_v57  ;;  %6729 = vmatmul.mubr.bf16.vlgmr.msra.gmra.mrb[24].mxu1 %v8328_v57 }
 0xac3   :  { %v6566_v50 = vpop.f32.mrb[24].mxu0  ;;  %v6730_v33 = vpop.f32.mrb[24].mxu1 }
 0xac4   :  { %v7461_v51 = vadd.f32 %v6566_v50, %v6392_v43  ;;  %v7463_v15 = vadd.f32 %v6730_v33, %v6400_v48  ;;  %v6568_v23 = vpop.f32.mrb[25].mxu0  ;;  %v6732_v54 = vpop.f32.mrb[25].mxu1 }
 0xac5   :  { %v7462_v61 = vadd.f32 %v6568_v23, %v6396_v1  ;;  %v7464_v55 = vadd.f32 %v6732_v54, %v6404_v49  ;;  %v6570_v28 = vpop.f32.mrb[26].mxu0  ;;  %v6734_v56 = vpop.f32.mrb[26].mxu1 }
 0xac6   :  { %v6737_v57 = vmax.f32 %v7461_v51, 0.0  ;;  %v6739_v58 = vmax.f32 %v7463_v15, 0.0  ;;  %v6571_v63 = vpop.f32.mrb[27].mxu0  ;;  %v6735_v39 = vpop.f32.mrb[27].mxu1 }
 0xac7   :  { %v6738_v27 = vmax.f32 %v7462_v61, 0.0  ;;  %v6740_v44 = vmax.f32 %v7464_v55, 0.0 }
 0xac8   :  { %v8354_v6 = vpack.c.bf16 %v6737_v57, %v6737_v57  ;;  %v8356_v45 = vpack.c.bf16 %v6739_v58, %v6739_v58 }
 0xac9   :  { %v6742_v25 = vpack.c.bf16 %v6738_v27, %v6738_v27  ;;  %v6744_v60 = vpack.c.bf16 %v6740_v44, %v6740_v44 }
 0xaca   :  { %7863 = dma.done.wait [#allocation6 + $0x3], 4096 }
 0xacb   :  { %7864 = vsyncadd [#allocation6 + $0x3], 4294963200  ;;  %6824 = vmatprep.mubr.bf16.mxu0 %v6742_v25  ;;  %6864 = vmatprep.mubr.bf16.mxu1 %v6744_v60  ;;  %v6761_v3 = vld [vmem:[#allocation5 + $0x40] sm:$0xff]  ;;  %v6762_v31 = vld [vmem:[#allocation5 + $0x48] sm:$0xff]  ;;  %s7894_s0 = smov [#allocation18]  }
 0xacc   :  { %v6777_v30 = vld [vmem:[#allocation5 + $0xc0] sm:$0xff]  ;;  %7393 = vmatprep.subr.bf16.mxu0 %v6761_v3  ;;  %v6778_v53 = vld [vmem:[#allocation5 + $0xc8] sm:$0xff]  ;;  %v6763_v13 = vld [vmem:[#allocation5 + $0x50] sm:$0xff]  ;;  %s6888_s1 = sshll.u32 %s7894_s0, 4  ;;  %s6889_s1 = int_to_ptr.vmem [resolvable:$true] %s6888_s1 }
 0xacd   :  { %v6753_v4 = vld [vmem:[#allocation5] sm:$0xff]  ;;  %7415 = vmatprep.subr.bf16.mxu1 %v6777_v30  ;;  %v6754_v11 = vld [vmem:[#allocation5 + $0x8] sm:$0xff]  ;;  %v6779_v59 = vld [vmem:[#allocation5 + $0xd0] sm:$0xff]  ;;  %s7827_s8 = scalar_lea.vmem %s6889_s1, 128  ;;  %p7832_p1 = scmp.lt.s32.totalorder %s6889_s1, %s6889_s1 }
 0xace   :  { %v6769_v2 = vld [vmem:[#allocation5 + $0x80] sm:$0xff]  ;;  %7394 = vmatpush3.bf16.msra.mxu0 %v6753_v4  ;;  %v6770_v0 = vld [vmem:[#allocation5 + $0x88] sm:$0xff]  ;;  %v6755_v12 = vld [vmem:[#allocation5 + $0x10] sm:$0xff]  ;;  %p7828_p0 = scmp.ne.s32.totalorder %s6889_s1, %s7827_s8  ;;  %p7833_p2 = scmp.lt.s32.totalorder %s7827_s8, %s7827_s8 }
 0xacf   :  { %7416 = vmatpush3.bf16.msra.mxu1 %v6769_v2  ;;  %7395 = vmatprep.subr.bf16.mxu0 %v6762_v31  ;;  %v6771_v14 = vld [vmem:[#allocation5 + $0x90] sm:$0xff]  ;;  %v6764_v18 = vld [vmem:[#allocation5 + $0x58] sm:$0xff]  ;;  %v6765_v19 = vld [vmem:[#allocation5 + $0x60] sm:$0xff] }
 0xad0   :  { %7417 = vmatprep.subr.bf16.mxu1 %v6778_v53  ;;  %v6780_v16 = vld [vmem:[#allocation5 + $0xd8] sm:$0xff]  ;;  %v6781_v9 = vld [vmem:[#allocation5 + $0xe0] sm:$0xff]  ;;  %v6766_v21 = vld [vmem:[#allocation5 + $0x68] sm:$0xff]  ;;  %p7834_p3 = por %p7833_p2, %p7832_p1 }
 0xad1   :  { %v6756_v17 = vld [vmem:[#allocation5 + $0x18] sm:$0xff]  ;;  %v6757_v20 = vld [vmem:[#allocation5 + $0x20] sm:$0xff]  ;;  %v6782_v22 = vld [vmem:[#allocation5 + $0xe8] sm:$0xff] }
 0xad2   :  { %7396 = vmatpush3.bf16.msra.mxu0 %v6754_v11  ;;  %v6772_v62 = vld [vmem:[#allocation5 + $0x98] sm:$0xff]  ;;  %v6773_v5 = vld [vmem:[#allocation5 + $0xa0] sm:$0xff]  ;;  %v6758_v24 = vld [vmem:[#allocation5 + $0x28] sm:$0xff]  ;;  %p7835_p4 = pnand %p7834_p3, %p7828_p0 }
 0xad3   :  { %7418 = vmatpush3.bf16.msra.mxu1 %v6770_v0  ;;  %7397 = vmatprep.subr.bf16.mxu0 %v6763_v13  ;;  %v6774_v36 = vld [vmem:[#allocation5 + $0xa8] sm:$0xff]  ;;  %v6767_v7 = vld [vmem:[#allocation5 + $0x70] sm:$0xff]  ;;  %v6768_v35 = vld [vmem:[#allocation5 + $0x78] sm:$0xff] }
 0xad4   :  { %7419 = vmatprep.subr.bf16.mxu1 %v6779_v59  ;;  %v6783_v29 = vld [vmem:[#allocation5 + $0xf0] sm:$0xff]  ;;  %v6784_v37 = vld [vmem:[#allocation5 + $0xf8] sm:$0xff] }
 0xad5   :  { %v6759_v34 = vld [vmem:[#allocation5 + $0x30] sm:$0xff]  ;;  %v6760_v38 = vld [vmem:[#allocation5 + $0x38] sm:$0xff] }
 0xad6   :  { %7398 = vmatpush3.bf16.msra.mxu0 %v6755_v12  ;;  %v6775_v52 = vld [vmem:[#allocation5 + $0xb0] sm:$0xff]  ;;  %v6776_v8 = vld [vmem:[#allocation5 + $0xb8] sm:$0xff] }
 0xad7   :  { %7420 = vmatpush3.bf16.msra.mxu1 %v6771_v14  ;;  %7399 = vmatprep.subr.bf16.mxu0 %v6764_v18  ;;  %v7388_v41 = vld [vmem:[#allocation16] ss:$0 sm:$0xff] }
 0xad8   :  { %7421 = vmatprep.subr.bf16.mxu1 %v6780_v16 }
 0xada   :  { %7400 = vmatpush3.bf16.msra.mxu0 %v6756_v17 }
 0xadb   :  { %7422 = vmatpush3.bf16.msra.mxu1 %v6772_v62  ;;  %7401 = vmatprep.subr.bf16.mxu0 %v6765_v19 }
 0xadc   :  { %7423 = vmatprep.subr.bf16.mxu1 %v6781_v9 }
 0xade   :  { %7402 = vmatpush3.bf16.msra.mxu0 %v6757_v20 }
 0xadf   :  { %7424 = vmatpush3.bf16.msra.mxu1 %v6773_v5  ;;  %7403 = vmatprep.subr.bf16.mxu0 %v6766_v21 }
 0xae0   :  { %7425 = vmatprep.subr.bf16.mxu1 %v6782_v22 }
 0xae2   :  { %7404 = vmatpush3.bf16.msra.mxu0 %v6758_v24 }
 0xae3   :  { %7426 = vmatpush3.bf16.msra.mxu1 %v6774_v36  ;;  %7405 = vmatprep.subr.bf16.mxu0 %v6767_v7 }
 0xae4   :  { %7427 = vmatprep.subr.bf16.mxu1 %v6783_v29 }
 0xae6   :  { %7406 = vmatpush3.bf16.msra.mxu0 %v6759_v34 }
 0xae7   :  { %7428 = vmatpush3.bf16.msra.mxu1 %v6775_v52  ;;  %7407 = vmatprep.subr.bf16.mxu0 %v6768_v35 }
 0xae8   :  { %7429 = vmatprep.subr.bf16.mxu1 %v6784_v37 }
 0xaea   :  { %7408 = vmatpush3.bf16.msra.mxu0 %v6760_v38 }
 0xaeb   :  { %7430 = vmatpush3.bf16.msra.mxu1 %v6776_v8 }
 0xaed   :  { %6825 = vmatmul.mubr.bf16.vlgmr.msra.gmra.mrb[28].mxu0 %v8354_v6 }
 0xaee   :  { %6865 = vmatmul.mubr.bf16.vlgmr.msra.gmra.mrb[28].mxu1 %v8356_v45 }
 0xbc0   :  { %v7409_v40 = vpop.f32.mrb[28].mxu0 }
 0xbc1   :  { %v7431_v26 = vpop.f32.mrb[28].mxu1  ;;  %v7410_v42 = vpop.f32.mrb[29].mxu0 }
 0xbc2   :  { %v7432_v10 = vpop.f32.mrb[29].mxu1  ;;  %v7411_v46 = vadd.f32 %v7410_v42, %v7409_v40  ;;  %v7412_v32 = vpop.f32.mrb[30].mxu0 }
 0xbc3   :  { %v7433_v47 = vadd.f32 %v7432_v10, %v7431_v26  ;;  %v7434_v43 = vpop.f32.mrb[30].mxu1  ;;  %v7413_v48 = vpop.f32.mrb[31].mxu0 }
 0xbc4   :  { %v7435_v1 = vpop.f32.mrb[31].mxu1  ;;  %v6827_v49 = vadd.f32 %v7411_v46, %v7388_v41 }
 0xbc6   :  { %v6867_v50 = vadd.f32 %v7433_v47, %v6827_v49 }
 0xbc8   :  { %6872 = vmax.xlane.f32.xlu0 %v6867_v50 }
 0xc55   :  { %v6873_v33 = vpop.xlane.xlu0 %6872 }
 0xc56   :  { %v6874_v51 = vsub.f32 %v6867_v50, %v6873_v33 }
 0xc58   :  { %v6875_v15 = vmul.f32 1.442695, %v6874_v51 }
 0xc5a   :  { %7669 = vpow2.f32 %v6875_v15 }
 0xc64   :  { %v7670_v23 = vpop.eup %7669 }
 0xc65   :  { %6877 = vadd.xlane.f32.xlu0 %v7670_v23 }
 0xcf2   :  { %v6878_v54 = vpop.xlane.xlu0 %6877 }
 0xcf3   :  { %7671 = vrcp.f32 %v6878_v54 }
 0xcfd   :  { %v7672_v61 = vpop.eup %7671 }
 0xcfe   :  { %v6880_v55 = vmul.f32 %v7672_v61, %v7670_v23 }
 0xd00   :  { %6881 = vst [vmem:[#allocation18] sm:$0xff] %v6880_v55 }
 0xd01   :  { %7838 = shalt.err (!%p7835_p4)
}
 0xd02   :  { %s7839_s27 = scalar_lea.hbm %s8383_s11, 128 }
 0xd03   :  { %p7840_p5 = scmp.ne.s32.totalorder %s8383_s11, %s7839_s27  ;;  %p7843_p6 = scmp.lt.u32.totalorder %s7839_s27, %s8383_s11 }
 0xd05   :  { %p7845_p7 = pnand %p7843_p6, %p7840_p5 }
 0xd07   :  { %7848 = shalt.err (!%p7845_p7)
}
 0xd08   :  { %6891 = dma.vmem_to_hbm [thread:$0]  %s6889_s1, 128, %s8383_s11, [#allocation9]  }
 0xd09   :  { %7865 = dma.done.wait [#allocation9], 128  }
 0xd0a   :  { %7866 = vsyncadd [#allocation9], 4294967168 }
 0xd0b   :  { %6895 = vsyncpa [#allocation8], 1 }
 0xd0c   :  { %6896 = vsyncpa [#allocation11], 1 }
 0xd0d   :  { %6897 = vsyncpa [#allocation14], 1 }
 0xd0e   :  { %6898 = vsyncpa [#allocation17], 1 }
 0xd0f   :  { %6899 = vsyncpa [#allocation9], 1 }
 0xd10   :  { %6900 = vsyncmov [#allocation6] }
 0xd13   :  { %s6901_s20 = vpop.sfrf %6900 }
 0xd14   :  { %p7389_p8 = scmp.ne.s32.totalorder %s6901_s20, 0 }
 0xd16   :  { %6905 = shalt.err (%p7389_p8)  }
 0xd17   :  { %6907 = vsyncmov [#allocation6 + $0x1] }
 0xd1a   :  { %s6908_s4 = vpop.sfrf %6907 }
 0xd1b   :  { %p7390_p9 = scmp.ne.s32.totalorder %s6908_s4, 0 }
 0xd1d   :  { %6912 = shalt.err (%p7390_p9)  }
 0xd1e   :  { %6914 = vsyncmov [#allocation6 + $0x2] }
 0xd21   :  { %s6915_s16 = vpop.sfrf %6914 }
 0xd22   :  { %p7391_p10 = scmp.ne.s32.totalorder %s6915_s16, 0 }
 0xd24   :  { %6919 = shalt.err (%p7391_p10)  }
 0xd25   :  { %6921 = vsyncmov [#allocation6 + $0x3] }
 0xd28   :  { %s6922_s11 = vpop.sfrf %6921 }
 0xd29   :  { %p7392_p11 = scmp.ne.s32.totalorder %s6922_s11, 0 }
 0xd2b   :  { %6926 = shalt.err (%p7392_p11)  }

</bundles_post_ra>
